<compile_context>
chip_gen: v7x
topology: tpu7x:2x2x1
jax: 0.10.0
libtpu: 0.0.40
codegen_flags: <defaults>
</compile_context>

<pallas_src>
import functools

import jax
import jax.numpy as jnp
from jax.experimental import pallas as pl
from jax.experimental.pallas import tpu as pltpu


# ----------------------------------------------------------------------------
# Helpers
# ----------------------------------------------------------------------------

def _round_up(v, m):
    return (v + m - 1) // m * m


def _pick_tile(extent, candidates):
    for c in candidates:
        if extent % c == 0:
            return c
    return candidates[-1]


# ----------------------------------------------------------------------------
# Fused matmul + BN(scale/bias) [+ residual] [+ ReLU] kernel (tiled, gridded)
# ----------------------------------------------------------------------------

def _mm_bn_kernel(x_ref, w_ref, s_ref, b_ref, o_ref, acc_ref, *, relu):
    @pl.when(pl.program_id(2) == 0)
    def _init():
        acc_ref[...] = jnp.zeros_like(acc_ref)

    acc_ref[...] += jnp.dot(x_ref[...], w_ref[...],
                            preferred_element_type=jnp.float32)

    @pl.when(pl.program_id(2) == pl.num_programs(2) - 1)
    def _finalize():
        out = acc_ref[...] * s_ref[...] + b_ref[...]
        if relu:
            out = jnp.maximum(out, 0.0)
        o_ref[...] = out.astype(o_ref.dtype)


def _mm_bn_res_kernel(x_ref, w_ref, s_ref, b_ref, r_ref, o_ref, acc_ref, *, relu):
    @pl.when(pl.program_id(2) == 0)
    def _init():
        acc_ref[...] = jnp.zeros_like(acc_ref)

    acc_ref[...] += jnp.dot(x_ref[...], w_ref[...],
                            preferred_element_type=jnp.float32)

    @pl.when(pl.program_id(2) == pl.num_programs(2) - 1)
    def _finalize():
        out = acc_ref[...] * s_ref[...] + b_ref[...] + r_ref[...].astype(jnp.float32)
        if relu:
            out = jnp.maximum(out, 0.0)
        o_ref[...] = out.astype(o_ref.dtype)


def matmul_bn(x, w, scale, bias, *, relu=False, residual=None,
              out_dtype=jnp.bfloat16):
    """(x @ w) * scale + bias [+ residual] [+ relu], tiled on the MXU.

    Inputs are padded to lane-dense (multiples of 128 on K/N, 8 on M) shapes and
    cast to bf16 at the pallas_call boundary; accumulation & epilogue are f32.
    """
    M, K = x.shape
    K2, N = w.shape
    assert K == K2
    Mp = _round_up(M, 8)
    Kp = _round_up(K, 128)
    Np = _round_up(N, 128)
    tm = _pick_tile(Mp, (256, 128, 64, 32, 16, 8))
    tk = _pick_tile(Kp, (512, 256, 128))
    tn = _pick_tile(Np, (256, 128))

    xb = jnp.pad(x, ((0, Mp - M), (0, Kp - K))).astype(jnp.bfloat16)
    wb = jnp.pad(w, ((0, Kp - K), (0, Np - N))).astype(jnp.bfloat16)
    sb = jnp.pad(scale.astype(jnp.float32), (0, Np - N)).reshape(1, Np)
    bb = jnp.pad(bias.astype(jnp.float32), (0, Np - N)).reshape(1, Np)

    in_specs = [
        pl.BlockSpec((tm, tk), lambda i, j, k: (i, k)),
        pl.BlockSpec((tk, tn), lambda i, j, k: (k, j)),
        pl.BlockSpec((1, tn), lambda i, j, k: (0, j)),
        pl.BlockSpec((1, tn), lambda i, j, k: (0, j)),
    ]
    args = [xb, wb, sb, bb]
    if residual is not None:
        rb = jnp.pad(residual, ((0, Mp - M), (0, Np - N))).astype(jnp.bfloat16)
        in_specs.append(pl.BlockSpec((tm, tn), lambda i, j, k: (i, j)))
        args.append(rb)
        kern = functools.partial(_mm_bn_res_kernel, relu=relu)
    else:
        kern = functools.partial(_mm_bn_kernel, relu=relu)

    out_bytes = Mp * Np * jnp.dtype(out_dtype).itemsize
    bytes_accessed = (Mp * Kp + Kp * Np) * 2 + out_bytes

    out = pl.pallas_call(
        kern,
        out_shape=jax.ShapeDtypeStruct((Mp, Np), out_dtype),
        grid_spec=pltpu.PrefetchScalarGridSpec(
            num_scalar_prefetch=0,
            grid=(Mp // tm, Np // tn, Kp // tk),
            in_specs=in_specs,
            out_specs=pl.BlockSpec((tm, tn), lambda i, j, k: (i, j)),
            scratch_shapes=[pltpu.VMEM((tm, tn), jnp.float32)]),
        compiler_params=pltpu.CompilerParams(
            dimension_semantics=("parallel", "parallel", "arbitrary"),
            vmem_limit_bytes=32 * 1024 * 1024),
        cost_estimate=pl.CostEstimate(
            flops=2 * Mp * Np * Kp, transcendentals=0,
            bytes_accessed=int(bytes_accessed)),
    )(*args)
    return out[:M, :N]


# ----------------------------------------------------------------------------
# Max-pool 3x3 stride-2: 9-way elementwise maximum tree (VPU)
# ----------------------------------------------------------------------------

def _max9_kernel(v0, v1, v2, v3, v4, v5, v6, v7, v8, o_ref):
    m = jnp.maximum(v0[...], v1[...])
    m = jnp.maximum(m, v2[...])
    m = jnp.maximum(m, v3[...])
    m = jnp.maximum(m, v4[...])
    m = jnp.maximum(m, v5[...])
    m = jnp.maximum(m, v6[...])
    m = jnp.maximum(m, v7[...])
    m = jnp.maximum(m, v8[...])
    o_ref[...] = m


def maxpool3x3_s2(x):
    N, H, W, C = x.shape
    xp = jnp.pad(x, ((0, 0), (1, 1), (1, 1), (0, 0)),
                 constant_values=float("-inf"))
    OH = (H + 2 - 3) // 2 + 1
    OW = (W + 2 - 3) // 2 + 1
    M = N * OH * OW
    Mp = _round_up(M, 8)
    tm = _pick_tile(Mp, (512, 256, 128, 64, 32, 16, 8))

    views = []
    for i in range(3):
        for j in range(3):
            v = xp[:, i:i + 2 * OH:2, j:j + 2 * OW:2, :].reshape(M, C)
            views.append(jnp.pad(v, ((0, Mp - M), (0, 0))))

    out = pl.pallas_call(
        _max9_kernel,
        out_shape=jax.ShapeDtypeStruct((Mp, C), x.dtype),
        grid_spec=pltpu.PrefetchScalarGridSpec(
            num_scalar_prefetch=0,
            grid=(Mp // tm,),
            in_specs=[pl.BlockSpec((tm, C), lambda m: (m, 0))] * 9,
            out_specs=pl.BlockSpec((tm, C), lambda m: (m, 0))),
        compiler_params=pltpu.CompilerParams(
            dimension_semantics=("parallel",),
            vmem_limit_bytes=32 * 1024 * 1024),
    )(*views)
    return out[:M].reshape(N, OH, OW, C)


# ----------------------------------------------------------------------------
# Global average pool + folded (resnet.fc o fc) head in one kernel
# ----------------------------------------------------------------------------

def _avgpool_head_kernel(x_ref, w_ref, b_ref, o_ref):
    # x: [N, HW, C] bf16, w: [C, Np] f32, b: [1, Np] f32 -> o: [N, Np] f32
    pooled = jnp.mean(x_ref[...].astype(jnp.float32), axis=1)
    o_ref[...] = jnp.dot(pooled, w_ref[...],
                         preferred_element_type=jnp.float32) + b_ref[...]


def avgpool_head(x, w, b):
    N, H, W, C = x.shape
    classes = w.shape[1]
    Np = _round_up(classes, 128)
    wp = jnp.pad(w.astype(jnp.float32), ((0, 0), (0, Np - classes)))
    bp = jnp.pad(b.astype(jnp.float32), (0, Np - classes)).reshape(1, Np)
    out = pl.pallas_call(
        _avgpool_head_kernel,
        out_shape=jax.ShapeDtypeStruct((N, Np), jnp.float32),
        in_specs=[pl.BlockSpec(memory_space=pltpu.MemorySpace.VMEM)] * 3,
        out_specs=pl.BlockSpec(memory_space=pltpu.MemorySpace.VMEM),
    )(x.reshape(N, H * W, C), wp, bp)
    return out[:, :classes]


# ----------------------------------------------------------------------------
# JAX glue: im2col patch extraction (slicing / reshape only, bf16)
# ----------------------------------------------------------------------------

def _im2col(x, kh, kw, stride, pad):
    """x: [N, H, W, C] -> patches [N, OH, OW, kh*kw, C]."""
    N, H, W, C = x.shape
    xp = jnp.pad(x, ((0, 0), (pad, pad), (pad, pad), (0, 0)))
    OH = (H + 2 * pad - kh) // stride + 1
    OW = (W + 2 * pad - kw) // stride + 1
    cols = []
    for i in range(kh):
        for j in range(kw):
            cols.append(xp[:, i:i + stride * OH:stride,
                           j:j + stride * OW:stride, :])
    patches = jnp.stack(cols, axis=3)  # [N, OH, OW, kh*kw, C]
    return patches, OH, OW


# ----------------------------------------------------------------------------
# ResNet building blocks
# ----------------------------------------------------------------------------

def conv_bn(x, p, *, stride, pad, relu, residual=None):
    """Conv2d(no bias) + folded BN(eval) [+ residual] [+ ReLU].  x: NHWC bf16."""
    w = p["w"]  # [kh, kw, cin, cout]
    kh, kw, cin, cout = w.shape
    N = x.shape[0]
    patches, OH, OW = _im2col(x, kh, kw, stride, pad)
    cols = patches.reshape(N * OH * OW, kh * kw * cin)
    wm = w.reshape(kh * kw * cin, cout)
    res2d = None
    if residual is not None:
        res2d = residual.reshape(N * OH * OW, cout)
    out = matmul_bn(cols, wm, p["scale"], p["bias"], relu=relu, residual=res2d)
    return out.reshape(N, OH, OW, cout)


def basic_block(x, p, stride):
    out = conv_bn(x, p["conv1"], stride=stride, pad=1, relu=True)
    if "down" in p:
        identity = conv_bn(x, p["down"], stride=stride, pad=0, relu=False)
    else:
        identity = x
    # conv2 + BN + residual-add + ReLU fused into a single kernel epilogue.
    return conv_bn(out, p["conv2"], stride=1, pad=1, relu=True,
                   residual=identity)


# ----------------------------------------------------------------------------
# Parameter construction (deterministic, synthetic)
# ----------------------------------------------------------------------------

def make_params(key, classes_num):
    keys = iter(jax.random.split(key, 512))

    def nk():
        return next(keys)

    def conv_p(kh, kw, cin, cout):
        fan_in = kh * kw * cin
        w = jax.random.normal(nk(), (kh, kw, cin, cout), jnp.float32)
        w = w * jnp.sqrt(2.0 / fan_in)
        gamma = 1.0 + 0.1 * jax.random.normal(nk(), (cout,), jnp.float32)
        beta = 0.1 * jax.random.normal(nk(), (cout,), jnp.float32)
        mean = 0.1 * jax.random.normal(nk(), (cout,), jnp.float32)
        var = 1.0 + 0.1 * jnp.abs(jax.random.normal(nk(), (cout,), jnp.float32))
        eps = 1e-5
        scale = gamma / jnp.sqrt(var + eps)
        bias = beta - mean * scale
        return {"w": w, "scale": scale, "bias": bias}

    def block_p(cin, cout, stride):
        p = {"conv1": conv_p(3, 3, cin, cout),
             "conv2": conv_p(3, 3, cout, cout)}
        if stride != 1 or cin != cout:
            p["down"] = conv_p(1, 1, cin, cout)
        return p

    def linear_p(cin, cout):
        w = jax.random.normal(nk(), (cin, cout), jnp.float32) * jnp.sqrt(1.0 / cin)
        b = 0.01 * jax.random.normal(nk(), (cout,), jnp.float32)
        return {"w": w, "b": b}

    params = {"stem": conv_p(7, 7, 3, 64)}
    layer_defs = [(64, 64, 1), (64, 128, 2), (128, 256, 2), (256, 512, 2)]
    layers = []
    for cin, cout, stride in layer_defs:  # ResNet18: 2 BasicBlocks per layer
        blocks = [block_p(cin, cout, stride), block_p(cout, cout, 1)]
        layers.append(blocks)
    params["layers"] = layers
    params["fc_resnet"] = linear_p(512, 1000)    # ResNet's own fc (512 -> 1000)
    params["fc"] = linear_p(1000, classes_num)   # VariantResnet.fc (1000 -> C)
    # Fold the two affine heads into one 512 -> classes affine (exact
    # composition: W = W1 @ W2, b = b1 @ W2 + b2).
    w1, b1 = params["fc_resnet"]["w"], params["fc_resnet"]["b"]
    w2, b2 = params["fc"]["w"], params["fc"]["b"]
    params["head"] = {"w": jnp.matmul(w1, w2), "b": jnp.matmul(b1, w2) + b2}
    return params


# ----------------------------------------------------------------------------
# Full forward pass (VariantResnet.forward)
# ----------------------------------------------------------------------------

@jax.jit
def variant_resnet_forward(params, x_nchw):
    x = jnp.transpose(x_nchw, (0, 2, 3, 1)).astype(jnp.bfloat16)  # NCHW -> NHWC
    # stem: 7x7 s2 conv + bn + relu, then 3x3 s2 maxpool
    x = conv_bn(x, params["stem"], stride=2, pad=3, relu=True)
    x = maxpool3x3_s2(x)
    # residual stages
    layer_strides = [1, 2, 2, 2]
    for blocks, stride in zip(params["layers"], layer_strides):
        for bi, bp in enumerate(blocks):
            x = basic_block(x, bp, stride if bi == 0 else 1)
    # global average pool + folded (resnet.fc o VariantResnet.fc) head
    head = params["head"]
    return avgpool_head(x, head["w"], head["b"])


if __name__ == "__main__":
    classes_num = 10
    key = jax.random.PRNGKey(0)
    kp, kx = jax.random.split(key)
    params = make_params(kp, classes_num)
    x = jax.random.normal(kx, (2, 3, 32, 32), jnp.float32)  # NCHW like PyTorch

    out = variant_resnet_forward(params, x)
    out = jax.block_until_ready(out)

    assert out.shape == (2, classes_num), out.shape
    assert bool(jnp.all(jnp.isfinite(out)))
    print("KERNEL_OK")
</pallas_src>

<mosaic_0001>
module attributes {stable_mosaic.version = 11 : i64} {
  func.func @_mm_bn_kernel(%arg0: i32, %arg1: i32, %arg2: i32, %arg3: memref<256x256xbf16, #tpu.memory_space<vmem>>, %arg4: memref<256x128xbf16, #tpu.memory_space<vmem>>, %arg5: memref<1x128xf32, #tpu.memory_space<vmem>>, %arg6: memref<1x128xf32, #tpu.memory_space<vmem>>, %arg7: memref<256x128xbf16, #tpu.memory_space<vmem>>, %arg8: memref<256x128xf32, #tpu.memory_space<vmem>>) attributes {dimension_semantics = [#tpu.dimension_semantics<parallel>, #tpu.dimension_semantics<parallel>, #tpu.dimension_semantics<arbitrary>], iteration_bounds = array<i64: 2, 1, 1>, scalar_prefetch = 0 : i64, scratch_operands = 1 : i64, tpu.core_type = #tpu.core_type<tc>, window_params = [{transform_indices = @transform_0, window_bounds = array<i64: 256, 256>}, {transform_indices = @transform_1, window_bounds = array<i64: 256, 128>}, {transform_indices = @transform_2, window_bounds = array<i64: 1, 128>}, {transform_indices = @transform_3, window_bounds = array<i64: 1, 128>}, {transform_indices = @transform_4, window_bounds = array<i64: 256, 128>}]} {
    %c0_i32 = arith.constant 0 : i32
    %0 = arith.cmpi eq, %arg2, %c0_i32 : i32
    %1 = arith.extui %0 : i1 to i32
    %c0_i32_0 = arith.constant 0 : i32
    %2 = arith.cmpi ne, %1, %c0_i32_0 : i32
    scf.if %2 {
      %cst_10 = arith.constant 0.000000e+00 : f32
      %12 = vector.broadcast %cst_10 : f32 to vector<256x128xf32>
      %c0_11 = arith.constant 0 : index
      %c0_12 = arith.constant 0 : index
      %13 = vector.load %arg8[%c0_11, %c0_12] : memref<256x128xf32, #tpu.memory_space<vmem>>, vector<256x128xf32>
      tpu.vector_store %arg8[%c0_11, %c0_12], %12 {strides = array<i32>} : memref<256x128xf32, #tpu.memory_space<vmem>>, vector<256x128xf32>,
    } else {
    }
    %c0 = arith.constant 0 : index
    %c0_1 = arith.constant 0 : index
    %3 = vector.load %arg8[%c0, %c0_1] : memref<256x128xf32, #tpu.memory_space<vmem>>, vector<256x128xf32>
    %c0_2 = arith.constant 0 : index
    %c0_3 = arith.constant 0 : index
    %4 = vector.load %arg3[%c0_2, %c0_3] : memref<256x256xbf16, #tpu.memory_space<vmem>>, vector<256x256xbf16>
    %c0_4 = arith.constant 0 : index
    %c0_5 = arith.constant 0 : index
    %5 = vector.load %arg4[%c0_4, %c0_5] : memref<256x128xbf16, #tpu.memory_space<vmem>>, vector<256x128xbf16>
    %cst = arith.constant dense<0.000000e+00> : vector<256x128xf32>
    %6 = tpu.matmul %4, %5, %cst {dimension_numbers = #tpu.dot_dimension_numbers<[1], [0], [0], [1], [0, 0, 1, 1], [], []>} : vector<256x256xbf16>, vector<256x128xbf16>, vector<256x128xf32> -> vector<256x128xf32>
    %7 = arith.addf %3, %6 : vector<256x128xf32>
    %c0_6 = arith.constant 0 : index
    %c0_7 = arith.constant 0 : index
    %8 = vector.load %arg8[%c0_6, %c0_7] : memref<256x128xf32, #tpu.memory_space<vmem>>, vector<256x128xf32>
    tpu.vector_store %arg8[%c0_6, %c0_7], %7 {strides = array<i32>} : memref<256x128xf32, #tpu.memory_space<vmem>>, vector<256x128xf32>,
    %c0_i32_8 = arith.constant 0 : i32
    %9 = arith.cmpi eq, %arg2, %c0_i32_8 : i32
    %10 = arith.extui %9 : i1 to i32
    %c0_i32_9 = arith.constant 0 : i32
    %11 = arith.cmpi ne, %10, %c0_i32_9 : i32
    scf.if %11 {
      %c0_10 = arith.constant 0 : index
      %c0_11 = arith.constant 0 : index
      %12 = vector.load %arg8[%c0_10, %c0_11] : memref<256x128xf32, #tpu.memory_space<vmem>>, vector<256x128xf32>
      %c0_12 = arith.constant 0 : index
      %c0_13 = arith.constant 0 : index
      %13 = vector.load %arg5[%c0_12, %c0_13] : memref<1x128xf32, #tpu.memory_space<vmem>>, vector<1x128xf32>
      %14 = vector.broadcast %13 : vector<1x128xf32> to vector<256x128xf32>
      %15 = arith.mulf %12, %14 : vector<256x128xf32>
      %c0_14 = arith.constant 0 : index
      %c0_15 = arith.constant 0 : index
      %16 = vector.load %arg6[%c0_14, %c0_15] : memref<1x128xf32, #tpu.memory_space<vmem>>, vector<1x128xf32>
      %17 = vector.broadcast %16 : vector<1x128xf32> to vector<256x128xf32>
      %18 = arith.addf %15, %17 : vector<256x128xf32>
      %cst_16 = arith.constant 0.000000e+00 : f32
      %19 = vector.broadcast %cst_16 : f32 to vector<256x128xf32>
      %20 = arith.maximumf %18, %19 : vector<256x128xf32>
      %21 = arith.truncf %20 : vector<256x128xf32> to vector<256x128xbf16>
      %c0_17 = arith.constant 0 : index
      %c0_18 = arith.constant 0 : index
      %22 = vector.load %arg7[%c0_17, %c0_18] : memref<256x128xbf16, #tpu.memory_space<vmem>>, vector<256x128xbf16>
      tpu.vector_store %arg7[%c0_17, %c0_18], %21 {strides = array<i32>} : memref<256x128xbf16, #tpu.memory_space<vmem>>, vector<256x128xbf16>,
    } else {
    }
    return
  }
  func.func @transform_0(%arg0: i32, %arg1: i32, %arg2: i32) -> (i32, i32) {
    %c0_i32 = arith.constant 0 : i32
    return %arg0, %arg2 : i32, i32
  }
  func.func @transform_1(%arg0: i32, %arg1: i32, %arg2: i32) -> (i32, i32) {
    %c0_i32 = arith.constant 0 : i32
    return %arg2, %arg1 : i32, i32
  }
  func.func @transform_2(%arg0: i32, %arg1: i32, %arg2: i32) -> (i32, i32) {
    %c0_i32 = arith.constant 0 : i32
    %c0_i32_0 = arith.constant 0 : i32
    return %c0_i32, %arg1 : i32, i32
  }
  func.func @transform_3(%arg0: i32, %arg1: i32, %arg2: i32) -> (i32, i32) {
    %c0_i32 = arith.constant 0 : i32
    %c0_i32_0 = arith.constant 0 : i32
    return %c0_i32, %arg1 : i32, i32
  }
  func.func @transform_4(%arg0: i32, %arg1: i32, %arg2: i32) -> (i32, i32) {
    %c0_i32 = arith.constant 0 : i32
    return %arg0, %arg1 : i32, i32
  }
}

module attributes {stable_mosaic.version = 11 : i64} {
  func.func @_max9_kernel(%arg0: i32, %arg1: memref<128x64xbf16, #tpu.memory_space<vmem>>, %arg2: memref<128x64xbf16, #tpu.memory_space<vmem>>, %arg3: memref<128x64xbf16, #tpu.memory_space<vmem>>, %arg4: memref<128x64xbf16, #tpu.memory_space<vmem>>, %arg5: memref<128x64xbf16, #tpu.memory_space<vmem>>, %arg6: memref<128x64xbf16, #tpu.memory_space<vmem>>, %arg7: memref<128x64xbf16, #tpu.memory_space<vmem>>, %arg8: memref<128x64xbf16, #tpu.memory_space<vmem>>, %arg9: memref<128x64xbf16, #tpu.memory_space<vmem>>, %arg10: memref<128x64xbf16, #tpu.memory_space<vmem>>) attributes {dimension_semantics = [#tpu.dimension_semantics<parallel>], iteration_bounds = array<i64: 1>, scalar_prefetch = 0 : i64, scratch_operands = 0 : i64, tpu.core_type = #tpu.core_type<tc>, window_params = [{transform_indices = @transform_0, window_bounds = array<i64: 128, 64>}, {transform_indices = @transform_1, window_bounds = array<i64: 128, 64>}, {transform_indices = @transform_2, window_bounds = array<i64: 128, 64>}, {transform_indices = @transform_3, window_bounds = array<i64: 128, 64>}, {transform_indices = @transform_4, window_bounds = array<i64: 128, 64>}, {transform_indices = @transform_5, window_bounds = array<i64: 128, 64>}, {transform_indices = @transform_6, window_bounds = array<i64: 128, 64>}, {transform_indices = @transform_7, window_bounds = array<i64: 128, 64>}, {transform_indices = @transform_8, window_bounds = array<i64: 128, 64>}, {transform_indices = @transform_9, window_bounds = array<i64: 128, 64>}]} {
    %c0 = arith.constant 0 : index
    %c0_0 = arith.constant 0 : index
    %0 = vector.load %arg1[%c0, %c0_0] : memref<128x64xbf16, #tpu.memory_space<vmem>>, vector<128x64xbf16>
    %c0_1 = arith.constant 0 : index
    %c0_2 = arith.constant 0 : index
    %1 = vector.load %arg2[%c0_1, %c0_2] : memref<128x64xbf16, #tpu.memory_space<vmem>>, vector<128x64xbf16>
    %2 = arith.maximumf %0, %1 : vector<128x64xbf16>
    %c0_3 = arith.constant 0 : index
    %c0_4 = arith.constant 0 : index
    %3 = vector.load %arg3[%c0_3, %c0_4] : memref<128x64xbf16, #tpu.memory_space<vmem>>, vector<128x64xbf16>
    %4 = arith.maximumf %2, %3 : vector<128x64xbf16>
    %c0_5 = arith.constant 0 : index
    %c0_6 = arith.constant 0 : index
    %5 = vector.load %arg4[%c0_5, %c0_6] : memref<128x64xbf16, #tpu.memory_space<vmem>>, vector<128x64xbf16>
    %6 = arith.maximumf %4, %5 : vector<128x64xbf16>
    %c0_7 = arith.constant 0 : index
    %c0_8 = arith.constant 0 : index
    %7 = vector.load %arg5[%c0_7, %c0_8] : memref<128x64xbf16, #tpu.memory_space<vmem>>, vector<128x64xbf16>
    %8 = arith.maximumf %6, %7 : vector<128x64xbf16>
    %c0_9 = arith.constant 0 : index
    %c0_10 = arith.constant 0 : index
    %9 = vector.load %arg6[%c0_9, %c0_10] : memref<128x64xbf16, #tpu.memory_space<vmem>>, vector<128x64xbf16>
    %10 = arith.maximumf %8, %9 : vector<128x64xbf16>
    %c0_11 = arith.constant 0 : index
    %c0_12 = arith.constant 0 : index
    %11 = vector.load %arg7[%c0_11, %c0_12] : memref<128x64xbf16, #tpu.memory_space<vmem>>, vector<128x64xbf16>
    %12 = arith.maximumf %10, %11 : vector<128x64xbf16>
    %c0_13 = arith.constant 0 : index
    %c0_14 = arith.constant 0 : index
    %13 = vector.load %arg8[%c0_13, %c0_14] : memref<128x64xbf16, #tpu.memory_space<vmem>>, vector<128x64xbf16>
    %14 = arith.maximumf %12, %13 : vector<128x64xbf16>
    %c0_15 = arith.constant 0 : index
    %c0_16 = arith.constant 0 : index
    %15 = vector.load %arg9[%c0_15, %c0_16] : memref<128x64xbf16, #tpu.memory_space<vmem>>, vector<128x64xbf16>
    %16 = arith.maximumf %14, %15 : vector<128x64xbf16>
    %c0_17 = arith.constant 0 : index
    %c0_18 = arith.constant 0 : index
    %17 = vector.load %arg10[%c0_17, %c0_18] : memref<128x64xbf16, #tpu.memory_space<vmem>>, vector<128x64xbf16>
    tpu.vector_store %arg10[%c0_17, %c0_18], %16 {strides = array<i32>} : memref<128x64xbf16, #tpu.memory_space<vmem>>, vector<128x64xbf16>,
    return
  }
  func.func @transform_0(%arg0: i32) -> (i32, i32) {
    %c0_i32 = arith.constant 0 : i32
    %c0_i32_0 = arith.constant 0 : i32
    return %arg0, %c0_i32 : i32, i32
  }
  func.func @transform_1(%arg0: i32) -> (i32, i32) {
    %c0_i32 = arith.constant 0 : i32
    %c0_i32_0 = arith.constant 0 : i32
    return %arg0, %c0_i32 : i32, i32
  }
  func.func @transform_2(%arg0: i32) -> (i32, i32) {
    %c0_i32 = arith.constant 0 : i32
    %c0_i32_0 = arith.constant 0 : i32
    return %arg0, %c0_i32 : i32, i32
  }
  func.func @transform_3(%arg0: i32) -> (i32, i32) {
    %c0_i32 = arith.constant 0 : i32
    %c0_i32_0 = arith.constant 0 : i32
    return %arg0, %c0_i32 : i32, i32
  }
  func.func @transform_4(%arg0: i32) -> (i32, i32) {
    %c0_i32 = arith.constant 0 : i32
    %c0_i32_0 = arith.constant 0 : i32
    return %arg0, %c0_i32 : i32, i32
  }
  func.func @transform_5(%arg0: i32) -> (i32, i32) {
    %c0_i32 = arith.constant 0 : i32
    %c0_i32_0 = arith.constant 0 : i32
    return %arg0, %c0_i32 : i32, i32
  }
  func.func @transform_6(%arg0: i32) -> (i32, i32) {
    %c0_i32 = arith.constant 0 : i32
    %c0_i32_0 = arith.constant 0 : i32
    return %arg0, %c0_i32 : i32, i32
  }
  func.func @transform_7(%arg0: i32) -> (i32, i32) {
    %c0_i32 = arith.constant 0 : i32
    %c0_i32_0 = arith.constant 0 : i32
    return %arg0, %c0_i32 : i32, i32
  }
  func.func @transform_8(%arg0: i32) -> (i32, i32) {
    %c0_i32 = arith.constant 0 : i32
    %c0_i32_0 = arith.constant 0 : i32
    return %arg0, %c0_i32 : i32, i32
  }
  func.func @transform_9(%arg0: i32) -> (i32, i32) {
    %c0_i32 = arith.constant 0 : i32
    %c0_i32_0 = arith.constant 0 : i32
    return %arg0, %c0_i32 : i32, i32
  }
}

module attributes {stable_mosaic.version = 11 : i64} {
  func.func @_mm_bn_kernel(%arg0: i32, %arg1: i32, %arg2: i32, %arg3: memref<128x128xbf16, #tpu.memory_space<vmem>>, %arg4: memref<128x128xbf16, #tpu.memory_space<vmem>>, %arg5: memref<1x128xf32, #tpu.memory_space<vmem>>, %arg6: memref<1x128xf32, #tpu.memory_space<vmem>>, %arg7: memref<128x128xbf16, #tpu.memory_space<vmem>>, %arg8: memref<128x128xf32, #tpu.memory_space<vmem>>) attributes {dimension_semantics = [#tpu.dimension_semantics<parallel>, #tpu.dimension_semantics<parallel>, #tpu.dimension_semantics<arbitrary>], iteration_bounds = array<i64: 1, 1, 5>, scalar_prefetch = 0 : i64, scratch_operands = 1 : i64, tpu.core_type = #tpu.core_type<tc>, window_params = [{transform_indices = @transform_0, window_bounds = array<i64: 128, 128>}, {transform_indices = @transform_1, window_bounds = array<i64: 128, 128>}, {transform_indices = @transform_2, window_bounds = array<i64: 1, 128>}, {transform_indices = @transform_3, window_bounds = array<i64: 1, 128>}, {transform_indices = @transform_4, window_bounds = array<i64: 128, 128>}]} {
    %c0_i32 = arith.constant 0 : i32
    %0 = arith.cmpi eq, %arg2, %c0_i32 : i32
    %1 = arith.extui %0 : i1 to i32
    %c0_i32_0 = arith.constant 0 : i32
    %2 = arith.cmpi ne, %1, %c0_i32_0 : i32
    scf.if %2 {
      %cst_9 = arith.constant 0.000000e+00 : f32
      %12 = vector.broadcast %cst_9 : f32 to vector<128x128xf32>
      %c0_10 = arith.constant 0 : index
      %c0_11 = arith.constant 0 : index
      %13 = vector.load %arg8[%c0_10, %c0_11] : memref<128x128xf32, #tpu.memory_space<vmem>>, vector<128x128xf32>
      tpu.vector_store %arg8[%c0_10, %c0_11], %12 {strides = array<i32>} : memref<128x128xf32, #tpu.memory_space<vmem>>, vector<128x128xf32>,
    } else {
    }
    %c0 = arith.constant 0 : index
    %c0_1 = arith.constant 0 : index
    %3 = vector.load %arg8[%c0, %c0_1] : memref<128x128xf32, #tpu.memory_space<vmem>>, vector<128x128xf32>
    %c0_2 = arith.constant 0 : index
    %c0_3 = arith.constant 0 : index
    %4 = vector.load %arg3[%c0_2, %c0_3] : memref<128x128xbf16, #tpu.memory_space<vmem>>, vector<128x128xbf16>
    %c0_4 = arith.constant 0 : index
    %c0_5 = arith.constant 0 : index
    %5 = vector.load %arg4[%c0_4, %c0_5] : memref<128x128xbf16, #tpu.memory_space<vmem>>, vector<128x128xbf16>
    %cst = arith.constant dense<0.000000e+00> : vector<128x128xf32>
    %6 = tpu.matmul %4, %5, %cst {dimension_numbers = #tpu.dot_dimension_numbers<[1], [0], [0], [1], [0, 0, 1, 1], [], []>} : vector<128x128xbf16>, vector<128x128xbf16>, vector<128x128xf32> -> vector<128x128xf32>
    %7 = arith.addf %3, %6 : vector<128x128xf32>
    %c0_6 = arith.constant 0 : index
    %c0_7 = arith.constant 0 : index
    %8 = vector.load %arg8[%c0_6, %c0_7] : memref<128x128xf32, #tpu.memory_space<vmem>>, vector<128x128xf32>
    tpu.vector_store %arg8[%c0_6, %c0_7], %7 {strides = array<i32>} : memref<128x128xf32, #tpu.memory_space<vmem>>, vector<128x128xf32>,
    %c4_i32 = arith.constant 4 : i32
    %9 = arith.cmpi eq, %arg2, %c4_i32 : i32
    %10 = arith.extui %9 : i1 to i32
    %c0_i32_8 = arith.constant 0 : i32
    %11 = arith.cmpi ne, %10, %c0_i32_8 : i32
    scf.if %11 {
      %c0_9 = arith.constant 0 : index
      %c0_10 = arith.constant 0 : index
      %12 = vector.load %arg8[%c0_9, %c0_10] : memref<128x128xf32, #tpu.memory_space<vmem>>, vector<128x128xf32>
      %c0_11 = arith.constant 0 : index
      %c0_12 = arith.constant 0 : index
      %13 = vector.load %arg5[%c0_11, %c0_12] : memref<1x128xf32, #tpu.memory_space<vmem>>, vector<1x128xf32>
      %14 = vector.broadcast %13 : vector<1x128xf32> to vector<128x128xf32>
      %15 = arith.mulf %12, %14 : vector<128x128xf32>
      %c0_13 = arith.constant 0 : index
      %c0_14 = arith.constant 0 : index
      %16 = vector.load %arg6[%c0_13, %c0_14] : memref<1x128xf32, #tpu.memory_space<vmem>>, vector<1x128xf32>
      %17 = vector.broadcast %16 : vector<1x128xf32> to vector<128x128xf32>
      %18 = arith.addf %15, %17 : vector<128x128xf32>
      %cst_15 = arith.constant 0.000000e+00 : f32
      %19 = vector.broadcast %cst_15 : f32 to vector<128x128xf32>
      %20 = arith.maximumf %18, %19 : vector<128x128xf32>
      %21 = arith.truncf %20 : vector<128x128xf32> to vector<128x128xbf16>
      %c0_16 = arith.constant 0 : index
      %c0_17 = arith.constant 0 : index
      %22 = vector.load %arg7[%c0_16, %c0_17] : memref<128x128xbf16, #tpu.memory_space<vmem>>, vector<128x128xbf16>
      tpu.vector_store %arg7[%c0_16, %c0_17], %21 {strides = array<i32>} : memref<128x128xbf16, #tpu.memory_space<vmem>>, vector<128x128xbf16>,
    } else {
    }
    return
  }
  func.func @transform_0(%arg0: i32, %arg1: i32, %arg2: i32) -> (i32, i32) {
    %c0_i32 = arith.constant 0 : i32
    return %arg0, %arg2 : i32, i32
  }
  func.func @transform_1(%arg0: i32, %arg1: i32, %arg2: i32) -> (i32, i32) {
    %c0_i32 = arith.constant 0 : i32
    return %arg2, %arg1 : i32, i32
  }
  func.func @transform_2(%arg0: i32, %arg1: i32, %arg2: i32) -> (i32, i32) {
    %c0_i32 = arith.constant 0 : i32
    %c0_i32_0 = arith.constant 0 : i32
    return %c0_i32, %arg1 : i32, i32
  }
  func.func @transform_3(%arg0: i32, %arg1: i32, %arg2: i32) -> (i32, i32) {
    %c0_i32 = arith.constant 0 : i32
    %c0_i32_0 = arith.constant 0 : i32
    return %c0_i32, %arg1 : i32, i32
  }
  func.func @transform_4(%arg0: i32, %arg1: i32, %arg2: i32) -> (i32, i32) {
    %c0_i32 = arith.constant 0 : i32
    return %arg0, %arg1 : i32, i32
  }
}

module attributes {stable_mosaic.version = 11 : i64} {
  func.func @_mm_bn_res_kernel(%arg0: i32, %arg1: i32, %arg2: i32, %arg3: memref<128x128xbf16, #tpu.memory_space<vmem>>, %arg4: memref<128x128xbf16, #tpu.memory_space<vmem>>, %arg5: memref<1x128xf32, #tpu.memory_space<vmem>>, %arg6: memref<1x128xf32, #tpu.memory_space<vmem>>, %arg7: memref<128x128xbf16, #tpu.memory_space<vmem>>, %arg8: memref<128x128xbf16, #tpu.memory_space<vmem>>, %arg9: memref<128x128xf32, #tpu.memory_space<vmem>>) attributes {dimension_semantics = [#tpu.dimension_semantics<parallel>, #tpu.dimension_semantics<parallel>, #tpu.dimension_semantics<arbitrary>], iteration_bounds = array<i64: 1, 1, 5>, scalar_prefetch = 0 : i64, scratch_operands = 1 : i64, tpu.core_type = #tpu.core_type<tc>, window_params = [{transform_indices = @transform_0, window_bounds = array<i64: 128, 128>}, {transform_indices = @transform_1, window_bounds = array<i64: 128, 128>}, {transform_indices = @transform_2, window_bounds = array<i64: 1, 128>}, {transform_indices = @transform_3, window_bounds = array<i64: 1, 128>}, {transform_indices = @transform_4, window_bounds = array<i64: 128, 128>}, {transform_indices = @transform_5, window_bounds = array<i64: 128, 128>}]} {
    %c0_i32 = arith.constant 0 : i32
    %0 = arith.cmpi eq, %arg2, %c0_i32 : i32
    %1 = arith.extui %0 : i1 to i32
    %c0_i32_0 = arith.constant 0 : i32
    %2 = arith.cmpi ne, %1, %c0_i32_0 : i32
    scf.if %2 {
      %cst_9 = arith.constant 0.000000e+00 : f32
      %12 = vector.broadcast %cst_9 : f32 to vector<128x128xf32>
      %c0_10 = arith.constant 0 : index
      %c0_11 = arith.constant 0 : index
      %13 = vector.load %arg9[%c0_10, %c0_11] : memref<128x128xf32, #tpu.memory_space<vmem>>, vector<128x128xf32>
      tpu.vector_store %arg9[%c0_10, %c0_11], %12 {strides = array<i32>} : memref<128x128xf32, #tpu.memory_space<vmem>>, vector<128x128xf32>,
    } else {
    }
    %c0 = arith.constant 0 : index
    %c0_1 = arith.constant 0 : index
    %3 = vector.load %arg9[%c0, %c0_1] : memref<128x128xf32, #tpu.memory_space<vmem>>, vector<128x128xf32>
    %c0_2 = arith.constant 0 : index
    %c0_3 = arith.constant 0 : index
    %4 = vector.load %arg3[%c0_2, %c0_3] : memref<128x128xbf16, #tpu.memory_space<vmem>>, vector<128x128xbf16>
    %c0_4 = arith.constant 0 : index
    %c0_5 = arith.constant 0 : index
    %5 = vector.load %arg4[%c0_4, %c0_5] : memref<128x128xbf16, #tpu.memory_space<vmem>>, vector<128x128xbf16>
    %cst = arith.constant dense<0.000000e+00> : vector<128x128xf32>
    %6 = tpu.matmul %4, %5, %cst {dimension_numbers = #tpu.dot_dimension_numbers<[1], [0], [0], [1], [0, 0, 1, 1], [], []>} : vector<128x128xbf16>, vector<128x128xbf16>, vector<128x128xf32> -> vector<128x128xf32>
    %7 = arith.addf %3, %6 : vector<128x128xf32>
    %c0_6 = arith.constant 0 : index
    %c0_7 = arith.constant 0 : index
    %8 = vector.load %arg9[%c0_6, %c0_7] : memref<128x128xf32, #tpu.memory_space<vmem>>, vector<128x128xf32>
    tpu.vector_store %arg9[%c0_6, %c0_7], %7 {strides = array<i32>} : memref<128x128xf32, #tpu.memory_space<vmem>>, vector<128x128xf32>,
    %c4_i32 = arith.constant 4 : i32
    %9 = arith.cmpi eq, %arg2, %c4_i32 : i32
    %10 = arith.extui %9 : i1 to i32
    %c0_i32_8 = arith.constant 0 : i32
    %11 = arith.cmpi ne, %10, %c0_i32_8 : i32
    scf.if %11 {
      %c0_9 = arith.constant 0 : index
      %c0_10 = arith.constant 0 : index
      %12 = vector.load %arg9[%c0_9, %c0_10] : memref<128x128xf32, #tpu.memory_space<vmem>>, vector<128x128xf32>
      %c0_11 = arith.constant 0 : index
      %c0_12 = arith.constant 0 : index
      %13 = vector.load %arg5[%c0_11, %c0_12] : memref<1x128xf32, #tpu.memory_space<vmem>>, vector<1x128xf32>
      %14 = vector.broadcast %13 : vector<1x128xf32> to vector<128x128xf32>
      %15 = arith.mulf %12, %14 : vector<128x128xf32>
      %c0_13 = arith.constant 0 : index
      %c0_14 = arith.constant 0 : index
      %16 = vector.load %arg6[%c0_13, %c0_14] : memref<1x128xf32, #tpu.memory_space<vmem>>, vector<1x128xf32>
      %17 = vector.broadcast %16 : vector<1x128xf32> to vector<128x128xf32>
      %18 = arith.addf %15, %17 : vector<128x128xf32>
      %c0_15 = arith.constant 0 : index
      %c0_16 = arith.constant 0 : index
      %19 = vector.load %arg7[%c0_15, %c0_16] : memref<128x128xbf16, #tpu.memory_space<vmem>>, vector<128x128xbf16>
      %20 = arith.extf %19 : vector<128x128xbf16> to vector<128x128xf32>
      %21 = arith.addf %18, %20 : vector<128x128xf32>
      %cst_17 = arith.constant 0.000000e+00 : f32
      %22 = vector.broadcast %cst_17 : f32 to vector<128x128xf32>
      %23 = arith.maximumf %21, %22 : vector<128x128xf32>
      %24 = arith.truncf %23 : vector<128x128xf32> to vector<128x128xbf16>
      %c0_18 = arith.constant 0 : index
      %c0_19 = arith.constant 0 : index
      %25 = vector.load %arg8[%c0_18, %c0_19] : memref<128x128xbf16, #tpu.memory_space<vmem>>, vector<128x128xbf16>
      tpu.vector_store %arg8[%c0_18, %c0_19], %24 {strides = array<i32>} : memref<128x128xbf16, #tpu.memory_space<vmem>>, vector<128x128xbf16>,
    } else {
    }
    return
  }
  func.func @transform_0(%arg0: i32, %arg1: i32, %arg2: i32) -> (i32, i32) {
    %c0_i32 = arith.constant 0 : i32
    return %arg0, %arg2 : i32, i32
  }
  func.func @transform_1(%arg0: i32, %arg1: i32, %arg2: i32) -> (i32, i32) {
    %c0_i32 = arith.constant 0 : i32
    return %arg2, %arg1 : i32, i32
  }
  func.func @transform_2(%arg0: i32, %arg1: i32, %arg2: i32) -> (i32, i32) {
    %c0_i32 = arith.constant 0 : i32
    %c0_i32_0 = arith.constant 0 : i32
    return %c0_i32, %arg1 : i32, i32
  }
  func.func @transform_3(%arg0: i32, %arg1: i32, %arg2: i32) -> (i32, i32) {
    %c0_i32 = arith.constant 0 : i32
    %c0_i32_0 = arith.constant 0 : i32
    return %c0_i32, %arg1 : i32, i32
  }
  func.func @transform_4(%arg0: i32, %arg1: i32, %arg2: i32) -> (i32, i32) {
    %c0_i32 = arith.constant 0 : i32
    return %arg0, %arg1 : i32, i32
  }
  func.func @transform_5(%arg0: i32, %arg1: i32, %arg2: i32) -> (i32, i32) {
    %c0_i32 = arith.constant 0 : i32
    return %arg0, %arg1 : i32, i32
  }
}

module attributes {stable_mosaic.version = 11 : i64} {
  func.func @_mm_bn_kernel(%arg0: i32, %arg1: i32, %arg2: i32, %arg3: memref<32x128xbf16, #tpu.memory_space<vmem>>, %arg4: memref<128x128xbf16, #tpu.memory_space<vmem>>, %arg5: memref<1x128xf32, #tpu.memory_space<vmem>>, %arg6: memref<1x128xf32, #tpu.memory_space<vmem>>, %arg7: memref<32x128xbf16, #tpu.memory_space<vmem>>, %arg8: memref<32x128xf32, #tpu.memory_space<vmem>>) attributes {dimension_semantics = [#tpu.dimension_semantics<parallel>, #tpu.dimension_semantics<parallel>, #tpu.dimension_semantics<arbitrary>], iteration_bounds = array<i64: 1, 1, 5>, scalar_prefetch = 0 : i64, scratch_operands = 1 : i64, tpu.core_type = #tpu.core_type<tc>, window_params = [{transform_indices = @transform_0, window_bounds = array<i64: 32, 128>}, {transform_indices = @transform_1, window_bounds = array<i64: 128, 128>}, {transform_indices = @transform_2, window_bounds = array<i64: 1, 128>}, {transform_indices = @transform_3, window_bounds = array<i64: 1, 128>}, {transform_indices = @transform_4, window_bounds = array<i64: 32, 128>}]} {
    %c0_i32 = arith.constant 0 : i32
    %0 = arith.cmpi eq, %arg2, %c0_i32 : i32
    %1 = arith.extui %0 : i1 to i32
    %c0_i32_0 = arith.constant 0 : i32
    %2 = arith.cmpi ne, %1, %c0_i32_0 : i32
    scf.if %2 {
      %cst_9 = arith.constant 0.000000e+00 : f32
      %12 = vector.broadcast %cst_9 : f32 to vector<32x128xf32>
      %c0_10 = arith.constant 0 : index
      %c0_11 = arith.constant 0 : index
      %13 = vector.load %arg8[%c0_10, %c0_11] : memref<32x128xf32, #tpu.memory_space<vmem>>, vector<32x128xf32>
      tpu.vector_store %arg8[%c0_10, %c0_11], %12 {strides = array<i32>} : memref<32x128xf32, #tpu.memory_space<vmem>>, vector<32x128xf32>,
    } else {
    }
    %c0 = arith.constant 0 : index
    %c0_1 = arith.constant 0 : index
    %3 = vector.load %arg8[%c0, %c0_1] : memref<32x128xf32, #tpu.memory_space<vmem>>, vector<32x128xf32>
    %c0_2 = arith.constant 0 : index
    %c0_3 = arith.constant 0 : index
    %4 = vector.load %arg3[%c0_2, %c0_3] : memref<32x128xbf16, #tpu.memory_space<vmem>>, vector<32x128xbf16>
    %c0_4 = arith.constant 0 : index
    %c0_5 = arith.constant 0 : index
    %5 = vector.load %arg4[%c0_4, %c0_5] : memref<128x128xbf16, #tpu.memory_space<vmem>>, vector<128x128xbf16>
    %cst = arith.constant dense<0.000000e+00> : vector<32x128xf32>
    %6 = tpu.matmul %4, %5, %cst {dimension_numbers = #tpu.dot_dimension_numbers<[1], [0], [0], [1], [0, 0, 1, 1], [], []>} : vector<32x128xbf16>, vector<128x128xbf16>, vector<32x128xf32> -> vector<32x128xf32>
    %7 = arith.addf %3, %6 : vector<32x128xf32>
    %c0_6 = arith.constant 0 : index
    %c0_7 = arith.constant 0 : index
    %8 = vector.load %arg8[%c0_6, %c0_7] : memref<32x128xf32, #tpu.memory_space<vmem>>, vector<32x128xf32>
    tpu.vector_store %arg8[%c0_6, %c0_7], %7 {strides = array<i32>} : memref<32x128xf32, #tpu.memory_space<vmem>>, vector<32x128xf32>,
    %c4_i32 = arith.constant 4 : i32
    %9 = arith.cmpi eq, %arg2, %c4_i32 : i32
    %10 = arith.extui %9 : i1 to i32
    %c0_i32_8 = arith.constant 0 : i32
    %11 = arith.cmpi ne, %10, %c0_i32_8 : i32
    scf.if %11 {
      %c0_9 = arith.constant 0 : index
      %c0_10 = arith.constant 0 : index
      %12 = vector.load %arg8[%c0_9, %c0_10] : memref<32x128xf32, #tpu.memory_space<vmem>>, vector<32x128xf32>
      %c0_11 = arith.constant 0 : index
      %c0_12 = arith.constant 0 : index
      %13 = vector.load %arg5[%c0_11, %c0_12] : memref<1x128xf32, #tpu.memory_space<vmem>>, vector<1x128xf32>
      %14 = vector.broadcast %13 : vector<1x128xf32> to vector<32x128xf32>
      %15 = arith.mulf %12, %14 : vector<32x128xf32>
      %c0_13 = arith.constant 0 : index
      %c0_14 = arith.constant 0 : index
      %16 = vector.load %arg6[%c0_13, %c0_14] : memref<1x128xf32, #tpu.memory_space<vmem>>, vector<1x128xf32>
      %17 = vector.broadcast %16 : vector<1x128xf32> to vector<32x128xf32>
      %18 = arith.addf %15, %17 : vector<32x128xf32>
      %cst_15 = arith.constant 0.000000e+00 : f32
      %19 = vector.broadcast %cst_15 : f32 to vector<32x128xf32>
      %20 = arith.maximumf %18, %19 : vector<32x128xf32>
      %21 = arith.truncf %20 : vector<32x128xf32> to vector<32x128xbf16>
      %c0_16 = arith.constant 0 : index
      %c0_17 = arith.constant 0 : index
      %22 = vector.load %arg7[%c0_16, %c0_17] : memref<32x128xbf16, #tpu.memory_space<vmem>>, vector<32x128xbf16>
      tpu.vector_store %arg7[%c0_16, %c0_17], %21 {strides = array<i32>} : memref<32x128xbf16, #tpu.memory_space<vmem>>, vector<32x128xbf16>,
    } else {
    }
    return
  }
  func.func @transform_0(%arg0: i32, %arg1: i32, %arg2: i32) -> (i32, i32) {
    %c0_i32 = arith.constant 0 : i32
    return %arg0, %arg2 : i32, i32
  }
  func.func @transform_1(%arg0: i32, %arg1: i32, %arg2: i32) -> (i32, i32) {
    %c0_i32 = arith.constant 0 : i32
    return %arg2, %arg1 : i32, i32
  }
  func.func @transform_2(%arg0: i32, %arg1: i32, %arg2: i32) -> (i32, i32) {
    %c0_i32 = arith.constant 0 : i32
    %c0_i32_0 = arith.constant 0 : i32
    return %c0_i32, %arg1 : i32, i32
  }
  func.func @transform_3(%arg0: i32, %arg1: i32, %arg2: i32) -> (i32, i32) {
    %c0_i32 = arith.constant 0 : i32
    %c0_i32_0 = arith.constant 0 : i32
    return %c0_i32, %arg1 : i32, i32
  }
  func.func @transform_4(%arg0: i32, %arg1: i32, %arg2: i32) -> (i32, i32) {
    %c0_i32 = arith.constant 0 : i32
    return %arg0, %arg1 : i32, i32
  }
}

module attributes {stable_mosaic.version = 11 : i64} {
  func.func @_mm_bn_kernel(%arg0: i32, %arg1: i32, %arg2: i32, %arg3: memref<32x128xbf16, #tpu.memory_space<vmem>>, %arg4: memref<128x128xbf16, #tpu.memory_space<vmem>>, %arg5: memref<1x128xf32, #tpu.memory_space<vmem>>, %arg6: memref<1x128xf32, #tpu.memory_space<vmem>>, %arg7: memref<32x128xbf16, #tpu.memory_space<vmem>>, %arg8: memref<32x128xf32, #tpu.memory_space<vmem>>) attributes {dimension_semantics = [#tpu.dimension_semantics<parallel>, #tpu.dimension_semantics<parallel>, #tpu.dimension_semantics<arbitrary>], iteration_bounds = array<i64: 1, 1, 1>, scalar_prefetch = 0 : i64, scratch_operands = 1 : i64, tpu.core_type = #tpu.core_type<tc>, window_params = [{transform_indices = @transform_0, window_bounds = array<i64: 32, 128>}, {transform_indices = @transform_1, window_bounds = array<i64: 128, 128>}, {transform_indices = @transform_2, window_bounds = array<i64: 1, 128>}, {transform_indices = @transform_3, window_bounds = array<i64: 1, 128>}, {transform_indices = @transform_4, window_bounds = array<i64: 32, 128>}]} {
    %c0_i32 = arith.constant 0 : i32
    %0 = arith.cmpi eq, %arg2, %c0_i32 : i32
    %1 = arith.extui %0 : i1 to i32
    %c0_i32_0 = arith.constant 0 : i32
    %2 = arith.cmpi ne, %1, %c0_i32_0 : i32
    scf.if %2 {
      %cst_10 = arith.constant 0.000000e+00 : f32
      %12 = vector.broadcast %cst_10 : f32 to vector<32x128xf32>
      %c0_11 = arith.constant 0 : index
      %c0_12 = arith.constant 0 : index
      %13 = vector.load %arg8[%c0_11, %c0_12] : memref<32x128xf32, #tpu.memory_space<vmem>>, vector<32x128xf32>
      tpu.vector_store %arg8[%c0_11, %c0_12], %12 {strides = array<i32>} : memref<32x128xf32, #tpu.memory_space<vmem>>, vector<32x128xf32>,
    } else {
    }
    %c0 = arith.constant 0 : index
    %c0_1 = arith.constant 0 : index
    %3 = vector.load %arg8[%c0, %c0_1] : memref<32x128xf32, #tpu.memory_space<vmem>>, vector<32x128xf32>
    %c0_2 = arith.constant 0 : index
    %c0_3 = arith.constant 0 : index
    %4 = vector.load %arg3[%c0_2, %c0_3] : memref<32x128xbf16, #tpu.memory_space<vmem>>, vector<32x128xbf16>
    %c0_4 = arith.constant 0 : index
    %c0_5 = arith.constant 0 : index
    %5 = vector.load %arg4[%c0_4, %c0_5] : memref<128x128xbf16, #tpu.memory_space<vmem>>, vector<128x128xbf16>
    %cst = arith.constant dense<0.000000e+00> : vector<32x128xf32>
    %6 = tpu.matmul %4, %5, %cst {dimension_numbers = #tpu.dot_dimension_numbers<[1], [0], [0], [1], [0, 0, 1, 1], [], []>} : vector<32x128xbf16>, vector<128x128xbf16>, vector<32x128xf32> -> vector<32x128xf32>
    %7 = arith.addf %3, %6 : vector<32x128xf32>
    %c0_6 = arith.constant 0 : index
    %c0_7 = arith.constant 0 : index
    %8 = vector.load %arg8[%c0_6, %c0_7] : memref<32x128xf32, #tpu.memory_space<vmem>>, vector<32x128xf32>
    tpu.vector_store %arg8[%c0_6, %c0_7], %7 {strides = array<i32>} : memref<32x128xf32, #tpu.memory_space<vmem>>, vector<32x128xf32>,
    %c0_i32_8 = arith.constant 0 : i32
    %9 = arith.cmpi eq, %arg2, %c0_i32_8 : i32
    %10 = arith.extui %9 : i1 to i32
    %c0_i32_9 = arith.constant 0 : i32
    %11 = arith.cmpi ne, %10, %c0_i32_9 : i32
    scf.if %11 {
      %c0_10 = arith.constant 0 : index
      %c0_11 = arith.constant 0 : index
      %12 = vector.load %arg8[%c0_10, %c0_11] : memref<32x128xf32, #tpu.memory_space<vmem>>, vector<32x128xf32>
      %c0_12 = arith.constant 0 : index
      %c0_13 = arith.constant 0 : index
      %13 = vector.load %arg5[%c0_12, %c0_13] : memref<1x128xf32, #tpu.memory_space<vmem>>, vector<1x128xf32>
      %14 = vector.broadcast %13 : vector<1x128xf32> to vector<32x128xf32>
      %15 = arith.mulf %12, %14 : vector<32x128xf32>
      %c0_14 = arith.constant 0 : index
      %c0_15 = arith.constant 0 : index
      %16 = vector.load %arg6[%c0_14, %c0_15] : memref<1x128xf32, #tpu.memory_space<vmem>>, vector<1x128xf32>
      %17 = vector.broadcast %16 : vector<1x128xf32> to vector<32x128xf32>
      %18 = arith.addf %15, %17 : vector<32x128xf32>
      %19 = arith.truncf %18 : vector<32x128xf32> to vector<32x128xbf16>
      %c0_16 = arith.constant 0 : index
      %c0_17 = arith.constant 0 : index
      %20 = vector.load %arg7[%c0_16, %c0_17] : memref<32x128xbf16, #tpu.memory_space<vmem>>, vector<32x128xbf16>
      tpu.vector_store %arg7[%c0_16, %c0_17], %19 {strides = array<i32>} : memref<32x128xbf16, #tpu.memory_space<vmem>>, vector<32x128xbf16>,
    } else {
    }
    return
  }
  func.func @transform_0(%arg0: i32, %arg1: i32, %arg2: i32) -> (i32, i32) {
    %c0_i32 = arith.constant 0 : i32
    return %arg0, %arg2 : i32, i32
  }
  func.func @transform_1(%arg0: i32, %arg1: i32, %arg2: i32) -> (i32, i32) {
    %c0_i32 = arith.constant 0 : i32
    return %arg2, %arg1 : i32, i32
  }
  func.func @transform_2(%arg0: i32, %arg1: i32, %arg2: i32) -> (i32, i32) {
    %c0_i32 = arith.constant 0 : i32
    %c0_i32_0 = arith.constant 0 : i32
    return %c0_i32, %arg1 : i32, i32
  }
  func.func @transform_3(%arg0: i32, %arg1: i32, %arg2: i32) -> (i32, i32) {
    %c0_i32 = arith.constant 0 : i32
    %c0_i32_0 = arith.constant 0 : i32
    return %c0_i32, %arg1 : i32, i32
  }
  func.func @transform_4(%arg0: i32, %arg1: i32, %arg2: i32) -> (i32, i32) {
    %c0_i32 = arith.constant 0 : i32
    return %arg0, %arg1 : i32, i32
  }
}

module attributes {stable_mosaic.version = 11 : i64} {
  func.func @_mm_bn_res_kernel(%arg0: i32, %arg1: i32, %arg2: i32, %arg3: memref<32x128xbf16, #tpu.memory_space<vmem>>, %arg4: memref<128x128xbf16, #tpu.memory_space<vmem>>, %arg5: memref<1x128xf32, #tpu.memory_space<vmem>>, %arg6: memref<1x128xf32, #tpu.memory_space<vmem>>, %arg7: memref<32x128xbf16, #tpu.memory_space<vmem>>, %arg8: memref<32x128xbf16, #tpu.memory_space<vmem>>, %arg9: memref<32x128xf32, #tpu.memory_space<vmem>>) attributes {dimension_semantics = [#tpu.dimension_semantics<parallel>, #tpu.dimension_semantics<parallel>, #tpu.dimension_semantics<arbitrary>], iteration_bounds = array<i64: 1, 1, 9>, scalar_prefetch = 0 : i64, scratch_operands = 1 : i64, tpu.core_type = #tpu.core_type<tc>, window_params = [{transform_indices = @transform_0, window_bounds = array<i64: 32, 128>}, {transform_indices = @transform_1, window_bounds = array<i64: 128, 128>}, {transform_indices = @transform_2, window_bounds = array<i64: 1, 128>}, {transform_indices = @transform_3, window_bounds = array<i64: 1, 128>}, {transform_indices = @transform_4, window_bounds = array<i64: 32, 128>}, {transform_indices = @transform_5, window_bounds = array<i64: 32, 128>}]} {
    %c0_i32 = arith.constant 0 : i32
    %0 = arith.cmpi eq, %arg2, %c0_i32 : i32
    %1 = arith.extui %0 : i1 to i32
    %c0_i32_0 = arith.constant 0 : i32
    %2 = arith.cmpi ne, %1, %c0_i32_0 : i32
    scf.if %2 {
      %cst_9 = arith.constant 0.000000e+00 : f32
      %12 = vector.broadcast %cst_9 : f32 to vector<32x128xf32>
      %c0_10 = arith.constant 0 : index
      %c0_11 = arith.constant 0 : index
      %13 = vector.load %arg9[%c0_10, %c0_11] : memref<32x128xf32, #tpu.memory_space<vmem>>, vector<32x128xf32>
      tpu.vector_store %arg9[%c0_10, %c0_11], %12 {strides = array<i32>} : memref<32x128xf32, #tpu.memory_space<vmem>>, vector<32x128xf32>,
    } else {
    }
    %c0 = arith.constant 0 : index
    %c0_1 = arith.constant 0 : index
    %3 = vector.load %arg9[%c0, %c0_1] : memref<32x128xf32, #tpu.memory_space<vmem>>, vector<32x128xf32>
    %c0_2 = arith.constant 0 : index
    %c0_3 = arith.constant 0 : index
    %4 = vector.load %arg3[%c0_2, %c0_3] : memref<32x128xbf16, #tpu.memory_space<vmem>>, vector<32x128xbf16>
    %c0_4 = arith.constant 0 : index
    %c0_5 = arith.constant 0 : index
    %5 = vector.load %arg4[%c0_4, %c0_5] : memref<128x128xbf16, #tpu.memory_space<vmem>>, vector<128x128xbf16>
    %cst = arith.constant dense<0.000000e+00> : vector<32x128xf32>
    %6 = tpu.matmul %4, %5, %cst {dimension_numbers = #tpu.dot_dimension_numbers<[1], [0], [0], [1], [0, 0, 1, 1], [], []>} : vector<32x128xbf16>, vector<128x128xbf16>, vector<32x128xf32> -> vector<32x128xf32>
    %7 = arith.addf %3, %6 : vector<32x128xf32>
    %c0_6 = arith.constant 0 : index
    %c0_7 = arith.constant 0 : index
    %8 = vector.load %arg9[%c0_6, %c0_7] : memref<32x128xf32, #tpu.memory_space<vmem>>, vector<32x128xf32>
    tpu.vector_store %arg9[%c0_6, %c0_7], %7 {strides = array<i32>} : memref<32x128xf32, #tpu.memory_space<vmem>>, vector<32x128xf32>,
    %c8_i32 = arith.constant 8 : i32
    %9 = arith.cmpi eq, %arg2, %c8_i32 : i32
    %10 = arith.extui %9 : i1 to i32
    %c0_i32_8 = arith.constant 0 : i32
    %11 = arith.cmpi ne, %10, %c0_i32_8 : i32
    scf.if %11 {
      %c0_9 = arith.constant 0 : index
      %c0_10 = arith.constant 0 : index
      %12 = vector.load %arg9[%c0_9, %c0_10] : memref<32x128xf32, #tpu.memory_space<vmem>>, vector<32x128xf32>
      %c0_11 = arith.constant 0 : index
      %c0_12 = arith.constant 0 : index
      %13 = vector.load %arg5[%c0_11, %c0_12] : memref<1x128xf32, #tpu.memory_space<vmem>>, vector<1x128xf32>
      %14 = vector.broadcast %13 : vector<1x128xf32> to vector<32x128xf32>
      %15 = arith.mulf %12, %14 : vector<32x128xf32>
      %c0_13 = arith.constant 0 : index
      %c0_14 = arith.constant 0 : index
      %16 = vector.load %arg6[%c0_13, %c0_14] : memref<1x128xf32, #tpu.memory_space<vmem>>, vector<1x128xf32>
      %17 = vector.broadcast %16 : vector<1x128xf32> to vector<32x128xf32>
      %18 = arith.addf %15, %17 : vector<32x128xf32>
      %c0_15 = arith.constant 0 : index
      %c0_16 = arith.constant 0 : index
      %19 = vector.load %arg7[%c0_15, %c0_16] : memref<32x128xbf16, #tpu.memory_space<vmem>>, vector<32x128xbf16>
      %20 = arith.extf %19 : vector<32x128xbf16> to vector<32x128xf32>
      %21 = arith.addf %18, %20 : vector<32x128xf32>
      %cst_17 = arith.constant 0.000000e+00 : f32
      %22 = vector.broadcast %cst_17 : f32 to vector<32x128xf32>
      %23 = arith.maximumf %21, %22 : vector<32x128xf32>
      %24 = arith.truncf %23 : vector<32x128xf32> to vector<32x128xbf16>
      %c0_18 = arith.constant 0 : index
      %c0_19 = arith.constant 0 : index
      %25 = vector.load %arg8[%c0_18, %c0_19] : memref<32x128xbf16, #tpu.memory_space<vmem>>, vector<32x128xbf16>
      tpu.vector_store %arg8[%c0_18, %c0_19], %24 {strides = array<i32>} : memref<32x128xbf16, #tpu.memory_space<vmem>>, vector<32x128xbf16>,
    } else {
    }
    return
  }
  func.func @transform_0(%arg0: i32, %arg1: i32, %arg2: i32) -> (i32, i32) {
    %c0_i32 = arith.constant 0 : i32
    return %arg0, %arg2 : i32, i32
  }
  func.func @transform_1(%arg0: i32, %arg1: i32, %arg2: i32) -> (i32, i32) {
    %c0_i32 = arith.constant 0 : i32
    return %arg2, %arg1 : i32, i32
  }
  func.func @transform_2(%arg0: i32, %arg1: i32, %arg2: i32) -> (i32, i32) {
    %c0_i32 = arith.constant 0 : i32
    %c0_i32_0 = arith.constant 0 : i32
    return %c0_i32, %arg1 : i32, i32
  }
  func.func @transform_3(%arg0: i32, %arg1: i32, %arg2: i32) -> (i32, i32) {
    %c0_i32 = arith.constant 0 : i32
    %c0_i32_0 = arith.constant 0 : i32
    return %c0_i32, %arg1 : i32, i32
  }
  func.func @transform_4(%arg0: i32, %arg1: i32, %arg2: i32) -> (i32, i32) {
    %c0_i32 = arith.constant 0 : i32
    return %arg0, %arg1 : i32, i32
  }
  func.func @transform_5(%arg0: i32, %arg1: i32, %arg2: i32) -> (i32, i32) {
    %c0_i32 = arith.constant 0 : i32
    return %arg0, %arg1 : i32, i32
  }
}

module attributes {stable_mosaic.version = 11 : i64} {
  func.func @_mm_bn_kernel(%arg0: i32, %arg1: i32, %arg2: i32, %arg3: memref<32x128xbf16, #tpu.memory_space<vmem>>, %arg4: memref<128x128xbf16, #tpu.memory_space<vmem>>, %arg5: memref<1x128xf32, #tpu.memory_space<vmem>>, %arg6: memref<1x128xf32, #tpu.memory_space<vmem>>, %arg7: memref<32x128xbf16, #tpu.memory_space<vmem>>, %arg8: memref<32x128xf32, #tpu.memory_space<vmem>>) attributes {dimension_semantics = [#tpu.dimension_semantics<parallel>, #tpu.dimension_semantics<parallel>, #tpu.dimension_semantics<arbitrary>], iteration_bounds = array<i64: 1, 1, 9>, scalar_prefetch = 0 : i64, scratch_operands = 1 : i64, tpu.core_type = #tpu.core_type<tc>, window_params = [{transform_indices = @transform_0, window_bounds = array<i64: 32, 128>}, {transform_indices = @transform_1, window_bounds = array<i64: 128, 128>}, {transform_indices = @transform_2, window_bounds = array<i64: 1, 128>}, {transform_indices = @transform_3, window_bounds = array<i64: 1, 128>}, {transform_indices = @transform_4, window_bounds = array<i64: 32, 128>}]} {
    %c0_i32 = arith.constant 0 : i32
    %0 = arith.cmpi eq, %arg2, %c0_i32 : i32
    %1 = arith.extui %0 : i1 to i32
    %c0_i32_0 = arith.constant 0 : i32
    %2 = arith.cmpi ne, %1, %c0_i32_0 : i32
    scf.if %2 {
      %cst_9 = arith.constant 0.000000e+00 : f32
      %12 = vector.broadcast %cst_9 : f32 to vector<32x128xf32>
      %c0_10 = arith.constant 0 : index
      %c0_11 = arith.constant 0 : index
      %13 = vector.load %arg8[%c0_10, %c0_11] : memref<32x128xf32, #tpu.memory_space<vmem>>, vector<32x128xf32>
      tpu.vector_store %arg8[%c0_10, %c0_11], %12 {strides = array<i32>} : memref<32x128xf32, #tpu.memory_space<vmem>>, vector<32x128xf32>,
    } else {
    }
    %c0 = arith.constant 0 : index
    %c0_1 = arith.constant 0 : index
    %3 = vector.load %arg8[%c0, %c0_1] : memref<32x128xf32, #tpu.memory_space<vmem>>, vector<32x128xf32>
    %c0_2 = arith.constant 0 : index
    %c0_3 = arith.constant 0 : index
    %4 = vector.load %arg3[%c0_2, %c0_3] : memref<32x128xbf16, #tpu.memory_space<vmem>>, vector<32x128xbf16>
    %c0_4 = arith.constant 0 : index
    %c0_5 = arith.constant 0 : index
    %5 = vector.load %arg4[%c0_4, %c0_5] : memref<128x128xbf16, #tpu.memory_space<vmem>>, vector<128x128xbf16>
    %cst = arith.constant dense<0.000000e+00> : vector<32x128xf32>
    %6 = tpu.matmul %4, %5, %cst {dimension_numbers = #tpu.dot_dimension_numbers<[1], [0], [0], [1], [0, 0, 1, 1], [], []>} : vector<32x128xbf16>, vector<128x128xbf16>, vector<32x128xf32> -> vector<32x128xf32>
    %7 = arith.addf %3, %6 : vector<32x128xf32>
    %c0_6 = arith.constant 0 : index
    %c0_7 = arith.constant 0 : index
    %8 = vector.load %arg8[%c0_6, %c0_7] : memref<32x128xf32, #tpu.memory_space<vmem>>, vector<32x128xf32>
    tpu.vector_store %arg8[%c0_6, %c0_7], %7 {strides = array<i32>} : memref<32x128xf32, #tpu.memory_space<vmem>>, vector<32x128xf32>,
    %c8_i32 = arith.constant 8 : i32
    %9 = arith.cmpi eq, %arg2, %c8_i32 : i32
    %10 = arith.extui %9 : i1 to i32
    %c0_i32_8 = arith.constant 0 : i32
    %11 = arith.cmpi ne, %10, %c0_i32_8 : i32
    scf.if %11 {
      %c0_9 = arith.constant 0 : index
      %c0_10 = arith.constant 0 : index
      %12 = vector.load %arg8[%c0_9, %c0_10] : memref<32x128xf32, #tpu.memory_space<vmem>>, vector<32x128xf32>
      %c0_11 = arith.constant 0 : index
      %c0_12 = arith.constant 0 : index
      %13 = vector.load %arg5[%c0_11, %c0_12] : memref<1x128xf32, #tpu.memory_space<vmem>>, vector<1x128xf32>
      %14 = vector.broadcast %13 : vector<1x128xf32> to vector<32x128xf32>
      %15 = arith.mulf %12, %14 : vector<32x128xf32>
      %c0_13 = arith.constant 0 : index
      %c0_14 = arith.constant 0 : index
      %16 = vector.load %arg6[%c0_13, %c0_14] : memref<1x128xf32, #tpu.memory_space<vmem>>, vector<1x128xf32>
      %17 = vector.broadcast %16 : vector<1x128xf32> to vector<32x128xf32>
      %18 = arith.addf %15, %17 : vector<32x128xf32>
      %cst_15 = arith.constant 0.000000e+00 : f32
      %19 = vector.broadcast %cst_15 : f32 to vector<32x128xf32>
      %20 = arith.maximumf %18, %19 : vector<32x128xf32>
      %21 = arith.truncf %20 : vector<32x128xf32> to vector<32x128xbf16>
      %c0_16 = arith.constant 0 : index
      %c0_17 = arith.constant 0 : index
      %22 = vector.load %arg7[%c0_16, %c0_17] : memref<32x128xbf16, #tpu.memory_space<vmem>>, vector<32x128xbf16>
      tpu.vector_store %arg7[%c0_16, %c0_17], %21 {strides = array<i32>} : memref<32x128xbf16, #tpu.memory_space<vmem>>, vector<32x128xbf16>,
    } else {
    }
    return
  }
  func.func @transform_0(%arg0: i32, %arg1: i32, %arg2: i32) -> (i32, i32) {
    %c0_i32 = arith.constant 0 : i32
    return %arg0, %arg2 : i32, i32
  }
  func.func @transform_1(%arg0: i32, %arg1: i32, %arg2: i32) -> (i32, i32) {
    %c0_i32 = arith.constant 0 : i32
    return %arg2, %arg1 : i32, i32
  }
  func.func @transform_2(%arg0: i32, %arg1: i32, %arg2: i32) -> (i32, i32) {
    %c0_i32 = arith.constant 0 : i32
    %c0_i32_0 = arith.constant 0 : i32
    return %c0_i32, %arg1 : i32, i32
  }
  func.func @transform_3(%arg0: i32, %arg1: i32, %arg2: i32) -> (i32, i32) {
    %c0_i32 = arith.constant 0 : i32
    %c0_i32_0 = arith.constant 0 : i32
    return %c0_i32, %arg1 : i32, i32
  }
  func.func @transform_4(%arg0: i32, %arg1: i32, %arg2: i32) -> (i32, i32) {
    %c0_i32 = arith.constant 0 : i32
    return %arg0, %arg1 : i32, i32
  }
}

module attributes {stable_mosaic.version = 11 : i64} {
  func.func @_mm_bn_kernel(%arg0: i32, %arg1: i32, %arg2: i32, %arg3: memref<8x128xbf16, #tpu.memory_space<vmem>>, %arg4: memref<128x256xbf16, #tpu.memory_space<vmem>>, %arg5: memref<1x256xf32, #tpu.memory_space<vmem>>, %arg6: memref<1x256xf32, #tpu.memory_space<vmem>>, %arg7: memref<8x256xbf16, #tpu.memory_space<vmem>>, %arg8: memref<8x256xf32, #tpu.memory_space<vmem>>) attributes {dimension_semantics = [#tpu.dimension_semantics<parallel>, #tpu.dimension_semantics<parallel>, #tpu.dimension_semantics<arbitrary>], iteration_bounds = array<i64: 1, 1, 9>, scalar_prefetch = 0 : i64, scratch_operands = 1 : i64, tpu.core_type = #tpu.core_type<tc>, window_params = [{transform_indices = @transform_0, window_bounds = array<i64: 8, 128>}, {transform_indices = @transform_1, window_bounds = array<i64: 128, 256>}, {transform_indices = @transform_2, window_bounds = array<i64: 1, 256>}, {transform_indices = @transform_3, window_bounds = array<i64: 1, 256>}, {transform_indices = @transform_4, window_bounds = array<i64: 8, 256>}]} {
    %c0_i32 = arith.constant 0 : i32
    %0 = arith.cmpi eq, %arg2, %c0_i32 : i32
    %1 = arith.extui %0 : i1 to i32
    %c0_i32_0 = arith.constant 0 : i32
    %2 = arith.cmpi ne, %1, %c0_i32_0 : i32
    scf.if %2 {
      %cst_9 = arith.constant 0.000000e+00 : f32
      %12 = vector.broadcast %cst_9 : f32 to vector<8x256xf32>
      %c0_10 = arith.constant 0 : index
      %c0_11 = arith.constant 0 : index
      %13 = vector.load %arg8[%c0_10, %c0_11] : memref<8x256xf32, #tpu.memory_space<vmem>>, vector<8x256xf32>
      tpu.vector_store %arg8[%c0_10, %c0_11], %12 {strides = array<i32>} : memref<8x256xf32, #tpu.memory_space<vmem>>, vector<8x256xf32>,
    } else {
    }
    %c0 = arith.constant 0 : index
    %c0_1 = arith.constant 0 : index
    %3 = vector.load %arg8[%c0, %c0_1] : memref<8x256xf32, #tpu.memory_space<vmem>>, vector<8x256xf32>
    %c0_2 = arith.constant 0 : index
    %c0_3 = arith.constant 0 : index
    %4 = vector.load %arg3[%c0_2, %c0_3] : memref<8x128xbf16, #tpu.memory_space<vmem>>, vector<8x128xbf16>
    %c0_4 = arith.constant 0 : index
    %c0_5 = arith.constant 0 : index
    %5 = vector.load %arg4[%c0_4, %c0_5] : memref<128x256xbf16, #tpu.memory_space<vmem>>, vector<128x256xbf16>
    %cst = arith.constant dense<0.000000e+00> : vector<8x256xf32>
    %6 = tpu.matmul %4, %5, %cst {dimension_numbers = #tpu.dot_dimension_numbers<[1], [0], [0], [1], [0, 0, 1, 1], [], []>} : vector<8x128xbf16>, vector<128x256xbf16>, vector<8x256xf32> -> vector<8x256xf32>
    %7 = arith.addf %3, %6 : vector<8x256xf32>
    %c0_6 = arith.constant 0 : index
    %c0_7 = arith.constant 0 : index
    %8 = vector.load %arg8[%c0_6, %c0_7] : memref<8x256xf32, #tpu.memory_space<vmem>>, vector<8x256xf32>
    tpu.vector_store %arg8[%c0_6, %c0_7], %7 {strides = array<i32>} : memref<8x256xf32, #tpu.memory_space<vmem>>, vector<8x256xf32>,
    %c8_i32 = arith.constant 8 : i32
    %9 = arith.cmpi eq, %arg2, %c8_i32 : i32
    %10 = arith.extui %9 : i1 to i32
    %c0_i32_8 = arith.constant 0 : i32
    %11 = arith.cmpi ne, %10, %c0_i32_8 : i32
    scf.if %11 {
      %c0_9 = arith.constant 0 : index
      %c0_10 = arith.constant 0 : index
      %12 = vector.load %arg8[%c0_9, %c0_10] : memref<8x256xf32, #tpu.memory_space<vmem>>, vector<8x256xf32>
      %c0_11 = arith.constant 0 : index
      %c0_12 = arith.constant 0 : index
      %13 = vector.load %arg5[%c0_11, %c0_12] : memref<1x256xf32, #tpu.memory_space<vmem>>, vector<1x256xf32>
      %14 = vector.broadcast %13 : vector<1x256xf32> to vector<8x256xf32>
      %15 = arith.mulf %12, %14 : vector<8x256xf32>
      %c0_13 = arith.constant 0 : index
      %c0_14 = arith.constant 0 : index
      %16 = vector.load %arg6[%c0_13, %c0_14] : memref<1x256xf32, #tpu.memory_space<vmem>>, vector<1x256xf32>
      %17 = vector.broadcast %16 : vector<1x256xf32> to vector<8x256xf32>
      %18 = arith.addf %15, %17 : vector<8x256xf32>
      %cst_15 = arith.constant 0.000000e+00 : f32
      %19 = vector.broadcast %cst_15 : f32 to vector<8x256xf32>
      %20 = arith.maximumf %18, %19 : vector<8x256xf32>
      %21 = arith.truncf %20 : vector<8x256xf32> to vector<8x256xbf16>
      %c0_16 = arith.constant 0 : index
      %c0_17 = arith.constant 0 : index
      %22 = vector.load %arg7[%c0_16, %c0_17] : memref<8x256xbf16, #tpu.memory_space<vmem>>, vector<8x256xbf16>
      tpu.vector_store %arg7[%c0_16, %c0_17], %21 {strides = array<i32>} : memref<8x256xbf16, #tpu.memory_space<vmem>>, vector<8x256xbf16>,
    } else {
    }
    return
  }
  func.func @transform_0(%arg0: i32, %arg1: i32, %arg2: i32) -> (i32, i32) {
    %c0_i32 = arith.constant 0 : i32
    return %arg0, %arg2 : i32, i32
  }
  func.func @transform_1(%arg0: i32, %arg1: i32, %arg2: i32) -> (i32, i32) {
    %c0_i32 = arith.constant 0 : i32
    return %arg2, %arg1 : i32, i32
  }
  func.func @transform_2(%arg0: i32, %arg1: i32, %arg2: i32) -> (i32, i32) {
    %c0_i32 = arith.constant 0 : i32
    %c0_i32_0 = arith.constant 0 : i32
    return %c0_i32, %arg1 : i32, i32
  }
  func.func @transform_3(%arg0: i32, %arg1: i32, %arg2: i32) -> (i32, i32) {
    %c0_i32 = arith.constant 0 : i32
    %c0_i32_0 = arith.constant 0 : i32
    return %c0_i32, %arg1 : i32, i32
  }
  func.func @transform_4(%arg0: i32, %arg1: i32, %arg2: i32) -> (i32, i32) {
    %c0_i32 = arith.constant 0 : i32
    return %arg0, %arg1 : i32, i32
  }
}

module attributes {stable_mosaic.version = 11 : i64} {
  func.func @_mm_bn_kernel(%arg0: i32, %arg1: i32, %arg2: i32, %arg3: memref<8x128xbf16, #tpu.memory_space<vmem>>, %arg4: memref<128x256xbf16, #tpu.memory_space<vmem>>, %arg5: memref<1x256xf32, #tpu.memory_space<vmem>>, %arg6: memref<1x256xf32, #tpu.memory_space<vmem>>, %arg7: memref<8x256xbf16, #tpu.memory_space<vmem>>, %arg8: memref<8x256xf32, #tpu.memory_space<vmem>>) attributes {dimension_semantics = [#tpu.dimension_semantics<parallel>, #tpu.dimension_semantics<parallel>, #tpu.dimension_semantics<arbitrary>], iteration_bounds = array<i64: 1, 1, 1>, scalar_prefetch = 0 : i64, scratch_operands = 1 : i64, tpu.core_type = #tpu.core_type<tc>, window_params = [{transform_indices = @transform_0, window_bounds = array<i64: 8, 128>}, {transform_indices = @transform_1, window_bounds = array<i64: 128, 256>}, {transform_indices = @transform_2, window_bounds = array<i64: 1, 256>}, {transform_indices = @transform_3, window_bounds = array<i64: 1, 256>}, {transform_indices = @transform_4, window_bounds = array<i64: 8, 256>}]} {
    %c0_i32 = arith.constant 0 : i32
    %0 = arith.cmpi eq, %arg2, %c0_i32 : i32
    %1 = arith.extui %0 : i1 to i32
    %c0_i32_0 = arith.constant 0 : i32
    %2 = arith.cmpi ne, %1, %c0_i32_0 : i32
    scf.if %2 {
      %cst_10 = arith.constant 0.000000e+00 : f32
      %12 = vector.broadcast %cst_10 : f32 to vector<8x256xf32>
      %c0_11 = arith.constant 0 : index
      %c0_12 = arith.constant 0 : index
      %13 = vector.load %arg8[%c0_11, %c0_12] : memref<8x256xf32, #tpu.memory_space<vmem>>, vector<8x256xf32>
      tpu.vector_store %arg8[%c0_11, %c0_12], %12 {strides = array<i32>} : memref<8x256xf32, #tpu.memory_space<vmem>>, vector<8x256xf32>,
    } else {
    }
    %c0 = arith.constant 0 : index
    %c0_1 = arith.constant 0 : index
    %3 = vector.load %arg8[%c0, %c0_1] : memref<8x256xf32, #tpu.memory_space<vmem>>, vector<8x256xf32>
    %c0_2 = arith.constant 0 : index
    %c0_3 = arith.constant 0 : index
    %4 = vector.load %arg3[%c0_2, %c0_3] : memref<8x128xbf16, #tpu.memory_space<vmem>>, vector<8x128xbf16>
    %c0_4 = arith.constant 0 : index
    %c0_5 = arith.constant 0 : index
    %5 = vector.load %arg4[%c0_4, %c0_5] : memref<128x256xbf16, #tpu.memory_space<vmem>>, vector<128x256xbf16>
    %cst = arith.constant dense<0.000000e+00> : vector<8x256xf32>
    %6 = tpu.matmul %4, %5, %cst {dimension_numbers = #tpu.dot_dimension_numbers<[1], [0], [0], [1], [0, 0, 1, 1], [], []>} : vector<8x128xbf16>, vector<128x256xbf16>, vector<8x256xf32> -> vector<8x256xf32>
    %7 = arith.addf %3, %6 : vector<8x256xf32>
    %c0_6 = arith.constant 0 : index
    %c0_7 = arith.constant 0 : index
    %8 = vector.load %arg8[%c0_6, %c0_7] : memref<8x256xf32, #tpu.memory_space<vmem>>, vector<8x256xf32>
    tpu.vector_store %arg8[%c0_6, %c0_7], %7 {strides = array<i32>} : memref<8x256xf32, #tpu.memory_space<vmem>>, vector<8x256xf32>,
    %c0_i32_8 = arith.constant 0 : i32
    %9 = arith.cmpi eq, %arg2, %c0_i32_8 : i32
    %10 = arith.extui %9 : i1 to i32
    %c0_i32_9 = arith.constant 0 : i32
    %11 = arith.cmpi ne, %10, %c0_i32_9 : i32
    scf.if %11 {
      %c0_10 = arith.constant 0 : index
      %c0_11 = arith.constant 0 : index
      %12 = vector.load %arg8[%c0_10, %c0_11] : memref<8x256xf32, #tpu.memory_space<vmem>>, vector<8x256xf32>
      %c0_12 = arith.constant 0 : index
      %c0_13 = arith.constant 0 : index
      %13 = vector.load %arg5[%c0_12, %c0_13] : memref<1x256xf32, #tpu.memory_space<vmem>>, vector<1x256xf32>
      %14 = vector.broadcast %13 : vector<1x256xf32> to vector<8x256xf32>
      %15 = arith.mulf %12, %14 : vector<8x256xf32>
      %c0_14 = arith.constant 0 : index
      %c0_15 = arith.constant 0 : index
      %16 = vector.load %arg6[%c0_14, %c0_15] : memref<1x256xf32, #tpu.memory_space<vmem>>, vector<1x256xf32>
      %17 = vector.broadcast %16 : vector<1x256xf32> to vector<8x256xf32>
      %18 = arith.addf %15, %17 : vector<8x256xf32>
      %19 = arith.truncf %18 : vector<8x256xf32> to vector<8x256xbf16>
      %c0_16 = arith.constant 0 : index
      %c0_17 = arith.constant 0 : index
      %20 = vector.load %arg7[%c0_16, %c0_17] : memref<8x256xbf16, #tpu.memory_space<vmem>>, vector<8x256xbf16>
      tpu.vector_store %arg7[%c0_16, %c0_17], %19 {strides = array<i32>} : memref<8x256xbf16, #tpu.memory_space<vmem>>, vector<8x256xbf16>,
    } else {
    }
    return
  }
  func.func @transform_0(%arg0: i32, %arg1: i32, %arg2: i32) -> (i32, i32) {
    %c0_i32 = arith.constant 0 : i32
    return %arg0, %arg2 : i32, i32
  }
  func.func @transform_1(%arg0: i32, %arg1: i32, %arg2: i32) -> (i32, i32) {
    %c0_i32 = arith.constant 0 : i32
    return %arg2, %arg1 : i32, i32
  }
  func.func @transform_2(%arg0: i32, %arg1: i32, %arg2: i32) -> (i32, i32) {
    %c0_i32 = arith.constant 0 : i32
    %c0_i32_0 = arith.constant 0 : i32
    return %c0_i32, %arg1 : i32, i32
  }
  func.func @transform_3(%arg0: i32, %arg1: i32, %arg2: i32) -> (i32, i32) {
    %c0_i32 = arith.constant 0 : i32
    %c0_i32_0 = arith.constant 0 : i32
    return %c0_i32, %arg1 : i32, i32
  }
  func.func @transform_4(%arg0: i32, %arg1: i32, %arg2: i32) -> (i32, i32) {
    %c0_i32 = arith.constant 0 : i32
    return %arg0, %arg1 : i32, i32
  }
}

module attributes {stable_mosaic.version = 11 : i64} {
  func.func @_mm_bn_res_kernel(%arg0: i32, %arg1: i32, %arg2: i32, %arg3: memref<8x256xbf16, #tpu.memory_space<vmem>>, %arg4: memref<256x256xbf16, #tpu.memory_space<vmem>>, %arg5: memref<1x256xf32, #tpu.memory_space<vmem>>, %arg6: memref<1x256xf32, #tpu.memory_space<vmem>>, %arg7: memref<8x256xbf16, #tpu.memory_space<vmem>>, %arg8: memref<8x256xbf16, #tpu.memory_space<vmem>>, %arg9: memref<8x256xf32, #tpu.memory_space<vmem>>) attributes {dimension_semantics = [#tpu.dimension_semantics<parallel>, #tpu.dimension_semantics<parallel>, #tpu.dimension_semantics<arbitrary>], iteration_bounds = array<i64: 1, 1, 9>, scalar_prefetch = 0 : i64, scratch_operands = 1 : i64, tpu.core_type = #tpu.core_type<tc>, window_params = [{transform_indices = @transform_0, window_bounds = array<i64: 8, 256>}, {transform_indices = @transform_1, window_bounds = array<i64: 256, 256>}, {transform_indices = @transform_2, window_bounds = array<i64: 1, 256>}, {transform_indices = @transform_3, window_bounds = array<i64: 1, 256>}, {transform_indices = @transform_4, window_bounds = array<i64: 8, 256>}, {transform_indices = @transform_5, window_bounds = array<i64: 8, 256>}]} {
    %c0_i32 = arith.constant 0 : i32
    %0 = arith.cmpi eq, %arg2, %c0_i32 : i32
    %1 = arith.extui %0 : i1 to i32
    %c0_i32_0 = arith.constant 0 : i32
    %2 = arith.cmpi ne, %1, %c0_i32_0 : i32
    scf.if %2 {
      %cst_9 = arith.constant 0.000000e+00 : f32
      %12 = vector.broadcast %cst_9 : f32 to vector<8x256xf32>
      %c0_10 = arith.constant 0 : index
      %c0_11 = arith.constant 0 : index
      %13 = vector.load %arg9[%c0_10, %c0_11] : memref<8x256xf32, #tpu.memory_space<vmem>>, vector<8x256xf32>
      tpu.vector_store %arg9[%c0_10, %c0_11], %12 {strides = array<i32>} : memref<8x256xf32, #tpu.memory_space<vmem>>, vector<8x256xf32>,
    } else {
    }
    %c0 = arith.constant 0 : index
    %c0_1 = arith.constant 0 : index
    %3 = vector.load %arg9[%c0, %c0_1] : memref<8x256xf32, #tpu.memory_space<vmem>>, vector<8x256xf32>
    %c0_2 = arith.constant 0 : index
    %c0_3 = arith.constant 0 : index
    %4 = vector.load %arg3[%c0_2, %c0_3] : memref<8x256xbf16, #tpu.memory_space<vmem>>, vector<8x256xbf16>
    %c0_4 = arith.constant 0 : index
    %c0_5 = arith.constant 0 : index
    %5 = vector.load %arg4[%c0_4, %c0_5] : memref<256x256xbf16, #tpu.memory_space<vmem>>, vector<256x256xbf16>
    %cst = arith.constant dense<0.000000e+00> : vector<8x256xf32>
    %6 = tpu.matmul %4, %5, %cst {dimension_numbers = #tpu.dot_dimension_numbers<[1], [0], [0], [1], [0, 0, 1, 1], [], []>} : vector<8x256xbf16>, vector<256x256xbf16>, vector<8x256xf32> -> vector<8x256xf32>
    %7 = arith.addf %3, %6 : vector<8x256xf32>
    %c0_6 = arith.constant 0 : index
    %c0_7 = arith.constant 0 : index
    %8 = vector.load %arg9[%c0_6, %c0_7] : memref<8x256xf32, #tpu.memory_space<vmem>>, vector<8x256xf32>
    tpu.vector_store %arg9[%c0_6, %c0_7], %7 {strides = array<i32>} : memref<8x256xf32, #tpu.memory_space<vmem>>, vector<8x256xf32>,
    %c8_i32 = arith.constant 8 : i32
    %9 = arith.cmpi eq, %arg2, %c8_i32 : i32
    %10 = arith.extui %9 : i1 to i32
    %c0_i32_8 = arith.constant 0 : i32
    %11 = arith.cmpi ne, %10, %c0_i32_8 : i32
    scf.if %11 {
      %c0_9 = arith.constant 0 : index
      %c0_10 = arith.constant 0 : index
      %12 = vector.load %arg9[%c0_9, %c0_10] : memref<8x256xf32, #tpu.memory_space<vmem>>, vector<8x256xf32>
      %c0_11 = arith.constant 0 : index
      %c0_12 = arith.constant 0 : index
      %13 = vector.load %arg5[%c0_11, %c0_12] : memref<1x256xf32, #tpu.memory_space<vmem>>, vector<1x256xf32>
      %14 = vector.broadcast %13 : vector<1x256xf32> to vector<8x256xf32>
      %15 = arith.mulf %12, %14 : vector<8x256xf32>
      %c0_13 = arith.constant 0 : index
      %c0_14 = arith.constant 0 : index
      %16 = vector.load %arg6[%c0_13, %c0_14] : memref<1x256xf32, #tpu.memory_space<vmem>>, vector<1x256xf32>
      %17 = vector.broadcast %16 : vector<1x256xf32> to vector<8x256xf32>
      %18 = arith.addf %15, %17 : vector<8x256xf32>
      %c0_15 = arith.constant 0 : index
      %c0_16 = arith.constant 0 : index
      %19 = vector.load %arg7[%c0_15, %c0_16] : memref<8x256xbf16, #tpu.memory_space<vmem>>, vector<8x256xbf16>
      %20 = arith.extf %19 : vector<8x256xbf16> to vector<8x256xf32>
      %21 = arith.addf %18, %20 : vector<8x256xf32>
      %cst_17 = arith.constant 0.000000e+00 : f32
      %22 = vector.broadcast %cst_17 : f32 to vector<8x256xf32>
      %23 = arith.maximumf %21, %22 : vector<8x256xf32>
      %24 = arith.truncf %23 : vector<8x256xf32> to vector<8x256xbf16>
      %c0_18 = arith.constant 0 : index
      %c0_19 = arith.constant 0 : index
      %25 = vector.load %arg8[%c0_18, %c0_19] : memref<8x256xbf16, #tpu.memory_space<vmem>>, vector<8x256xbf16>
      tpu.vector_store %arg8[%c0_18, %c0_19], %24 {strides = array<i32>} : memref<8x256xbf16, #tpu.memory_space<vmem>>, vector<8x256xbf16>,
    } else {
    }
    return
  }
  func.func @transform_0(%arg0: i32, %arg1: i32, %arg2: i32) -> (i32, i32) {
    %c0_i32 = arith.constant 0 : i32
    return %arg0, %arg2 : i32, i32
  }
  func.func @transform_1(%arg0: i32, %arg1: i32, %arg2: i32) -> (i32, i32) {
    %c0_i32 = arith.constant 0 : i32
    return %arg2, %arg1 : i32, i32
  }
  func.func @transform_2(%arg0: i32, %arg1: i32, %arg2: i32) -> (i32, i32) {
    %c0_i32 = arith.constant 0 : i32
    %c0_i32_0 = arith.constant 0 : i32
    return %c0_i32, %arg1 : i32, i32
  }
  func.func @transform_3(%arg0: i32, %arg1: i32, %arg2: i32) -> (i32, i32) {
    %c0_i32 = arith.constant 0 : i32
    %c0_i32_0 = arith.constant 0 : i32
    return %c0_i32, %arg1 : i32, i32
  }
  func.func @transform_4(%arg0: i32, %arg1: i32, %arg2: i32) -> (i32, i32) {
    %c0_i32 = arith.constant 0 : i32
    return %arg0, %arg1 : i32, i32
  }
  func.func @transform_5(%arg0: i32, %arg1: i32, %arg2: i32) -> (i32, i32) {
    %c0_i32 = arith.constant 0 : i32
    return %arg0, %arg1 : i32, i32
  }
}

module attributes {stable_mosaic.version = 11 : i64} {
  func.func @_mm_bn_kernel(%arg0: i32, %arg1: i32, %arg2: i32, %arg3: memref<8x256xbf16, #tpu.memory_space<vmem>>, %arg4: memref<256x256xbf16, #tpu.memory_space<vmem>>, %arg5: memref<1x256xf32, #tpu.memory_space<vmem>>, %arg6: memref<1x256xf32, #tpu.memory_space<vmem>>, %arg7: memref<8x256xbf16, #tpu.memory_space<vmem>>, %arg8: memref<8x256xf32, #tpu.memory_space<vmem>>) attributes {dimension_semantics = [#tpu.dimension_semantics<parallel>, #tpu.dimension_semantics<parallel>, #tpu.dimension_semantics<arbitrary>], iteration_bounds = array<i64: 1, 1, 9>, scalar_prefetch = 0 : i64, scratch_operands = 1 : i64, tpu.core_type = #tpu.core_type<tc>, window_params = [{transform_indices = @transform_0, window_bounds = array<i64: 8, 256>}, {transform_indices = @transform_1, window_bounds = array<i64: 256, 256>}, {transform_indices = @transform_2, window_bounds = array<i64: 1, 256>}, {transform_indices = @transform_3, window_bounds = array<i64: 1, 256>}, {transform_indices = @transform_4, window_bounds = array<i64: 8, 256>}]} {
    %c0_i32 = arith.constant 0 : i32
    %0 = arith.cmpi eq, %arg2, %c0_i32 : i32
    %1 = arith.extui %0 : i1 to i32
    %c0_i32_0 = arith.constant 0 : i32
    %2 = arith.cmpi ne, %1, %c0_i32_0 : i32
    scf.if %2 {
      %cst_9 = arith.constant 0.000000e+00 : f32
      %12 = vector.broadcast %cst_9 : f32 to vector<8x256xf32>
      %c0_10 = arith.constant 0 : index
      %c0_11 = arith.constant 0 : index
      %13 = vector.load %arg8[%c0_10, %c0_11] : memref<8x256xf32, #tpu.memory_space<vmem>>, vector<8x256xf32>
      tpu.vector_store %arg8[%c0_10, %c0_11], %12 {strides = array<i32>} : memref<8x256xf32, #tpu.memory_space<vmem>>, vector<8x256xf32>,
    } else {
    }
    %c0 = arith.constant 0 : index
    %c0_1 = arith.constant 0 : index
    %3 = vector.load %arg8[%c0, %c0_1] : memref<8x256xf32, #tpu.memory_space<vmem>>, vector<8x256xf32>
    %c0_2 = arith.constant 0 : index
    %c0_3 = arith.constant 0 : index
    %4 = vector.load %arg3[%c0_2, %c0_3] : memref<8x256xbf16, #tpu.memory_space<vmem>>, vector<8x256xbf16>
    %c0_4 = arith.constant 0 : index
    %c0_5 = arith.constant 0 : index
    %5 = vector.load %arg4[%c0_4, %c0_5] : memref<256x256xbf16, #tpu.memory_space<vmem>>, vector<256x256xbf16>
    %cst = arith.constant dense<0.000000e+00> : vector<8x256xf32>
    %6 = tpu.matmul %4, %5, %cst {dimension_numbers = #tpu.dot_dimension_numbers<[1], [0], [0], [1], [0, 0, 1, 1], [], []>} : vector<8x256xbf16>, vector<256x256xbf16>, vector<8x256xf32> -> vector<8x256xf32>
    %7 = arith.addf %3, %6 : vector<8x256xf32>
    %c0_6 = arith.constant 0 : index
    %c0_7 = arith.constant 0 : index
    %8 = vector.load %arg8[%c0_6, %c0_7] : memref<8x256xf32, #tpu.memory_space<vmem>>, vector<8x256xf32>
    tpu.vector_store %arg8[%c0_6, %c0_7], %7 {strides = array<i32>} : memref<8x256xf32, #tpu.memory_space<vmem>>, vector<8x256xf32>,
    %c8_i32 = arith.constant 8 : i32
    %9 = arith.cmpi eq, %arg2, %c8_i32 : i32
    %10 = arith.extui %9 : i1 to i32
    %c0_i32_8 = arith.constant 0 : i32
    %11 = arith.cmpi ne, %10, %c0_i32_8 : i32
    scf.if %11 {
      %c0_9 = arith.constant 0 : index
      %c0_10 = arith.constant 0 : index
      %12 = vector.load %arg8[%c0_9, %c0_10] : memref<8x256xf32, #tpu.memory_space<vmem>>, vector<8x256xf32>
      %c0_11 = arith.constant 0 : index
      %c0_12 = arith.constant 0 : index
      %13 = vector.load %arg5[%c0_11, %c0_12] : memref<1x256xf32, #tpu.memory_space<vmem>>, vector<1x256xf32>
      %14 = vector.broadcast %13 : vector<1x256xf32> to vector<8x256xf32>
      %15 = arith.mulf %12, %14 : vector<8x256xf32>
      %c0_13 = arith.constant 0 : index
      %c0_14 = arith.constant 0 : index
      %16 = vector.load %arg6[%c0_13, %c0_14] : memref<1x256xf32, #tpu.memory_space<vmem>>, vector<1x256xf32>
      %17 = vector.broadcast %16 : vector<1x256xf32> to vector<8x256xf32>
      %18 = arith.addf %15, %17 : vector<8x256xf32>
      %cst_15 = arith.constant 0.000000e+00 : f32
      %19 = vector.broadcast %cst_15 : f32 to vector<8x256xf32>
      %20 = arith.maximumf %18, %19 : vector<8x256xf32>
      %21 = arith.truncf %20 : vector<8x256xf32> to vector<8x256xbf16>
      %c0_16 = arith.constant 0 : index
      %c0_17 = arith.constant 0 : index
      %22 = vector.load %arg7[%c0_16, %c0_17] : memref<8x256xbf16, #tpu.memory_space<vmem>>, vector<8x256xbf16>
      tpu.vector_store %arg7[%c0_16, %c0_17], %21 {strides = array<i32>} : memref<8x256xbf16, #tpu.memory_space<vmem>>, vector<8x256xbf16>,
    } else {
    }
    return
  }
  func.func @transform_0(%arg0: i32, %arg1: i32, %arg2: i32) -> (i32, i32) {
    %c0_i32 = arith.constant 0 : i32
    return %arg0, %arg2 : i32, i32
  }
  func.func @transform_1(%arg0: i32, %arg1: i32, %arg2: i32) -> (i32, i32) {
    %c0_i32 = arith.constant 0 : i32
    return %arg2, %arg1 : i32, i32
  }
  func.func @transform_2(%arg0: i32, %arg1: i32, %arg2: i32) -> (i32, i32) {
    %c0_i32 = arith.constant 0 : i32
    %c0_i32_0 = arith.constant 0 : i32
    return %c0_i32, %arg1 : i32, i32
  }
  func.func @transform_3(%arg0: i32, %arg1: i32, %arg2: i32) -> (i32, i32) {
    %c0_i32 = arith.constant 0 : i32
    %c0_i32_0 = arith.constant 0 : i32
    return %c0_i32, %arg1 : i32, i32
  }
  func.func @transform_4(%arg0: i32, %arg1: i32, %arg2: i32) -> (i32, i32) {
    %c0_i32 = arith.constant 0 : i32
    return %arg0, %arg1 : i32, i32
  }
}

module attributes {stable_mosaic.version = 11 : i64} {
  func.func @_mm_bn_kernel(%arg0: i32, %arg1: i32, %arg2: i32, %arg3: memref<8x256xbf16, #tpu.memory_space<vmem>>, %arg4: memref<256x256xbf16, #tpu.memory_space<vmem>>, %arg5: memref<1x256xf32, #tpu.memory_space<vmem>>, %arg6: memref<1x256xf32, #tpu.memory_space<vmem>>, %arg7: memref<8x256xbf16, #tpu.memory_space<vmem>>, %arg8: memref<8x256xf32, #tpu.memory_space<vmem>>) attributes {dimension_semantics = [#tpu.dimension_semantics<parallel>, #tpu.dimension_semantics<parallel>, #tpu.dimension_semantics<arbitrary>], iteration_bounds = array<i64: 1, 2, 9>, scalar_prefetch = 0 : i64, scratch_operands = 1 : i64, tpu.core_type = #tpu.core_type<tc>, window_params = [{transform_indices = @transform_0, window_bounds = array<i64: 8, 256>}, {transform_indices = @transform_1, window_bounds = array<i64: 256, 256>}, {transform_indices = @transform_2, window_bounds = array<i64: 1, 256>}, {transform_indices = @transform_3, window_bounds = array<i64: 1, 256>}, {transform_indices = @transform_4, window_bounds = array<i64: 8, 256>}]} {
    %c0_i32 = arith.constant 0 : i32
    %0 = arith.cmpi eq, %arg2, %c0_i32 : i32
    %1 = arith.extui %0 : i1 to i32
    %c0_i32_0 = arith.constant 0 : i32
    %2 = arith.cmpi ne, %1, %c0_i32_0 : i32
    scf.if %2 {
      %cst_9 = arith.constant 0.000000e+00 : f32
      %12 = vector.broadcast %cst_9 : f32 to vector<8x256xf32>
      %c0_10 = arith.constant 0 : index
      %c0_11 = arith.constant 0 : index
      %13 = vector.load %arg8[%c0_10, %c0_11] : memref<8x256xf32, #tpu.memory_space<vmem>>, vector<8x256xf32>
      tpu.vector_store %arg8[%c0_10, %c0_11], %12 {strides = array<i32>} : memref<8x256xf32, #tpu.memory_space<vmem>>, vector<8x256xf32>,
    } else {
    }
    %c0 = arith.constant 0 : index
    %c0_1 = arith.constant 0 : index
    %3 = vector.load %arg8[%c0, %c0_1] : memref<8x256xf32, #tpu.memory_space<vmem>>, vector<8x256xf32>
    %c0_2 = arith.constant 0 : index
    %c0_3 = arith.constant 0 : index
    %4 = vector.load %arg3[%c0_2, %c0_3] : memref<8x256xbf16, #tpu.memory_space<vmem>>, vector<8x256xbf16>
    %c0_4 = arith.constant 0 : index
    %c0_5 = arith.constant 0 : index
    %5 = vector.load %arg4[%c0_4, %c0_5] : memref<256x256xbf16, #tpu.memory_space<vmem>>, vector<256x256xbf16>
    %cst = arith.constant dense<0.000000e+00> : vector<8x256xf32>
    %6 = tpu.matmul %4, %5, %cst {dimension_numbers = #tpu.dot_dimension_numbers<[1], [0], [0], [1], [0, 0, 1, 1], [], []>} : vector<8x256xbf16>, vector<256x256xbf16>, vector<8x256xf32> -> vector<8x256xf32>
    %7 = arith.addf %3, %6 : vector<8x256xf32>
    %c0_6 = arith.constant 0 : index
    %c0_7 = arith.constant 0 : index
    %8 = vector.load %arg8[%c0_6, %c0_7] : memref<8x256xf32, #tpu.memory_space<vmem>>, vector<8x256xf32>
    tpu.vector_store %arg8[%c0_6, %c0_7], %7 {strides = array<i32>} : memref<8x256xf32, #tpu.memory_space<vmem>>, vector<8x256xf32>,
    %c8_i32 = arith.constant 8 : i32
    %9 = arith.cmpi eq, %arg2, %c8_i32 : i32
    %10 = arith.extui %9 : i1 to i32
    %c0_i32_8 = arith.constant 0 : i32
    %11 = arith.cmpi ne, %10, %c0_i32_8 : i32
    scf.if %11 {
      %c0_9 = arith.constant 0 : index
      %c0_10 = arith.constant 0 : index
      %12 = vector.load %arg8[%c0_9, %c0_10] : memref<8x256xf32, #tpu.memory_space<vmem>>, vector<8x256xf32>
      %c0_11 = arith.constant 0 : index
      %c0_12 = arith.constant 0 : index
      %13 = vector.load %arg5[%c0_11, %c0_12] : memref<1x256xf32, #tpu.memory_space<vmem>>, vector<1x256xf32>
      %14 = vector.broadcast %13 : vector<1x256xf32> to vector<8x256xf32>
      %15 = arith.mulf %12, %14 : vector<8x256xf32>
      %c0_13 = arith.constant 0 : index
      %c0_14 = arith.constant 0 : index
      %16 = vector.load %arg6[%c0_13, %c0_14] : memref<1x256xf32, #tpu.memory_space<vmem>>, vector<1x256xf32>
      %17 = vector.broadcast %16 : vector<1x256xf32> to vector<8x256xf32>
      %18 = arith.addf %15, %17 : vector<8x256xf32>
      %cst_15 = arith.constant 0.000000e+00 : f32
      %19 = vector.broadcast %cst_15 : f32 to vector<8x256xf32>
      %20 = arith.maximumf %18, %19 : vector<8x256xf32>
      %21 = arith.truncf %20 : vector<8x256xf32> to vector<8x256xbf16>
      %c0_16 = arith.constant 0 : index
      %c0_17 = arith.constant 0 : index
      %22 = vector.load %arg7[%c0_16, %c0_17] : memref<8x256xbf16, #tpu.memory_space<vmem>>, vector<8x256xbf16>
      tpu.vector_store %arg7[%c0_16, %c0_17], %21 {strides = array<i32>} : memref<8x256xbf16, #tpu.memory_space<vmem>>, vector<8x256xbf16>,
    } else {
    }
    return
  }
  func.func @transform_0(%arg0: i32, %arg1: i32, %arg2: i32) -> (i32, i32) {
    %c0_i32 = arith.constant 0 : i32
    return %arg0, %arg2 : i32, i32
  }
  func.func @transform_1(%arg0: i32, %arg1: i32, %arg2: i32) -> (i32, i32) {
    %c0_i32 = arith.constant 0 : i32
    return %arg2, %arg1 : i32, i32
  }
  func.func @transform_2(%arg0: i32, %arg1: i32, %arg2: i32) -> (i32, i32) {
    %c0_i32 = arith.constant 0 : i32
    %c0_i32_0 = arith.constant 0 : i32
    return %c0_i32, %arg1 : i32, i32
  }
  func.func @transform_3(%arg0: i32, %arg1: i32, %arg2: i32) -> (i32, i32) {
    %c0_i32 = arith.constant 0 : i32
    %c0_i32_0 = arith.constant 0 : i32
    return %c0_i32, %arg1 : i32, i32
  }
  func.func @transform_4(%arg0: i32, %arg1: i32, %arg2: i32) -> (i32, i32) {
    %c0_i32 = arith.constant 0 : i32
    return %arg0, %arg1 : i32, i32
  }
}

module attributes {stable_mosaic.version = 11 : i64} {
  func.func @_mm_bn_kernel(%arg0: i32, %arg1: i32, %arg2: i32, %arg3: memref<8x256xbf16, #tpu.memory_space<vmem>>, %arg4: memref<256x256xbf16, #tpu.memory_space<vmem>>, %arg5: memref<1x256xf32, #tpu.memory_space<vmem>>, %arg6: memref<1x256xf32, #tpu.memory_space<vmem>>, %arg7: memref<8x256xbf16, #tpu.memory_space<vmem>>, %arg8: memref<8x256xf32, #tpu.memory_space<vmem>>) attributes {dimension_semantics = [#tpu.dimension_semantics<parallel>, #tpu.dimension_semantics<parallel>, #tpu.dimension_semantics<arbitrary>], iteration_bounds = array<i64: 1, 2, 1>, scalar_prefetch = 0 : i64, scratch_operands = 1 : i64, tpu.core_type = #tpu.core_type<tc>, window_params = [{transform_indices = @transform_0, window_bounds = array<i64: 8, 256>}, {transform_indices = @transform_1, window_bounds = array<i64: 256, 256>}, {transform_indices = @transform_2, window_bounds = array<i64: 1, 256>}, {transform_indices = @transform_3, window_bounds = array<i64: 1, 256>}, {transform_indices = @transform_4, window_bounds = array<i64: 8, 256>}]} {
    %c0_i32 = arith.constant 0 : i32
    %0 = arith.cmpi eq, %arg2, %c0_i32 : i32
    %1 = arith.extui %0 : i1 to i32
    %c0_i32_0 = arith.constant 0 : i32
    %2 = arith.cmpi ne, %1, %c0_i32_0 : i32
    scf.if %2 {
      %cst_10 = arith.constant 0.000000e+00 : f32
      %12 = vector.broadcast %cst_10 : f32 to vector<8x256xf32>
      %c0_11 = arith.constant 0 : index
      %c0_12 = arith.constant 0 : index
      %13 = vector.load %arg8[%c0_11, %c0_12] : memref<8x256xf32, #tpu.memory_space<vmem>>, vector<8x256xf32>
      tpu.vector_store %arg8[%c0_11, %c0_12], %12 {strides = array<i32>} : memref<8x256xf32, #tpu.memory_space<vmem>>, vector<8x256xf32>,
    } else {
    }
    %c0 = arith.constant 0 : index
    %c0_1 = arith.constant 0 : index
    %3 = vector.load %arg8[%c0, %c0_1] : memref<8x256xf32, #tpu.memory_space<vmem>>, vector<8x256xf32>
    %c0_2 = arith.constant 0 : index
    %c0_3 = arith.constant 0 : index
    %4 = vector.load %arg3[%c0_2, %c0_3] : memref<8x256xbf16, #tpu.memory_space<vmem>>, vector<8x256xbf16>
    %c0_4 = arith.constant 0 : index
    %c0_5 = arith.constant 0 : index
    %5 = vector.load %arg4[%c0_4, %c0_5] : memref<256x256xbf16, #tpu.memory_space<vmem>>, vector<256x256xbf16>
    %cst = arith.constant dense<0.000000e+00> : vector<8x256xf32>
    %6 = tpu.matmul %4, %5, %cst {dimension_numbers = #tpu.dot_dimension_numbers<[1], [0], [0], [1], [0, 0, 1, 1], [], []>} : vector<8x256xbf16>, vector<256x256xbf16>, vector<8x256xf32> -> vector<8x256xf32>
    %7 = arith.addf %3, %6 : vector<8x256xf32>
    %c0_6 = arith.constant 0 : index
    %c0_7 = arith.constant 0 : index
    %8 = vector.load %arg8[%c0_6, %c0_7] : memref<8x256xf32, #tpu.memory_space<vmem>>, vector<8x256xf32>
    tpu.vector_store %arg8[%c0_6, %c0_7], %7 {strides = array<i32>} : memref<8x256xf32, #tpu.memory_space<vmem>>, vector<8x256xf32>,
    %c0_i32_8 = arith.constant 0 : i32
    %9 = arith.cmpi eq, %arg2, %c0_i32_8 : i32
    %10 = arith.extui %9 : i1 to i32
    %c0_i32_9 = arith.constant 0 : i32
    %11 = arith.cmpi ne, %10, %c0_i32_9 : i32
    scf.if %11 {
      %c0_10 = arith.constant 0 : index
      %c0_11 = arith.constant 0 : index
      %12 = vector.load %arg8[%c0_10, %c0_11] : memref<8x256xf32, #tpu.memory_space<vmem>>, vector<8x256xf32>
      %c0_12 = arith.constant 0 : index
      %c0_13 = arith.constant 0 : index
      %13 = vector.load %arg5[%c0_12, %c0_13] : memref<1x256xf32, #tpu.memory_space<vmem>>, vector<1x256xf32>
      %14 = vector.broadcast %13 : vector<1x256xf32> to vector<8x256xf32>
      %15 = arith.mulf %12, %14 : vector<8x256xf32>
      %c0_14 = arith.constant 0 : index
      %c0_15 = arith.constant 0 : index
      %16 = vector.load %arg6[%c0_14, %c0_15] : memref<1x256xf32, #tpu.memory_space<vmem>>, vector<1x256xf32>
      %17 = vector.broadcast %16 : vector<1x256xf32> to vector<8x256xf32>
      %18 = arith.addf %15, %17 : vector<8x256xf32>
      %19 = arith.truncf %18 : vector<8x256xf32> to vector<8x256xbf16>
      %c0_16 = arith.constant 0 : index
      %c0_17 = arith.constant 0 : index
      %20 = vector.load %arg7[%c0_16, %c0_17] : memref<8x256xbf16, #tpu.memory_space<vmem>>, vector<8x256xbf16>
      tpu.vector_store %arg7[%c0_16, %c0_17], %19 {strides = array<i32>} : memref<8x256xbf16, #tpu.memory_space<vmem>>, vector<8x256xbf16>,
    } else {
    }
    return
  }
  func.func @transform_0(%arg0: i32, %arg1: i32, %arg2: i32) -> (i32, i32) {
    %c0_i32 = arith.constant 0 : i32
    return %arg0, %arg2 : i32, i32
  }
  func.func @transform_1(%arg0: i32, %arg1: i32, %arg2: i32) -> (i32, i32) {
    %c0_i32 = arith.constant 0 : i32
    return %arg2, %arg1 : i32, i32
  }
  func.func @transform_2(%arg0: i32, %arg1: i32, %arg2: i32) -> (i32, i32) {
    %c0_i32 = arith.constant 0 : i32
    %c0_i32_0 = arith.constant 0 : i32
    return %c0_i32, %arg1 : i32, i32
  }
  func.func @transform_3(%arg0: i32, %arg1: i32, %arg2: i32) -> (i32, i32) {
    %c0_i32 = arith.constant 0 : i32
    %c0_i32_0 = arith.constant 0 : i32
    return %c0_i32, %arg1 : i32, i32
  }
  func.func @transform_4(%arg0: i32, %arg1: i32, %arg2: i32) -> (i32, i32) {
    %c0_i32 = arith.constant 0 : i32
    return %arg0, %arg1 : i32, i32
  }
}

module attributes {stable_mosaic.version = 11 : i64} {
  func.func @_mm_bn_res_kernel(%arg0: i32, %arg1: i32, %arg2: i32, %arg3: memref<8x512xbf16, #tpu.memory_space<vmem>>, %arg4: memref<512x256xbf16, #tpu.memory_space<vmem>>, %arg5: memref<1x256xf32, #tpu.memory_space<vmem>>, %arg6: memref<1x256xf32, #tpu.memory_space<vmem>>, %arg7: memref<8x256xbf16, #tpu.memory_space<vmem>>, %arg8: memref<8x256xbf16, #tpu.memory_space<vmem>>, %arg9: memref<8x256xf32, #tpu.memory_space<vmem>>) attributes {dimension_semantics = [#tpu.dimension_semantics<parallel>, #tpu.dimension_semantics<parallel>, #tpu.dimension_semantics<arbitrary>], iteration_bounds = array<i64: 1, 2, 9>, scalar_prefetch = 0 : i64, scratch_operands = 1 : i64, tpu.core_type = #tpu.core_type<tc>, window_params = [{transform_indices = @transform_0, window_bounds = array<i64: 8, 512>}, {transform_indices = @transform_1, window_bounds = array<i64: 512, 256>}, {transform_indices = @transform_2, window_bounds = array<i64: 1, 256>}, {transform_indices = @transform_3, window_bounds = array<i64: 1, 256>}, {transform_indices = @transform_4, window_bounds = array<i64: 8, 256>}, {transform_indices = @transform_5, window_bounds = array<i64: 8, 256>}]} {
    %c0_i32 = arith.constant 0 : i32
    %0 = arith.cmpi eq, %arg2, %c0_i32 : i32
    %1 = arith.extui %0 : i1 to i32
    %c0_i32_0 = arith.constant 0 : i32
    %2 = arith.cmpi ne, %1, %c0_i32_0 : i32
    scf.if %2 {
      %cst_9 = arith.constant 0.000000e+00 : f32
      %12 = vector.broadcast %cst_9 : f32 to vector<8x256xf32>
      %c0_10 = arith.constant 0 : index
      %c0_11 = arith.constant 0 : index
      %13 = vector.load %arg9[%c0_10, %c0_11] : memref<8x256xf32, #tpu.memory_space<vmem>>, vector<8x256xf32>
      tpu.vector_store %arg9[%c0_10, %c0_11], %12 {strides = array<i32>} : memref<8x256xf32, #tpu.memory_space<vmem>>, vector<8x256xf32>,
    } else {
    }
    %c0 = arith.constant 0 : index
    %c0_1 = arith.constant 0 : index
    %3 = vector.load %arg9[%c0, %c0_1] : memref<8x256xf32, #tpu.memory_space<vmem>>, vector<8x256xf32>
    %c0_2 = arith.constant 0 : index
    %c0_3 = arith.constant 0 : index
    %4 = vector.load %arg3[%c0_2, %c0_3] : memref<8x512xbf16, #tpu.memory_space<vmem>>, vector<8x512xbf16>
    %c0_4 = arith.constant 0 : index
    %c0_5 = arith.constant 0 : index
    %5 = vector.load %arg4[%c0_4, %c0_5] : memref<512x256xbf16, #tpu.memory_space<vmem>>, vector<512x256xbf16>
    %cst = arith.constant dense<0.000000e+00> : vector<8x256xf32>
    %6 = tpu.matmul %4, %5, %cst {dimension_numbers = #tpu.dot_dimension_numbers<[1], [0], [0], [1], [0, 0, 1, 1], [], []>} : vector<8x512xbf16>, vector<512x256xbf16>, vector<8x256xf32> -> vector<8x256xf32>
    %7 = arith.addf %3, %6 : vector<8x256xf32>
    %c0_6 = arith.constant 0 : index
    %c0_7 = arith.constant 0 : index
    %8 = vector.load %arg9[%c0_6, %c0_7] : memref<8x256xf32, #tpu.memory_space<vmem>>, vector<8x256xf32>
    tpu.vector_store %arg9[%c0_6, %c0_7], %7 {strides = array<i32>} : memref<8x256xf32, #tpu.memory_space<vmem>>, vector<8x256xf32>,
    %c8_i32 = arith.constant 8 : i32
    %9 = arith.cmpi eq, %arg2, %c8_i32 : i32
    %10 = arith.extui %9 : i1 to i32
    %c0_i32_8 = arith.constant 0 : i32
    %11 = arith.cmpi ne, %10, %c0_i32_8 : i32
    scf.if %11 {
      %c0_9 = arith.constant 0 : index
      %c0_10 = arith.constant 0 : index
      %12 = vector.load %arg9[%c0_9, %c0_10] : memref<8x256xf32, #tpu.memory_space<vmem>>, vector<8x256xf32>
      %c0_11 = arith.constant 0 : index
      %c0_12 = arith.constant 0 : index
      %13 = vector.load %arg5[%c0_11, %c0_12] : memref<1x256xf32, #tpu.memory_space<vmem>>, vector<1x256xf32>
      %14 = vector.broadcast %13 : vector<1x256xf32> to vector<8x256xf32>
      %15 = arith.mulf %12, %14 : vector<8x256xf32>
      %c0_13 = arith.constant 0 : index
      %c0_14 = arith.constant 0 : index
      %16 = vector.load %arg6[%c0_13, %c0_14] : memref<1x256xf32, #tpu.memory_space<vmem>>, vector<1x256xf32>
      %17 = vector.broadcast %16 : vector<1x256xf32> to vector<8x256xf32>
      %18 = arith.addf %15, %17 : vector<8x256xf32>
      %c0_15 = arith.constant 0 : index
      %c0_16 = arith.constant 0 : index
      %19 = vector.load %arg7[%c0_15, %c0_16] : memref<8x256xbf16, #tpu.memory_space<vmem>>, vector<8x256xbf16>
      %20 = arith.extf %19 : vector<8x256xbf16> to vector<8x256xf32>
      %21 = arith.addf %18, %20 : vector<8x256xf32>
      %cst_17 = arith.constant 0.000000e+00 : f32
      %22 = vector.broadcast %cst_17 : f32 to vector<8x256xf32>
      %23 = arith.maximumf %21, %22 : vector<8x256xf32>
      %24 = arith.truncf %23 : vector<8x256xf32> to vector<8x256xbf16>
      %c0_18 = arith.constant 0 : index
      %c0_19 = arith.constant 0 : index
      %25 = vector.load %arg8[%c0_18, %c0_19] : memref<8x256xbf16, #tpu.memory_space<vmem>>, vector<8x256xbf16>
      tpu.vector_store %arg8[%c0_18, %c0_19], %24 {strides = array<i32>} : memref<8x256xbf16, #tpu.memory_space<vmem>>, vector<8x256xbf16>,
    } else {
    }
    return
  }
  func.func @transform_0(%arg0: i32, %arg1: i32, %arg2: i32) -> (i32, i32) {
    %c0_i32 = arith.constant 0 : i32
    return %arg0, %arg2 : i32, i32
  }
  func.func @transform_1(%arg0: i32, %arg1: i32, %arg2: i32) -> (i32, i32) {
    %c0_i32 = arith.constant 0 : i32
    return %arg2, %arg1 : i32, i32
  }
  func.func @transform_2(%arg0: i32, %arg1: i32, %arg2: i32) -> (i32, i32) {
    %c0_i32 = arith.constant 0 : i32
    %c0_i32_0 = arith.constant 0 : i32
    return %c0_i32, %arg1 : i32, i32
  }
  func.func @transform_3(%arg0: i32, %arg1: i32, %arg2: i32) -> (i32, i32) {
    %c0_i32 = arith.constant 0 : i32
    %c0_i32_0 = arith.constant 0 : i32
    return %c0_i32, %arg1 : i32, i32
  }
  func.func @transform_4(%arg0: i32, %arg1: i32, %arg2: i32) -> (i32, i32) {
    %c0_i32 = arith.constant 0 : i32
    return %arg0, %arg1 : i32, i32
  }
  func.func @transform_5(%arg0: i32, %arg1: i32, %arg2: i32) -> (i32, i32) {
    %c0_i32 = arith.constant 0 : i32
    return %arg0, %arg1 : i32, i32
  }
}

module attributes {stable_mosaic.version = 11 : i64} {
  func.func @_mm_bn_kernel(%arg0: i32, %arg1: i32, %arg2: i32, %arg3: memref<8x512xbf16, #tpu.memory_space<vmem>>, %arg4: memref<512x256xbf16, #tpu.memory_space<vmem>>, %arg5: memref<1x256xf32, #tpu.memory_space<vmem>>, %arg6: memref<1x256xf32, #tpu.memory_space<vmem>>, %arg7: memref<8x256xbf16, #tpu.memory_space<vmem>>, %arg8: memref<8x256xf32, #tpu.memory_space<vmem>>) attributes {dimension_semantics = [#tpu.dimension_semantics<parallel>, #tpu.dimension_semantics<parallel>, #tpu.dimension_semantics<arbitrary>], iteration_bounds = array<i64: 1, 2, 9>, scalar_prefetch = 0 : i64, scratch_operands = 1 : i64, tpu.core_type = #tpu.core_type<tc>, window_params = [{transform_indices = @transform_0, window_bounds = array<i64: 8, 512>}, {transform_indices = @transform_1, window_bounds = array<i64: 512, 256>}, {transform_indices = @transform_2, window_bounds = array<i64: 1, 256>}, {transform_indices = @transform_3, window_bounds = array<i64: 1, 256>}, {transform_indices = @transform_4, window_bounds = array<i64: 8, 256>}]} {
    %c0_i32 = arith.constant 0 : i32
    %0 = arith.cmpi eq, %arg2, %c0_i32 : i32
    %1 = arith.extui %0 : i1 to i32
    %c0_i32_0 = arith.constant 0 : i32
    %2 = arith.cmpi ne, %1, %c0_i32_0 : i32
    scf.if %2 {
      %cst_9 = arith.constant 0.000000e+00 : f32
      %12 = vector.broadcast %cst_9 : f32 to vector<8x256xf32>
      %c0_10 = arith.constant 0 : index
      %c0_11 = arith.constant 0 : index
      %13 = vector.load %arg8[%c0_10, %c0_11] : memref<8x256xf32, #tpu.memory_space<vmem>>, vector<8x256xf32>
      tpu.vector_store %arg8[%c0_10, %c0_11], %12 {strides = array<i32>} : memref<8x256xf32, #tpu.memory_space<vmem>>, vector<8x256xf32>,
    } else {
    }
    %c0 = arith.constant 0 : index
    %c0_1 = arith.constant 0 : index
    %3 = vector.load %arg8[%c0, %c0_1] : memref<8x256xf32, #tpu.memory_space<vmem>>, vector<8x256xf32>
    %c0_2 = arith.constant 0 : index
    %c0_3 = arith.constant 0 : index
    %4 = vector.load %arg3[%c0_2, %c0_3] : memref<8x512xbf16, #tpu.memory_space<vmem>>, vector<8x512xbf16>
    %c0_4 = arith.constant 0 : index
    %c0_5 = arith.constant 0 : index
    %5 = vector.load %arg4[%c0_4, %c0_5] : memref<512x256xbf16, #tpu.memory_space<vmem>>, vector<512x256xbf16>
    %cst = arith.constant dense<0.000000e+00> : vector<8x256xf32>
    %6 = tpu.matmul %4, %5, %cst {dimension_numbers = #tpu.dot_dimension_numbers<[1], [0], [0], [1], [0, 0, 1, 1], [], []>} : vector<8x512xbf16>, vector<512x256xbf16>, vector<8x256xf32> -> vector<8x256xf32>
    %7 = arith.addf %3, %6 : vector<8x256xf32>
    %c0_6 = arith.constant 0 : index
    %c0_7 = arith.constant 0 : index
    %8 = vector.load %arg8[%c0_6, %c0_7] : memref<8x256xf32, #tpu.memory_space<vmem>>, vector<8x256xf32>
    tpu.vector_store %arg8[%c0_6, %c0_7], %7 {strides = array<i32>} : memref<8x256xf32, #tpu.memory_space<vmem>>, vector<8x256xf32>,
    %c8_i32 = arith.constant 8 : i32
    %9 = arith.cmpi eq, %arg2, %c8_i32 : i32
    %10 = arith.extui %9 : i1 to i32
    %c0_i32_8 = arith.constant 0 : i32
    %11 = arith.cmpi ne, %10, %c0_i32_8 : i32
    scf.if %11 {
      %c0_9 = arith.constant 0 : index
      %c0_10 = arith.constant 0 : index
      %12 = vector.load %arg8[%c0_9, %c0_10] : memref<8x256xf32, #tpu.memory_space<vmem>>, vector<8x256xf32>
      %c0_11 = arith.constant 0 : index
      %c0_12 = arith.constant 0 : index
      %13 = vector.load %arg5[%c0_11, %c0_12] : memref<1x256xf32, #tpu.memory_space<vmem>>, vector<1x256xf32>
      %14 = vector.broadcast %13 : vector<1x256xf32> to vector<8x256xf32>
      %15 = arith.mulf %12, %14 : vector<8x256xf32>
      %c0_13 = arith.constant 0 : index
      %c0_14 = arith.constant 0 : index
      %16 = vector.load %arg6[%c0_13, %c0_14] : memref<1x256xf32, #tpu.memory_space<vmem>>, vector<1x256xf32>
      %17 = vector.broadcast %16 : vector<1x256xf32> to vector<8x256xf32>
      %18 = arith.addf %15, %17 : vector<8x256xf32>
      %cst_15 = arith.constant 0.000000e+00 : f32
      %19 = vector.broadcast %cst_15 : f32 to vector<8x256xf32>
      %20 = arith.maximumf %18, %19 : vector<8x256xf32>
      %21 = arith.truncf %20 : vector<8x256xf32> to vector<8x256xbf16>
      %c0_16 = arith.constant 0 : index
      %c0_17 = arith.constant 0 : index
      %22 = vector.load %arg7[%c0_16, %c0_17] : memref<8x256xbf16, #tpu.memory_space<vmem>>, vector<8x256xbf16>
      tpu.vector_store %arg7[%c0_16, %c0_17], %21 {strides = array<i32>} : memref<8x256xbf16, #tpu.memory_space<vmem>>, vector<8x256xbf16>,
    } else {
    }
    return
  }
  func.func @transform_0(%arg0: i32, %arg1: i32, %arg2: i32) -> (i32, i32) {
    %c0_i32 = arith.constant 0 : i32
    return %arg0, %arg2 : i32, i32
  }
  func.func @transform_1(%arg0: i32, %arg1: i32, %arg2: i32) -> (i32, i32) {
    %c0_i32 = arith.constant 0 : i32
    return %arg2, %arg1 : i32, i32
  }
  func.func @transform_2(%arg0: i32, %arg1: i32, %arg2: i32) -> (i32, i32) {
    %c0_i32 = arith.constant 0 : i32
    %c0_i32_0 = arith.constant 0 : i32
    return %c0_i32, %arg1 : i32, i32
  }
  func.func @transform_3(%arg0: i32, %arg1: i32, %arg2: i32) -> (i32, i32) {
    %c0_i32 = arith.constant 0 : i32
    %c0_i32_0 = arith.constant 0 : i32
    return %c0_i32, %arg1 : i32, i32
  }
  func.func @transform_4(%arg0: i32, %arg1: i32, %arg2: i32) -> (i32, i32) {
    %c0_i32 = arith.constant 0 : i32
    return %arg0, %arg1 : i32, i32
  }
}

module attributes {stable_mosaic.version = 11 : i64} {
  func.func @_avgpool_head_kernel(%arg0: memref<2x1x512xbf16, #tpu.memory_space<vmem>>, %arg1: memref<512x128xf32, #tpu.memory_space<vmem>>, %arg2: memref<1x128xf32, #tpu.memory_space<vmem>>, %arg3: memref<2x128xf32, #tpu.memory_space<vmem>>) attributes {dimension_semantics = [], scalar_prefetch = 0 : i64, scratch_operands = 0 : i64, tpu.core_type = #tpu.core_type<tc>} {
    %c0 = arith.constant 0 : index
    %c0_0 = arith.constant 0 : index
    %c0_1 = arith.constant 0 : index
    %0 = vector.load %arg0[%c0, %c0_0, %c0_1] : memref<2x1x512xbf16, #tpu.memory_space<vmem>>, vector<2x1x512xbf16>
    %1 = arith.extf %0 : vector<2x1x512xbf16> to vector<2x1x512xf32>
    %cst = arith.constant dense<0.000000e+00> : vector<2x512xf32>
    %2 = vector.multi_reduction <add>, %1, %cst [1] : vector<2x1x512xf32> to vector<2x512xf32>
    %cst_2 = arith.constant 1.000000e+00 : f32
    %3 = vector.broadcast %cst_2 : f32 to vector<2x512xf32>
    %4 = arith.divf %2, %3 : vector<2x512xf32>
    %c0_3 = arith.constant 0 : index
    %c0_4 = arith.constant 0 : index
    %5 = vector.load %arg1[%c0_3, %c0_4] : memref<512x128xf32, #tpu.memory_space<vmem>>, vector<512x128xf32>
    %cst_5 = arith.constant dense<0.000000e+00> : vector<2x128xf32>
    %6 = tpu.matmul %4, %5, %cst_5 {dimension_numbers = #tpu.dot_dimension_numbers<[1], [0], [0], [1], [0, 0, 1, 1], [], []>} : vector<2x512xf32>, vector<512x128xf32>, vector<2x128xf32> -> vector<2x128xf32>
    %c0_6 = arith.constant 0 : index
    %c0_7 = arith.constant 0 : index
    %7 = vector.load %arg2[%c0_6, %c0_7] : memref<1x128xf32, #tpu.memory_space<vmem>>, vector<1x128xf32>
    %8 = vector.broadcast %7 : vector<1x128xf32> to vector<2x128xf32>
    %9 = arith.addf %6, %8 : vector<2x128xf32>
    %c0_8 = arith.constant 0 : index
    %c0_9 = arith.constant 0 : index
    %10 = vector.load %arg3[%c0_8, %c0_9] : memref<2x128xf32, #tpu.memory_space<vmem>>, vector<2x128xf32>
    tpu.vector_store %arg3[%c0_8, %c0_9], %9 {strides = array<i32>} : memref<2x128xf32, #tpu.memory_space<vmem>>, vector<2x128xf32>,
    return
  }
}

</mosaic_0001>

<bundles_post_ra>
// kernel: variant_resnet_forward.22
= control target key start
LH: loop header
LB: loop body
LE: loop exit
PB: predicated region body
PF: predicated region fallthrough
CT: control target
= control target key end

     0   :  { %s1843_s15 = smov 0   ;;  %s1845_s16 = smov 0   ;;  %s2054_s0 = inlined_call_operand.vmem [shape: bf16[512,256], index: 0, kind: input, shape index: {}]   ;;  %s2055_s1 = inlined_call_operand.vmem [shape: bf16[256,128], index: 1, kind: input, shape index: {}]   ;;  %s2056_s2 = inlined_call_operand.vmem [shape: f32[1,128], index: 2, kind: input, shape index: {}]   ;;  %s2057_s3 = inlined_call_operand.vmem [shape: f32[1,128], index: 3, kind: input, shape index: {}]   ;;  %s2058_s4 = inlined_call_operand.vmem [shape: bf16[512,128], index: 4, kind: output, shape index: {}]  }
   0x1   :  { %s1847_s17 = smov 0  }
   0x2 LB: > { %s33_s18 = sadd.s32 1, %s1812_s16  ;;  %p1360_p0 = scmp.ge.s32.totalorder %s1816_s17, 1  ;;  %s1816_s17 = sphi %s1847_s17, %s14_s17   ;;  %s1812_s16 = sphi %s1845_s16, %s2060_s16   ;;  %s1808_s15 = sphi %s1843_s15, %s2059_s15  }
   0x3   : > { %p35_p1 = scmp.ge.s32.totalorder %s33_s18, 2  ;;  %p224_p2 = scmp.lt.s32.totalorder %s1816_s17, 3 }
   0x5   : > { %s2062_s18 = smov (%p35_p1, %s33_s18), 0  ;;  %p225_p3 = pnand %p1360_p0, %p224_p2 }
   0x6   : > { %v1730_v0 = vld [vmem:[%s2055_s1 + $0x40] sm:$0xff] (!%p225_p3)   ;;  %s1361_s21 = sshll.u32 (!%p225_p3), %s1808_s15, 5  ;;  %v1732_v2 = vld [vmem:[%s2055_s1 + $0x48] sm:$0xff] (!%p225_p3)   ;;  %v1734_v4 = vld [vmem:[%s2055_s1 + $0x50] sm:$0xff] (!%p225_p3)  }
   0x7   : > { %228 = sbr.rel (%p225_p3) target bundleno = 322 (0x142), region = 36  ;;  %v1731_v1 = vld [vmem:[%s2055_s1] sm:$0xff] (!%p225_p3)   ;;  %1578 = vmatprep.subr.bf16.mxu0 (!%p225_p3), %v1730_v0  ;;  %1690 = vmatprep.subr.bf16.mxu1 (!%p225_p3), %v1730_v0  ;;  %v1733_v3 = vld [vmem:[%s2055_s1 + $0x8] sm:$0xff] (!%p225_p3)   ;;  %p274_p4 = scmp.lt.s32.totalorder (!%p225_p3), %s1361_s21, 63  ;;  %v1735_v5 = vld [vmem:[%s2055_s1 + $0x10] sm:$0xff] (!%p225_p3)  }
   0x8   : > { %1579 = vmatpush3.bf16.msra.mxu0 (!%p225_p3), %v1731_v1  ;;  %1698 = vmatpush3.bf16.msra.mxu1 (!%p225_p3), %v1731_v1  ;;  %v1736_v6 = vld [vmem:[%s2055_s1 + $0x58] sm:$0xff] (!%p225_p3)   ;;  %v1738_v8 = vld [vmem:[%s2055_s1 + $0x60] sm:$0xff] (!%p225_p3)   ;;  %v1740_v10 = vld [vmem:[%s2055_s1 + $0x68] sm:$0xff] (!%p225_p3)  }
   0x9   : > { %1580 = vmatprep.subr.bf16.mxu0 (!%p225_p3), %v1732_v2  ;;  %1691 = vmatprep.subr.bf16.mxu1 (!%p225_p3), %v1732_v2  ;;  %v1737_v7 = vld [vmem:[%s2055_s1 + $0x18] sm:$0xff] (!%p225_p3)   ;;  %v1739_v9 = vld [vmem:[%s2055_s1 + $0x20] sm:$0xff] (!%p225_p3)   ;;  %v1741_v13 = vld [vmem:[%s2055_s1 + $0x28] sm:$0xff] (!%p225_p3)  }
   0xa   : > { %v1742_v14 = vld [vmem:[%s2055_s1 + $0x70] sm:$0xff] (!%p225_p3)   ;;  %v1744_v16 = vld [vmem:[%s2055_s1 + $0x78] sm:$0xff] (!%p225_p3)   ;;  %v1952_v51 = vld [vmem:[%s2056_s2] ss:$0 sm:$0xff] (!%p225_p3) }
   0xb   : > { %v1743_v15 = vld [vmem:[%s2055_s1 + $0x30] sm:$0xff] (!%p225_p3)   ;;  %v1745_v17 = vld [vmem:[%s2055_s1 + $0x38] sm:$0xff] (!%p225_p3)   ;;  %v1957_v57 = vld [vmem:[%s2057_s3] ss:$0 sm:$0xff] (!%p225_p3) }
   0xc   : > { %1581 = vmatpush3.bf16.msra.mxu0 (!%p225_p3), %v1733_v3  ;;  %1699 = vmatpush3.bf16.msra.mxu1 (!%p225_p3), %v1733_v3 }
   0xd   : > { %1582 = vmatprep.subr.bf16.mxu0 (!%p225_p3), %v1734_v4  ;;  %1692 = vmatprep.subr.bf16.mxu1 (!%p225_p3), %v1734_v4 }
   0xe   : > { %s2064_s21 = smov (!%p274_p4, %s1361_s21), 63 }
   0xf   : > { %s1450_s10 = sshll.u32 %s2064_s21, 3  ;;  %s1365_s12 = sshll.u32 %s2064_s21, 2 }
  0x10   : > { %1583 = vmatpush3.bf16.msra.mxu0 %v1735_v5  ;;  %1700 = vmatpush3.bf16.msra.mxu1 %v1735_v5  ;;  %s1894_s15 = scalar_lea.vmem %s2054_s0, %s1450_s10  ;;  %s1971_s21 = scalar_lea.vmem %s2058_s4, %s1365_s12 }
  0x11   : > { %1584 = vmatprep.subr.bf16.mxu0 %v1736_v6  ;;  %1693 = vmatprep.subr.bf16.mxu1 %v1736_v6  ;;  %v1748_v11 = vld [vmem:[%s1894_s15 + $0x4] ss:$8 sps:$4 sm:$0xff]   ;;  %v1746_v18 = vld [vmem:[%s1894_s15] ss:$8 sps:$4 sm:$0xff]   ;;  %v1752_v20 = vld [vmem:[%s1894_s15 + $0x14] ss:$8 sps:$4 sm:$0xff]  }
  0x12   : > { %v1751_v12 = vld [vmem:[%s1894_s15 + $0x84] ss:$8 sps:$4 sm:$0xff]   ;;  %729 = vmatprep.mubr.bf16.mxu0 %v1748_v11  ;;  %v1749_v19 = vld [vmem:[%s1894_s15 + $0x80] ss:$8 sps:$4 sm:$0xff]   ;;  %v1754_v21 = vld [vmem:[%s1894_s15 + $0x94] ss:$8 sps:$4 sm:$0xff]  }
  0x13   : > { %793 = vmatprep.mubr.bf16.mxu1 %v1751_v12  ;;  %v1756_v22 = vld [vmem:[%s1894_s15 + $0x10] ss:$8 sps:$4 sm:$0xff]   ;;  %v1758_v24 = vld [vmem:[%s1894_s15 + $0x24] ss:$8 sps:$4 sm:$0xff]   ;;  %v1762_v26 = vld [vmem:[%s1894_s15 + $0x20] ss:$8 sps:$4 sm:$0xff]  }
  0x14   : > { %1585 = vmatpush3.bf16.msra.mxu0 %v1737_v7  ;;  %1701 = vmatpush3.bf16.msra.mxu1 %v1737_v7  ;;  %v1757_v23 = vld [vmem:[%s1894_s15 + $0x90] ss:$8 sps:$4 sm:$0xff]   ;;  %v1760_v25 = vld [vmem:[%s1894_s15 + $0xa4] ss:$8 sps:$4 sm:$0xff]   ;;  %v1763_v27 = vld [vmem:[%s1894_s15 + $0xa0] ss:$8 sps:$4 sm:$0xff]  }
  0x15   : > { %1586 = vmatprep.subr.bf16.mxu0 %v1738_v8  ;;  %1694 = vmatprep.subr.bf16.mxu1 %v1738_v8  ;;  %v1764_v28 = vld [vmem:[%s1894_s15 + $0x34] ss:$8 sps:$4 sm:$0xff]   ;;  %v1768_v30 = vld [vmem:[%s1894_s15 + $0x30] ss:$8 sps:$4 sm:$0xff]   ;;  %v1770_v32 = vld [vmem:[%s1894_s15 + $0x44] ss:$8 sps:$4 sm:$0xff]  }
  0x16   : > { %v1766_v29 = vld [vmem:[%s1894_s15 + $0xb4] ss:$8 sps:$4 sm:$0xff]   ;;  %v1769_v31 = vld [vmem:[%s1894_s15 + $0xb0] ss:$8 sps:$4 sm:$0xff]   ;;  %v1772_v33 = vld [vmem:[%s1894_s15 + $0xc4] ss:$8 sps:$4 sm:$0xff]  }
  0x17   : > { %v1774_v34 = vld [vmem:[%s1894_s15 + $0x40] ss:$8 sps:$4 sm:$0xff]   ;;  %v1776_v36 = vld [vmem:[%s1894_s15 + $0x54] ss:$8 sps:$4 sm:$0xff]   ;;  %v1780_v38 = vld [vmem:[%s1894_s15 + $0x50] ss:$8 sps:$4 sm:$0xff]  }
  0x18   : > { %1587 = vmatpush3.bf16.msra.mxu0 %v1739_v9  ;;  %1702 = vmatpush3.bf16.msra.mxu1 %v1739_v9  ;;  %v1775_v35 = vld [vmem:[%s1894_s15 + $0xc0] ss:$8 sps:$4 sm:$0xff]   ;;  %v1778_v37 = vld [vmem:[%s1894_s15 + $0xd4] ss:$8 sps:$4 sm:$0xff]   ;;  %v1781_v39 = vld [vmem:[%s1894_s15 + $0xd0] ss:$8 sps:$4 sm:$0xff]  }
  0x19   : > { %1588 = vmatprep.subr.bf16.mxu0 %v1740_v10  ;;  %1695 = vmatprep.subr.bf16.mxu1 %v1740_v10  ;;  %v1782_v40 = vld [vmem:[%s1894_s15 + $0x64] ss:$8 sps:$4 sm:$0xff]   ;;  %v1786_v42 = vld [vmem:[%s1894_s15 + $0x60] ss:$8 sps:$4 sm:$0xff]   ;;  %v1788_v44 = vld [vmem:[%s1894_s15 + $0x74] ss:$8 sps:$4 sm:$0xff]  }
  0x1a   : > { %v1784_v41 = vld [vmem:[%s1894_s15 + $0xe4] ss:$8 sps:$4 sm:$0xff]   ;;  %v1787_v43 = vld [vmem:[%s1894_s15 + $0xe0] ss:$8 sps:$4 sm:$0xff]   ;;  %v1790_v45 = vld [vmem:[%s1894_s15 + $0xf4] ss:$8 sps:$4 sm:$0xff]  }
  0x1b   : > { %v1792_v46 = vld [vmem:[%s1894_s15 + $0x70] ss:$8 sps:$4 sm:$0xff]  }
  0x1c   : > { %1589 = vmatpush3.bf16.msra.mxu0 %v1741_v13  ;;  %1703 = vmatpush3.bf16.msra.mxu1 %v1741_v13  ;;  %v1793_v47 = vld [vmem:[%s1894_s15 + $0xf0] ss:$8 sps:$4 sm:$0xff]  }
  0x1d   : > { %1590 = vmatprep.subr.bf16.mxu0 %v1742_v14  ;;  %1696 = vmatprep.subr.bf16.mxu1 %v1742_v14 }
  0x20   : > { %1591 = vmatpush3.bf16.msra.mxu0 %v1743_v15  ;;  %1704 = vmatpush3.bf16.msra.mxu1 %v1743_v15 }
  0x21   : > { %1592 = vmatprep.subr.bf16.mxu0 %v1744_v16  ;;  %1697 = vmatprep.subr.bf16.mxu1 %v1744_v16 }
  0x24   : > { %1593 = vmatpush3.bf16.msra.mxu0 %v1745_v17  ;;  %1705 = vmatpush3.bf16.msra.mxu1 %v1745_v17 }
  0x27   : > { %730 = vmatmul.mubr.bf16.vlgmr.msra.gmra.mrb[0].mxu0 %v1746_v18  ;;  %794 = vmatmul.mubr.bf16.vlgmr.msra.gmra.mrb[0].mxu1 %v1749_v19 }
  0x28   : > { %737 = vmatprep.mubr.bf16.mxu0 %v1752_v20  ;;  %801 = vmatprep.mubr.bf16.mxu1 %v1754_v21 }
  0x2f   : > { %738 = vmatmul.mubr.bf16.gmra.mrb[4].mxu0 %v1756_v22  ;;  %802 = vmatmul.mubr.bf16.gmra.mrb[4].mxu1 %v1757_v23 }
  0x30   : > { %745 = vmatprep.mubr.bf16.mxu0 %v1758_v24  ;;  %809 = vmatprep.mubr.bf16.mxu1 %v1760_v25 }
  0x37   : > { %746 = vmatmul.mubr.bf16.gmra.mrb[8].mxu0 %v1762_v26  ;;  %810 = vmatmul.mubr.bf16.gmra.mrb[8].mxu1 %v1763_v27 }
  0x38   : > { %753 = vmatprep.mubr.bf16.mxu0 %v1764_v28  ;;  %817 = vmatprep.mubr.bf16.mxu1 %v1766_v29 }
  0x3f   : > { %754 = vmatmul.mubr.bf16.gmra.mrb[12].mxu0 %v1768_v30  ;;  %818 = vmatmul.mubr.bf16.gmra.mrb[12].mxu1 %v1769_v31 }
  0x40   : > { %761 = vmatprep.mubr.bf16.mxu0 %v1770_v32  ;;  %825 = vmatprep.mubr.bf16.mxu1 %v1772_v33 }
  0x47   : > { %762 = vmatmul.mubr.bf16.gmra.mrb[16].mxu0 %v1774_v34  ;;  %826 = vmatmul.mubr.bf16.gmra.mrb[16].mxu1 %v1775_v35 }
  0x48   : > { %769 = vmatprep.mubr.bf16.mxu0 %v1776_v36  ;;  %833 = vmatprep.mubr.bf16.mxu1 %v1778_v37 }
  0x4f   : > { %770 = vmatmul.mubr.bf16.gmra.mrb[20].mxu0 %v1780_v38  ;;  %834 = vmatmul.mubr.bf16.gmra.mrb[20].mxu1 %v1781_v39 }
  0x50   : > { %777 = vmatprep.mubr.bf16.mxu0 %v1782_v40  ;;  %841 = vmatprep.mubr.bf16.mxu1 %v1784_v41 }
  0x57   : > { %778 = vmatmul.mubr.bf16.gmra.mrb[24].mxu0 %v1786_v42  ;;  %842 = vmatmul.mubr.bf16.gmra.mrb[24].mxu1 %v1787_v43 }
  0x58   : > { %785 = vmatprep.mubr.bf16.mxu0 %v1788_v44  ;;  %849 = vmatprep.mubr.bf16.mxu1 %v1790_v45 }
  0x5f   : > { %786 = vmatmul.mubr.bf16.gmra.mrb[28].mxu0 %v1792_v46  ;;  %850 = vmatmul.mubr.bf16.gmra.mrb[28].mxu1 %v1793_v47 }
  0xfa   : > { %v1594_v48 = vpop.f32.mrb[0].mxu0  ;;  %v1642_v49 = vpop.f32.mrb[0].mxu1 }
  0xfb   : > { %v1595_v50 = vpop.f32.mrb[1].mxu0  ;;  %v1643_v52 = vpop.f32.mrb[1].mxu1 }
  0xfc   : > { %v1596_v53 = vadd.f32 %v1595_v50, %v1594_v48  ;;  %v1644_v54 = vadd.f32 %v1643_v52, %v1642_v49  ;;  %v1597_v55 = vpop.f32.mrb[2].mxu0  ;;  %v1645_v56 = vpop.f32.mrb[2].mxu1 }
  0xfd   : > { %v1598_v58 = vpop.f32.mrb[3].mxu0  ;;  %v1646_v59 = vpop.f32.mrb[3].mxu1 }
  0xfe   : > { %v964_v60 = vmul.f32 %v1596_v53, %v1952_v51  ;;  %v980_v61 = vmul.f32 %v1644_v54, %v1952_v51  ;;  %v1599_v62 = vadd.f32 %v1598_v58, %v1597_v55  ;;  %v1647_v63 = vadd.f32 %v1646_v59, %v1645_v56 }
 0x100   : > { %v1003_v0 = vadd.f32 %v1957_v57, %v964_v60  ;;  %v1019_v1 = vadd.f32 %v1957_v57, %v980_v61  ;;  %v965_v2 = vmul.f32 %v1599_v62, %v1952_v51  ;;  %v981_v3 = vmul.f32 %v1647_v63, %v1952_v51 }
 0x102   : > { %v1004_v4 = vadd.f32 %v1957_v57, %v965_v2  ;;  %v1020_v5 = vadd.f32 %v1957_v57, %v981_v3  ;;  %v1600_v6 = vpop.f32.mrb[4].mxu0  ;;  %v1648_v7 = vpop.f32.mrb[4].mxu1  ;;  %v1035_v8 = vmax.f32 %v1003_v0, 0.0  ;;  %v1051_v9 = vmax.f32 %v1019_v1, 0.0 }
 0x103   : > { %v1601_v10 = vpop.f32.mrb[5].mxu0  ;;  %v1649_v11 = vpop.f32.mrb[5].mxu1 }
 0x104   : > { %v1036_v12 = vmax.f32 %v1004_v4, 0.0  ;;  %v1052_v13 = vmax.f32 %v1020_v5, 0.0  ;;  %v1602_v14 = vadd.f32 %v1601_v10, %v1600_v6  ;;  %v1650_v15 = vadd.f32 %v1649_v11, %v1648_v7  ;;  %v1603_v16 = vpop.f32.mrb[6].mxu0  ;;  %v1651_v17 = vpop.f32.mrb[6].mxu1 }
 0x105   : > { %v1604_v18 = vpop.f32.mrb[7].mxu0  ;;  %v1652_v19 = vpop.f32.mrb[7].mxu1 }
 0x106   : > { %v1486_v20 = vpack.c.bf16 %v1036_v12, %v1035_v8  ;;  %v1526_v21 = vpack.c.bf16 %v1052_v13, %v1051_v9  ;;  %v966_v22 = vmul.f32 %v1602_v14, %v1952_v51  ;;  %v982_v23 = vmul.f32 %v1650_v15, %v1952_v51 }
 0x107   : > { %v1605_v24 = vadd.f32 %v1604_v18, %v1603_v16  ;;  %v1653_v25 = vadd.f32 %v1652_v19, %v1651_v17 }
 0x108   : > { %1487 = vst [vmem:[%s1971_s21] sm:$0xff] %v1486_v20   ;;  %1570 = vst [vmem:[%s1971_s21 + $0x40] sm:$0xff] %v1526_v21   ;;  %v1005_v26 = vadd.f32 %v1957_v57, %v966_v22  ;;  %v1021_v27 = vadd.f32 %v1957_v57, %v982_v23 }
 0x109   : > { %v967_v28 = vmul.f32 %v1605_v24, %v1952_v51  ;;  %v983_v29 = vmul.f32 %v1653_v25, %v1952_v51 }
 0x10a   : > { %v1606_v30 = vpop.f32.mrb[8].mxu0  ;;  %v1654_v31 = vpop.f32.mrb[8].mxu1  ;;  %v1037_v40 = vmax.f32 %v1005_v26, 0.0  ;;  %v1053_v41 = vmax.f32 %v1021_v27, 0.0 }
 0x10b   : > { %v1006_v32 = vadd.f32 %v1957_v57, %v967_v28  ;;  %v1022_v33 = vadd.f32 %v1957_v57, %v983_v29  ;;  %v1607_v34 = vpop.f32.mrb[9].mxu0  ;;  %v1655_v35 = vpop.f32.mrb[9].mxu1 }
 0x10c   : > { %v1608_v36 = vadd.f32 %v1607_v34, %v1606_v30  ;;  %v1656_v37 = vadd.f32 %v1655_v35, %v1654_v31  ;;  %v1609_v38 = vpop.f32.mrb[10].mxu0  ;;  %v1657_v39 = vpop.f32.mrb[10].mxu1 }
 0x10d   : > { %v1038_v42 = vmax.f32 %v1006_v32, 0.0  ;;  %v1054_v43 = vmax.f32 %v1022_v33, 0.0  ;;  %v1610_v44 = vpop.f32.mrb[11].mxu0  ;;  %v1658_v45 = vpop.f32.mrb[11].mxu1 }
 0x10e   : > { %v968_v46 = vmul.f32 %v1608_v36, %v1952_v51  ;;  %v984_v47 = vmul.f32 %v1656_v37, %v1952_v51  ;;  %v1611_v48 = vadd.f32 %v1610_v44, %v1609_v38  ;;  %v1659_v49 = vadd.f32 %v1658_v45, %v1657_v39 }
 0x10f   : > { %v1491_v50 = vpack.c.bf16 %v1038_v42, %v1037_v40  ;;  %v1531_v52 = vpack.c.bf16 %v1054_v43, %v1053_v41 }
 0x110   : > { %v1007_v53 = vadd.f32 %v1957_v57, %v968_v46  ;;  %v1023_v54 = vadd.f32 %v1957_v57, %v984_v47  ;;  %v969_v55 = vmul.f32 %v1611_v48, %v1952_v51  ;;  %v985_v56 = vmul.f32 %v1659_v49, %v1952_v51 }
 0x111   : > { %1563 = vst [vmem:[%s1971_s21 + $0x8] sm:$0xff] %v1491_v50   ;;  %1571 = vst [vmem:[%s1971_s21 + $0x48] sm:$0xff] %v1531_v52  }
 0x112   : > { %v1008_v58 = vadd.f32 %v1957_v57, %v969_v55  ;;  %v1024_v59 = vadd.f32 %v1957_v57, %v985_v56  ;;  %v1612_v60 = vpop.f32.mrb[12].mxu0  ;;  %v1660_v61 = vpop.f32.mrb[12].mxu1  ;;  %v1039_v62 = vmax.f32 %v1007_v53, 0.0  ;;  %v1055_v63 = vmax.f32 %v1023_v54, 0.0 }
 0x113   : > { %v1613_v0 = vpop.f32.mrb[13].mxu0  ;;  %v1661_v1 = vpop.f32.mrb[13].mxu1 }
 0x114   : > { %v1040_v2 = vmax.f32 %v1008_v58, 0.0  ;;  %v1056_v3 = vmax.f32 %v1024_v59, 0.0  ;;  %v1614_v4 = vadd.f32 %v1613_v0, %v1612_v60  ;;  %v1662_v5 = vadd.f32 %v1661_v1, %v1660_v61  ;;  %v1615_v6 = vpop.f32.mrb[14].mxu0  ;;  %v1663_v7 = vpop.f32.mrb[14].mxu1 }
 0x115   : > { %v1616_v8 = vpop.f32.mrb[15].mxu0  ;;  %v1664_v9 = vpop.f32.mrb[15].mxu1 }
 0x116   : > { %v1496_v10 = vpack.c.bf16 %v1040_v2, %v1039_v62  ;;  %v1536_v11 = vpack.c.bf16 %v1056_v3, %v1055_v63  ;;  %v970_v12 = vmul.f32 %v1614_v4, %v1952_v51  ;;  %v986_v13 = vmul.f32 %v1662_v5, %v1952_v51 }
 0x117   : > { %v1617_v14 = vadd.f32 %v1616_v8, %v1615_v6  ;;  %v1665_v15 = vadd.f32 %v1664_v9, %v1663_v7 }
 0x118   : > { %1564 = vst [vmem:[%s1971_s21 + $0x10] sm:$0xff] %v1496_v10   ;;  %1572 = vst [vmem:[%s1971_s21 + $0x50] sm:$0xff] %v1536_v11   ;;  %v1009_v16 = vadd.f32 %v1957_v57, %v970_v12  ;;  %v1025_v17 = vadd.f32 %v1957_v57, %v986_v13 }
 0x119   : > { %v971_v18 = vmul.f32 %v1617_v14, %v1952_v51  ;;  %v987_v19 = vmul.f32 %v1665_v15, %v1952_v51 }
 0x11a   : > { %v1618_v20 = vpop.f32.mrb[16].mxu0  ;;  %v1666_v21 = vpop.f32.mrb[16].mxu1  ;;  %v1041_v30 = vmax.f32 %v1009_v16, 0.0  ;;  %v1057_v31 = vmax.f32 %v1025_v17, 0.0 }
 0x11b   : > { %v1010_v22 = vadd.f32 %v1957_v57, %v971_v18  ;;  %v1026_v23 = vadd.f32 %v1957_v57, %v987_v19  ;;  %v1619_v24 = vpop.f32.mrb[17].mxu0  ;;  %v1667_v25 = vpop.f32.mrb[17].mxu1 }
 0x11c   : > { %v1620_v26 = vadd.f32 %v1619_v24, %v1618_v20  ;;  %v1668_v27 = vadd.f32 %v1667_v25, %v1666_v21  ;;  %v1621_v28 = vpop.f32.mrb[18].mxu0  ;;  %v1669_v29 = vpop.f32.mrb[18].mxu1 }
 0x11d   : > { %v1042_v32 = vmax.f32 %v1010_v22, 0.0  ;;  %v1058_v33 = vmax.f32 %v1026_v23, 0.0  ;;  %v1622_v34 = vpop.f32.mrb[19].mxu0  ;;  %v1670_v35 = vpop.f32.mrb[19].mxu1 }
 0x11e   : > { %v972_v36 = vmul.f32 %v1620_v26, %v1952_v51  ;;  %v988_v37 = vmul.f32 %v1668_v27, %v1952_v51  ;;  %v1623_v38 = vadd.f32 %v1622_v34, %v1621_v28  ;;  %v1671_v39 = vadd.f32 %v1670_v35, %v1669_v29 }
 0x11f   : > { %v1501_v40 = vpack.c.bf16 %v1042_v32, %v1041_v30  ;;  %v1541_v41 = vpack.c.bf16 %v1058_v33, %v1057_v31 }
 0x120   : > { %v1011_v42 = vadd.f32 %v1957_v57, %v972_v36  ;;  %v1027_v43 = vadd.f32 %v1957_v57, %v988_v37  ;;  %v973_v44 = vmul.f32 %v1623_v38, %v1952_v51  ;;  %v989_v45 = vmul.f32 %v1671_v39, %v1952_v51 }
 0x121   : > { %1565 = vst [vmem:[%s1971_s21 + $0x18] sm:$0xff] %v1501_v40   ;;  %1573 = vst [vmem:[%s1971_s21 + $0x58] sm:$0xff] %v1541_v41  }
 0x122   : > { %v1012_v46 = vadd.f32 %v1957_v57, %v973_v44  ;;  %v1028_v47 = vadd.f32 %v1957_v57, %v989_v45  ;;  %v1624_v48 = vpop.f32.mrb[20].mxu0  ;;  %v1672_v49 = vpop.f32.mrb[20].mxu1  ;;  %v1043_v50 = vmax.f32 %v1011_v42, 0.0  ;;  %v1059_v52 = vmax.f32 %v1027_v43, 0.0 }
 0x123   : > { %v1625_v53 = vpop.f32.mrb[21].mxu0  ;;  %v1673_v54 = vpop.f32.mrb[21].mxu1 }
 0x124   : > { %v1044_v55 = vmax.f32 %v1012_v46, 0.0  ;;  %v1060_v56 = vmax.f32 %v1028_v47, 0.0  ;;  %v1626_v58 = vadd.f32 %v1625_v53, %v1624_v48  ;;  %v1674_v59 = vadd.f32 %v1673_v54, %v1672_v49  ;;  %v1627_v60 = vpop.f32.mrb[22].mxu0  ;;  %v1675_v61 = vpop.f32.mrb[22].mxu1 }
 0x125   : > { %v1628_v62 = vpop.f32.mrb[23].mxu0  ;;  %v1676_v63 = vpop.f32.mrb[23].mxu1 }
 0x126   : > { %v1506_v0 = vpack.c.bf16 %v1044_v55, %v1043_v50  ;;  %v1546_v1 = vpack.c.bf16 %v1060_v56, %v1059_v52  ;;  %v974_v2 = vmul.f32 %v1626_v58, %v1952_v51  ;;  %v990_v3 = vmul.f32 %v1674_v59, %v1952_v51 }
 0x127   : > { %v1629_v4 = vadd.f32 %v1628_v62, %v1627_v60  ;;  %v1677_v5 = vadd.f32 %v1676_v63, %v1675_v61 }
 0x128   : > { %1566 = vst [vmem:[%s1971_s21 + $0x20] sm:$0xff] %v1506_v0   ;;  %1574 = vst [vmem:[%s1971_s21 + $0x60] sm:$0xff] %v1546_v1   ;;  %v1013_v6 = vadd.f32 %v1957_v57, %v974_v2  ;;  %v1029_v7 = vadd.f32 %v1957_v57, %v990_v3 }
 0x129   : > { %v975_v8 = vmul.f32 %v1629_v4, %v1952_v51  ;;  %v991_v9 = vmul.f32 %v1677_v5, %v1952_v51 }
 0x12a   : > { %v1630_v10 = vpop.f32.mrb[24].mxu0  ;;  %v1678_v11 = vpop.f32.mrb[24].mxu1  ;;  %v1045_v20 = vmax.f32 %v1013_v6, 0.0  ;;  %v1061_v21 = vmax.f32 %v1029_v7, 0.0 }
 0x12b   : > { %v1014_v12 = vadd.f32 %v1957_v57, %v975_v8  ;;  %v1030_v13 = vadd.f32 %v1957_v57, %v991_v9  ;;  %v1631_v14 = vpop.f32.mrb[25].mxu0  ;;  %v1679_v15 = vpop.f32.mrb[25].mxu1 }
 0x12c   : > { %v1632_v16 = vadd.f32 %v1631_v14, %v1630_v10  ;;  %v1680_v17 = vadd.f32 %v1679_v15, %v1678_v11  ;;  %v1633_v18 = vpop.f32.mrb[26].mxu0  ;;  %v1681_v19 = vpop.f32.mrb[26].mxu1 }
 0x12d   : > { %v1046_v22 = vmax.f32 %v1014_v12, 0.0  ;;  %v1062_v23 = vmax.f32 %v1030_v13, 0.0  ;;  %v1634_v24 = vpop.f32.mrb[27].mxu0  ;;  %v1682_v25 = vpop.f32.mrb[27].mxu1 }
 0x12e   : > { %v976_v26 = vmul.f32 %v1632_v16, %v1952_v51  ;;  %v992_v27 = vmul.f32 %v1680_v17, %v1952_v51  ;;  %v1635_v28 = vadd.f32 %v1634_v24, %v1633_v18  ;;  %v1683_v29 = vadd.f32 %v1682_v25, %v1681_v19 }
 0x12f   : > { %v1511_v30 = vpack.c.bf16 %v1046_v22, %v1045_v20  ;;  %v1551_v31 = vpack.c.bf16 %v1062_v23, %v1061_v21 }
 0x130   : > { %v1015_v32 = vadd.f32 %v1957_v57, %v976_v26  ;;  %v1031_v33 = vadd.f32 %v1957_v57, %v992_v27  ;;  %v977_v34 = vmul.f32 %v1635_v28, %v1952_v51  ;;  %v993_v35 = vmul.f32 %v1683_v29, %v1952_v51 }
 0x131   : > { %1567 = vst [vmem:[%s1971_s21 + $0x28] sm:$0xff] %v1511_v30   ;;  %1575 = vst [vmem:[%s1971_s21 + $0x68] sm:$0xff] %v1551_v31  }
 0x132   : > { %v1016_v36 = vadd.f32 %v1957_v57, %v977_v34  ;;  %v1032_v37 = vadd.f32 %v1957_v57, %v993_v35  ;;  %v1636_v38 = vpop.f32.mrb[28].mxu0  ;;  %v1684_v39 = vpop.f32.mrb[28].mxu1  ;;  %v1047_v40 = vmax.f32 %v1015_v32, 0.0  ;;  %v1063_v41 = vmax.f32 %v1031_v33, 0.0 }
 0x133   : > { %v1637_v42 = vpop.f32.mrb[29].mxu0  ;;  %v1685_v43 = vpop.f32.mrb[29].mxu1 }
 0x134   : > { %v1048_v44 = vmax.f32 %v1016_v36, 0.0  ;;  %v1064_v45 = vmax.f32 %v1032_v37, 0.0  ;;  %v1638_v46 = vadd.f32 %v1637_v42, %v1636_v38  ;;  %v1686_v47 = vadd.f32 %v1685_v43, %v1684_v39  ;;  %v1639_v48 = vpop.f32.mrb[30].mxu0  ;;  %v1687_v49 = vpop.f32.mrb[30].mxu1 }
 0x135   : > { %v1640_v50 = vpop.f32.mrb[31].mxu0  ;;  %v1688_v52 = vpop.f32.mrb[31].mxu1 }
 0x136   : > { %v1516_v53 = vpack.c.bf16 %v1048_v44, %v1047_v40  ;;  %v1556_v54 = vpack.c.bf16 %v1064_v45, %v1063_v41  ;;  %v978_v55 = vmul.f32 %v1638_v46, %v1952_v51  ;;  %v994_v56 = vmul.f32 %v1686_v47, %v1952_v51 }
 0x137   : > { %v1641_v58 = vadd.f32 %v1640_v50, %v1639_v48  ;;  %v1689_v59 = vadd.f32 %v1688_v52, %v1687_v49 }
 0x138   : > { %1568 = vst [vmem:[%s1971_s21 + $0x30] sm:$0xff] %v1516_v53   ;;  %1576 = vst [vmem:[%s1971_s21 + $0x70] sm:$0xff] %v1556_v54   ;;  %v1017_v60 = vadd.f32 %v1957_v57, %v978_v55  ;;  %v1033_v61 = vadd.f32 %v1957_v57, %v994_v56 }
 0x139   : > { %v979_v62 = vmul.f32 %v1641_v58, %v1952_v51  ;;  %v995_v63 = vmul.f32 %v1689_v59, %v1952_v51 }
 0x13a   : > { %v1049_v2 = vmax.f32 %v1017_v60, 0.0  ;;  %v1065_v3 = vmax.f32 %v1033_v61, 0.0 }
 0x13b   : > { %v1018_v0 = vadd.f32 %v1957_v57, %v979_v62  ;;  %v1034_v1 = vadd.f32 %v1957_v57, %v995_v63 }
 0x13d   : > { %v1050_v4 = vmax.f32 %v1018_v0, 0.0  ;;  %v1066_v5 = vmax.f32 %v1034_v1, 0.0 }
 0x13f   : > { %v1521_v6 = vpack.c.bf16 %v1050_v4, %v1049_v2  ;;  %v1561_v7 = vpack.c.bf16 %v1066_v5, %v1065_v3 }
 0x141   : > { %1569 = vst [vmem:[%s1971_s21 + $0x38] sm:$0xff] %v1521_v6   ;;  %1577 = vst [vmem:[%s1971_s21 + $0x78] sm:$0xff] %v1561_v7  }
 0x142 PF: > { %s14_s17 = sadd.s32 1, %s1816_s17   ;;  %s2059_s15 = smov %s1812_s16 }
 0x143   : > { %p11_p5 = scmp.ge.s32.totalorder %s14_s17, 4   ;;  %s2060_s16 = smov %s2062_s18 }
 0x145   :  { %13 = sbr.rel (!%p11_p5) target bundleno = 2 (0x2), region = 83 }

// kernel: variant_resnet_forward.23
= control target key start
LH: loop header
LB: loop body
LE: loop exit
PB: predicated region body
PF: predicated region fallthrough
CT: control target
= control target key end

     0   :  { %vm304_vm0 = vcmask 519168   ;;  %s871_s0 = inlined_call_operand.vmem [shape: bf16[128,64], index: 0, kind: input, shape index: {}]   ;;  %s872_s1 = inlined_call_operand.vmem [shape: bf16[128,64], index: 1, kind: input, shape index: {}]   ;;  %s873_s2 = inlined_call_operand.vmem [shape: bf16[128,64], index: 2, kind: input, shape index: {}]   ;;  %s874_s3 = inlined_call_operand.vmem [shape: bf16[128,64], index: 3, kind: input, shape index: {}]   ;;  %s875_s4 = inlined_call_operand.vmem [shape: bf16[128,64], index: 4, kind: input, shape index: {}]   ;;  %s876_s5 = inlined_call_operand.vmem [shape: bf16[128,64], index: 5, kind: input, shape index: {}]   ;;  %s877_s6 = inlined_call_operand.vmem [shape: bf16[128,64], index: 6, kind: input, shape index: {}]   ;;  %s878_s7 = inlined_call_operand.vmem [shape: bf16[128,64], index: 7, kind: input, shape index: {}]   ;;  %s879_s8 = inlined_call_operand.vmem [shape: bf16[128,64], index: 8, kind: input, shape index: {}]   ;;  %s880_s9 = inlined_call_operand.vmem [shape: bf16[128,64], index: 9, kind: output, shape index: {}]  }
   0x1   :  { %v32_v0 = vld [vmem:[%s871_s0] sm:$0xf]  ;;  %v33_v6 = vld [vmem:[%s871_s0 + $0x4] sm:$0xf]  ;;  %v34_v15 = vld [vmem:[%s871_s0 + $0x8] sm:$0xf] }
   0x2   :  { %v48_v1 = vld [vmem:[%s872_s1] sm:$0xf]  ;;  %v49_v7 = vld [vmem:[%s872_s1 + $0x4] sm:$0xf]  ;;  %v50_v16 = vld [vmem:[%s872_s1 + $0x8] sm:$0xf] }
   0x3   :  { %v80_v2 = vld [vmem:[%s873_s2] sm:$0xf]  ;;  %v64_v3 = vmax.bf16 %v48_v1, %v32_v0  ;;  %v81_v8 = vld [vmem:[%s873_s2 + $0x4] sm:$0xf]  ;;  %v65_v10 = vmax.bf16 %v49_v7, %v33_v6  ;;  %v82_v17 = vld [vmem:[%s873_s2 + $0x8] sm:$0xf]  ;;  %v66_v20 = vmax.bf16 %v50_v16, %v34_v15 }
   0x4   :  { %v112_v4 = vld [vmem:[%s874_s3] sm:$0xf]  ;;  %v113_v13 = vld [vmem:[%s874_s3 + $0x4] sm:$0xf]  ;;  %v114_v24 = vld [vmem:[%s874_s3 + $0x8] sm:$0xf] }
   0x5   :  { %v96_v5 = vmax.bf16 %v80_v2, %v64_v3  ;;  %v144_v9 = vld [vmem:[%s875_s4] sm:$0xf]  ;;  %v97_v14 = vmax.bf16 %v81_v8, %v65_v10  ;;  %v145_v19 = vld [vmem:[%s875_s4 + $0x4] sm:$0xf]  ;;  %v98_v26 = vmax.bf16 %v82_v17, %v66_v20  ;;  %v35_v27 = vld [vmem:[%s871_s0 + $0xc] sm:$0xf] }
   0x6   :  { %v176_v12 = vld [vmem:[%s876_s5] sm:$0xf]  ;;  %v177_v23 = vld [vmem:[%s876_s5 + $0x4] sm:$0xf]  ;;  %v51_v28 = vld [vmem:[%s872_s1 + $0xc] sm:$0xf] }
   0x7   :  { %v128_v11 = vmax.bf16 %v112_v4, %v96_v5  ;;  %v208_v21 = vld [vmem:[%s877_s6] sm:$0xf]  ;;  %v129_v22 = vmax.bf16 %v113_v13, %v97_v14  ;;  %v83_v29 = vld [vmem:[%s873_s2 + $0xc] sm:$0xf]  ;;  %v146_v33 = vld [vmem:[%s875_s4 + $0x8] sm:$0xf]  ;;  %v67_v34 = vmax.bf16 %v51_v28, %v35_v27  ;;  %v130_v37 = vmax.bf16 %v114_v24, %v98_v26 }
   0x8   :  { %v240_v30 = vld [vmem:[%s878_s7] sm:$0xf]  ;;  %v209_v36 = vld [vmem:[%s877_s6 + $0x4] sm:$0xf]  ;;  %v178_v38 = vld [vmem:[%s876_s5 + $0x8] sm:$0xf] }
   0x9   :  { %v160_v18 = vmax.bf16 %v144_v9, %v128_v11  ;;  %v272_v31 = vld [vmem:[%s879_s8] sm:$0xf]  ;;  %v161_v32 = vmax.bf16 %v145_v19, %v129_v22  ;;  %v115_v39 = vld [vmem:[%s874_s3 + $0xc] sm:$0xf]  ;;  %v99_v41 = vmax.bf16 %v83_v29, %v67_v34  ;;  %v36_v42 = vld [vmem:[%s871_s0 + $0x10] sm:$0xf]  ;;  %v162_v48 = vmax.bf16 %v146_v33, %v130_v37 }
   0xa   :  { %v52_v43 = vld [vmem:[%s872_s1 + $0x10] sm:$0xf]  ;;  %v241_v46 = vld [vmem:[%s878_s7 + $0x4] sm:$0xf]  ;;  %v147_v49 = vld [vmem:[%s875_s4 + $0xc] sm:$0xf] }
   0xb   :  { %v192_v25 = vmax.bf16 %v176_v12, %v160_v18  ;;  %v193_v40 = vmax.bf16 %v177_v23, %v161_v32  ;;  %v84_v44 = vld [vmem:[%s873_s2 + $0x10] sm:$0xf]  ;;  %v273_v47 = vld [vmem:[%s879_s8 + $0x4] sm:$0xf]  ;;  %v68_v50 = vmax.bf16 %v52_v43, %v36_v42  ;;  %v210_v52 = vld [vmem:[%s877_s6 + $0x8] sm:$0xf]  ;;  %v131_v53 = vmax.bf16 %v115_v39, %v99_v41 }
   0xc   :  { %v179_v54 = vld [vmem:[%s876_s5 + $0xc] sm:$0xf]  ;;  %v116_v55 = vld [vmem:[%s874_s3 + $0x10] sm:$0xf]  ;;  %v194_v57 = vmax.bf16 %v178_v38, %v162_v48  ;;  %v37_v59 = vld [vmem:[%s871_s0 + $0x14] sm:$0xf] }
   0xd   :  { %v224_v35 = vmax.bf16 %v208_v21, %v192_v25  ;;  %v225_v51 = vmax.bf16 %v209_v36, %v193_v40  ;;  %v100_v58 = vmax.bf16 %v84_v44, %v68_v50  ;;  %v53_v60 = vld [vmem:[%s872_s1 + $0x14] sm:$0xf]  ;;  %v242_v63 = vld [vmem:[%s878_s7 + $0x8] sm:$0xf]  ;;  %v163_v1 = vmax.bf16 %v147_v49, %v131_v53  ;;  %v148_v2 = vld [vmem:[%s875_s4 + $0x10] sm:$0xf] }
   0xe   :  { %v85_v61 = vld [vmem:[%s873_s2 + $0x14] sm:$0xf]  ;;  %v274_v0 = vld [vmem:[%s879_s8 + $0x8] sm:$0xf]  ;;  %v69_v3 = vmax.bf16 %v53_v60, %v37_v59  ;;  %v226_v4 = vmax.bf16 %v210_v52, %v194_v57  ;;  %v211_v5 = vld [vmem:[%s877_s6 + $0xc] sm:$0xf] }
   0xf   :  { %v256_v45 = vmax.bf16 %v240_v30, %v224_v35  ;;  %v257_v62 = vmax.bf16 %v241_v46, %v225_v51  ;;  %v132_v6 = vmax.bf16 %v116_v55, %v100_v58  ;;  %v180_v7 = vld [vmem:[%s876_s5 + $0x10] sm:$0xf]  ;;  %v117_v8 = vld [vmem:[%s874_s3 + $0x14] sm:$0xf]  ;;  %v195_v10 = vmax.bf16 %v179_v54, %v163_v1  ;;  %v38_v12 = vld [vmem:[%s871_s0 + $0x18] sm:$0xf] }
  0x10   :  { %v101_v11 = vmax.bf16 %v85_v61, %v69_v3  ;;  %v54_v13 = vld [vmem:[%s872_s1 + $0x18] sm:$0xf]  ;;  %v258_v15 = vmax.bf16 %v242_v63, %v226_v4  ;;  %v243_v16 = vld [vmem:[%s878_s7 + $0xc] sm:$0xf]  ;;  %v149_v19 = vld [vmem:[%s875_s4 + $0x14] sm:$0xf] }
  0x11   :  { %v288_v56 = vmax.bf16 %v272_v31, %v256_v45  ;;  %v289_v9 = vmax.bf16 %v273_v47, %v257_v62  ;;  %v86_v14 = vld [vmem:[%s873_s2 + $0x18] sm:$0xf]  ;;  %v275_v17 = vld [vmem:[%s879_s8 + $0xc] sm:$0xf]  ;;  %v164_v18 = vmax.bf16 %v148_v2, %v132_v6  ;;  %v70_v20 = vmax.bf16 %v54_v13, %v38_v12  ;;  %v212_v22 = vld [vmem:[%s877_s6 + $0x10] sm:$0xf] }
  0x12   :  { %v227_v21 = vmax.bf16 %v211_v5, %v195_v10  ;;  %v133_v23 = vmax.bf16 %v117_v8, %v101_v11  ;;  %v181_v24 = vld [vmem:[%s876_s5 + $0x14] sm:$0xf]  ;;  %v118_v25 = vld [vmem:[%s874_s3 + $0x18] sm:$0xf]  ;;  %v290_v26 = vmax.bf16 %v274_v0, %v258_v15  ;;  %v39_v29 = vld [vmem:[%s871_s0 + $0x1c] sm:$0xf] }
  0x13   :  { %305 = vst.msk [vmem:[%s880_s9] sm:$0xf] %vm304_vm0, %v288_v56  ;;  %306 = vst.msk [vmem:[%s880_s9 + $0x4] sm:$0xf] %vm304_vm0, %v289_v9  ;;  %v196_v27 = vmax.bf16 %v180_v7, %v164_v18  ;;  %v102_v28 = vmax.bf16 %v86_v14, %v70_v20  ;;  %v55_v30 = vld [vmem:[%s872_s1 + $0x1c] sm:$0xf] }
  0x14   :  { %v87_v31 = vld [vmem:[%s873_s2 + $0x1c] sm:$0xf]  ;;  %v259_v32 = vmax.bf16 %v243_v16, %v227_v21  ;;  %v244_v33 = vld [vmem:[%s878_s7 + $0x10] sm:$0xf]  ;;  %v165_v35 = vmax.bf16 %v149_v19, %v133_v23  ;;  %v150_v36 = vld [vmem:[%s875_s4 + $0x18] sm:$0xf]  ;;  %v71_v37 = vmax.bf16 %v55_v30, %v39_v29 }
  0x15   :  { %v276_v34 = vld [vmem:[%s879_s8 + $0x10] sm:$0xf]  ;;  %307 = vst.msk [vmem:[%s880_s9 + $0x8] sm:$0xf] %vm304_vm0, %v290_v26  ;;  %v228_v38 = vmax.bf16 %v212_v22, %v196_v27  ;;  %v213_v39 = vld [vmem:[%s877_s6 + $0x14] sm:$0xf]  ;;  %v134_v40 = vmax.bf16 %v118_v25, %v102_v28 }
  0x16   :  { %v182_v41 = vld [vmem:[%s876_s5 + $0x18] sm:$0xf]  ;;  %v119_v42 = vld [vmem:[%s874_s3 + $0x1c] sm:$0xf]  ;;  %v291_v43 = vmax.bf16 %v275_v17, %v259_v32  ;;  %v197_v44 = vmax.bf16 %v181_v24, %v165_v35  ;;  %v103_v45 = vmax.bf16 %v87_v31, %v71_v37  ;;  %v40_v46 = vld [vmem:[%s871_s0 + $0x20] sm:$0xf] }
  0x17   :  { %v56_v47 = vld [vmem:[%s872_s1 + $0x20] sm:$0xf]  ;;  %v260_v49 = vmax.bf16 %v244_v33, %v228_v38  ;;  %v245_v50 = vld [vmem:[%s878_s7 + $0x14] sm:$0xf]  ;;  %v166_v52 = vmax.bf16 %v150_v36, %v134_v40  ;;  %v151_v53 = vld [vmem:[%s875_s4 + $0x1c] sm:$0xf] }
  0x18   :  { %v88_v48 = vld [vmem:[%s873_s2 + $0x20] sm:$0xf]  ;;  %v277_v51 = vld [vmem:[%s879_s8 + $0x14] sm:$0xf]  ;;  %v72_v54 = vmax.bf16 %v56_v47, %v40_v46  ;;  %308 = vst.msk [vmem:[%s880_s9 + $0xc] sm:$0xf] %vm304_vm0, %v291_v43  ;;  %v229_v55 = vmax.bf16 %v213_v39, %v197_v44  ;;  %v135_v57 = vmax.bf16 %v119_v42, %v103_v45 }
  0x19   :  { %v214_v56 = vld [vmem:[%s877_s6 + $0x18] sm:$0xf]  ;;  %v183_v58 = vld [vmem:[%s876_s5 + $0x1c] sm:$0xf]  ;;  %v120_v59 = vld [vmem:[%s874_s3 + $0x20] sm:$0xf]  ;;  %v292_v60 = vmax.bf16 %v276_v34, %v260_v49  ;;  %v198_v61 = vmax.bf16 %v182_v41, %v166_v52 }
  0x1a   :  { %v104_v62 = vmax.bf16 %v88_v48, %v72_v54  ;;  %v41_v63 = vld [vmem:[%s871_s0 + $0x24] sm:$0xf]  ;;  %v261_v2 = vmax.bf16 %v245_v50, %v229_v55  ;;  %v246_v3 = vld [vmem:[%s878_s7 + $0x18] sm:$0xf]  ;;  %v167_v5 = vmax.bf16 %v151_v53, %v135_v57  ;;  %v152_v6 = vld [vmem:[%s875_s4 + $0x20] sm:$0xf] }
  0x1b   :  { %v57_v0 = vld [vmem:[%s872_s1 + $0x24] sm:$0xf]  ;;  %v278_v4 = vld [vmem:[%s879_s8 + $0x18] sm:$0xf]  ;;  %309 = vst.msk [vmem:[%s880_s9 + $0x10] sm:$0xf] %vm304_vm0, %v292_v60  ;;  %v230_v8 = vmax.bf16 %v214_v56, %v198_v61 }
  0x1c   :  { %v89_v1 = vld [vmem:[%s873_s2 + $0x24] sm:$0xf]  ;;  %v73_v7 = vmax.bf16 %v57_v0, %v41_v63  ;;  %v215_v9 = vld [vmem:[%s877_s6 + $0x1c] sm:$0xf]  ;;  %v136_v10 = vmax.bf16 %v120_v59, %v104_v62  ;;  %v184_v11 = vld [vmem:[%s876_s5 + $0x20] sm:$0xf]  ;;  %v293_v13 = vmax.bf16 %v277_v51, %v261_v2  ;;  %v199_v14 = vmax.bf16 %v183_v58, %v167_v5 }
  0x1d   :  { %v121_v12 = vld [vmem:[%s874_s3 + $0x24] sm:$0xf]  ;;  %v42_v16 = vld [vmem:[%s871_s0 + $0x28] sm:$0xf]  ;;  %v262_v19 = vmax.bf16 %v246_v3, %v230_v8  ;;  %v247_v20 = vld [vmem:[%s878_s7 + $0x1c] sm:$0xf] }
  0x1e   :  { %v105_v15 = vmax.bf16 %v89_v1, %v73_v7  ;;  %v58_v17 = vld [vmem:[%s872_s1 + $0x28] sm:$0xf]  ;;  %v279_v21 = vld [vmem:[%s879_s8 + $0x1c] sm:$0xf]  ;;  %v168_v22 = vmax.bf16 %v152_v6, %v136_v10  ;;  %v153_v23 = vld [vmem:[%s875_s4 + $0x24] sm:$0xf]  ;;  %v231_v25 = vmax.bf16 %v215_v9, %v199_v14 }
  0x1f   :  { %v90_v18 = vld [vmem:[%s873_s2 + $0x28] sm:$0xf]  ;;  %v74_v24 = vmax.bf16 %v58_v17, %v42_v16  ;;  %310 = vst.msk [vmem:[%s880_s9 + $0x14] sm:$0xf] %vm304_vm0, %v293_v13  ;;  %v216_v26 = vld [vmem:[%s877_s6 + $0x20] sm:$0xf]  ;;  %v294_v30 = vmax.bf16 %v278_v4, %v262_v19 }
  0x20   :  { %v137_v27 = vmax.bf16 %v121_v12, %v105_v15  ;;  %v185_v28 = vld [vmem:[%s876_s5 + $0x24] sm:$0xf]  ;;  %v122_v29 = vld [vmem:[%s874_s3 + $0x28] sm:$0xf]  ;;  %v200_v31 = vmax.bf16 %v184_v11, %v168_v22  ;;  %v43_v33 = vld [vmem:[%s871_s0 + $0x2c] sm:$0xf]  ;;  %v263_v36 = vmax.bf16 %v247_v20, %v231_v25 }
  0x21   :  { %v106_v32 = vmax.bf16 %v90_v18, %v74_v24  ;;  %v59_v34 = vld [vmem:[%s872_s1 + $0x2c] sm:$0xf]  ;;  %v248_v37 = vld [vmem:[%s878_s7 + $0x20] sm:$0xf]  ;;  %v154_v40 = vld [vmem:[%s875_s4 + $0x28] sm:$0xf] }
  0x22   :  { %v91_v35 = vld [vmem:[%s873_s2 + $0x2c] sm:$0xf]  ;;  %v280_v38 = vld [vmem:[%s879_s8 + $0x20] sm:$0xf]  ;;  %v169_v39 = vmax.bf16 %v153_v23, %v137_v27  ;;  %v75_v41 = vmax.bf16 %v59_v34, %v43_v33  ;;  %311 = vst.msk [vmem:[%s880_s9 + $0x18] sm:$0xf] %vm304_vm0, %v294_v30  ;;  %v232_v42 = vmax.bf16 %v216_v26, %v200_v31  ;;  %v295_v47 = vmax.bf16 %v279_v21, %v263_v36 }
  0x23   :  { %v217_v43 = vld [vmem:[%s877_s6 + $0x24] sm:$0xf]  ;;  %v138_v44 = vmax.bf16 %v122_v29, %v106_v32  ;;  %v186_v45 = vld [vmem:[%s876_s5 + $0x28] sm:$0xf]  ;;  %v123_v46 = vld [vmem:[%s874_s3 + $0x2c] sm:$0xf] }
  0x24   :  { %v201_v48 = vmax.bf16 %v185_v28, %v169_v39  ;;  %v107_v49 = vmax.bf16 %v91_v35, %v75_v41  ;;  %v44_v50 = vld [vmem:[%s871_s0 + $0x30] sm:$0xf]  ;;  %v264_v53 = vmax.bf16 %v248_v37, %v232_v42  ;;  %v249_v54 = vld [vmem:[%s878_s7 + $0x24] sm:$0xf]  ;;  %v155_v57 = vld [vmem:[%s875_s4 + $0x2c] sm:$0xf] }
  0x25   :  { %v60_v51 = vld [vmem:[%s872_s1 + $0x30] sm:$0xf]  ;;  %v281_v55 = vld [vmem:[%s879_s8 + $0x24] sm:$0xf]  ;;  %v170_v56 = vmax.bf16 %v154_v40, %v138_v44  ;;  %312 = vst.msk [vmem:[%s880_s9 + $0x1c] sm:$0xf] %vm304_vm0, %v295_v47 }
  0x26   :  { %v92_v52 = vld [vmem:[%s873_s2 + $0x30] sm:$0xf]  ;;  %v76_v58 = vmax.bf16 %v60_v51, %v44_v50  ;;  %v233_v59 = vmax.bf16 %v217_v43, %v201_v48  ;;  %v218_v60 = vld [vmem:[%s877_s6 + $0x28] sm:$0xf]  ;;  %v139_v61 = vmax.bf16 %v123_v46, %v107_v49  ;;  %v187_v62 = vld [vmem:[%s876_s5 + $0x2c] sm:$0xf]  ;;  %v296_v0 = vmax.bf16 %v280_v38, %v264_v53 }
  0x27   :  { %v124_v63 = vld [vmem:[%s874_s3 + $0x30] sm:$0xf]  ;;  %v202_v1 = vmax.bf16 %v186_v45, %v170_v56  ;;  %v45_v3 = vld [vmem:[%s871_s0 + $0x34] sm:$0xf]  ;;  %v250_v7 = vld [vmem:[%s878_s7 + $0x28] sm:$0xf] }
  0x28   :  { %v108_v2 = vmax.bf16 %v92_v52, %v76_v58  ;;  %v61_v4 = vld [vmem:[%s872_s1 + $0x34] sm:$0xf]  ;;  %v265_v6 = vmax.bf16 %v249_v54, %v233_v59  ;;  %v282_v8 = vld [vmem:[%s879_s8 + $0x28] sm:$0xf]  ;;  %v171_v9 = vmax.bf16 %v155_v57, %v139_v61  ;;  %v156_v10 = vld [vmem:[%s875_s4 + $0x30] sm:$0xf] }
  0x29   :  { %v93_v5 = vld [vmem:[%s873_s2 + $0x34] sm:$0xf]  ;;  %v77_v11 = vmax.bf16 %v61_v4, %v45_v3  ;;  %313 = vst.msk [vmem:[%s880_s9 + $0x20] sm:$0xf] %vm304_vm0, %v296_v0  ;;  %v234_v12 = vmax.bf16 %v218_v60, %v202_v1  ;;  %v219_v13 = vld [vmem:[%s877_s6 + $0x2c] sm:$0xf] }
  0x2a   :  { %v140_v14 = vmax.bf16 %v124_v63, %v108_v2  ;;  %v188_v15 = vld [vmem:[%s876_s5 + $0x30] sm:$0xf]  ;;  %v125_v16 = vld [vmem:[%s874_s3 + $0x34] sm:$0xf]  ;;  %v297_v17 = vmax.bf16 %v281_v55, %v265_v6  ;;  %v203_v18 = vmax.bf16 %v187_v62, %v171_v9  ;;  %v46_v20 = vld [vmem:[%s871_s0 + $0x38] sm:$0xf] }
  0x2b   :  { %v109_v19 = vmax.bf16 %v93_v5, %v77_v11  ;;  %v62_v21 = vld [vmem:[%s872_s1 + $0x38] sm:$0xf]  ;;  %v266_v23 = vmax.bf16 %v250_v7, %v234_v12  ;;  %v251_v24 = vld [vmem:[%s878_s7 + $0x2c] sm:$0xf]  ;;  %v157_v27 = vld [vmem:[%s875_s4 + $0x34] sm:$0xf] }
  0x2c   :  { %v94_v22 = vld [vmem:[%s873_s2 + $0x38] sm:$0xf]  ;;  %v283_v25 = vld [vmem:[%s879_s8 + $0x2c] sm:$0xf]  ;;  %v172_v26 = vmax.bf16 %v156_v10, %v140_v14  ;;  %v78_v28 = vmax.bf16 %v62_v21, %v46_v20  ;;  %314 = vst.msk [vmem:[%s880_s9 + $0x24] sm:$0xf] %vm304_vm0, %v297_v17  ;;  %v235_v29 = vmax.bf16 %v219_v13, %v203_v18 }
  0x2d   :  { %v220_v30 = vld [vmem:[%s877_s6 + $0x30] sm:$0xf]  ;;  %v141_v31 = vmax.bf16 %v125_v16, %v109_v19  ;;  %v189_v32 = vld [vmem:[%s876_s5 + $0x34] sm:$0xf]  ;;  %v126_v33 = vld [vmem:[%s874_s3 + $0x38] sm:$0xf]  ;;  %v298_v34 = vmax.bf16 %v282_v8, %v266_v23 }
  0x2e   :  { %v204_v35 = vmax.bf16 %v188_v15, %v172_v26  ;;  %v110_v36 = vmax.bf16 %v94_v22, %v78_v28  ;;  %v47_v37 = vld [vmem:[%s871_s0 + $0x3c] sm:$0xf]  ;;  %v267_v40 = vmax.bf16 %v251_v24, %v235_v29  ;;  %v252_v41 = vld [vmem:[%s878_s7 + $0x30] sm:$0xf]  ;;  %v158_v43 = vld [vmem:[%s875_s4 + $0x38] sm:$0xf] }
  0x2f   :  { %v63_v38 = vld [vmem:[%s872_s1 + $0x3c] sm:$0xf]  ;;  %v173_v42 = vmax.bf16 %v157_v27, %v141_v31  ;;  %315 = vst.msk [vmem:[%s880_s9 + $0x28] sm:$0xf] %vm304_vm0, %v298_v34  ;;  %v221_v46 = vld [vmem:[%s877_s6 + $0x34] sm:$0xf] }
  0x30   :  { %v95_v39 = vld [vmem:[%s873_s2 + $0x3c] sm:$0xf]  ;;  %v79_v44 = vmax.bf16 %v63_v38, %v47_v37  ;;  %v236_v45 = vmax.bf16 %v220_v30, %v204_v35  ;;  %v142_v47 = vmax.bf16 %v126_v33, %v110_v36  ;;  %v299_v49 = vmax.bf16 %v283_v25, %v267_v40  ;;  %v284_v50 = vld [vmem:[%s879_s8 + $0x30] sm:$0xf]  ;;  %v190_v52 = vld [vmem:[%s876_s5 + $0x38] sm:$0xf] }
  0x31   :  { %v127_v48 = vld [vmem:[%s874_s3 + $0x3c] sm:$0xf]  ;;  %v205_v51 = vmax.bf16 %v189_v32, %v173_v42  ;;  %v253_v55 = vld [vmem:[%s878_s7 + $0x34] sm:$0xf]  ;;  %v222_v59 = vld [vmem:[%s877_s6 + $0x38] sm:$0xf] }
  0x32   :  { %v111_v53 = vmax.bf16 %v95_v39, %v79_v44  ;;  %v268_v54 = vmax.bf16 %v252_v41, %v236_v45  ;;  %v174_v56 = vmax.bf16 %v158_v43, %v142_v47  ;;  %v159_v57 = vld [vmem:[%s875_s4 + $0x3c] sm:$0xf]  ;;  %316 = vst.msk [vmem:[%s880_s9 + $0x2c] sm:$0xf] %vm304_vm0, %v299_v49  ;;  %v285_v62 = vld [vmem:[%s879_s8 + $0x34] sm:$0xf] }
  0x33   :  { %v237_v58 = vmax.bf16 %v221_v46, %v205_v51  ;;  %v191_v0 = vld [vmem:[%s876_s5 + $0x3c] sm:$0xf]  ;;  %v254_v2 = vld [vmem:[%s878_s7 + $0x38] sm:$0xf] }
  0x34   :  { %v143_v60 = vmax.bf16 %v127_v48, %v111_v53  ;;  %v300_v61 = vmax.bf16 %v284_v50, %v268_v54  ;;  %v206_v63 = vmax.bf16 %v190_v52, %v174_v56  ;;  %v223_v5 = vld [vmem:[%s877_s6 + $0x3c] sm:$0xf]  ;;  %v286_v7 = vld [vmem:[%s879_s8 + $0x38] sm:$0xf] }
  0x35   :  { %v269_v1 = vmax.bf16 %v253_v55, %v237_v58  ;;  %v255_v10 = vld [vmem:[%s878_s7 + $0x3c] sm:$0xf] }
  0x36   :  { %v175_v3 = vmax.bf16 %v159_v57, %v143_v60  ;;  %317 = vst.msk [vmem:[%s880_s9 + $0x30] sm:$0xf] %vm304_vm0, %v300_v61  ;;  %v238_v4 = vmax.bf16 %v222_v59, %v206_v63  ;;  %v287_v13 = vld [vmem:[%s879_s8 + $0x3c] sm:$0xf] }
  0x37   :  { %v301_v6 = vmax.bf16 %v285_v62, %v269_v1 }
  0x38   :  { %v207_v8 = vmax.bf16 %v191_v0, %v175_v3  ;;  %v270_v9 = vmax.bf16 %v254_v2, %v238_v4 }
  0x39   :  { %318 = vst.msk [vmem:[%s880_s9 + $0x34] sm:$0xf] %vm304_vm0, %v301_v6 }
  0x3a   :  { %v239_v11 = vmax.bf16 %v223_v5, %v207_v8  ;;  %v302_v12 = vmax.bf16 %v286_v7, %v270_v9 }
  0x3c   :  { %v271_v14 = vmax.bf16 %v255_v10, %v239_v11  ;;  %319 = vst.msk [vmem:[%s880_s9 + $0x38] sm:$0xf] %vm304_vm0, %v302_v12 }
  0x3e   :  { %v303_v15 = vmax.bf16 %v287_v13, %v271_v14 }
  0x40   :  { %320 = vst.msk [vmem:[%s880_s9 + $0x3c] sm:$0xf] %vm304_vm0, %v303_v15 }

// kernel: variant_resnet_forward.24
= control target key start
LH: loop header
LB: loop body
LE: loop exit
PB: predicated region body
PF: predicated region fallthrough
CT: control target
= control target key end

     0   :  { %s1273_s15 = smov 0   ;;  %s1275_s16 = smov 0   ;;  %s1444_s0 = inlined_call_operand.vmem [shape: bf16[128,640], index: 0, kind: input, shape index: {}]   ;;  %s1445_s1 = inlined_call_operand.vmem [shape: bf16[640,128], index: 1, kind: input, shape index: {}]   ;;  %s1446_s2 = inlined_call_operand.vmem [shape: f32[1,128], index: 2, kind: input, shape index: {}]   ;;  %s1447_s3 = inlined_call_operand.vmem [shape: f32[1,128], index: 3, kind: input, shape index: {}]   ;;  %s1448_s4 = inlined_call_operand.vmem [shape: bf16[128,128], index: 4, kind: output, shape index: {}]  }
   0x1   :  { %s1277_s17 = smov 0   ;;  %s1279_s18 = smov 0  }
   0x2   :  { %s1281_s19 = smov 0  }
   0x3 LB: > { %s26_s20 = sadd.s32 1, %s1241_s18  ;;  %p49_p1 = scmp.ne.s32.totalorder %s1233_s16, %s1229_s15  ;;  %s1245_s19 = sphi %s1281_s19, %s14_s19   ;;  %s1241_s18 = sphi %s1279_s18, %s1452_s18   ;;  %s1237_s17 = sphi %s1277_s17, %s1451_s17   ;;  %s1233_s16 = sphi %s1275_s16, %s1450_s16   ;;  %s1229_s15 = sphi %s1273_s15, %s1449_s15  }
   0x4   : > { %p27_p0 = scmp.ge.s32.totalorder %s26_s20, 5  ;;  %p50_p2 = scmp.eq.s32.totalorder %s1245_s19, 0 }
   0x5   : > { %s42_s22 = sadd.s32 1, %s1233_s16  ;;  %p976_p5 = scmp.ge.s32.totalorder %s1245_s19, 5 }
   0x6   : > { %s1454_s20 = smov (%p27_p0, %s26_s20), 0  ;;  %p51_p3 = por %p50_p2, %p49_p1 }
   0x7   : > { %s38_s21 = ssub.s32 %s1241_s18, %s1454_s20  ;;  %195 = sbr.rel (%p976_p5) target bundleno = 28 (0x1c), region = 24 }
   0x8   : > { %p40_p4 = scmp.eq.s32.totalorder %s38_s21, 0 }
   0xa   : > { %s1308_s23 = scalar_select %p40_p4, %s1233_s16, %s42_s22  }
   0xe   : > { %198 = sbr.rel (!%p51_p3) target bundleno = 28 (0x1c), region = 28  ;;  %s200_s24 = sand.u32 (%p51_p3), 1, %s1233_s16  }
   0xf   : > { %s978_s25 = sshll.u32 (%p51_p3), %s1241_s18, 2  ;;  %s977_s26 = sshll.u32 (%p51_p3), %s200_s24, 6 }
  0x10   : > { %s1316_s29 = scalar_lea.vmem (%p51_p3), %s1444_s0, %s978_s25  ;;  %s202_s30 = scalar_lea.vmem (%p51_p3), [#allocation3], %s977_s26 }
  0x11   : > { %v223_v0 = vld [vmem:[%s1316_s29] sm:$0xf] (%p51_p3)  ;;  %v225_v1 = vld [vmem:[%s1316_s29 + $0x14] sm:$0xf] (%p51_p3)  ;;  %v227_v2 = vld [vmem:[%s1316_s29 + $0x28] sm:$0xf] (%p51_p3) }
  0x12   : > { %224 = vst [vmem:[%s202_s30] sm:$0xf] (%p51_p3), %v223_v0  ;;  %226 = vst [vmem:[%s202_s30 + $0x4] sm:$0xf] (%p51_p3), %v225_v1  ;;  %v229_v3 = vld [vmem:[%s1316_s29 + $0x3c] sm:$0xf] (%p51_p3) }
  0x13   : > { %v231_v4 = vld [vmem:[%s1316_s29 + $0x50] sm:$0xf] (%p51_p3)  ;;  %228 = vst [vmem:[%s202_s30 + $0x8] sm:$0xf] (%p51_p3), %v227_v2  ;;  %230 = vst [vmem:[%s202_s30 + $0xc] sm:$0xf] (%p51_p3), %v229_v3 }
  0x14   : > { %232 = vst [vmem:[%s202_s30 + $0x10] sm:$0xf] (%p51_p3), %v231_v4  ;;  %v233_v5 = vld [vmem:[%s1316_s29 + $0x64] sm:$0xf] (%p51_p3)  ;;  %v235_v6 = vld [vmem:[%s1316_s29 + $0x78] sm:$0xf] (%p51_p3) }
  0x15   : > { %v237_v7 = vld [vmem:[%s1316_s29 + $0x8c] sm:$0xf]  ;;  %234 = vst [vmem:[%s202_s30 + $0x14] sm:$0xf] %v233_v5  ;;  %236 = vst [vmem:[%s202_s30 + $0x18] sm:$0xf] %v235_v6 }
  0x16   : > { %238 = vst [vmem:[%s202_s30 + $0x1c] sm:$0xf] %v237_v7  ;;  %v239_v8 = vld [vmem:[%s1316_s29 + $0xa0] sm:$0xf]  ;;  %v241_v9 = vld [vmem:[%s1316_s29 + $0xb4] sm:$0xf] }
  0x17   : > { %v243_v10 = vld [vmem:[%s1316_s29 + $0xc8] sm:$0xf]  ;;  %240 = vst [vmem:[%s202_s30 + $0x20] sm:$0xf] %v239_v8  ;;  %242 = vst [vmem:[%s202_s30 + $0x24] sm:$0xf] %v241_v9 }
  0x18   : > { %244 = vst [vmem:[%s202_s30 + $0x28] sm:$0xf] %v243_v10  ;;  %v245_v11 = vld [vmem:[%s1316_s29 + $0xdc] sm:$0xf]  ;;  %v247_v12 = vld [vmem:[%s1316_s29 + $0xf0] sm:$0xf] }
  0x19   : > { %v249_v13 = vld [vmem:[%s1316_s29 + $0x104] sm:$0xf]  ;;  %246 = vst [vmem:[%s202_s30 + $0x2c] sm:$0xf] %v245_v11  ;;  %248 = vst [vmem:[%s202_s30 + $0x30] sm:$0xf] %v247_v12 }
  0x1a   : > { %250 = vst [vmem:[%s202_s30 + $0x34] sm:$0xf] %v249_v13  ;;  %v251_v14 = vld [vmem:[%s1316_s29 + $0x118] sm:$0xf]  ;;  %v253_v15 = vld [vmem:[%s1316_s29 + $0x12c] sm:$0xf] }
  0x1b   : > { %252 = vst [vmem:[%s202_s30 + $0x38] sm:$0xf] %v251_v14  ;;  %254 = vst [vmem:[%s202_s30 + $0x3c] sm:$0xf] %v253_v15 }
  0x1c PF: > { %p979_p6 = scmp.ge.s32.totalorder %s1245_s19, 1  ;;  %p320_p7 = scmp.lt.s32.totalorder %s1245_s19, 6 }
  0x1e   : > { %p321_p8 = pnand %p979_p6, %p320_p7 }
  0x1f   : > { %s327_s5 = sand.u32 (!%p321_p8), 1, %s1229_s15   ;;  %s981_s6 = sshll.u32 (!%p321_p8), %s1237_s17, 4 }
  0x20   : > { %324 = sbr.rel (%p321_p8) target bundleno = 325 (0x145), region = 73  ;;  %s980_s7 = sshll.u32 (!%p321_p8), %s327_s5, 6 }
  0x21   : > { %p371_p9 = scmp.lt.s32.totalorder (!%p321_p8), %s981_s6, 79  ;;  %s1343_s12 = scalar_lea.vmem (!%p321_p8), [#allocation3], %s980_s7 }
  0x22   : > { %p983_p10 = scmp.ne.s32.totalorder (!%p321_p8), %s1237_s17, 0 }
  0x27   : > { %s1456_s6 = smov (!%p371_p9, %s981_s6), 79  ;;  %398 = sbr.rel (%p983_p10) target bundleno = 49 (0x31), region = 81 }
  0x28   : > { %s982_s8 = sshll.u32 %s1456_s6, 2  ;;  %v1247_v16 = vmov (!%p983_p10), 0.0  }
  0x29   : > { %s1341_s11 = scalar_lea.vmem %s1445_s1, %s982_s8  ;;  %399 = vst [vmem:[#allocation2] sm:$0xff] (!%p983_p10), %v1247_v16  ;;  %400 = vst [vmem:[#allocation2 + $0x8] sm:$0xff] (!%p983_p10), %v1247_v16 }
  0x2a   : > { %401 = vst [vmem:[#allocation2 + $0x10] sm:$0xff] (!%p983_p10), %v1247_v16  ;;  %402 = vst [vmem:[#allocation2 + $0x18] sm:$0xff] (!%p983_p10), %v1247_v16 }
  0x2b   : > { %403 = vst [vmem:[#allocation2 + $0x20] sm:$0xff] (!%p983_p10), %v1247_v16  ;;  %404 = vst [vmem:[#allocation2 + $0x28] sm:$0xff] (!%p983_p10), %v1247_v16 }
  0x2c   : > { %405 = vst [vmem:[#allocation2 + $0x30] sm:$0xff] (!%p983_p10), %v1247_v16  ;;  %406 = vst [vmem:[#allocation2 + $0x38] sm:$0xff] (!%p983_p10), %v1247_v16 }
  0x2d   : > { %407 = vst [vmem:[#allocation2 + $0x40] sm:$0xff] (!%p983_p10), %v1247_v16  ;;  %408 = vst [vmem:[#allocation2 + $0x48] sm:$0xff] (!%p983_p10), %v1247_v16 }
  0x2e   : > { %409 = vst [vmem:[#allocation2 + $0x50] sm:$0xff] %v1247_v16  ;;  %410 = vst [vmem:[#allocation2 + $0x58] sm:$0xff] %v1247_v16 }
  0x2f   : > { %411 = vst [vmem:[#allocation2 + $0x60] sm:$0xff] %v1247_v16  ;;  %412 = vst [vmem:[#allocation2 + $0x68] sm:$0xff] %v1247_v16 }
  0x30   : > { %413 = vst [vmem:[#allocation2 + $0x70] sm:$0xff] %v1247_v16  ;;  %414 = vst [vmem:[#allocation2 + $0x78] sm:$0xff] %v1247_v16 }
  0x31 PF: > { %v1191_v17 = vld [vmem:[%s1341_s11] sm:$0xff]   ;;  %v1192_v18 = vld [vmem:[%s1341_s11 + $0x8] sm:$0xff]   ;;  %v1193_v19 = vld [vmem:[%s1341_s11 + $0x10] sm:$0xff]   ;;  %p1000_p11 = scmp.ne.s32.totalorder %s1237_s17, 4 }
  0x32   : > { %1102 = vmatprep.subr.bf16.mxu0 %v1191_v17  ;;  %1134 = vmatprep.subr.bf16.mxu1 %v1191_v17  ;;  %v1194_v20 = vld [vmem:[%s1341_s11 + $0x18] sm:$0xff]   ;;  %v1199_v21 = vld [vmem:[%s1343_s12] sm:$0xff]   ;;  %v1196_v24 = vld [vmem:[%s1341_s11 + $0x28] sm:$0xff]  }
  0x33   : > { %1103 = vmatpush3.bf16.msra.mxu0 %v1191_v17  ;;  %1142 = vmatpush3.bf16.msra.mxu1 %v1191_v17  ;;  %v1200_v22 = vld [vmem:[%s1343_s12 + $0x20] sm:$0xff]   ;;  %v1197_v25 = vld [vmem:[%s1341_s11 + $0x30] sm:$0xff]   ;;  %v1198_v26 = vld [vmem:[%s1341_s11 + $0x38] sm:$0xff]  }
  0x34   : > { %1104 = vmatprep.subr.bf16.mxu0 %v1192_v18  ;;  %1135 = vmatprep.subr.bf16.mxu1 %v1192_v18  ;;  %v1195_v23 = vld [vmem:[%s1341_s11 + $0x20] sm:$0xff]   ;;  %v1201_v27 = vld [vmem:[%s1343_s12 + $0x8] sm:$0xff]   ;;  %v1203_v29 = vld [vmem:[%s1343_s12 + $0x10] sm:$0xff]  }
  0x35   : > { %1118 = vmatprep.mubr.bf16.mxu0 %v1199_v21  ;;  %1126 = vmatprep.mubr.bf16.mxu1 %v1200_v22  ;;  %v1202_v28 = vld [vmem:[%s1343_s12 + $0x28] sm:$0xff]   ;;  %v1204_v30 = vld [vmem:[%s1343_s12 + $0x30] sm:$0xff]   ;;  %v1205_v31 = vld [vmem:[%s1343_s12 + $0x18] sm:$0xff]  }
  0x36   : > { %v1206_v32 = vld [vmem:[%s1343_s12 + $0x38] sm:$0xff]   ;;  %v417_v33 = vld [vmem:[#allocation2 + $0x10] sm:$0xff]  ;;  %v415_v35 = vld [vmem:[#allocation2] sm:$0xff] }
  0x37   : > { %1105 = vmatpush3.bf16.msra.mxu0 %v1192_v18  ;;  %1143 = vmatpush3.bf16.msra.mxu1 %v1192_v18  ;;  %v425_v34 = vld [vmem:[#allocation2 + $0x50] sm:$0xff]  ;;  %v423_v36 = vld [vmem:[#allocation2 + $0x40] sm:$0xff]  ;;  %v418_v39 = vld [vmem:[#allocation2 + $0x18] sm:$0xff] }
  0x38   : > { %1106 = vmatprep.subr.bf16.mxu0 %v1193_v19  ;;  %1136 = vmatprep.subr.bf16.mxu1 %v1193_v19  ;;  %v426_v40 = vld [vmem:[#allocation2 + $0x58] sm:$0xff]  ;;  %v416_v45 = vld [vmem:[#allocation2 + $0x8] sm:$0xff]  ;;  %v421_v57 = vld [vmem:[#allocation2 + $0x30] sm:$0xff] }
  0x39   : > { %v424_v46 = vld [vmem:[#allocation2 + $0x48] sm:$0xff]  ;;  %v429_v58 = vld [vmem:[#allocation2 + $0x70] sm:$0xff]  ;;  %v419_v59 = vld [vmem:[#allocation2 + $0x20] sm:$0xff] }
  0x3a   : > { %v427_v60 = vld [vmem:[#allocation2 + $0x60] sm:$0xff]  ;;  %v422_v63 = vld [vmem:[#allocation2 + $0x38] sm:$0xff]  ;;  %v420_v5 = vld [vmem:[#allocation2 + $0x28] sm:$0xff] }
  0x3b   : > { %1107 = vmatpush3.bf16.msra.mxu0 %v1193_v19  ;;  %1144 = vmatpush3.bf16.msra.mxu1 %v1193_v19  ;;  %v430_v0 = vld [vmem:[#allocation2 + $0x78] sm:$0xff]  ;;  %v428_v6 = vld [vmem:[#allocation2 + $0x68] sm:$0xff]  ;;  %v1366_v19 = vld [vmem:[%s1446_s2] ss:$0 sm:$0xff] (!%p1000_p11) }
  0x3c   : > { %1108 = vmatprep.subr.bf16.mxu0 %v1194_v20  ;;  %1137 = vmatprep.subr.bf16.mxu1 %v1194_v20  ;;  %v1373_v22 = vld [vmem:[%s1447_s3] ss:$0 sm:$0xff] (!%p1000_p11) }
  0x3f   : > { %1109 = vmatpush3.bf16.msra.mxu0 %v1194_v20  ;;  %1145 = vmatpush3.bf16.msra.mxu1 %v1194_v20 }
  0x40   : > { %1110 = vmatprep.subr.bf16.mxu0 %v1195_v23  ;;  %1138 = vmatprep.subr.bf16.mxu1 %v1195_v23 }
  0x43   : > { %1111 = vmatpush3.bf16.msra.mxu0 %v1195_v23  ;;  %1146 = vmatpush3.bf16.msra.mxu1 %v1195_v23 }
  0x44   : > { %1112 = vmatprep.subr.bf16.mxu0 %v1196_v24  ;;  %1139 = vmatprep.subr.bf16.mxu1 %v1196_v24 }
  0x47   : > { %1113 = vmatpush3.bf16.msra.mxu0 %v1196_v24  ;;  %1147 = vmatpush3.bf16.msra.mxu1 %v1196_v24 }
  0x48   : > { %1114 = vmatprep.subr.bf16.mxu0 %v1197_v25  ;;  %1140 = vmatprep.subr.bf16.mxu1 %v1197_v25 }
  0x4b   : > { %1115 = vmatpush3.bf16.msra.mxu0 %v1197_v25  ;;  %1148 = vmatpush3.bf16.msra.mxu1 %v1197_v25 }
  0x4c   : > { %1116 = vmatprep.subr.bf16.mxu0 %v1198_v26  ;;  %1141 = vmatprep.subr.bf16.mxu1 %v1198_v26 }
  0x4f   : > { %1117 = vmatpush3.bf16.msra.mxu0 %v1198_v26  ;;  %1149 = vmatpush3.bf16.msra.mxu1 %v1198_v26 }
  0x52   : > { %1119 = vmatmul.mubr.bf16.vlgmr.msra.gmra.mrb[0].mxu0 %v1201_v27  ;;  %1127 = vmatmul.mubr.bf16.vlgmr.msra.gmra.mrb[0].mxu1 %v1202_v28 }
  0x53   : > { %1122 = vmatprep.mubr.bf16.mxu0 %v1203_v29  ;;  %1130 = vmatprep.mubr.bf16.mxu1 %v1204_v30 }
  0x5a   : > { %1123 = vmatmul.mubr.bf16.gmra.mrb[4].mxu0 %v1205_v31  ;;  %1131 = vmatmul.mubr.bf16.gmra.mrb[4].mxu1 %v1206_v32 }
 0x125   : > { %v1120_v37 = vpop.f32.mrb[0].mxu0  ;;  %v1128_v38 = vpop.f32.mrb[0].mxu1 }
 0x126   : > { %v658_v41 = vadd.f32 %v1120_v37, %v417_v33  ;;  %v666_v42 = vadd.f32 %v1128_v38, %v425_v34  ;;  %v593_v43 = vpop.f32.mrb[1].mxu0  ;;  %v625_v44 = vpop.f32.mrb[1].mxu1 }
 0x127   : > { %v656_v47 = vadd.f32 %v593_v43, %v415_v35  ;;  %v664_v48 = vadd.f32 %v625_v44, %v423_v36  ;;  %v1121_v49 = vpop.f32.mrb[2].mxu0  ;;  %v1129_v50 = vpop.f32.mrb[2].mxu1 }
 0x128   : > { %674 = vst [vmem:[#allocation2 + $0x10] sm:$0xff] %v658_v41  ;;  %682 = vst [vmem:[#allocation2 + $0x50] sm:$0xff] %v666_v42  ;;  %v659_v51 = vadd.f32 %v1121_v49, %v418_v39  ;;  %v667_v52 = vadd.f32 %v1129_v50, %v426_v40  ;;  %v596_v53 = vpop.f32.mrb[3].mxu0  ;;  %v628_v54 = vpop.f32.mrb[3].mxu1 }
 0x129   : > { %672 = vst [vmem:[#allocation2] sm:$0xff] %v656_v47  ;;  %680 = vst [vmem:[#allocation2 + $0x40] sm:$0xff] %v664_v48  ;;  %v657_v55 = vadd.f32 %v596_v53, %v416_v45  ;;  %v665_v56 = vadd.f32 %v628_v54, %v424_v46 }
 0x12a   : > { %675 = vst [vmem:[#allocation2 + $0x18] sm:$0xff] %v659_v51  ;;  %683 = vst [vmem:[#allocation2 + $0x58] sm:$0xff] %v667_v52 }
 0x12b   : > { %673 = vst [vmem:[#allocation2 + $0x8] sm:$0xff] %v657_v55  ;;  %681 = vst [vmem:[#allocation2 + $0x48] sm:$0xff] %v665_v56 }
 0x12d   : > { %v1124_v61 = vpop.f32.mrb[4].mxu0  ;;  %v1132_v62 = vpop.f32.mrb[4].mxu1  ;;  %691 = sbr.rel (%p1000_p11) target bundleno = 325 (0x145), region = 85 }
 0x12e   : > { %v662_v1 = vadd.f32 %v1124_v61, %v421_v57  ;;  %v670_v2 = vadd.f32 %v1132_v62, %v429_v58  ;;  %v609_v3 = vpop.f32.mrb[5].mxu0  ;;  %v641_v4 = vpop.f32.mrb[5].mxu1 }
 0x12f   : > { %v660_v7 = vadd.f32 %v609_v3, %v419_v59  ;;  %v668_v8 = vadd.f32 %v641_v4, %v427_v60  ;;  %v1125_v9 = vpop.f32.mrb[6].mxu0  ;;  %v1133_v10 = vpop.f32.mrb[6].mxu1  ;;  %v694_v23 = vld [vmem:[#allocation2 + $0x10] sm:$0xff] (!%p1000_p11) }
 0x130   : > { %678 = vst [vmem:[#allocation2 + $0x30] sm:$0xff] %v662_v1  ;;  %686 = vst [vmem:[#allocation2 + $0x70] sm:$0xff] %v670_v2  ;;  %v663_v11 = vadd.f32 %v1125_v9, %v422_v63  ;;  %v671_v12 = vadd.f32 %v1133_v10, %v430_v0  ;;  %v612_v13 = vpop.f32.mrb[7].mxu0  ;;  %v644_v14 = vpop.f32.mrb[7].mxu1  ;;  %v692_v17 = vld [vmem:[#allocation2] sm:$0xff] (!%p1000_p11)  ;;  %v717_v25 = vmul.f32 (!%p1000_p11), %v1366_v19, %v694_v23  ;;  %v702_v49 = vld [vmem:[#allocation2 + $0x50] sm:$0xff] (!%p1000_p11) }
 0x131   : > { %676 = vst [vmem:[#allocation2 + $0x20] sm:$0xff] %v660_v7  ;;  %684 = vst [vmem:[#allocation2 + $0x60] sm:$0xff] %v668_v8  ;;  %v661_v15 = vadd.f32 %v612_v13, %v420_v5  ;;  %v669_v16 = vadd.f32 %v644_v14, %v428_v6  ;;  %v715_v20 = vmul.f32 (!%p1000_p11), %v1366_v19, %v692_v17  ;;  %v695_v24 = vld [vmem:[#allocation2 + $0x18] sm:$0xff] (!%p1000_p11)  ;;  %v700_v39 = vld [vmem:[#allocation2 + $0x40] sm:$0xff] (!%p1000_p11) }
 0x132   : > { %679 = vst [vmem:[#allocation2 + $0x38] sm:$0xff] %v663_v11  ;;  %687 = vst [vmem:[#allocation2 + $0x78] sm:$0xff] %v671_v12  ;;  %v693_v18 = vld [vmem:[#allocation2 + $0x8] sm:$0xff] (!%p1000_p11)  ;;  %v718_v26 = vmul.f32 (!%p1000_p11), %v1366_v19, %v695_v24  ;;  %v740_v35 = vadd.f32 (!%p1000_p11), %v1373_v22, %v717_v25  ;;  %v703_v50 = vld [vmem:[#allocation2 + $0x58] sm:$0xff] (!%p1000_p11)  ;;  %v723_v54 = vmul.f32 (!%p1000_p11), %v1366_v19, %v700_v39 }
 0x133   : > { %677 = vst [vmem:[#allocation2 + $0x28] sm:$0xff] %v661_v15  ;;  %685 = vst [vmem:[#allocation2 + $0x68] sm:$0xff] %v669_v16  ;;  %v716_v21 = vmul.f32 (!%p1000_p11), %v1366_v19, %v693_v18  ;;  %v738_v30 = vadd.f32 (!%p1000_p11), %v1373_v22, %v715_v20  ;;  %v701_v44 = vld [vmem:[#allocation2 + $0x48] sm:$0xff] (!%p1000_p11)  ;;  %v725_v0 = vmul.f32 (!%p1000_p11), %v1366_v19, %v702_v49 }
 0x134   : > { %v741_v36 = vadd.f32 %v1373_v22, %v718_v26  ;;  %v756_v45 = vmax.f32 %v740_v35, 0.0  ;;  %v724_v60 = vmul.f32 %v1366_v19, %v701_v44  ;;  %v746_v63 = vadd.f32 %v1373_v22, %v723_v54 }
 0x135   : > { %v739_v31 = vadd.f32 %v1373_v22, %v716_v21  ;;  %v754_v40 = vmax.f32 %v738_v30, 0.0  ;;  %v726_v1 = vmul.f32 %v1366_v19, %v703_v50  ;;  %v748_v8 = vadd.f32 %v1373_v22, %v725_v0 }
 0x136   : > { %v757_v46 = vmax.f32 %v741_v36, 0.0  ;;  %v747_v4 = vadd.f32 %v1373_v22, %v724_v60  ;;  %v762_v7 = vmax.f32 %v746_v63, 0.0 }
 0x137   : > { %v698_v29 = vld [vmem:[#allocation2 + $0x30] sm:$0xff]  ;;  %v755_v41 = vmax.f32 %v739_v31, 0.0  ;;  %v749_v9 = vadd.f32 %v1373_v22, %v726_v1  ;;  %v764_v15 = vmax.f32 %v748_v8, 0.0 }
 0x138   : > { %v696_v27 = vld [vmem:[#allocation2 + $0x20] sm:$0xff]  ;;  %v721_v37 = vmul.f32 %v1366_v19, %v698_v29  ;;  %v1047_v57 = vpack.c.bf16 %v757_v46, %v756_v45  ;;  %v706_v61 = vld [vmem:[#allocation2 + $0x70] sm:$0xff]  ;;  %v763_v11 = vmax.f32 %v747_v4, 0.0 }
 0x139   : > { %v719_v32 = vmul.f32 %v1366_v19, %v696_v27  ;;  %v699_v34 = vld [vmem:[#allocation2 + $0x38] sm:$0xff]  ;;  %v1042_v51 = vpack.c.bf16 %v755_v41, %v754_v40  ;;  %v704_v55 = vld [vmem:[#allocation2 + $0x60] sm:$0xff]  ;;  %v729_v10 = vmul.f32 %v1366_v19, %v706_v61  ;;  %v765_v16 = vmax.f32 %v749_v9, 0.0 }
 0x13a   : > { %v697_v28 = vld [vmem:[#allocation2 + $0x28] sm:$0xff]  ;;  %v722_v38 = vmul.f32 %v1366_v19, %v699_v34  ;;  %v744_v47 = vadd.f32 %v1373_v22, %v721_v37  ;;  %v707_v2 = vld [vmem:[#allocation2 + $0x78] sm:$0xff]  ;;  %1079 = vst [vmem:[%s1448_s4 + $0x8] sm:$0xff] %v1047_v57   ;;  %v727_v5 = vmul.f32 %v1366_v19, %v704_v55  ;;  %v1062_v18 = vpack.c.bf16 %v763_v11, %v762_v7 }
 0x13b   : > { %v720_v33 = vmul.f32 %v1366_v19, %v697_v28  ;;  %v742_v42 = vadd.f32 %v1373_v22, %v719_v32  ;;  %v705_v56 = vld [vmem:[#allocation2 + $0x68] sm:$0xff]  ;;  %1043 = vst [vmem:[%s1448_s4] sm:$0xff] %v1042_v51   ;;  %v730_v14 = vmul.f32 %v1366_v19, %v707_v2  ;;  %v752_v17 = vadd.f32 %v1373_v22, %v729_v10 }
 0x13c   : > { %v745_v48 = vadd.f32 %v1373_v22, %v722_v38  ;;  %v760_v58 = vmax.f32 %v744_v47, 0.0  ;;  %v728_v6 = vmul.f32 %v1366_v19, %v705_v56  ;;  %v750_v12 = vadd.f32 %v1373_v22, %v727_v5  ;;  %1082 = vst [vmem:[%s1448_s4 + $0x20] sm:$0xff] %v1062_v18  }
 0x13d   : > { %v743_v43 = vadd.f32 %v1373_v22, %v720_v33  ;;  %v758_v52 = vmax.f32 %v742_v42, 0.0  ;;  %v753_v23 = vadd.f32 %v1373_v22, %v730_v14  ;;  %v1067_v24 = vpack.c.bf16 %v765_v16, %v764_v15 }
 0x13e   : > { %v761_v59 = vmax.f32 %v745_v48, 0.0  ;;  %v751_v13 = vadd.f32 %v1373_v22, %v728_v6  ;;  %v766_v20 = vmax.f32 %v750_v12, 0.0  ;;  %v768_v25 = vmax.f32 %v752_v17, 0.0 }
 0x13f   : > { %v759_v53 = vmax.f32 %v743_v43, 0.0  ;;  %v769_v27 = vmax.f32 %v753_v23, 0.0  ;;  %1083 = vst [vmem:[%s1448_s4 + $0x28] sm:$0xff] %v1067_v24  }
 0x140   : > { %v1057_v3 = vpack.c.bf16 %v761_v59, %v760_v58  ;;  %v767_v21 = vmax.f32 %v751_v13, 0.0 }
 0x141   : > { %v1052_v62 = vpack.c.bf16 %v759_v53, %v758_v52  ;;  %v1077_v19 = vpack.c.bf16 %v769_v27, %v768_v25 }
 0x142   : > { %1081 = vst [vmem:[%s1448_s4 + $0x18] sm:$0xff] %v1057_v3   ;;  %v1072_v26 = vpack.c.bf16 %v767_v21, %v766_v20 }
 0x143   : > { %1080 = vst [vmem:[%s1448_s4 + $0x10] sm:$0xff] %v1052_v62   ;;  %1085 = vst [vmem:[%s1448_s4 + $0x38] sm:$0xff] %v1077_v19  }
 0x144   : > { %1084 = vst [vmem:[%s1448_s4 + $0x30] sm:$0xff] %v1072_v26  }
 0x145 PF: > { %s14_s19 = sadd.s32 1, %s1245_s19   ;;  %s1449_s15 = smov %s1233_s16 }
 0x146   : > { %p11_p12 = scmp.ge.s32.totalorder %s14_s19, 7   ;;  %s1450_s16 = smov %s1308_s23 }
 0x147   : > { %s1451_s17 = smov %s1241_s18  ;;  %s1452_s18 = smov %s1454_s20 }
 0x148   :  { %13 = sbr.rel (!%p11_p12) target bundleno = 3 (0x3), region = 129 }

// kernel: variant_resnet_forward.25
= control target key start
LH: loop header
LB: loop body
LE: loop exit
PB: predicated region body
PF: predicated region fallthrough
CT: control target
= control target key end

     0   :  { %s1444_s18 = smov 0   ;;  %s1446_s19 = smov 0   ;;  %s1639_s0 = inlined_call_operand.vmem [shape: bf16[128,640], index: 0, kind: input, shape index: {}]   ;;  %s1640_s1 = inlined_call_operand.vmem [shape: bf16[640,128], index: 1, kind: input, shape index: {}]   ;;  %s1641_s2 = inlined_call_operand.vmem [shape: f32[1,128], index: 2, kind: input, shape index: {}]   ;;  %s1642_s3 = inlined_call_operand.vmem [shape: f32[1,128], index: 3, kind: input, shape index: {}]   ;;  %s1643_s4 = inlined_call_operand.vmem [shape: bf16[128,128], index: 4, kind: input, shape index: {}]   ;;  %s1644_s5 = inlined_call_operand.vmem [shape: bf16[128,128], index: 5, kind: output, shape index: {}]  }
   0x1   :  { %s1448_s20 = smov 0   ;;  %s1450_s21 = smov 0  }
   0x2   :  { %s1452_s22 = smov 0  }
   0x3 LB: > { %s27_s23 = sadd.s32 1, %s1407_s21  ;;  %p50_p1 = scmp.ne.s32.totalorder %s1399_s19, %s1395_s18  ;;  %s1411_s22 = sphi %s1452_s22, %s15_s22   ;;  %s1407_s21 = sphi %s1450_s21, %s1648_s21   ;;  %s1403_s20 = sphi %s1448_s20, %s1647_s20   ;;  %s1399_s19 = sphi %s1446_s19, %s1646_s19   ;;  %s1395_s18 = sphi %s1444_s18, %s1645_s18  }
   0x4   : > { %p28_p0 = scmp.ge.s32.totalorder %s27_s23, 5  ;;  %p51_p2 = scmp.eq.s32.totalorder %s1411_s22, 0 }
   0x5   : > { %s43_s25 = sadd.s32 1, %s1399_s19  ;;  %p1103_p5 = scmp.ge.s32.totalorder %s1411_s22, 5 }
   0x6   : > { %s1650_s23 = smov (%p28_p0, %s27_s23), 0  ;;  %p52_p3 = por %p51_p2, %p50_p1 }
   0x7   : > { %s39_s24 = ssub.s32 %s1407_s21, %s1650_s23  ;;  %236 = sbr.rel (%p1103_p5) target bundleno = 28 (0x1c), region = 28 }
   0x8   : > { %p41_p4 = scmp.eq.s32.totalorder %s39_s24, 0 }
   0xa   : > { %s1479_s26 = scalar_select %p41_p4, %s1399_s19, %s43_s25  }
   0xe   : > { %239 = sbr.rel (!%p52_p3) target bundleno = 28 (0x1c), region = 32  ;;  %s241_s27 = sand.u32 (%p52_p3), 1, %s1399_s19  }
   0xf   : > { %s1105_s28 = sshll.u32 (%p52_p3), %s1407_s21, 2  ;;  %s1104_s29 = sshll.u32 (%p52_p3), %s241_s27, 6 }
  0x10   : > { %s1487_s7 = scalar_lea.vmem (%p52_p3), %s1639_s0, %s1105_s28  ;;  %s243_s8 = scalar_lea.vmem (%p52_p3), [#allocation3], %s1104_s29 }
  0x11   : > { %v264_v0 = vld [vmem:[%s1487_s7] sm:$0xf] (%p52_p3)  ;;  %v266_v1 = vld [vmem:[%s1487_s7 + $0x14] sm:$0xf] (%p52_p3)  ;;  %v268_v2 = vld [vmem:[%s1487_s7 + $0x28] sm:$0xf] (%p52_p3) }
  0x12   : > { %265 = vst [vmem:[%s243_s8] sm:$0xf] (%p52_p3), %v264_v0  ;;  %267 = vst [vmem:[%s243_s8 + $0x4] sm:$0xf] (%p52_p3), %v266_v1  ;;  %v270_v3 = vld [vmem:[%s1487_s7 + $0x3c] sm:$0xf] (%p52_p3) }
  0x13   : > { %v272_v4 = vld [vmem:[%s1487_s7 + $0x50] sm:$0xf] (%p52_p3)  ;;  %269 = vst [vmem:[%s243_s8 + $0x8] sm:$0xf] (%p52_p3), %v268_v2  ;;  %271 = vst [vmem:[%s243_s8 + $0xc] sm:$0xf] (%p52_p3), %v270_v3 }
  0x14   : > { %273 = vst [vmem:[%s243_s8 + $0x10] sm:$0xf] (%p52_p3), %v272_v4  ;;  %v274_v5 = vld [vmem:[%s1487_s7 + $0x64] sm:$0xf] (%p52_p3)  ;;  %v276_v6 = vld [vmem:[%s1487_s7 + $0x78] sm:$0xf] (%p52_p3) }
  0x15   : > { %v278_v7 = vld [vmem:[%s1487_s7 + $0x8c] sm:$0xf]  ;;  %275 = vst [vmem:[%s243_s8 + $0x14] sm:$0xf] %v274_v5  ;;  %277 = vst [vmem:[%s243_s8 + $0x18] sm:$0xf] %v276_v6 }
  0x16   : > { %279 = vst [vmem:[%s243_s8 + $0x1c] sm:$0xf] %v278_v7  ;;  %v280_v8 = vld [vmem:[%s1487_s7 + $0xa0] sm:$0xf]  ;;  %v282_v9 = vld [vmem:[%s1487_s7 + $0xb4] sm:$0xf] }
  0x17   : > { %v284_v10 = vld [vmem:[%s1487_s7 + $0xc8] sm:$0xf]  ;;  %281 = vst [vmem:[%s243_s8 + $0x20] sm:$0xf] %v280_v8  ;;  %283 = vst [vmem:[%s243_s8 + $0x24] sm:$0xf] %v282_v9 }
  0x18   : > { %285 = vst [vmem:[%s243_s8 + $0x28] sm:$0xf] %v284_v10  ;;  %v286_v11 = vld [vmem:[%s1487_s7 + $0xdc] sm:$0xf]  ;;  %v288_v12 = vld [vmem:[%s1487_s7 + $0xf0] sm:$0xf] }
  0x19   : > { %v290_v13 = vld [vmem:[%s1487_s7 + $0x104] sm:$0xf]  ;;  %287 = vst [vmem:[%s243_s8 + $0x2c] sm:$0xf] %v286_v11  ;;  %289 = vst [vmem:[%s243_s8 + $0x30] sm:$0xf] %v288_v12 }
  0x1a   : > { %291 = vst [vmem:[%s243_s8 + $0x34] sm:$0xf] %v290_v13  ;;  %v292_v14 = vld [vmem:[%s1487_s7 + $0x118] sm:$0xf]  ;;  %v294_v15 = vld [vmem:[%s1487_s7 + $0x12c] sm:$0xf] }
  0x1b   : > { %293 = vst [vmem:[%s243_s8 + $0x38] sm:$0xf] %v292_v14  ;;  %295 = vst [vmem:[%s243_s8 + $0x3c] sm:$0xf] %v294_v15 }
  0x1c PF: > { %p1106_p6 = scmp.ge.s32.totalorder %s1411_s22, 1  ;;  %p361_p7 = scmp.lt.s32.totalorder %s1411_s22, 6 }
  0x1e   : > { %p362_p8 = pnand %p1106_p6, %p361_p7 }
  0x1f   : > { %s368_s9 = sand.u32 (!%p362_p8), 1, %s1395_s18   ;;  %s1108_s10 = sshll.u32 (!%p362_p8), %s1403_s20, 4 }
  0x20   : > { %365 = sbr.rel (%p362_p8) target bundleno = 332 (0x14c), region = 77  ;;  %s1107_s11 = sshll.u32 (!%p362_p8), %s368_s9, 6 }
  0x21   : > { %p422_p9 = scmp.lt.s32.totalorder (!%p362_p8), %s1108_s10, 79  ;;  %s1514_s16 = scalar_lea.vmem (!%p362_p8), [#allocation3], %s1107_s11 }
  0x22   : > { %p1110_p10 = scmp.ne.s32.totalorder (!%p362_p8), %s1403_s20, 0 }
  0x27   : > { %s1652_s10 = smov (!%p422_p9, %s1108_s10), 79  ;;  %458 = sbr.rel (%p1110_p10) target bundleno = 49 (0x31), region = 85 }
  0x28   : > { %s1109_s12 = sshll.u32 %s1652_s10, 2  ;;  %v1413_v16 = vmov (!%p1110_p10), 0.0  }
  0x29   : > { %s1512_s15 = scalar_lea.vmem %s1640_s1, %s1109_s12  ;;  %459 = vst [vmem:[#allocation2] sm:$0xff] (!%p1110_p10), %v1413_v16  ;;  %460 = vst [vmem:[#allocation2 + $0x8] sm:$0xff] (!%p1110_p10), %v1413_v16 }
  0x2a   : > { %461 = vst [vmem:[#allocation2 + $0x10] sm:$0xff] (!%p1110_p10), %v1413_v16  ;;  %462 = vst [vmem:[#allocation2 + $0x18] sm:$0xff] (!%p1110_p10), %v1413_v16 }
  0x2b   : > { %463 = vst [vmem:[#allocation2 + $0x20] sm:$0xff] (!%p1110_p10), %v1413_v16  ;;  %464 = vst [vmem:[#allocation2 + $0x28] sm:$0xff] (!%p1110_p10), %v1413_v16 }
  0x2c   : > { %465 = vst [vmem:[#allocation2 + $0x30] sm:$0xff] (!%p1110_p10), %v1413_v16  ;;  %466 = vst [vmem:[#allocation2 + $0x38] sm:$0xff] (!%p1110_p10), %v1413_v16 }
  0x2d   : > { %467 = vst [vmem:[#allocation2 + $0x40] sm:$0xff] (!%p1110_p10), %v1413_v16  ;;  %468 = vst [vmem:[#allocation2 + $0x48] sm:$0xff] (!%p1110_p10), %v1413_v16 }
  0x2e   : > { %469 = vst [vmem:[#allocation2 + $0x50] sm:$0xff] %v1413_v16  ;;  %470 = vst [vmem:[#allocation2 + $0x58] sm:$0xff] %v1413_v16 }
  0x2f   : > { %471 = vst [vmem:[#allocation2 + $0x60] sm:$0xff] %v1413_v16  ;;  %472 = vst [vmem:[#allocation2 + $0x68] sm:$0xff] %v1413_v16 }
  0x30   : > { %473 = vst [vmem:[#allocation2 + $0x70] sm:$0xff] %v1413_v16  ;;  %474 = vst [vmem:[#allocation2 + $0x78] sm:$0xff] %v1413_v16 }
  0x31 PF: > { %v1357_v17 = vld [vmem:[%s1512_s15] sm:$0xff]   ;;  %v1358_v18 = vld [vmem:[%s1512_s15 + $0x8] sm:$0xff]   ;;  %v1359_v19 = vld [vmem:[%s1512_s15 + $0x10] sm:$0xff]   ;;  %p1127_p11 = scmp.ne.s32.totalorder %s1403_s20, 4 }
  0x32   : > { %1268 = vmatprep.subr.bf16.mxu0 %v1357_v17  ;;  %1300 = vmatprep.subr.bf16.mxu1 %v1357_v17  ;;  %v1360_v20 = vld [vmem:[%s1512_s15 + $0x18] sm:$0xff]   ;;  %v1365_v21 = vld [vmem:[%s1514_s16] sm:$0xff]   ;;  %v1362_v24 = vld [vmem:[%s1512_s15 + $0x28] sm:$0xff]  }
  0x33   : > { %1269 = vmatpush3.bf16.msra.mxu0 %v1357_v17  ;;  %1308 = vmatpush3.bf16.msra.mxu1 %v1357_v17  ;;  %v1366_v22 = vld [vmem:[%s1514_s16 + $0x20] sm:$0xff]   ;;  %v1363_v25 = vld [vmem:[%s1512_s15 + $0x30] sm:$0xff]   ;;  %v1364_v26 = vld [vmem:[%s1512_s15 + $0x38] sm:$0xff]  }
  0x34   : > { %1270 = vmatprep.subr.bf16.mxu0 %v1358_v18  ;;  %1301 = vmatprep.subr.bf16.mxu1 %v1358_v18  ;;  %v1361_v23 = vld [vmem:[%s1512_s15 + $0x20] sm:$0xff]   ;;  %v1367_v27 = vld [vmem:[%s1514_s16 + $0x8] sm:$0xff]   ;;  %v1369_v29 = vld [vmem:[%s1514_s16 + $0x10] sm:$0xff]  }
  0x35   : > { %1284 = vmatprep.mubr.bf16.mxu0 %v1365_v21  ;;  %1292 = vmatprep.mubr.bf16.mxu1 %v1366_v22  ;;  %v1368_v28 = vld [vmem:[%s1514_s16 + $0x28] sm:$0xff]   ;;  %v1370_v30 = vld [vmem:[%s1514_s16 + $0x30] sm:$0xff]   ;;  %v1371_v31 = vld [vmem:[%s1514_s16 + $0x18] sm:$0xff]  }
  0x36   : > { %v1372_v32 = vld [vmem:[%s1514_s16 + $0x38] sm:$0xff]   ;;  %v477_v33 = vld [vmem:[#allocation2 + $0x10] sm:$0xff]  ;;  %v475_v35 = vld [vmem:[#allocation2] sm:$0xff] }
  0x37   : > { %1271 = vmatpush3.bf16.msra.mxu0 %v1358_v18  ;;  %1309 = vmatpush3.bf16.msra.mxu1 %v1358_v18  ;;  %v485_v34 = vld [vmem:[#allocation2 + $0x50] sm:$0xff]  ;;  %v483_v36 = vld [vmem:[#allocation2 + $0x40] sm:$0xff]  ;;  %v478_v39 = vld [vmem:[#allocation2 + $0x18] sm:$0xff] }
  0x38   : > { %1272 = vmatprep.subr.bf16.mxu0 %v1359_v19  ;;  %1302 = vmatprep.subr.bf16.mxu1 %v1359_v19  ;;  %v486_v40 = vld [vmem:[#allocation2 + $0x58] sm:$0xff]  ;;  %v476_v45 = vld [vmem:[#allocation2 + $0x8] sm:$0xff]  ;;  %v481_v57 = vld [vmem:[#allocation2 + $0x30] sm:$0xff] }
  0x39   : > { %v484_v46 = vld [vmem:[#allocation2 + $0x48] sm:$0xff]  ;;  %v489_v58 = vld [vmem:[#allocation2 + $0x70] sm:$0xff]  ;;  %v479_v59 = vld [vmem:[#allocation2 + $0x20] sm:$0xff] }
  0x3a   : > { %v487_v60 = vld [vmem:[#allocation2 + $0x60] sm:$0xff]  ;;  %v482_v63 = vld [vmem:[#allocation2 + $0x38] sm:$0xff]  ;;  %v480_v5 = vld [vmem:[#allocation2 + $0x28] sm:$0xff] }
  0x3b   : > { %1273 = vmatpush3.bf16.msra.mxu0 %v1359_v19  ;;  %1310 = vmatpush3.bf16.msra.mxu1 %v1359_v19  ;;  %v490_v0 = vld [vmem:[#allocation2 + $0x78] sm:$0xff]  ;;  %v488_v6 = vld [vmem:[#allocation2 + $0x68] sm:$0xff]  ;;  %v1537_v19 = vld [vmem:[%s1641_s2] ss:$0 sm:$0xff] (!%p1127_p11) }
  0x3c   : > { %1274 = vmatprep.subr.bf16.mxu0 %v1360_v20  ;;  %1303 = vmatprep.subr.bf16.mxu1 %v1360_v20  ;;  %v1544_v22 = vld [vmem:[%s1642_s3] ss:$0 sm:$0xff] (!%p1127_p11) }
  0x3f   : > { %1275 = vmatpush3.bf16.msra.mxu0 %v1360_v20  ;;  %1311 = vmatpush3.bf16.msra.mxu1 %v1360_v20 }
  0x40   : > { %1276 = vmatprep.subr.bf16.mxu0 %v1361_v23  ;;  %1304 = vmatprep.subr.bf16.mxu1 %v1361_v23 }
  0x43   : > { %1277 = vmatpush3.bf16.msra.mxu0 %v1361_v23  ;;  %1312 = vmatpush3.bf16.msra.mxu1 %v1361_v23  ;;  %v1167_v23 = vld [vmem:[%s1643_s4] sm:$0xff] (!%p1127_p11)  }
  0x44   : > { %1278 = vmatprep.subr.bf16.mxu0 %v1362_v24  ;;  %1305 = vmatprep.subr.bf16.mxu1 %v1362_v24 }
  0x47   : > { %1279 = vmatpush3.bf16.msra.mxu0 %v1362_v24  ;;  %1313 = vmatpush3.bf16.msra.mxu1 %v1362_v24 }
  0x48   : > { %1280 = vmatprep.subr.bf16.mxu0 %v1363_v25  ;;  %1306 = vmatprep.subr.bf16.mxu1 %v1363_v25 }
  0x4b   : > { %1281 = vmatpush3.bf16.msra.mxu0 %v1363_v25  ;;  %1314 = vmatpush3.bf16.msra.mxu1 %v1363_v25  ;;  %v1168_v25 = vunpack.c.l.bf16 (!%p1127_p11), %v1167_v23 }
  0x4c   : > { %1282 = vmatprep.subr.bf16.mxu0 %v1364_v26  ;;  %1307 = vmatprep.subr.bf16.mxu1 %v1364_v26 }
  0x4f   : > { %1283 = vmatpush3.bf16.msra.mxu0 %v1364_v26  ;;  %1315 = vmatpush3.bf16.msra.mxu1 %v1364_v26  ;;  %v1169_v26 = vunpack.c.h.bf16 (!%p1127_p11), %v1167_v23 }
  0x52   : > { %1285 = vmatmul.mubr.bf16.vlgmr.msra.gmra.mrb[0].mxu0 %v1367_v27  ;;  %1293 = vmatmul.mubr.bf16.vlgmr.msra.gmra.mrb[0].mxu1 %v1368_v28 }
  0x53   : > { %1288 = vmatprep.mubr.bf16.mxu0 %v1369_v29  ;;  %1296 = vmatprep.mubr.bf16.mxu1 %v1370_v30  ;;  %v1238_v29 = vld [vmem:[%s1643_s4 + $0x8] sm:$0xff] (!%p1127_p11)  }
  0x5a   : > { %1289 = vmatmul.mubr.bf16.gmra.mrb[4].mxu0 %v1371_v31  ;;  %1297 = vmatmul.mubr.bf16.gmra.mrb[4].mxu1 %v1372_v32 }
 0x125   : > { %v1286_v37 = vpop.f32.mrb[0].mxu0  ;;  %v1294_v38 = vpop.f32.mrb[0].mxu1 }
 0x126   : > { %v718_v41 = vadd.f32 %v1286_v37, %v477_v33  ;;  %v726_v42 = vadd.f32 %v1294_v38, %v485_v34  ;;  %v653_v43 = vpop.f32.mrb[1].mxu0  ;;  %v685_v44 = vpop.f32.mrb[1].mxu1  ;;  %v1172_v34 = vunpack.c.l.bf16 (!%p1127_p11), %v1238_v29  ;;  %v1173_v38 = vunpack.c.h.bf16 (!%p1127_p11), %v1238_v29 }
 0x127   : > { %v716_v47 = vadd.f32 %v653_v43, %v475_v35  ;;  %v724_v48 = vadd.f32 %v685_v44, %v483_v36  ;;  %v1287_v49 = vpop.f32.mrb[2].mxu0  ;;  %v1295_v50 = vpop.f32.mrb[2].mxu1  ;;  %v1239_v36 = vld [vmem:[%s1643_s4 + $0x10] sm:$0xff] (!%p1127_p11)  }
 0x128   : > { %734 = vst [vmem:[#allocation2 + $0x10] sm:$0xff] %v718_v41  ;;  %742 = vst [vmem:[#allocation2 + $0x50] sm:$0xff] %v726_v42  ;;  %v719_v51 = vadd.f32 %v1287_v49, %v478_v39  ;;  %v727_v52 = vadd.f32 %v1295_v50, %v486_v40  ;;  %v656_v53 = vpop.f32.mrb[3].mxu0  ;;  %v688_v54 = vpop.f32.mrb[3].mxu1  ;;  %v1177_v50 = vunpack.c.h.bf16 (!%p1127_p11), %v1239_v36 }
 0x129   : > { %732 = vst [vmem:[#allocation2] sm:$0xff] %v716_v47  ;;  %740 = vst [vmem:[#allocation2 + $0x40] sm:$0xff] %v724_v48  ;;  %v717_v55 = vadd.f32 %v656_v53, %v476_v45  ;;  %v725_v56 = vadd.f32 %v688_v54, %v484_v46  ;;  %v1176_v45 = vunpack.c.l.bf16 (!%p1127_p11), %v1239_v36 }
 0x12a   : > { %735 = vst [vmem:[#allocation2 + $0x18] sm:$0xff] %v719_v51  ;;  %743 = vst [vmem:[#allocation2 + $0x58] sm:$0xff] %v727_v52  ;;  %v1240_v51 = vld [vmem:[%s1643_s4 + $0x18] sm:$0xff] (!%p1127_p11)  }
 0x12b   : > { %733 = vst [vmem:[#allocation2 + $0x8] sm:$0xff] %v717_v55  ;;  %741 = vst [vmem:[#allocation2 + $0x48] sm:$0xff] %v725_v56 }
 0x12d   : > { %v1290_v61 = vpop.f32.mrb[4].mxu0  ;;  %v1298_v62 = vpop.f32.mrb[4].mxu1  ;;  %751 = sbr.rel (%p1127_p11) target bundleno = 332 (0x14c), region = 89 }
 0x12e   : > { %v722_v1 = vadd.f32 %v1290_v61, %v481_v57  ;;  %v730_v2 = vadd.f32 %v1298_v62, %v489_v58  ;;  %v669_v3 = vpop.f32.mrb[5].mxu0  ;;  %v701_v4 = vpop.f32.mrb[5].mxu1 }
 0x12f   : > { %v720_v7 = vadd.f32 %v669_v3, %v479_v59  ;;  %v728_v8 = vadd.f32 %v701_v4, %v487_v60  ;;  %v1291_v9 = vpop.f32.mrb[6].mxu0  ;;  %v1299_v10 = vpop.f32.mrb[6].mxu1  ;;  %v754_v24 = vld [vmem:[#allocation2 + $0x10] sm:$0xff] (!%p1127_p11) }
 0x130   : > { %738 = vst [vmem:[#allocation2 + $0x30] sm:$0xff] %v722_v1  ;;  %746 = vst [vmem:[#allocation2 + $0x70] sm:$0xff] %v730_v2  ;;  %v723_v11 = vadd.f32 %v1291_v9, %v482_v63  ;;  %v731_v12 = vadd.f32 %v1299_v10, %v490_v0  ;;  %v672_v13 = vpop.f32.mrb[7].mxu0  ;;  %v704_v14 = vpop.f32.mrb[7].mxu1  ;;  %v752_v17 = vld [vmem:[#allocation2] sm:$0xff] (!%p1127_p11)  ;;  %v777_v28 = vmul.f32 (!%p1127_p11), %v1537_v19, %v754_v24  ;;  %v1180_v1 = vunpack.c.l.bf16 (!%p1127_p11), %v1240_v51 }
 0x131   : > { %736 = vst [vmem:[#allocation2 + $0x20] sm:$0xff] %v720_v7  ;;  %744 = vst [vmem:[#allocation2 + $0x60] sm:$0xff] %v728_v8  ;;  %v721_v15 = vadd.f32 %v672_v13, %v480_v5  ;;  %v729_v16 = vadd.f32 %v704_v14, %v488_v6  ;;  %v775_v20 = vmul.f32 (!%p1127_p11), %v1537_v19, %v752_v17  ;;  %v755_v27 = vld [vmem:[#allocation2 + $0x18] sm:$0xff] (!%p1127_p11)  ;;  %v760_v60 = vld [vmem:[#allocation2 + $0x40] sm:$0xff] (!%p1127_p11)  ;;  %v1181_v6 = vunpack.c.h.bf16 (!%p1127_p11), %v1240_v51 }
 0x132   : > { %739 = vst [vmem:[#allocation2 + $0x38] sm:$0xff] %v723_v11  ;;  %747 = vst [vmem:[#allocation2 + $0x78] sm:$0xff] %v731_v12  ;;  %v753_v18 = vld [vmem:[#allocation2 + $0x8] sm:$0xff] (!%p1127_p11)  ;;  %v778_v33 = vmul.f32 (!%p1127_p11), %v1537_v19, %v755_v27  ;;  %v800_v37 = vadd.f32 (!%p1127_p11), %v1544_v22, %v777_v28  ;;  %v1241_v2 = vld [vmem:[%s1643_s4 + $0x20] sm:$0xff] (!%p1127_p11)   ;;  %v783_v10 = vmul.f32 (!%p1127_p11), %v1537_v19, %v760_v60 }
 0x133   : > { %737 = vst [vmem:[#allocation2 + $0x28] sm:$0xff] %v721_v15  ;;  %745 = vst [vmem:[#allocation2 + $0x68] sm:$0xff] %v729_v16  ;;  %v776_v21 = vmul.f32 (!%p1127_p11), %v1537_v19, %v753_v18  ;;  %v798_v31 = vadd.f32 (!%p1127_p11), %v1544_v22, %v775_v20  ;;  %v761_v61 = vld [vmem:[#allocation2 + $0x48] sm:$0xff] (!%p1127_p11)  ;;  %v762_v7 = vld [vmem:[#allocation2 + $0x50] sm:$0xff] (!%p1127_p11)  ;;  %v1184_v16 = vunpack.c.l.bf16 (!%p1127_p11), %v1241_v2  ;;  %v1185_v17 = vunpack.c.h.bf16 (!%p1127_p11), %v1241_v2 }
 0x134   : > { %v801_v44 = vadd.f32 %v1544_v22, %v778_v33  ;;  %v848_v47 = vadd.f32 %v1172_v34, %v800_v37  ;;  %v784_v11 = vmul.f32 %v1537_v19, %v761_v61  ;;  %v763_v12 = vld [vmem:[#allocation2 + $0x58] sm:$0xff]  ;;  %v1242_v13 = vld [vmem:[%s1643_s4 + $0x28] sm:$0xff]   ;;  %v785_v24 = vmul.f32 %v1537_v19, %v762_v7 }
 0x135   : > { %v799_v32 = vadd.f32 %v1544_v22, %v776_v21  ;;  %v846_v42 = vadd.f32 %v1168_v25, %v798_v31  ;;  %v806_v21 = vadd.f32 %v1544_v22, %v783_v10  ;;  %v786_v28 = vmul.f32 %v1537_v19, %v763_v12 }
 0x136   : > { %v849_v54 = vadd.f32 %v1173_v38, %v801_v44  ;;  %v864_v56 = vmax.f32 %v848_v47, 0.0  ;;  %v807_v23 = vadd.f32 %v1544_v22, %v784_v11  ;;  %v1188_v29 = vunpack.c.l.bf16 %v1242_v13 }
 0x137   : > { %v758_v41 = vld [vmem:[#allocation2 + $0x30] sm:$0xff]  ;;  %v847_v43 = vadd.f32 %v1169_v26, %v799_v32  ;;  %v862_v52 = vmax.f32 %v846_v42, 0.0  ;;  %v854_v31 = vadd.f32 %v1184_v16, %v806_v21  ;;  %v808_v33 = vadd.f32 %v1544_v22, %v785_v24 }
 0x138   : > { %v756_v30 = vld [vmem:[#allocation2 + $0x20] sm:$0xff]  ;;  %v781_v55 = vmul.f32 %v1537_v19, %v758_v41  ;;  %v865_v63 = vmax.f32 %v849_v54, 0.0  ;;  %v1243_v26 = vld [vmem:[%s1643_s4 + $0x30] sm:$0xff]   ;;  %v855_v32 = vadd.f32 %v1185_v17, %v807_v23  ;;  %v809_v37 = vadd.f32 %v1544_v22, %v786_v28 }
 0x139   : > { %v779_v39 = vmul.f32 %v1537_v19, %v756_v30  ;;  %v759_v46 = vld [vmem:[#allocation2 + $0x38] sm:$0xff]  ;;  %v863_v53 = vmax.f32 %v847_v43, 0.0  ;;  %v764_v18 = vld [vmem:[#allocation2 + $0x60] sm:$0xff]  ;;  %v1189_v30 = vunpack.c.h.bf16 %v1242_v13  ;;  %v870_v41 = vmax.f32 %v854_v31, 0.0 }
 0x13a   : > { %v757_v35 = vld [vmem:[#allocation2 + $0x28] sm:$0xff]  ;;  %v782_v59 = vmul.f32 %v1537_v19, %v759_v46  ;;  %v804_v0 = vadd.f32 %v1544_v22, %v781_v55  ;;  %v1206_v8 = vpack.c.bf16 %v865_v63, %v864_v56  ;;  %v787_v34 = vmul.f32 %v1537_v19, %v764_v18 }
 0x13b   : > { %v780_v40 = vmul.f32 %v1537_v19, %v757_v35  ;;  %v802_v48 = vadd.f32 %v1544_v22, %v779_v39  ;;  %v1201_v62 = vpack.c.bf16 %v863_v53, %v862_v52  ;;  %v765_v25 = vld [vmem:[#allocation2 + $0x68] sm:$0xff]  ;;  %v766_v35 = vld [vmem:[#allocation2 + $0x70] sm:$0xff]  ;;  %v1192_v39 = vunpack.c.l.bf16 %v1243_v26 }
 0x13c   : > { %v805_v5 = vadd.f32 %v1544_v22, %v782_v59  ;;  %v852_v9 = vadd.f32 %v1180_v1, %v804_v0  ;;  %1245 = vst [vmem:[%s1644_s5 + $0x8] sm:$0xff] %v1206_v8   ;;  %v788_v38 = vmul.f32 %v1537_v19, %v765_v25  ;;  %v871_v42 = vmax.f32 %v855_v32, 0.0 }
 0x13d   : > { %v803_v49 = vadd.f32 %v1544_v22, %v780_v40  ;;  %v850_v57 = vadd.f32 %v1176_v45, %v802_v48  ;;  %1202 = vst [vmem:[%s1644_s5] sm:$0xff] %v1201_v62   ;;  %v767_v40 = vld [vmem:[#allocation2 + $0x78] sm:$0xff]  ;;  %v856_v43 = vadd.f32 %v1188_v29, %v808_v33  ;;  %v810_v44 = vadd.f32 %v1544_v22, %v787_v34 }
 0x13e   : > { %v853_v15 = vadd.f32 %v1181_v6, %v805_v5  ;;  %v868_v20 = vmax.f32 %v852_v9, 0.0  ;;  %v1244_v45 = vld [vmem:[%s1643_s4 + $0x38] sm:$0xff]   ;;  %v857_v46 = vadd.f32 %v1189_v30, %v809_v37  ;;  %v811_v47 = vadd.f32 %v1544_v22, %v788_v38 }
 0x13f   : > { %v851_v58 = vadd.f32 %v1177_v50, %v803_v49  ;;  %v866_v3 = vmax.f32 %v850_v57, 0.0  ;;  %v1193_v48 = vunpack.c.h.bf16 %v1243_v26  ;;  %v789_v49 = vmul.f32 %v1537_v19, %v766_v35 }
 0x140   : > { %v869_v27 = vmax.f32 %v853_v15, 0.0  ;;  %v1221_v50 = vpack.c.bf16 %v871_v42, %v870_v41  ;;  %v872_v51 = vmax.f32 %v856_v43, 0.0  ;;  %v858_v52 = vadd.f32 %v1192_v39, %v810_v44 }
 0x141   : > { %v867_v4 = vmax.f32 %v851_v58, 0.0  ;;  %v790_v53 = vmul.f32 %v1537_v19, %v767_v40  ;;  %v873_v54 = vmax.f32 %v857_v46, 0.0  ;;  %v859_v55 = vadd.f32 %v1193_v48, %v811_v47 }
 0x142   : > { %v1216_v36 = vpack.c.bf16 %v869_v27, %v868_v20  ;;  %v812_v56 = vadd.f32 %v1544_v22, %v789_v49  ;;  %v1196_v57 = vunpack.c.l.bf16 %v1244_v45  ;;  %1248 = vst [vmem:[%s1644_s5 + $0x20] sm:$0xff] %v1221_v50   ;;  %v874_v58 = vmax.f32 %v858_v52, 0.0 }
 0x143   : > { %v1211_v14 = vpack.c.bf16 %v867_v4, %v866_v3  ;;  %v813_v59 = vadd.f32 %v1544_v22, %v790_v53  ;;  %v1197_v60 = vunpack.c.h.bf16 %v1244_v45  ;;  %v1226_v61 = vpack.c.bf16 %v873_v54, %v872_v51 }
 0x144   : > { %1247 = vst [vmem:[%s1644_s5 + $0x18] sm:$0xff] %v1216_v36   ;;  %v875_v62 = vmax.f32 %v859_v55, 0.0  ;;  %v860_v63 = vadd.f32 %v1196_v57, %v812_v56 }
 0x145   : > { %1246 = vst [vmem:[%s1644_s5 + $0x10] sm:$0xff] %v1211_v14   ;;  %v861_v0 = vadd.f32 %v1197_v60, %v813_v59  ;;  %1249 = vst [vmem:[%s1644_s5 + $0x28] sm:$0xff] %v1226_v61  }
 0x146   : > { %v1231_v19 = vpack.c.bf16 %v875_v62, %v874_v58  ;;  %v876_v1 = vmax.f32 %v860_v63, 0.0 }
 0x147   : > { %v877_v2 = vmax.f32 %v861_v0, 0.0 }
 0x148   : > { %1250 = vst [vmem:[%s1644_s5 + $0x30] sm:$0xff] %v1231_v19  }
 0x149   : > { %v1236_v3 = vpack.c.bf16 %v877_v2, %v876_v1 }
 0x14b   : > { %1251 = vst [vmem:[%s1644_s5 + $0x38] sm:$0xff] %v1236_v3  }
 0x14c PF: > { %s15_s22 = sadd.s32 1, %s1411_s22   ;;  %s1645_s18 = smov %s1399_s19 }
 0x14d   : > { %p12_p12 = scmp.ge.s32.totalorder %s15_s22, 7   ;;  %s1646_s19 = smov %s1479_s26 }
 0x14e   : > { %s1647_s20 = smov %s1407_s21  ;;  %s1648_s21 = smov %s1650_s23 }
 0x14f   :  { %14 = sbr.rel (!%p12_p12) target bundleno = 3 (0x3), region = 136 }

// kernel: variant_resnet_forward.28
= control target key start
LH: loop header
LB: loop body
LE: loop exit
PB: predicated region body
PF: predicated region fallthrough
CT: control target
= control target key end

     0   :  { %s867_s15 = smov 0   ;;  %s869_s16 = smov 0   ;;  %s963_s0 = inlined_call_operand.vmem [shape: bf16[32,640], index: 0, kind: input, shape index: {}]   ;;  %s964_s1 = inlined_call_operand.vmem [shape: bf16[640,128], index: 1, kind: input, shape index: {}]   ;;  %s965_s2 = inlined_call_operand.vmem [shape: f32[1,128], index: 2, kind: input, shape index: {}]   ;;  %s966_s3 = inlined_call_operand.vmem [shape: f32[1,128], index: 3, kind: input, shape index: {}]   ;;  %s967_s4 = inlined_call_operand.vmem [shape: bf16[32,128], index: 4, kind: output, shape index: {}]  }
   0x1   :  { %s871_s17 = smov 0   ;;  %s873_s18 = smov 0  }
   0x2   :  { %s875_s19 = smov 0  }
   0x3 LB: > { %s26_s20 = sadd.s32 1, %s835_s18  ;;  %p49_p1 = scmp.ne.s32.totalorder %s827_s16, %s823_s15  ;;  %s839_s19 = sphi %s875_s19, %s14_s19   ;;  %s835_s18 = sphi %s873_s18, %s971_s18   ;;  %s831_s17 = sphi %s871_s17, %s970_s17   ;;  %s827_s16 = sphi %s869_s16, %s969_s16   ;;  %s823_s15 = sphi %s867_s15, %s968_s15  }
   0x4   : > { %p27_p0 = scmp.ge.s32.totalorder %s26_s20, 5  ;;  %p50_p2 = scmp.eq.s32.totalorder %s839_s19, 0 }
   0x5   : > { %s42_s22 = sadd.s32 1, %s827_s16  ;;  %p676_p5 = scmp.ge.s32.totalorder %s839_s19, 5 }
   0x6   : > { %s973_s20 = smov (%p27_p0, %s26_s20), 0  ;;  %p51_p3 = por %p50_p2, %p49_p1 }
   0x7   : > { %s38_s21 = ssub.s32 %s835_s18, %s973_s20  ;;  %195 = sbr.rel (%p676_p5) target bundleno = 21 (0x15), region = 24 }
   0x8   : > { %p40_p4 = scmp.eq.s32.totalorder %s38_s21, 0 }
   0xa   : > { %s902_s23 = scalar_select %p40_p4, %s827_s16, %s42_s22  }
   0xe   : > { %198 = sbr.rel (!%p51_p3) target bundleno = 21 (0x15), region = 28  ;;  %s200_s24 = sand.u32 (%p51_p3), 1, %s827_s16  }
   0xf   : > { %s678_s25 = sshll.u32 (%p51_p3), %s835_s18, 2  ;;  %s677_s26 = sshll.u32 (%p51_p3), %s200_s24, 4 }
  0x10   : > { %s207_s29 = scalar_lea.vmem (%p51_p3), %s963_s0, %s678_s25  ;;  %s202_s30 = scalar_lea.vmem (%p51_p3), [#allocation3], %s677_s26 }
  0x11   : > { %v223_v0 = vld [vmem:[%s207_s29] sm:$0xf] (%p51_p3)  ;;  %v225_v1 = vld [vmem:[%s207_s29 + $0x14] sm:$0xf] (%p51_p3)  ;;  %v227_v2 = vld [vmem:[%s207_s29 + $0x28] sm:$0xf] (%p51_p3) }
  0x12   : > { %224 = vst [vmem:[%s202_s30] sm:$0xf] (%p51_p3), %v223_v0  ;;  %226 = vst [vmem:[%s202_s30 + $0x4] sm:$0xf] (%p51_p3), %v225_v1  ;;  %v229_v3 = vld [vmem:[%s207_s29 + $0x3c] sm:$0xf] (%p51_p3) }
  0x13   : > { %228 = vst [vmem:[%s202_s30 + $0x8] sm:$0xf] (%p51_p3), %v227_v2  ;;  %230 = vst [vmem:[%s202_s30 + $0xc] sm:$0xf] (%p51_p3), %v229_v3 }
  0x15 PF: > { %p679_p6 = scmp.ge.s32.totalorder %s839_s19, 1  ;;  %p272_p7 = scmp.lt.s32.totalorder %s839_s19, 6 }
  0x17   : > { %p273_p8 = pnand %p679_p6, %p272_p7 }
  0x18   : > { %s279_s5 = sand.u32 (!%p273_p8), 1, %s823_s15   ;;  %s681_s6 = sshll.u32 (!%p273_p8), %s831_s17, 4 }
  0x19   : > { %276 = sbr.rel (%p273_p8) target bundleno = 306 (0x132), region = 73  ;;  %s914_s7 = sshll.u32 (!%p273_p8), %s279_s5, 4 }
  0x1a   : > { %p323_p9 = scmp.lt.s32.totalorder (!%p273_p8), %s681_s6, 79  ;;  %s281_s12 = scalar_lea.vmem (!%p273_p8), [#allocation3], %s914_s7 }
  0x1b   : > { %p683_p10 = scmp.ne.s32.totalorder (!%p273_p8), %s831_s17, 0 }
  0x20   : > { %s975_s6 = smov (!%p323_p9, %s681_s6), 79  ;;  %350 = sbr.rel (%p683_p10) target bundleno = 39 (0x27), region = 81 }
  0x21   : > { %s682_s8 = sshll.u32 %s975_s6, 2  ;;  %v841_v4 = vmov (!%p683_p10), 0.0  }
  0x22   : > { %s919_s11 = scalar_lea.vmem %s964_s1, %s682_s8  ;;  %351 = vst [vmem:[#allocation2] sm:$0xff] (!%p683_p10), %v841_v4  ;;  %352 = vst [vmem:[#allocation2 + $0x8] sm:$0xff] (!%p683_p10), %v841_v4 }
  0x23   : > { %353 = vst [vmem:[#allocation2 + $0x10] sm:$0xff] (!%p683_p10), %v841_v4  ;;  %354 = vst [vmem:[#allocation2 + $0x18] sm:$0xff] (!%p683_p10), %v841_v4 }
  0x27 PF: > { %v791_v5 = vld [vmem:[%s919_s11] sm:$0xff]   ;;  %v792_v6 = vld [vmem:[%s919_s11 + $0x8] sm:$0xff]   ;;  %v793_v7 = vld [vmem:[%s919_s11 + $0x10] sm:$0xff]   ;;  %p694_p11 = scmp.ne.s32.totalorder %s831_s17, 4 }
  0x28   : > { %730 = vmatprep.subr.bf16.mxu0 %v791_v5  ;;  %v794_v8 = vld [vmem:[%s919_s11 + $0x18] sm:$0xff]   ;;  %v799_v9 = vld [vmem:[%s281_s12] sm:$0xff]   ;;  %v796_v11 = vld [vmem:[%s919_s11 + $0x28] sm:$0xff]  }
  0x29   : > { %731 = vmatpush3.bf16.msra.mxu0 %v791_v5  ;;  %746 = vmatprep.mubr.bf16.mxu0 %v799_v9  ;;  %v795_v10 = vld [vmem:[%s919_s11 + $0x20] sm:$0xff]   ;;  %v797_v12 = vld [vmem:[%s919_s11 + $0x30] sm:$0xff]   ;;  %v798_v13 = vld [vmem:[%s919_s11 + $0x38] sm:$0xff]  }
  0x2a   : > { %732 = vmatprep.subr.bf16.mxu0 %v792_v6  ;;  %v800_v14 = vld [vmem:[%s281_s12 + $0x8] sm:$0xff]   ;;  %v357_v15 = vld [vmem:[#allocation2 + $0x10] sm:$0xff]  ;;  %v355_v16 = vld [vmem:[#allocation2] sm:$0xff] }
  0x2b   : > { %v358_v18 = vld [vmem:[#allocation2 + $0x18] sm:$0xff]  ;;  %v356_v21 = vld [vmem:[#allocation2 + $0x8] sm:$0xff]  ;;  %v695_v29 = vld [vmem:[%s965_s2] ss:$0 sm:$0xff] (!%p694_p11) }
  0x2c   : > { %v696_v32 = vld [vmem:[%s966_s3] ss:$0 sm:$0xff] (!%p694_p11) }
  0x2d   : > { %733 = vmatpush3.bf16.msra.mxu0 %v792_v6 }
  0x2e   : > { %734 = vmatprep.subr.bf16.mxu0 %v793_v7 }
  0x31   : > { %735 = vmatpush3.bf16.msra.mxu0 %v793_v7 }
  0x32   : > { %736 = vmatprep.subr.bf16.mxu0 %v794_v8 }
  0x35   : > { %737 = vmatpush3.bf16.msra.mxu0 %v794_v8 }
  0x36   : > { %738 = vmatprep.subr.bf16.mxu0 %v795_v10 }
  0x39   : > { %739 = vmatpush3.bf16.msra.mxu0 %v795_v10 }
  0x3a   : > { %740 = vmatprep.subr.bf16.mxu0 %v796_v11 }
  0x3d   : > { %741 = vmatpush3.bf16.msra.mxu0 %v796_v11 }
  0x3e   : > { %742 = vmatprep.subr.bf16.mxu0 %v797_v12 }
  0x41   : > { %743 = vmatpush3.bf16.msra.mxu0 %v797_v12 }
  0x42   : > { %744 = vmatprep.subr.bf16.mxu0 %v798_v13 }
  0x45   : > { %745 = vmatpush3.bf16.msra.mxu0 %v798_v13 }
  0x48   : > { %747 = vmatmul.mubr.bf16.vlgmr.msra.gmra.mrb[0].mxu0 %v800_v14 }
 0x11b   : > { %v748_v17 = vpop.f32.mrb[0].mxu0  ;;  %499 = sbr.rel (%p694_p11) target bundleno = 306 (0x132), region = 85 }
 0x11c   : > { %v490_v19 = vadd.f32 %v748_v17, %v357_v15  ;;  %v473_v20 = vpop.f32.mrb[1].mxu0 }
 0x11d   : > { %v488_v22 = vadd.f32 %v473_v20, %v355_v16  ;;  %v749_v23 = vpop.f32.mrb[2].mxu0 }
 0x11e   : > { %494 = vst [vmem:[#allocation2 + $0x10] sm:$0xff] %v490_v19  ;;  %v491_v24 = vadd.f32 %v749_v23, %v358_v18  ;;  %v476_v25 = vpop.f32.mrb[3].mxu0 }
 0x11f   : > { %492 = vst [vmem:[#allocation2] sm:$0xff] %v488_v22  ;;  %v489_v26 = vadd.f32 %v476_v25, %v356_v21 }
 0x120   : > { %495 = vst [vmem:[#allocation2 + $0x18] sm:$0xff] %v491_v24 }
 0x121   : > { %493 = vst [vmem:[#allocation2 + $0x8] sm:$0xff] %v489_v26 }
 0x125   : > { %v502_v33 = vld [vmem:[#allocation2 + $0x10] sm:$0xff] }
 0x126   : > { %v500_v27 = vld [vmem:[#allocation2] sm:$0xff]  ;;  %v513_v35 = vmul.f32 %v695_v29, %v502_v33 }
 0x127   : > { %v511_v30 = vmul.f32 %v695_v29, %v500_v27  ;;  %v503_v34 = vld [vmem:[#allocation2 + $0x18] sm:$0xff] }
 0x128   : > { %v501_v28 = vld [vmem:[#allocation2 + $0x8] sm:$0xff]  ;;  %v514_v36 = vmul.f32 %v695_v29, %v503_v34  ;;  %v524_v39 = vadd.f32 %v696_v32, %v513_v35 }
 0x129   : > { %v512_v31 = vmul.f32 %v695_v29, %v501_v28  ;;  %v522_v37 = vadd.f32 %v696_v32, %v511_v30 }
 0x12a   : > { %v525_v40 = vadd.f32 %v696_v32, %v514_v36  ;;  %v528_v43 = vmax.f32 %v524_v39, 0.0 }
 0x12b   : > { %v523_v38 = vadd.f32 %v696_v32, %v512_v31  ;;  %v526_v41 = vmax.f32 %v522_v37, 0.0 }
 0x12c   : > { %v529_v44 = vmax.f32 %v525_v40, 0.0 }
 0x12d   : > { %v527_v42 = vmax.f32 %v523_v38, 0.0 }
 0x12e   : > { %v717_v46 = vpack.c.bf16 %v529_v44, %v528_v43 }
 0x12f   : > { %v712_v45 = vpack.c.bf16 %v527_v42, %v526_v41 }
 0x130   : > { %719 = vst [vmem:[%s967_s4 + $0x8] sm:$0xff] %v717_v46  }
 0x131   : > { %713 = vst [vmem:[%s967_s4] sm:$0xff] %v712_v45  }
 0x132 PF: > { %s14_s19 = sadd.s32 1, %s839_s19   ;;  %s968_s15 = smov %s827_s16 }
 0x133   : > { %p11_p12 = scmp.ge.s32.totalorder %s14_s19, 7   ;;  %s969_s16 = smov %s902_s23 }
 0x134   : > { %s970_s17 = smov %s835_s18  ;;  %s971_s18 = smov %s973_s20 }
 0x135   :  { %13 = sbr.rel (!%p11_p12) target bundleno = 3 (0x3), region = 129 }

// kernel: variant_resnet_forward.29
= control target key start
LH: loop header
LB: loop body
LE: loop exit
PB: predicated region body
PF: predicated region fallthrough
CT: control target
= control target key end

     0   :  { %s358_s1 = inlined_call_operand.vmem [shape: bf16[128,128], index: 1, kind: input, shape index: {}]   ;;  %s359_s0 = inlined_call_operand.vmem [shape: bf16[32,128], index: 0, kind: input, shape index: {}]   ;;  %s360_s2 = inlined_call_operand.vmem [shape: f32[1,128], index: 2, kind: input, shape index: {}]   ;;  %s361_s3 = inlined_call_operand.vmem [shape: f32[1,128], index: 3, kind: input, shape index: {}]   ;;  %s362_s4 = inlined_call_operand.vmem [shape: bf16[32,128], index: 4, kind: output, shape index: {}]  }
   0x1   :  { %v281_v0 = vld [vmem:[%s358_s1] sm:$0xff]   ;;  %v282_v1 = vld [vmem:[%s358_s1 + $0x8] sm:$0xff]   ;;  %v283_v2 = vld [vmem:[%s358_s1 + $0x10] sm:$0xff]  }
   0x2   :  { %261 = vmatprep.subr.bf16.mxu0 %v281_v0  ;;  %v284_v3 = vld [vmem:[%s358_s1 + $0x18] sm:$0xff]   ;;  %v289_v4 = vld [vmem:[%s359_s0] sm:$0xff]   ;;  %v286_v6 = vld [vmem:[%s358_s1 + $0x28] sm:$0xff]  }
   0x3   :  { %262 = vmatpush3.bf16.msra.mxu0 %v281_v0  ;;  %277 = vmatprep.mubr.bf16.mxu0 %v289_v4  ;;  %v285_v5 = vld [vmem:[%s358_s1 + $0x20] sm:$0xff]   ;;  %v287_v7 = vld [vmem:[%s358_s1 + $0x30] sm:$0xff]   ;;  %v288_v8 = vld [vmem:[%s358_s1 + $0x38] sm:$0xff]  }
   0x4   :  { %263 = vmatprep.subr.bf16.mxu0 %v282_v1  ;;  %v290_v9 = vld [vmem:[%s359_s0 + $0x8] sm:$0xff]   ;;  %v230_v10 = vld [vmem:[%s360_s2] ss:$0 sm:$0xff] }
   0x5   :  { %v231_v14 = vld [vmem:[%s361_s3] ss:$0 sm:$0xff] }
   0x7   :  { %264 = vmatpush3.bf16.msra.mxu0 %v282_v1 }
   0x8   :  { %265 = vmatprep.subr.bf16.mxu0 %v283_v2 }
   0xb   :  { %266 = vmatpush3.bf16.msra.mxu0 %v283_v2 }
   0xc   :  { %267 = vmatprep.subr.bf16.mxu0 %v284_v3 }
   0xf   :  { %268 = vmatpush3.bf16.msra.mxu0 %v284_v3 }
  0x10   :  { %269 = vmatprep.subr.bf16.mxu0 %v285_v5 }
  0x13   :  { %270 = vmatpush3.bf16.msra.mxu0 %v285_v5 }
  0x14   :  { %271 = vmatprep.subr.bf16.mxu0 %v286_v6 }
  0x17   :  { %272 = vmatpush3.bf16.msra.mxu0 %v286_v6 }
  0x18   :  { %273 = vmatprep.subr.bf16.mxu0 %v287_v7 }
  0x1b   :  { %274 = vmatpush3.bf16.msra.mxu0 %v287_v7 }
  0x1c   :  { %275 = vmatprep.subr.bf16.mxu0 %v288_v8 }
  0x1f   :  { %276 = vmatpush3.bf16.msra.mxu0 %v288_v8 }
  0x22   :  { %278 = vmatmul.mubr.bf16.vlgmr.msra.gmra.mrb[0].mxu0 %v290_v9 }
  0xf5   :  { %v279_v11 = vpop.f32.mrb[0].mxu0 }
  0xf6   :  { %v183_v12 = vmul.f32 %v279_v11, %v230_v10  ;;  %v144_v13 = vpop.f32.mrb[1].mxu0 }
  0xf7   :  { %v181_v15 = vmul.f32 %v230_v10, %v144_v13  ;;  %v280_v16 = vpop.f32.mrb[2].mxu0 }
  0xf8   :  { %v184_v17 = vmul.f32 %v280_v16, %v230_v10  ;;  %v147_v18 = vpop.f32.mrb[3].mxu0  ;;  %v194_v20 = vadd.f32 %v231_v14, %v183_v12 }
  0xf9   :  { %v182_v19 = vmul.f32 %v230_v10, %v147_v18  ;;  %v192_v22 = vadd.f32 %v231_v14, %v181_v15 }
  0xfa   :  { %v195_v21 = vadd.f32 %v231_v14, %v184_v17 }
  0xfb   :  { %v193_v23 = vadd.f32 %v231_v14, %v182_v19 }
  0xfc   :  { %v248_v24 = vpack.c.bf16 %v195_v21, %v194_v20 }
  0xfd   :  { %v243_v25 = vpack.c.bf16 %v193_v23, %v192_v22 }
  0xfe   :  { %250 = vst [vmem:[%s362_s4 + $0x8] sm:$0xff] %v248_v24  }
  0xff   :  { %244 = vst [vmem:[%s362_s4] sm:$0xff] %v243_v25  }

// kernel: variant_resnet_forward.30
= control target key start
LH: loop header
LB: loop body
LE: loop exit
PB: predicated region body
PF: predicated region fallthrough
CT: control target
= control target key end

     0   :  { %s972_s18 = smov 0   ;;  %s974_s19 = smov 0   ;;  %s1074_s0 = inlined_call_operand.vmem [shape: bf16[32,1152], index: 0, kind: input, shape index: {}]   ;;  %s1075_s1 = inlined_call_operand.vmem [shape: bf16[1152,128], index: 1, kind: input, shape index: {}]   ;;  %s1076_s2 = inlined_call_operand.vmem [shape: f32[1,128], index: 2, kind: input, shape index: {}]   ;;  %s1077_s3 = inlined_call_operand.vmem [shape: f32[1,128], index: 3, kind: input, shape index: {}]   ;;  %s1078_s4 = inlined_call_operand.vmem [shape: bf16[32,128], index: 4, kind: input, shape index: {}]   ;;  %s1079_s5 = inlined_call_operand.vmem [shape: bf16[32,128], index: 5, kind: output, shape index: {}]  }
   0x1   :  { %s976_s20 = smov 0   ;;  %s978_s21 = smov 0  }
   0x2   :  { %s980_s22 = smov 0  }
   0x3 LB: > { %s27_s23 = sadd.s32 1, %s935_s21  ;;  %p50_p1 = scmp.ne.s32.totalorder %s927_s19, %s923_s18  ;;  %s939_s22 = sphi %s980_s22, %s15_s22   ;;  %s935_s21 = sphi %s978_s21, %s1083_s21   ;;  %s931_s20 = sphi %s976_s20, %s1082_s20   ;;  %s927_s19 = sphi %s974_s19, %s1081_s19   ;;  %s923_s18 = sphi %s972_s18, %s1080_s18  }
   0x4   : > { %p28_p0 = scmp.ge.s32.totalorder %s27_s23, 9  ;;  %p51_p2 = scmp.eq.s32.totalorder %s939_s22, 0 }
   0x5   : > { %s43_s25 = sadd.s32 1, %s927_s19  ;;  %p767_p5 = scmp.ge.s32.totalorder %s939_s22, 9 }
   0x6   : > { %s1085_s23 = smov (%p28_p0, %s27_s23), 0  ;;  %p52_p3 = por %p51_p2, %p50_p1 }
   0x7   : > { %s39_s24 = ssub.s32 %s935_s21, %s1085_s23  ;;  %236 = sbr.rel (%p767_p5) target bundleno = 21 (0x15), region = 28 }
   0x8   : > { %p41_p4 = scmp.eq.s32.totalorder %s39_s24, 0 }
   0xa   : > { %s1007_s26 = scalar_select %p41_p4, %s927_s19, %s43_s25  }
   0xe   : > { %239 = sbr.rel (!%p52_p3) target bundleno = 21 (0x15), region = 32  ;;  %s241_s27 = sand.u32 (%p52_p3), 1, %s927_s19  }
   0xf   : > { %s769_s28 = sshll.u32 (%p52_p3), %s935_s21, 2  ;;  %s768_s29 = sshll.u32 (%p52_p3), %s241_s27, 4 }
  0x10   : > { %s248_s7 = scalar_lea.vmem (%p52_p3), %s1074_s0, %s769_s28  ;;  %s243_s8 = scalar_lea.vmem (%p52_p3), [#allocation3], %s768_s29 }
  0x11   : > { %v264_v0 = vld [vmem:[%s248_s7] sm:$0xf] (%p52_p3)  ;;  %v266_v1 = vld [vmem:[%s248_s7 + $0x24] sm:$0xf] (%p52_p3)  ;;  %v268_v2 = vld [vmem:[%s248_s7 + $0x48] sm:$0xf] (%p52_p3) }
  0x12   : > { %265 = vst [vmem:[%s243_s8] sm:$0xf] (%p52_p3), %v264_v0  ;;  %267 = vst [vmem:[%s243_s8 + $0x4] sm:$0xf] (%p52_p3), %v266_v1  ;;  %v270_v3 = vld [vmem:[%s248_s7 + $0x6c] sm:$0xf] (%p52_p3) }
  0x13   : > { %269 = vst [vmem:[%s243_s8 + $0x8] sm:$0xf] (%p52_p3), %v268_v2  ;;  %271 = vst [vmem:[%s243_s8 + $0xc] sm:$0xf] (%p52_p3), %v270_v3 }
  0x15 PF: > { %p770_p6 = scmp.ge.s32.totalorder %s939_s22, 1  ;;  %p313_p7 = scmp.lt.s32.totalorder %s939_s22, 10 }
  0x17   : > { %p314_p8 = pnand %p770_p6, %p313_p7 }
  0x18   : > { %s320_s9 = sand.u32 (!%p314_p8), 1, %s923_s18   ;;  %s772_s10 = sshll.u32 (!%p314_p8), %s931_s20, 4 }
  0x19   : > { %317 = sbr.rel (%p314_p8) target bundleno = 308 (0x134), region = 77  ;;  %s1019_s11 = sshll.u32 (!%p314_p8), %s320_s9, 4 }
  0x1a   : > { %p374_p9 = scmp.lt.s32.totalorder (!%p314_p8), %s772_s10, 143  ;;  %s322_s16 = scalar_lea.vmem (!%p314_p8), [#allocation3], %s1019_s11 }
  0x1b   : > { %p774_p10 = scmp.ne.s32.totalorder (!%p314_p8), %s931_s20, 0 }
  0x20   : > { %s1087_s10 = smov (!%p374_p9, %s772_s10), 143  ;;  %410 = sbr.rel (%p774_p10) target bundleno = 39 (0x27), region = 85 }
  0x21   : > { %s773_s12 = sshll.u32 %s1087_s10, 2  ;;  %v941_v4 = vmov (!%p774_p10), 0.0  }
  0x22   : > { %s1024_s15 = scalar_lea.vmem %s1075_s1, %s773_s12  ;;  %411 = vst [vmem:[#allocation2] sm:$0xff] (!%p774_p10), %v941_v4  ;;  %412 = vst [vmem:[#allocation2 + $0x8] sm:$0xff] (!%p774_p10), %v941_v4 }
  0x23   : > { %413 = vst [vmem:[#allocation2 + $0x10] sm:$0xff] (!%p774_p10), %v941_v4  ;;  %414 = vst [vmem:[#allocation2 + $0x18] sm:$0xff] (!%p774_p10), %v941_v4 }
  0x27 PF: > { %v891_v5 = vld [vmem:[%s1024_s15] sm:$0xff]   ;;  %v892_v6 = vld [vmem:[%s1024_s15 + $0x8] sm:$0xff]   ;;  %v893_v7 = vld [vmem:[%s1024_s15 + $0x10] sm:$0xff]   ;;  %p785_p11 = scmp.ne.s32.totalorder %s931_s20, 8 }
  0x28   : > { %830 = vmatprep.subr.bf16.mxu0 %v891_v5  ;;  %v894_v8 = vld [vmem:[%s1024_s15 + $0x18] sm:$0xff]   ;;  %v899_v9 = vld [vmem:[%s322_s16] sm:$0xff]   ;;  %v896_v11 = vld [vmem:[%s1024_s15 + $0x28] sm:$0xff]  }
  0x29   : > { %831 = vmatpush3.bf16.msra.mxu0 %v891_v5  ;;  %846 = vmatprep.mubr.bf16.mxu0 %v899_v9  ;;  %v895_v10 = vld [vmem:[%s1024_s15 + $0x20] sm:$0xff]   ;;  %v897_v12 = vld [vmem:[%s1024_s15 + $0x30] sm:$0xff]   ;;  %v898_v13 = vld [vmem:[%s1024_s15 + $0x38] sm:$0xff]  }
  0x2a   : > { %832 = vmatprep.subr.bf16.mxu0 %v892_v6  ;;  %v900_v14 = vld [vmem:[%s322_s16 + $0x8] sm:$0xff]   ;;  %v417_v15 = vld [vmem:[#allocation2 + $0x10] sm:$0xff]  ;;  %v415_v16 = vld [vmem:[#allocation2] sm:$0xff] }
  0x2b   : > { %v418_v18 = vld [vmem:[#allocation2 + $0x18] sm:$0xff]  ;;  %v416_v21 = vld [vmem:[#allocation2 + $0x8] sm:$0xff]  ;;  %v786_v29 = vld [vmem:[%s1076_s2] ss:$0 sm:$0xff] (!%p785_p11) }
  0x2c   : > { %v787_v32 = vld [vmem:[%s1077_s3] ss:$0 sm:$0xff] (!%p785_p11)  ;;  %v818_v39 = vld [vmem:[%s1078_s4 + $0x8] sm:$0xff] (!%p785_p11)  }
  0x2d   : > { %833 = vmatpush3.bf16.msra.mxu0 %v892_v6  ;;  %v801_v33 = vld [vmem:[%s1078_s4] sm:$0xff] (!%p785_p11)   ;;  %v806_v43 = vunpack.c.l.bf16 (!%p785_p11), %v818_v39  ;;  %v807_v45 = vunpack.c.h.bf16 (!%p785_p11), %v818_v39 }
  0x2e   : > { %834 = vmatprep.subr.bf16.mxu0 %v893_v7  ;;  %v802_v35 = vunpack.c.l.bf16 (!%p785_p11), %v801_v33  ;;  %v803_v36 = vunpack.c.h.bf16 (!%p785_p11), %v801_v33 }
  0x31   : > { %835 = vmatpush3.bf16.msra.mxu0 %v893_v7 }
  0x32   : > { %836 = vmatprep.subr.bf16.mxu0 %v894_v8 }
  0x35   : > { %837 = vmatpush3.bf16.msra.mxu0 %v894_v8 }
  0x36   : > { %838 = vmatprep.subr.bf16.mxu0 %v895_v10 }
  0x39   : > { %839 = vmatpush3.bf16.msra.mxu0 %v895_v10 }
  0x3a   : > { %840 = vmatprep.subr.bf16.mxu0 %v896_v11 }
  0x3d   : > { %841 = vmatpush3.bf16.msra.mxu0 %v896_v11 }
  0x3e   : > { %842 = vmatprep.subr.bf16.mxu0 %v897_v12 }
  0x41   : > { %843 = vmatpush3.bf16.msra.mxu0 %v897_v12 }
  0x42   : > { %844 = vmatprep.subr.bf16.mxu0 %v898_v13 }
  0x45   : > { %845 = vmatpush3.bf16.msra.mxu0 %v898_v13 }
  0x48   : > { %847 = vmatmul.mubr.bf16.vlgmr.msra.gmra.mrb[0].mxu0 %v900_v14 }
 0x11b   : > { %v848_v17 = vpop.f32.mrb[0].mxu0  ;;  %559 = sbr.rel (%p785_p11) target bundleno = 308 (0x134), region = 89 }
 0x11c   : > { %v550_v19 = vadd.f32 %v848_v17, %v417_v15  ;;  %v533_v20 = vpop.f32.mrb[1].mxu0 }
 0x11d   : > { %v548_v22 = vadd.f32 %v533_v20, %v415_v16  ;;  %v849_v23 = vpop.f32.mrb[2].mxu0 }
 0x11e   : > { %554 = vst [vmem:[#allocation2 + $0x10] sm:$0xff] %v550_v19  ;;  %v551_v24 = vadd.f32 %v849_v23, %v418_v18  ;;  %v536_v25 = vpop.f32.mrb[3].mxu0 }
 0x11f   : > { %552 = vst [vmem:[#allocation2] sm:$0xff] %v548_v22  ;;  %v549_v26 = vadd.f32 %v536_v25, %v416_v21 }
 0x120   : > { %555 = vst [vmem:[#allocation2 + $0x18] sm:$0xff] %v551_v24 }
 0x121   : > { %553 = vst [vmem:[#allocation2 + $0x8] sm:$0xff] %v549_v26 }
 0x125   : > { %v562_v34 = vld [vmem:[#allocation2 + $0x10] sm:$0xff] }
 0x126   : > { %v560_v27 = vld [vmem:[#allocation2] sm:$0xff]  ;;  %v573_v38 = vmul.f32 %v786_v29, %v562_v34 }
 0x127   : > { %v571_v30 = vmul.f32 %v786_v29, %v560_v27  ;;  %v563_v37 = vld [vmem:[#allocation2 + $0x18] sm:$0xff] }
 0x128   : > { %v561_v28 = vld [vmem:[#allocation2 + $0x8] sm:$0xff]  ;;  %v574_v42 = vmul.f32 %v786_v29, %v563_v37  ;;  %v584_v44 = vadd.f32 %v787_v32, %v573_v38 }
 0x129   : > { %v572_v31 = vmul.f32 %v786_v29, %v561_v28  ;;  %v582_v40 = vadd.f32 %v787_v32, %v571_v30 }
 0x12a   : > { %v585_v48 = vadd.f32 %v787_v32, %v574_v42  ;;  %v596_v49 = vadd.f32 %v806_v43, %v584_v44 }
 0x12b   : > { %v583_v41 = vadd.f32 %v787_v32, %v572_v31  ;;  %v594_v46 = vadd.f32 %v802_v35, %v582_v40 }
 0x12c   : > { %v597_v52 = vadd.f32 %v807_v45, %v585_v48  ;;  %v600_v53 = vmax.f32 %v596_v49, 0.0 }
 0x12d   : > { %v595_v47 = vadd.f32 %v803_v36, %v583_v41  ;;  %v598_v50 = vmax.f32 %v594_v46, 0.0 }
 0x12e   : > { %v601_v55 = vmax.f32 %v597_v52, 0.0 }
 0x12f   : > { %v599_v51 = vmax.f32 %v595_v47, 0.0 }
 0x130   : > { %v816_v56 = vpack.c.bf16 %v601_v55, %v600_v53 }
 0x131   : > { %v811_v54 = vpack.c.bf16 %v599_v51, %v598_v50 }
 0x132   : > { %819 = vst [vmem:[%s1079_s5 + $0x8] sm:$0xff] %v816_v56  }
 0x133   : > { %812 = vst [vmem:[%s1079_s5] sm:$0xff] %v811_v54  }
 0x134 PF: > { %s15_s22 = sadd.s32 1, %s939_s22   ;;  %s1080_s18 = smov %s927_s19 }
 0x135   : > { %p12_p12 = scmp.ge.s32.totalorder %s15_s22, 11   ;;  %s1081_s19 = smov %s1007_s26 }
 0x136   : > { %s1082_s20 = smov %s935_s21  ;;  %s1083_s21 = smov %s1085_s23 }
 0x137   :  { %14 = sbr.rel (!%p12_p12) target bundleno = 3 (0x3), region = 136 }

// kernel: variant_resnet_forward.31
= control target key start
LH: loop header
LB: loop body
LE: loop exit
PB: predicated region body
PF: predicated region fallthrough
CT: control target
= control target key end

     0   :  { %s867_s15 = smov 0   ;;  %s869_s16 = smov 0   ;;  %s963_s0 = inlined_call_operand.vmem [shape: bf16[32,1152], index: 0, kind: input, shape index: {}]   ;;  %s964_s1 = inlined_call_operand.vmem [shape: bf16[1152,128], index: 1, kind: input, shape index: {}]   ;;  %s965_s2 = inlined_call_operand.vmem [shape: f32[1,128], index: 2, kind: input, shape index: {}]   ;;  %s966_s3 = inlined_call_operand.vmem [shape: f32[1,128], index: 3, kind: input, shape index: {}]   ;;  %s967_s4 = inlined_call_operand.vmem [shape: bf16[32,128], index: 4, kind: output, shape index: {}]  }
   0x1   :  { %s871_s17 = smov 0   ;;  %s873_s18 = smov 0  }
   0x2   :  { %s875_s19 = smov 0  }
   0x3 LB: > { %s26_s20 = sadd.s32 1, %s835_s18  ;;  %p49_p1 = scmp.ne.s32.totalorder %s827_s16, %s823_s15  ;;  %s839_s19 = sphi %s875_s19, %s14_s19   ;;  %s835_s18 = sphi %s873_s18, %s971_s18   ;;  %s831_s17 = sphi %s871_s17, %s970_s17   ;;  %s827_s16 = sphi %s869_s16, %s969_s16   ;;  %s823_s15 = sphi %s867_s15, %s968_s15  }
   0x4   : > { %p27_p0 = scmp.ge.s32.totalorder %s26_s20, 9  ;;  %p50_p2 = scmp.eq.s32.totalorder %s839_s19, 0 }
   0x5   : > { %s42_s22 = sadd.s32 1, %s827_s16  ;;  %p676_p5 = scmp.ge.s32.totalorder %s839_s19, 9 }
   0x6   : > { %s973_s20 = smov (%p27_p0, %s26_s20), 0  ;;  %p51_p3 = por %p50_p2, %p49_p1 }
   0x7   : > { %s38_s21 = ssub.s32 %s835_s18, %s973_s20  ;;  %195 = sbr.rel (%p676_p5) target bundleno = 21 (0x15), region = 24 }
   0x8   : > { %p40_p4 = scmp.eq.s32.totalorder %s38_s21, 0 }
   0xa   : > { %s902_s23 = scalar_select %p40_p4, %s827_s16, %s42_s22  }
   0xe   : > { %198 = sbr.rel (!%p51_p3) target bundleno = 21 (0x15), region = 28  ;;  %s200_s24 = sand.u32 (%p51_p3), 1, %s827_s16  }
   0xf   : > { %s678_s25 = sshll.u32 (%p51_p3), %s835_s18, 2  ;;  %s677_s26 = sshll.u32 (%p51_p3), %s200_s24, 4 }
  0x10   : > { %s207_s29 = scalar_lea.vmem (%p51_p3), %s963_s0, %s678_s25  ;;  %s202_s30 = scalar_lea.vmem (%p51_p3), [#allocation3], %s677_s26 }
  0x11   : > { %v223_v0 = vld [vmem:[%s207_s29] sm:$0xf] (%p51_p3)  ;;  %v225_v1 = vld [vmem:[%s207_s29 + $0x24] sm:$0xf] (%p51_p3)  ;;  %v227_v2 = vld [vmem:[%s207_s29 + $0x48] sm:$0xf] (%p51_p3) }
  0x12   : > { %224 = vst [vmem:[%s202_s30] sm:$0xf] (%p51_p3), %v223_v0  ;;  %226 = vst [vmem:[%s202_s30 + $0x4] sm:$0xf] (%p51_p3), %v225_v1  ;;  %v229_v3 = vld [vmem:[%s207_s29 + $0x6c] sm:$0xf] (%p51_p3) }
  0x13   : > { %228 = vst [vmem:[%s202_s30 + $0x8] sm:$0xf] (%p51_p3), %v227_v2  ;;  %230 = vst [vmem:[%s202_s30 + $0xc] sm:$0xf] (%p51_p3), %v229_v3 }
  0x15 PF: > { %p679_p6 = scmp.ge.s32.totalorder %s839_s19, 1  ;;  %p272_p7 = scmp.lt.s32.totalorder %s839_s19, 10 }
  0x17   : > { %p273_p8 = pnand %p679_p6, %p272_p7 }
  0x18   : > { %s279_s5 = sand.u32 (!%p273_p8), 1, %s823_s15   ;;  %s681_s6 = sshll.u32 (!%p273_p8), %s831_s17, 4 }
  0x19   : > { %276 = sbr.rel (%p273_p8) target bundleno = 306 (0x132), region = 73  ;;  %s914_s7 = sshll.u32 (!%p273_p8), %s279_s5, 4 }
  0x1a   : > { %p323_p9 = scmp.lt.s32.totalorder (!%p273_p8), %s681_s6, 143  ;;  %s281_s12 = scalar_lea.vmem (!%p273_p8), [#allocation3], %s914_s7 }
  0x1b   : > { %p683_p10 = scmp.ne.s32.totalorder (!%p273_p8), %s831_s17, 0 }
  0x20   : > { %s975_s6 = smov (!%p323_p9, %s681_s6), 143  ;;  %350 = sbr.rel (%p683_p10) target bundleno = 39 (0x27), region = 81 }
  0x21   : > { %s682_s8 = sshll.u32 %s975_s6, 2  ;;  %v841_v4 = vmov (!%p683_p10), 0.0  }
  0x22   : > { %s919_s11 = scalar_lea.vmem %s964_s1, %s682_s8  ;;  %351 = vst [vmem:[#allocation2] sm:$0xff] (!%p683_p10), %v841_v4  ;;  %352 = vst [vmem:[#allocation2 + $0x8] sm:$0xff] (!%p683_p10), %v841_v4 }
  0x23   : > { %353 = vst [vmem:[#allocation2 + $0x10] sm:$0xff] (!%p683_p10), %v841_v4  ;;  %354 = vst [vmem:[#allocation2 + $0x18] sm:$0xff] (!%p683_p10), %v841_v4 }
  0x27 PF: > { %v791_v5 = vld [vmem:[%s919_s11] sm:$0xff]   ;;  %v792_v6 = vld [vmem:[%s919_s11 + $0x8] sm:$0xff]   ;;  %v793_v7 = vld [vmem:[%s919_s11 + $0x10] sm:$0xff]   ;;  %p694_p11 = scmp.ne.s32.totalorder %s831_s17, 8 }
  0x28   : > { %730 = vmatprep.subr.bf16.mxu0 %v791_v5  ;;  %v794_v8 = vld [vmem:[%s919_s11 + $0x18] sm:$0xff]   ;;  %v799_v9 = vld [vmem:[%s281_s12] sm:$0xff]   ;;  %v796_v11 = vld [vmem:[%s919_s11 + $0x28] sm:$0xff]  }
  0x29   : > { %731 = vmatpush3.bf16.msra.mxu0 %v791_v5  ;;  %746 = vmatprep.mubr.bf16.mxu0 %v799_v9  ;;  %v795_v10 = vld [vmem:[%s919_s11 + $0x20] sm:$0xff]   ;;  %v797_v12 = vld [vmem:[%s919_s11 + $0x30] sm:$0xff]   ;;  %v798_v13 = vld [vmem:[%s919_s11 + $0x38] sm:$0xff]  }
  0x2a   : > { %732 = vmatprep.subr.bf16.mxu0 %v792_v6  ;;  %v800_v14 = vld [vmem:[%s281_s12 + $0x8] sm:$0xff]   ;;  %v357_v15 = vld [vmem:[#allocation2 + $0x10] sm:$0xff]  ;;  %v355_v16 = vld [vmem:[#allocation2] sm:$0xff] }
  0x2b   : > { %v358_v18 = vld [vmem:[#allocation2 + $0x18] sm:$0xff]  ;;  %v356_v21 = vld [vmem:[#allocation2 + $0x8] sm:$0xff]  ;;  %v695_v29 = vld [vmem:[%s965_s2] ss:$0 sm:$0xff] (!%p694_p11) }
  0x2c   : > { %v696_v32 = vld [vmem:[%s966_s3] ss:$0 sm:$0xff] (!%p694_p11) }
  0x2d   : > { %733 = vmatpush3.bf16.msra.mxu0 %v792_v6 }
  0x2e   : > { %734 = vmatprep.subr.bf16.mxu0 %v793_v7 }
  0x31   : > { %735 = vmatpush3.bf16.msra.mxu0 %v793_v7 }
  0x32   : > { %736 = vmatprep.subr.bf16.mxu0 %v794_v8 }
  0x35   : > { %737 = vmatpush3.bf16.msra.mxu0 %v794_v8 }
  0x36   : > { %738 = vmatprep.subr.bf16.mxu0 %v795_v10 }
  0x39   : > { %739 = vmatpush3.bf16.msra.mxu0 %v795_v10 }
  0x3a   : > { %740 = vmatprep.subr.bf16.mxu0 %v796_v11 }
  0x3d   : > { %741 = vmatpush3.bf16.msra.mxu0 %v796_v11 }
  0x3e   : > { %742 = vmatprep.subr.bf16.mxu0 %v797_v12 }
  0x41   : > { %743 = vmatpush3.bf16.msra.mxu0 %v797_v12 }
  0x42   : > { %744 = vmatprep.subr.bf16.mxu0 %v798_v13 }
  0x45   : > { %745 = vmatpush3.bf16.msra.mxu0 %v798_v13 }
  0x48   : > { %747 = vmatmul.mubr.bf16.vlgmr.msra.gmra.mrb[0].mxu0 %v800_v14 }
 0x11b   : > { %v748_v17 = vpop.f32.mrb[0].mxu0  ;;  %499 = sbr.rel (%p694_p11) target bundleno = 306 (0x132), region = 85 }
 0x11c   : > { %v490_v19 = vadd.f32 %v748_v17, %v357_v15  ;;  %v473_v20 = vpop.f32.mrb[1].mxu0 }
 0x11d   : > { %v488_v22 = vadd.f32 %v473_v20, %v355_v16  ;;  %v749_v23 = vpop.f32.mrb[2].mxu0 }
 0x11e   : > { %494 = vst [vmem:[#allocation2 + $0x10] sm:$0xff] %v490_v19  ;;  %v491_v24 = vadd.f32 %v749_v23, %v358_v18  ;;  %v476_v25 = vpop.f32.mrb[3].mxu0 }
 0x11f   : > { %492 = vst [vmem:[#allocation2] sm:$0xff] %v488_v22  ;;  %v489_v26 = vadd.f32 %v476_v25, %v356_v21 }
 0x120   : > { %495 = vst [vmem:[#allocation2 + $0x18] sm:$0xff] %v491_v24 }
 0x121   : > { %493 = vst [vmem:[#allocation2 + $0x8] sm:$0xff] %v489_v26 }
 0x125   : > { %v502_v33 = vld [vmem:[#allocation2 + $0x10] sm:$0xff] }
 0x126   : > { %v500_v27 = vld [vmem:[#allocation2] sm:$0xff]  ;;  %v513_v35 = vmul.f32 %v695_v29, %v502_v33 }
 0x127   : > { %v511_v30 = vmul.f32 %v695_v29, %v500_v27  ;;  %v503_v34 = vld [vmem:[#allocation2 + $0x18] sm:$0xff] }
 0x128   : > { %v501_v28 = vld [vmem:[#allocation2 + $0x8] sm:$0xff]  ;;  %v514_v36 = vmul.f32 %v695_v29, %v503_v34  ;;  %v524_v39 = vadd.f32 %v696_v32, %v513_v35 }
 0x129   : > { %v512_v31 = vmul.f32 %v695_v29, %v501_v28  ;;  %v522_v37 = vadd.f32 %v696_v32, %v511_v30 }
 0x12a   : > { %v525_v40 = vadd.f32 %v696_v32, %v514_v36  ;;  %v528_v43 = vmax.f32 %v524_v39, 0.0 }
 0x12b   : > { %v523_v38 = vadd.f32 %v696_v32, %v512_v31  ;;  %v526_v41 = vmax.f32 %v522_v37, 0.0 }
 0x12c   : > { %v529_v44 = vmax.f32 %v525_v40, 0.0 }
 0x12d   : > { %v527_v42 = vmax.f32 %v523_v38, 0.0 }
 0x12e   : > { %v717_v46 = vpack.c.bf16 %v529_v44, %v528_v43 }
 0x12f   : > { %v712_v45 = vpack.c.bf16 %v527_v42, %v526_v41 }
 0x130   : > { %719 = vst [vmem:[%s967_s4 + $0x8] sm:$0xff] %v717_v46  }
 0x131   : > { %713 = vst [vmem:[%s967_s4] sm:$0xff] %v712_v45  }
 0x132 PF: > { %s14_s19 = sadd.s32 1, %s839_s19   ;;  %s968_s15 = smov %s827_s16 }
 0x133   : > { %p11_p12 = scmp.ge.s32.totalorder %s14_s19, 11   ;;  %s969_s16 = smov %s902_s23 }
 0x134   : > { %s970_s17 = smov %s835_s18  ;;  %s971_s18 = smov %s973_s20 }
 0x135   :  { %13 = sbr.rel (!%p11_p12) target bundleno = 3 (0x3), region = 129 }

// kernel: variant_resnet_forward.33
= control target key start
LH: loop header
LB: loop body
LE: loop exit
PB: predicated region body
PF: predicated region fallthrough
CT: control target
= control target key end

     0   :  { %s779_s15 = smov 0   ;;  %s781_s16 = smov 0   ;;  %s849_s0 = inlined_call_operand.vmem [shape: bf16[8,1152], index: 0, kind: input, shape index: {}]   ;;  %s850_s1 = inlined_call_operand.vmem [shape: bf16[1152,256], index: 1, kind: input, shape index: {}]   ;;  %s851_s2 = inlined_call_operand.vmem [shape: f32[1,256], index: 2, kind: input, shape index: {}]   ;;  %s852_s3 = inlined_call_operand.vmem [shape: f32[1,256], index: 3, kind: input, shape index: {}]   ;;  %s853_s4 = inlined_call_operand.vmem [shape: bf16[8,256], index: 4, kind: output, shape index: {}]  }
   0x1   :  { %s783_s17 = smov 0  }
   0x2 LB: > { %s26_s18 = sadd.s32 1, %s746_s16  ;;  %p648_p0 = scmp.ge.s32.totalorder %s750_s17, 1  ;;  %s750_s17 = sphi %s783_s17, %s14_s17   ;;  %s746_s16 = sphi %s781_s16, %s855_s16   ;;  %s742_s15 = sphi %s779_s15, %s854_s15  }
   0x3   : > { %p27_p1 = scmp.ge.s32.totalorder %s26_s18, 9  ;;  %p227_p2 = scmp.lt.s32.totalorder %s750_s17, 10 }
   0x5   : > { %s857_s18 = smov (%p27_p1, %s26_s18), 0  ;;  %p228_p3 = pnand %p648_p0, %p227_p2 }
   0x6   : > { %p280_p4 = scmp.lt.s32.totalorder (!%p228_p3), %s742_s15, 8  ;;  %s650_s19 = sshll.u32 (!%p228_p3), %s742_s15, 4 }
   0x7   : > { %231 = sbr.rel (%p228_p3) target bundleno = 287 (0x11f), region = 36  ;;  %p288_p5 = scmp.lt.s32.totalorder (!%p228_p3), %s650_s19, 143 }
   0x8   : > { %p653_p6 = scmp.ne.s32.totalorder (!%p228_p3), %s742_s15, 0 }
   0xe   : > { %s281_s20 = scalar_select %p280_p4, %s742_s15, 8 }
   0xf   : > { %s859_s19 = smov (!%p288_p5, %s650_s19), 143  ;;  %322 = sbr.rel (%p653_p6) target bundleno = 22 (0x16), region = 40 }
  0x10   : > { %s649_s21 = sshll.u32 %s281_s20, 2  ;;  %s676_s25 = sshll.u32 %s859_s19, 3  ;;  %v752_v0 = vmov (!%p653_p6), 0.0  }
  0x11   : > { %s805_s24 = scalar_lea.vmem %s849_s0, %s649_s21  ;;  %s810_s28 = scalar_lea.vmem %s850_s1, %s676_s25  ;;  %323 = vst [vmem:[#allocation2] sm:$0xff] (!%p653_p6), %v752_v0  ;;  %324 = vst [vmem:[#allocation2 + $0x8] sm:$0xff] (!%p653_p6), %v752_v0 }
  0x16 PF: > { %v704_v1 = vld [vmem:[%s810_s28 + $0x4] ss:$8 sps:$4 sm:$0xff]   ;;  %v706_v2 = vld [vmem:[%s810_s28] ss:$8 sps:$4 sm:$0xff]   ;;  %v753_v3 = vmov 0   ;;  %p670_p7 = scmp.ne.s32.totalorder %s742_s15, 8 }
  0x17   : > { %456 = vmatprep.mubr.bf16.mxu0 %v753_v3  ;;  %424 = vmatprep.subr.bf16.mxu0 %v704_v1  ;;  %v707_v4 = vld [vmem:[%s810_s28 + $0x14] ss:$8 sps:$4 sm:$0xff]   ;;  %v709_v5 = vld [vmem:[%s810_s28 + $0x10] ss:$8 sps:$4 sm:$0xff]   ;;  %v710_v6 = vld [vmem:[%s810_s28 + $0x24] ss:$8 sps:$4 sm:$0xff]   ;;  %v477_v27 = vlaneseq (!%p670_p7) }
  0x18   : > { %425 = vmatpush1.bf16.msra.mxu0 %v706_v2  ;;  %v712_v7 = vld [vmem:[%s810_s28 + $0x20] ss:$8 sps:$4 sm:$0xff]   ;;  %v713_v8 = vld [vmem:[%s810_s28 + $0x34] ss:$8 sps:$4 sm:$0xff]   ;;  %v715_v9 = vld [vmem:[%s810_s28 + $0x30] ss:$8 sps:$4 sm:$0xff]  }
  0x19   : > { %426 = vmatprep.subr.bf16.mxu0 %v707_v4  ;;  %v716_v10 = vld [vmem:[%s810_s28 + $0x44] ss:$8 sps:$4 sm:$0xff]   ;;  %v718_v11 = vld [vmem:[%s810_s28 + $0x40] ss:$8 sps:$4 sm:$0xff]   ;;  %v719_v12 = vld [vmem:[%s810_s28 + $0x54] ss:$8 sps:$4 sm:$0xff]  }
  0x1a   : > { %v721_v13 = vld [vmem:[%s810_s28 + $0x50] ss:$8 sps:$4 sm:$0xff]   ;;  %v722_v14 = vld [vmem:[%s810_s28 + $0x64] ss:$8 sps:$4 sm:$0xff]   ;;  %v724_v15 = vld [vmem:[%s810_s28 + $0x60] ss:$8 sps:$4 sm:$0xff]  }
  0x1b   : > { %v725_v16 = vld [vmem:[%s810_s28 + $0x74] ss:$8 sps:$4 sm:$0xff]   ;;  %v727_v17 = vld [vmem:[%s810_s28 + $0x70] ss:$8 sps:$4 sm:$0xff]   ;;  %v327_v18 = vld [vmem:[%s805_s24] sm:$0xf] }
  0x1c   : > { %427 = vmatpush1.bf16.msra.mxu0 %v709_v5  ;;  %v325_v19 = vld [vmem:[#allocation2] sm:$0xff]  ;;  %v326_v20 = vld [vmem:[#allocation2 + $0x8] sm:$0xff]  ;;  %v478_v28 = vshrl.u32 (!%p670_p7), %v477_v27, 7 }
  0x1d   : > { %428 = vmatprep.subr.bf16.mxu0 %v710_v6  ;;  %v475_v29 = vld [vmem:[%s851_s2] sm:$0x3] (!%p670_p7) }
  0x1e   : > { %v489_v30 = vld [vmem:[%s852_s3] sm:$0x3] (!%p670_p7)  ;;  %v479_v31 = vsub.s32 (!%p670_p7), 0, %v478_v28  ;;  %v483_v32 = vsub.s32 (!%p670_p7), 1, %v478_v28 }
  0x20   : > { %429 = vmatpush1.bf16.msra.mxu0 %v712_v7  ;;  %v480_v35 = vrot.slane (!%p670_p7), %v475_v29, %v479_v31  ;;  %v484_v36 = vrot.slane (!%p670_p7), %v475_v29, %v483_v32  ;;  %v494_v37 = vrot.slane (!%p670_p7), %v489_v30, %v479_v31  ;;  %v498_v38 = vrot.slane (!%p670_p7), %v489_v30, %v483_v32 }
  0x21   : > { %430 = vmatprep.subr.bf16.mxu0 %v713_v8 }
  0x24   : > { %431 = vmatpush1.bf16.msra.mxu0 %v715_v9 }
  0x25   : > { %432 = vmatprep.subr.bf16.mxu0 %v716_v10 }
  0x28   : > { %433 = vmatpush1.bf16.msra.mxu0 %v718_v11 }
  0x29   : > { %434 = vmatprep.subr.bf16.mxu0 %v719_v12 }
  0x2c   : > { %435 = vmatpush1.bf16.msra.mxu0 %v721_v13 }
  0x2d   : > { %436 = vmatprep.subr.bf16.mxu0 %v722_v14 }
  0x30   : > { %437 = vmatpush1.bf16.msra.mxu0 %v724_v15 }
  0x31   : > { %438 = vmatprep.subr.bf16.mxu0 %v725_v16 }
  0x34   : > { %439 = vmatpush1.bf16.msra.mxu0 %v727_v17 }
  0x37   : > { %457 = vmatmul.mubr.bf16.vlgmr.msra.gmra.mrb[0].mxu0 %v327_v18 }
 0x108   : > { %472 = sbr.rel (%p670_p7) target bundleno = 287 (0x11f), region = 44 }
 0x10a   : > { %v458_v21 = vpop.f32.mrb[0].mxu0 }
 0x10b   : > { %v465_v22 = vadd.f32 %v458_v21, %v325_v19  ;;  %v460_v23 = vpop.f32.mrb[1].mxu0 }
 0x10c   : > { %v466_v24 = vadd.f32 %v460_v23, %v326_v20  ;;  %v462_v25 = vpop.f32.mrb[2].mxu0 }
 0x10d   : > { %467 = vst [vmem:[#allocation2] sm:$0xff] %v465_v22  ;;  %v463_v26 = vpop.f32.mrb[3].mxu0 }
 0x10e   : > { %468 = vst [vmem:[#allocation2 + $0x8] sm:$0xff] %v466_v24 }
 0x114   : > { %v473_v33 = vld [vmem:[#allocation2] sm:$0xff] }
 0x115   : > { %v474_v34 = vld [vmem:[#allocation2 + $0x8] sm:$0xff]  ;;  %v487_v39 = vmul.f32 %v480_v35, %v473_v33 }
 0x116   : > { %v488_v40 = vmul.f32 %v484_v36, %v474_v34 }
 0x117   : > { %v501_v41 = vadd.f32 %v494_v37, %v487_v39 }
 0x118   : > { %v502_v42 = vadd.f32 %v498_v38, %v488_v40 }
 0x119   : > { %v503_v43 = vmax.f32 %v501_v41, 0.0 }
 0x11a   : > { %v504_v44 = vmax.f32 %v502_v42, 0.0 }
 0x11c   : > { %v677_v45 = vpack.c.bf16 %v504_v44, %v503_v43 }
 0x11e   : > { %513 = vst [vmem:[%s853_s4] sm:$0xff] %v677_v45 }
 0x11f PF: > { %s14_s17 = sadd.s32 1, %s750_s17   ;;  %s854_s15 = smov %s746_s16 }
 0x120   : > { %p11_p8 = scmp.ge.s32.totalorder %s14_s17, 11   ;;  %s855_s16 = smov %s857_s18 }
 0x122   :  { %13 = sbr.rel (!%p11_p8) target bundleno = 2 (0x2), region = 83 }

// kernel: variant_resnet_forward.34
= control target key start
LH: loop header
LB: loop body
LE: loop exit
PB: predicated region body
PF: predicated region fallthrough
CT: control target
= control target key end

     0   :  { %v257_v1 = vmov 0   ;;  %v175_v18 = vlaneseq  ;;  %s343_s1 = inlined_call_operand.vmem [shape: bf16[128,256], index: 1, kind: input, shape index: {}]   ;;  %s344_s0 = inlined_call_operand.vmem [shape: bf16[8,128], index: 0, kind: input, shape index: {}]   ;;  %s345_s2 = inlined_call_operand.vmem [shape: f32[1,256], index: 2, kind: input, shape index: {}]   ;;  %s346_s3 = inlined_call_operand.vmem [shape: f32[1,256], index: 3, kind: input, shape index: {}]   ;;  %s347_s4 = inlined_call_operand.vmem [shape: bf16[8,256], index: 4, kind: output, shape index: {}]  }
   0x1   :  { %v233_v0 = vld [vmem:[%s343_s1 + $0x4] ss:$8 sps:$4 sm:$0xff]   ;;  %155 = vmatprep.mubr.bf16.mxu0 %v257_v1  ;;  %v235_v2 = vld [vmem:[%s343_s1] ss:$8 sps:$4 sm:$0xff]   ;;  %v236_v3 = vld [vmem:[%s343_s1 + $0x14] ss:$8 sps:$4 sm:$0xff]  }
   0x2   :  { %123 = vmatprep.subr.bf16.mxu0 %v233_v0  ;;  %v238_v4 = vld [vmem:[%s343_s1 + $0x10] ss:$8 sps:$4 sm:$0xff]   ;;  %v239_v5 = vld [vmem:[%s343_s1 + $0x24] ss:$8 sps:$4 sm:$0xff]   ;;  %v241_v6 = vld [vmem:[%s343_s1 + $0x20] ss:$8 sps:$4 sm:$0xff]  }
   0x3   :  { %124 = vmatpush1.bf16.msra.mxu0 %v235_v2  ;;  %v242_v7 = vld [vmem:[%s343_s1 + $0x34] ss:$8 sps:$4 sm:$0xff]   ;;  %v244_v8 = vld [vmem:[%s343_s1 + $0x30] ss:$8 sps:$4 sm:$0xff]   ;;  %v245_v9 = vld [vmem:[%s343_s1 + $0x44] ss:$8 sps:$4 sm:$0xff]  }
   0x4   :  { %125 = vmatprep.subr.bf16.mxu0 %v236_v3  ;;  %v247_v10 = vld [vmem:[%s343_s1 + $0x40] ss:$8 sps:$4 sm:$0xff]   ;;  %v248_v11 = vld [vmem:[%s343_s1 + $0x54] ss:$8 sps:$4 sm:$0xff]   ;;  %v250_v12 = vld [vmem:[%s343_s1 + $0x50] ss:$8 sps:$4 sm:$0xff]  }
   0x5   :  { %v251_v13 = vld [vmem:[%s343_s1 + $0x64] ss:$8 sps:$4 sm:$0xff]   ;;  %v253_v14 = vld [vmem:[%s343_s1 + $0x60] ss:$8 sps:$4 sm:$0xff]   ;;  %v254_v15 = vld [vmem:[%s343_s1 + $0x74] ss:$8 sps:$4 sm:$0xff]  }
   0x6   :  { %v256_v16 = vld [vmem:[%s343_s1 + $0x70] ss:$8 sps:$4 sm:$0xff]   ;;  %v26_v17 = vld [vmem:[%s344_s0] sm:$0xf]  ;;  %v176_v19 = vshrl.u32 %v175_v18, 7 }
   0x7   :  { %126 = vmatpush1.bf16.msra.mxu0 %v238_v4  ;;  %v173_v21 = vld [vmem:[%s345_s2] sm:$0x3] }
   0x8   :  { %127 = vmatprep.subr.bf16.mxu0 %v239_v5  ;;  %v177_v20 = vsub.s32 0, %v176_v19  ;;  %v181_v22 = vsub.s32 1, %v176_v19  ;;  %v187_v23 = vld [vmem:[%s346_s3] sm:$0x3] }
   0xa   :  { %v178_v24 = vrot.slane %v173_v21, %v177_v20  ;;  %v182_v25 = vrot.slane %v173_v21, %v181_v22  ;;  %v192_v26 = vrot.slane %v187_v23, %v177_v20  ;;  %v196_v28 = vrot.slane %v187_v23, %v181_v22 }
   0xb   :  { %128 = vmatpush1.bf16.msra.mxu0 %v241_v6 }
   0xc   :  { %129 = vmatprep.subr.bf16.mxu0 %v242_v7 }
   0xf   :  { %130 = vmatpush1.bf16.msra.mxu0 %v244_v8 }
  0x10   :  { %131 = vmatprep.subr.bf16.mxu0 %v245_v9 }
  0x13   :  { %132 = vmatpush1.bf16.msra.mxu0 %v247_v10 }
  0x14   :  { %133 = vmatprep.subr.bf16.mxu0 %v248_v11 }
  0x17   :  { %134 = vmatpush1.bf16.msra.mxu0 %v250_v12 }
  0x18   :  { %135 = vmatprep.subr.bf16.mxu0 %v251_v13 }
  0x1b   :  { %136 = vmatpush1.bf16.msra.mxu0 %v253_v14 }
  0x1c   :  { %137 = vmatprep.subr.bf16.mxu0 %v254_v15 }
  0x1f   :  { %138 = vmatpush1.bf16.msra.mxu0 %v256_v16 }
  0x22   :  { %156 = vmatmul.mubr.bf16.vlgmr.msra.gmra.mrb[0].mxu0 %v26_v17 }
  0xf5   :  { %v157_v27 = vpop.f32.mrb[0].mxu0 }
  0xf6   :  { %v185_v29 = vmul.f32 %v178_v24, %v157_v27  ;;  %v159_v30 = vpop.f32.mrb[1].mxu0 }
  0xf7   :  { %v186_v31 = vmul.f32 %v182_v25, %v159_v30  ;;  %v161_v32 = vpop.f32.mrb[2].mxu0 }
  0xf8   :  { %v199_v33 = vadd.f32 %v192_v26, %v185_v29  ;;  %v162_v34 = vpop.f32.mrb[3].mxu0 }
  0xf9   :  { %v200_v35 = vadd.f32 %v196_v28, %v186_v31 }
  0xfb   :  { %v231_v36 = vpack.c.bf16 %v200_v35, %v199_v33 }
  0xfd   :  { %209 = vst [vmem:[%s347_s4] sm:$0xff] %v231_v36 }

// kernel: variant_resnet_forward.35
= control target key start
LH: loop header
LB: loop body
LE: loop exit
PB: predicated region body
PF: predicated region fallthrough
CT: control target
= control target key end

     0   :  { %s1024_s18 = smov 0   ;;  %s1026_s19 = smov 0   ;;  %s1112_s0 = inlined_call_operand.vmem [shape: bf16[8,2304], index: 0, kind: input, shape index: {}]   ;;  %s1113_s1 = inlined_call_operand.vmem [shape: bf16[2304,256], index: 1, kind: input, shape index: {}]   ;;  %s1114_s2 = inlined_call_operand.vmem [shape: f32[1,256], index: 2, kind: input, shape index: {}]   ;;  %s1115_s3 = inlined_call_operand.vmem [shape: f32[1,256], index: 3, kind: input, shape index: {}]   ;;  %s1116_s4 = inlined_call_operand.vmem [shape: bf16[8,256], index: 4, kind: input, shape index: {}]   ;;  %s1117_s5 = inlined_call_operand.vmem [shape: bf16[8,256], index: 5, kind: output, shape index: {}]  }
   0x1   :  { %s1028_s20 = smov 0  }
   0x2 LB: > { %s27_s21 = sadd.s32 1, %s987_s19  ;;  %p845_p0 = scmp.ge.s32.totalorder %s991_s20, 1  ;;  %s991_s20 = sphi %s1028_s20, %s15_s20   ;;  %s987_s19 = sphi %s1026_s19, %s1119_s19   ;;  %s983_s18 = sphi %s1024_s18, %s1118_s18  }
   0x3   : > { %p28_p1 = scmp.ge.s32.totalorder %s27_s21, 9  ;;  %p271_p2 = scmp.lt.s32.totalorder %s991_s20, 10 }
   0x5   : > { %s1121_s21 = smov (%p28_p1, %s27_s21), 0  ;;  %p272_p3 = pnand %p845_p0, %p271_p2 }
   0x6   : > { %s846_s22 = sshll.u32 (!%p272_p3), %s983_s18, 1  ;;  %s848_s23 = sshll.u32 (!%p272_p3), %s983_s18, 5 }
   0x7   : > { %275 = sbr.rel (%p272_p3) target bundleno = 323 (0x143), region = 40  ;;  %p337_p4 = scmp.lt.s32.totalorder (!%p272_p3), %s846_s22, 17 }
   0x8   : > { %p346_p5 = scmp.lt.s32.totalorder (!%p272_p3), %s848_s23, 287  ;;  %p851_p6 = scmp.ne.s32.totalorder (!%p272_p3), %s983_s18, 0 }
   0xe   : > { %s1123_s22 = smov (!%p337_p4, %s846_s22), 17  ;;  %s1125_s23 = smov (!%p346_p5, %s848_s23), 287 }
   0xf   : > { %s847_s24 = sshll.u32 %s1123_s22, 2  ;;  %s892_s28 = sshll.u32 %s1125_s23, 3  ;;  %v993_v0 = vmov (!%p851_p6), 0.0  }
  0x10   : > { %s1049_s27 = scalar_lea.vmem %s1112_s0, %s847_s24  ;;  %s1054_s6 = scalar_lea.vmem %s1113_s1, %s892_s28  ;;  %390 = vst [vmem:[#allocation2] sm:$0xff] (!%p851_p6), %v993_v0  ;;  %391 = vst [vmem:[#allocation2 + $0x8] sm:$0xff] (!%p851_p6), %v993_v0 }
  0x11   : > { %389 = sbr.rel (%p851_p6) target bundleno = 24 (0x18), region = 44 }
  0x18 PF: > { %v919_v1 = vld [vmem:[%s1054_s6 + $0x4] ss:$8 sps:$4 sm:$0xff]   ;;  %v921_v2 = vld [vmem:[%s1054_s6] ss:$8 sps:$4 sm:$0xff]   ;;  %v922_v3 = vld [vmem:[%s1054_s6 + $0x14] ss:$8 sps:$4 sm:$0xff]  }
  0x19   : > { %594 = vmatprep.subr.bf16.mxu0 %v919_v1  ;;  %v924_v4 = vld [vmem:[%s1054_s6 + $0x10] ss:$8 sps:$4 sm:$0xff]   ;;  %v925_v5 = vld [vmem:[%s1054_s6 + $0x24] ss:$8 sps:$4 sm:$0xff]   ;;  %v927_v6 = vld [vmem:[%s1054_s6 + $0x20] ss:$8 sps:$4 sm:$0xff]  }
  0x1a   : > { %595 = vmatpush1.bf16.msra.mxu0 %v921_v2  ;;  %v928_v7 = vld [vmem:[%s1054_s6 + $0x34] ss:$8 sps:$4 sm:$0xff]   ;;  %v930_v8 = vld [vmem:[%s1054_s6 + $0x30] ss:$8 sps:$4 sm:$0xff]   ;;  %v931_v9 = vld [vmem:[%s1054_s6 + $0x44] ss:$8 sps:$4 sm:$0xff]  }
  0x1b   : > { %596 = vmatprep.subr.bf16.mxu0 %v922_v3  ;;  %v933_v10 = vld [vmem:[%s1054_s6 + $0x40] ss:$8 sps:$4 sm:$0xff]   ;;  %v934_v11 = vld [vmem:[%s1054_s6 + $0x54] ss:$8 sps:$4 sm:$0xff]   ;;  %v936_v12 = vld [vmem:[%s1054_s6 + $0x50] ss:$8 sps:$4 sm:$0xff]  }
  0x1c   : > { %v937_v13 = vld [vmem:[%s1054_s6 + $0x64] ss:$8 sps:$4 sm:$0xff]   ;;  %v939_v16 = vld [vmem:[%s1054_s6 + $0x60] ss:$8 sps:$4 sm:$0xff]   ;;  %v940_v17 = vld [vmem:[%s1054_s6 + $0x74] ss:$8 sps:$4 sm:$0xff]  }
  0x1d   : > { %v394_v14 = vld [vmem:[%s1049_s27] sm:$0xff]  ;;  %v942_v18 = vld [vmem:[%s1054_s6 + $0x70] ss:$8 sps:$4 sm:$0xff]   ;;  %v946_v21 = vld [vmem:[%s1054_s6 + $0x94] ss:$8 sps:$4 sm:$0xff]   ;;  %p886_p7 = scmp.ne.s32.totalorder %s983_s18, 8 }
  0x1e   : > { %597 = vmatpush1.bf16.msra.mxu0 %v924_v4  ;;  %v853_v15 = vcombine.high %v394_v14, %v394_v14  ;;  %v943_v19 = vld [vmem:[%s1054_s6 + $0x84] ss:$8 sps:$4 sm:$0xff]   ;;  %v945_v20 = vld [vmem:[%s1054_s6 + $0x80] ss:$8 sps:$4 sm:$0xff]   ;;  %v948_v22 = vld [vmem:[%s1054_s6 + $0x90] ss:$8 sps:$4 sm:$0xff]   ;;  %v852_v35 = vcombine.low %v394_v14, %v394_v14  ;;  %v647_v44 = vlaneseq (!%p886_p7) }
  0x1f   : > { %598 = vmatprep.subr.bf16.mxu0 %v925_v5  ;;  %v949_v23 = vld [vmem:[%s1054_s6 + $0xa4] ss:$8 sps:$4 sm:$0xff]   ;;  %v951_v24 = vld [vmem:[%s1054_s6 + $0xa0] ss:$8 sps:$4 sm:$0xff]   ;;  %v952_v25 = vld [vmem:[%s1054_s6 + $0xb4] ss:$8 sps:$4 sm:$0xff]  }
  0x20   : > { %626 = vmatprep.mubr.bf16.mxu0 %v853_v15  ;;  %v954_v26 = vld [vmem:[%s1054_s6 + $0xb0] ss:$8 sps:$4 sm:$0xff]   ;;  %v955_v27 = vld [vmem:[%s1054_s6 + $0xc4] ss:$8 sps:$4 sm:$0xff]   ;;  %v957_v28 = vld [vmem:[%s1054_s6 + $0xc0] ss:$8 sps:$4 sm:$0xff]  }
  0x21   : > { %v958_v29 = vld [vmem:[%s1054_s6 + $0xd4] ss:$8 sps:$4 sm:$0xff]   ;;  %v960_v30 = vld [vmem:[%s1054_s6 + $0xd0] ss:$8 sps:$4 sm:$0xff]   ;;  %v961_v31 = vld [vmem:[%s1054_s6 + $0xe4] ss:$8 sps:$4 sm:$0xff]  }
  0x22   : > { %599 = vmatpush1.bf16.msra.mxu0 %v927_v6  ;;  %v963_v32 = vld [vmem:[%s1054_s6 + $0xe0] ss:$8 sps:$4 sm:$0xff]   ;;  %v964_v33 = vld [vmem:[%s1054_s6 + $0xf4] ss:$8 sps:$4 sm:$0xff]   ;;  %v966_v34 = vld [vmem:[%s1054_s6 + $0xf0] ss:$8 sps:$4 sm:$0xff]  }
  0x23   : > { %600 = vmatprep.subr.bf16.mxu0 %v928_v7  ;;  %v392_v36 = vld [vmem:[#allocation2] sm:$0xff]  ;;  %v393_v37 = vld [vmem:[#allocation2 + $0x8] sm:$0xff]  ;;  %v648_v45 = vshrl.u32 (!%p886_p7), %v647_v44, 7 }
  0x24   : > { %v645_v46 = vld [vmem:[%s1114_s2] sm:$0x3] (!%p886_p7) }
  0x25   : > { %v659_v47 = vld [vmem:[%s1115_s3] sm:$0x3] (!%p886_p7)  ;;  %v649_v48 = vsub.s32 (!%p886_p7), 0, %v648_v45  ;;  %v653_v49 = vsub.s32 (!%p886_p7), 1, %v648_v45 }
  0x26   : > { %601 = vmatpush1.bf16.msra.mxu0 %v930_v8  ;;  %v673_v52 = vld [vmem:[%s1116_s4] sm:$0xff] (!%p886_p7) }
  0x27   : > { %602 = vmatprep.subr.bf16.mxu0 %v931_v9  ;;  %v650_v53 = vrot.slane (!%p886_p7), %v645_v46, %v649_v48  ;;  %v654_v54 = vrot.slane (!%p886_p7), %v645_v46, %v653_v49  ;;  %v664_v55 = vrot.slane (!%p886_p7), %v659_v47, %v649_v48  ;;  %v668_v56 = vrot.slane (!%p886_p7), %v659_v47, %v653_v49 }
  0x28   : > { %v674_v59 = vunpack.c.l.bf16 (!%p886_p7), %v673_v52  ;;  %v675_v60 = vunpack.c.h.bf16 (!%p886_p7), %v673_v52 }
  0x2a   : > { %603 = vmatpush1.bf16.msra.mxu0 %v933_v10 }
  0x2b   : > { %604 = vmatprep.subr.bf16.mxu0 %v934_v11 }
  0x2e   : > { %605 = vmatpush1.bf16.msra.mxu0 %v936_v12 }
  0x2f   : > { %606 = vmatprep.subr.bf16.mxu0 %v937_v13 }
  0x32   : > { %607 = vmatpush1.bf16.msra.mxu0 %v939_v16 }
  0x33   : > { %608 = vmatprep.subr.bf16.mxu0 %v940_v17 }
  0x36   : > { %609 = vmatpush1.bf16.msra.mxu0 %v942_v18 }
  0x37   : > { %610 = vmatprep.subr.bf16.mxu0 %v943_v19 }
  0x3a   : > { %611 = vmatpush1.bf16.msra.mxu0 %v945_v20 }
  0x3b   : > { %612 = vmatprep.subr.bf16.mxu0 %v946_v21 }
  0x3e   : > { %613 = vmatpush1.bf16.msra.mxu0 %v948_v22 }
  0x3f   : > { %614 = vmatprep.subr.bf16.mxu0 %v949_v23 }
  0x42   : > { %615 = vmatpush1.bf16.msra.mxu0 %v951_v24 }
  0x43   : > { %616 = vmatprep.subr.bf16.mxu0 %v952_v25 }
  0x46   : > { %617 = vmatpush1.bf16.msra.mxu0 %v954_v26 }
  0x47   : > { %618 = vmatprep.subr.bf16.mxu0 %v955_v27 }
  0x4a   : > { %619 = vmatpush1.bf16.msra.mxu0 %v957_v28 }
  0x4b   : > { %620 = vmatprep.subr.bf16.mxu0 %v958_v29 }
  0x4e   : > { %621 = vmatpush1.bf16.msra.mxu0 %v960_v30 }
  0x4f   : > { %622 = vmatprep.subr.bf16.mxu0 %v961_v31 }
  0x52   : > { %623 = vmatpush1.bf16.msra.mxu0 %v963_v32 }
  0x53   : > { %624 = vmatprep.subr.bf16.mxu0 %v964_v33 }
  0x56   : > { %625 = vmatpush1.bf16.msra.mxu0 %v966_v34 }
  0x59   : > { %627 = vmatmul.mubr.bf16.vlgmr.msra.gmra.mrb[0].mxu0 %v852_v35 }
 0x12a   : > { %642 = sbr.rel (%p886_p7) target bundleno = 323 (0x143), region = 48 }
 0x12c   : > { %v628_v38 = vpop.f32.mrb[0].mxu0 }
 0x12d   : > { %v635_v39 = vadd.f32 %v628_v38, %v392_v36  ;;  %v630_v40 = vpop.f32.mrb[1].mxu0 }
 0x12e   : > { %v636_v41 = vadd.f32 %v630_v40, %v393_v37  ;;  %v632_v42 = vpop.f32.mrb[2].mxu0 }
 0x12f   : > { %637 = vst [vmem:[#allocation2] sm:$0xff] %v635_v39  ;;  %v633_v43 = vpop.f32.mrb[3].mxu0 }
 0x130   : > { %638 = vst [vmem:[#allocation2 + $0x8] sm:$0xff] %v636_v41 }
 0x136   : > { %v643_v50 = vld [vmem:[#allocation2] sm:$0xff] }
 0x137   : > { %v644_v51 = vld [vmem:[#allocation2 + $0x8] sm:$0xff]  ;;  %v657_v57 = vmul.f32 %v650_v53, %v643_v50 }
 0x138   : > { %v658_v58 = vmul.f32 %v654_v54, %v644_v51 }
 0x139   : > { %v671_v61 = vadd.f32 %v664_v55, %v657_v57 }
 0x13a   : > { %v672_v62 = vadd.f32 %v668_v56, %v658_v58 }
 0x13b   : > { %v676_v63 = vadd.f32 %v674_v59, %v671_v61 }
 0x13c   : > { %v677_v0 = vadd.f32 %v675_v60, %v672_v62 }
 0x13d   : > { %v678_v1 = vmax.f32 %v676_v63, 0.0 }
 0x13e   : > { %v679_v2 = vmax.f32 %v677_v0, 0.0 }
 0x140   : > { %v893_v3 = vpack.c.bf16 %v679_v2, %v678_v1 }
 0x142   : > { %688 = vst [vmem:[%s1117_s5] sm:$0xff] %v893_v3 }
 0x143 PF: > { %s15_s20 = sadd.s32 1, %s991_s20   ;;  %s1118_s18 = smov %s987_s19 }
 0x144   : > { %p12_p8 = scmp.ge.s32.totalorder %s15_s20, 11   ;;  %s1119_s19 = smov %s1121_s21 }
 0x146   :  { %14 = sbr.rel (!%p12_p8) target bundleno = 2 (0x2), region = 90 }

// kernel: variant_resnet_forward.36
= control target key start
LH: loop header
LB: loop body
LE: loop exit
PB: predicated region body
PF: predicated region fallthrough
CT: control target
= control target key end

     0   :  { %s929_s15 = smov 0   ;;  %s931_s16 = smov 0   ;;  %s1014_s0 = inlined_call_operand.vmem [shape: bf16[8,2304], index: 0, kind: input, shape index: {}]   ;;  %s1015_s1 = inlined_call_operand.vmem [shape: bf16[2304,256], index: 1, kind: input, shape index: {}]   ;;  %s1016_s2 = inlined_call_operand.vmem [shape: f32[1,256], index: 2, kind: input, shape index: {}]   ;;  %s1017_s3 = inlined_call_operand.vmem [shape: f32[1,256], index: 3, kind: input, shape index: {}]   ;;  %s1018_s4 = inlined_call_operand.vmem [shape: bf16[8,256], index: 4, kind: output, shape index: {}]  }
   0x1   :  { %s933_s17 = smov 0  }
   0x2 LB: > { %s26_s18 = sadd.s32 1, %s897_s16  ;;  %p755_p0 = scmp.ge.s32.totalorder %s901_s17, 1  ;;  %s901_s17 = sphi %s933_s17, %s14_s17   ;;  %s897_s16 = sphi %s931_s16, %s1020_s16   ;;  %s893_s15 = sphi %s929_s15, %s1019_s15  }
   0x3   : > { %p27_p1 = scmp.ge.s32.totalorder %s26_s18, 9  ;;  %p229_p2 = scmp.lt.s32.totalorder %s901_s17, 10 }
   0x5   : > { %s1022_s18 = smov (%p27_p1, %s26_s18), 0  ;;  %p230_p3 = pnand %p755_p0, %p229_p2 }
   0x6   : > { %s756_s19 = sshll.u32 (!%p230_p3), %s893_s15, 1  ;;  %s758_s20 = sshll.u32 (!%p230_p3), %s893_s15, 5 }
   0x7   : > { %233 = sbr.rel (%p230_p3) target bundleno = 321 (0x141), region = 36  ;;  %p284_p4 = scmp.lt.s32.totalorder (!%p230_p3), %s756_s19, 17 }
   0x8   : > { %p293_p5 = scmp.lt.s32.totalorder (!%p230_p3), %s758_s20, 287  ;;  %p761_p6 = scmp.ne.s32.totalorder (!%p230_p3), %s893_s15, 0 }
   0xe   : > { %s1024_s19 = smov (!%p284_p4, %s756_s19), 17  ;;  %s1026_s20 = smov (!%p293_p5, %s758_s20), 287 }
   0xf   : > { %s757_s21 = sshll.u32 %s1024_s19, 2  ;;  %s802_s25 = sshll.u32 %s1026_s20, 3  ;;  %v903_v0 = vmov (!%p761_p6), 0.0  }
  0x10   : > { %s954_s24 = scalar_lea.vmem %s1014_s0, %s757_s21  ;;  %s959_s28 = scalar_lea.vmem %s1015_s1, %s802_s25  ;;  %327 = vst [vmem:[#allocation2] sm:$0xff] (!%p761_p6), %v903_v0  ;;  %328 = vst [vmem:[#allocation2 + $0x8] sm:$0xff] (!%p761_p6), %v903_v0 }
  0x11   : > { %326 = sbr.rel (%p761_p6) target bundleno = 24 (0x18), region = 40 }
  0x18 PF: > { %v829_v1 = vld [vmem:[%s959_s28 + $0x4] ss:$8 sps:$4 sm:$0xff]   ;;  %v831_v2 = vld [vmem:[%s959_s28] ss:$8 sps:$4 sm:$0xff]   ;;  %v832_v3 = vld [vmem:[%s959_s28 + $0x14] ss:$8 sps:$4 sm:$0xff]  }
  0x19   : > { %531 = vmatprep.subr.bf16.mxu0 %v829_v1  ;;  %v834_v4 = vld [vmem:[%s959_s28 + $0x10] ss:$8 sps:$4 sm:$0xff]   ;;  %v835_v5 = vld [vmem:[%s959_s28 + $0x24] ss:$8 sps:$4 sm:$0xff]   ;;  %v837_v6 = vld [vmem:[%s959_s28 + $0x20] ss:$8 sps:$4 sm:$0xff]  }
  0x1a   : > { %532 = vmatpush1.bf16.msra.mxu0 %v831_v2  ;;  %v838_v7 = vld [vmem:[%s959_s28 + $0x34] ss:$8 sps:$4 sm:$0xff]   ;;  %v840_v8 = vld [vmem:[%s959_s28 + $0x30] ss:$8 sps:$4 sm:$0xff]   ;;  %v841_v9 = vld [vmem:[%s959_s28 + $0x44] ss:$8 sps:$4 sm:$0xff]  }
  0x1b   : > { %533 = vmatprep.subr.bf16.mxu0 %v832_v3  ;;  %v843_v10 = vld [vmem:[%s959_s28 + $0x40] ss:$8 sps:$4 sm:$0xff]   ;;  %v844_v11 = vld [vmem:[%s959_s28 + $0x54] ss:$8 sps:$4 sm:$0xff]   ;;  %v846_v12 = vld [vmem:[%s959_s28 + $0x50] ss:$8 sps:$4 sm:$0xff]  }
  0x1c   : > { %v847_v13 = vld [vmem:[%s959_s28 + $0x64] ss:$8 sps:$4 sm:$0xff]   ;;  %v849_v16 = vld [vmem:[%s959_s28 + $0x60] ss:$8 sps:$4 sm:$0xff]   ;;  %v850_v17 = vld [vmem:[%s959_s28 + $0x74] ss:$8 sps:$4 sm:$0xff]  }
  0x1d   : > { %v331_v14 = vld [vmem:[%s954_s24] sm:$0xff]  ;;  %v852_v18 = vld [vmem:[%s959_s28 + $0x70] ss:$8 sps:$4 sm:$0xff]   ;;  %v856_v21 = vld [vmem:[%s959_s28 + $0x94] ss:$8 sps:$4 sm:$0xff]   ;;  %p796_p7 = scmp.ne.s32.totalorder %s893_s15, 8 }
  0x1e   : > { %534 = vmatpush1.bf16.msra.mxu0 %v834_v4  ;;  %v763_v15 = vcombine.high %v331_v14, %v331_v14  ;;  %v853_v19 = vld [vmem:[%s959_s28 + $0x84] ss:$8 sps:$4 sm:$0xff]   ;;  %v855_v20 = vld [vmem:[%s959_s28 + $0x80] ss:$8 sps:$4 sm:$0xff]   ;;  %v858_v22 = vld [vmem:[%s959_s28 + $0x90] ss:$8 sps:$4 sm:$0xff]   ;;  %v762_v35 = vcombine.low %v331_v14, %v331_v14  ;;  %v584_v44 = vlaneseq (!%p796_p7) }
  0x1f   : > { %535 = vmatprep.subr.bf16.mxu0 %v835_v5  ;;  %v859_v23 = vld [vmem:[%s959_s28 + $0xa4] ss:$8 sps:$4 sm:$0xff]   ;;  %v861_v24 = vld [vmem:[%s959_s28 + $0xa0] ss:$8 sps:$4 sm:$0xff]   ;;  %v862_v25 = vld [vmem:[%s959_s28 + $0xb4] ss:$8 sps:$4 sm:$0xff]  }
  0x20   : > { %563 = vmatprep.mubr.bf16.mxu0 %v763_v15  ;;  %v864_v26 = vld [vmem:[%s959_s28 + $0xb0] ss:$8 sps:$4 sm:$0xff]   ;;  %v865_v27 = vld [vmem:[%s959_s28 + $0xc4] ss:$8 sps:$4 sm:$0xff]   ;;  %v867_v28 = vld [vmem:[%s959_s28 + $0xc0] ss:$8 sps:$4 sm:$0xff]  }
  0x21   : > { %v868_v29 = vld [vmem:[%s959_s28 + $0xd4] ss:$8 sps:$4 sm:$0xff]   ;;  %v870_v30 = vld [vmem:[%s959_s28 + $0xd0] ss:$8 sps:$4 sm:$0xff]   ;;  %v871_v31 = vld [vmem:[%s959_s28 + $0xe4] ss:$8 sps:$4 sm:$0xff]  }
  0x22   : > { %536 = vmatpush1.bf16.msra.mxu0 %v837_v6  ;;  %v873_v32 = vld [vmem:[%s959_s28 + $0xe0] ss:$8 sps:$4 sm:$0xff]   ;;  %v874_v33 = vld [vmem:[%s959_s28 + $0xf4] ss:$8 sps:$4 sm:$0xff]   ;;  %v876_v34 = vld [vmem:[%s959_s28 + $0xf0] ss:$8 sps:$4 sm:$0xff]  }
  0x23   : > { %537 = vmatprep.subr.bf16.mxu0 %v838_v7  ;;  %v329_v36 = vld [vmem:[#allocation2] sm:$0xff]  ;;  %v330_v37 = vld [vmem:[#allocation2 + $0x8] sm:$0xff]  ;;  %v585_v45 = vshrl.u32 (!%p796_p7), %v584_v44, 7 }
  0x24   : > { %v582_v46 = vld [vmem:[%s1016_s2] sm:$0x3] (!%p796_p7) }
  0x25   : > { %v596_v47 = vld [vmem:[%s1017_s3] sm:$0x3] (!%p796_p7)  ;;  %v586_v48 = vsub.s32 (!%p796_p7), 0, %v585_v45  ;;  %v590_v49 = vsub.s32 (!%p796_p7), 1, %v585_v45 }
  0x26   : > { %538 = vmatpush1.bf16.msra.mxu0 %v840_v8 }
  0x27   : > { %539 = vmatprep.subr.bf16.mxu0 %v841_v9  ;;  %v587_v52 = vrot.slane (!%p796_p7), %v582_v46, %v586_v48  ;;  %v591_v53 = vrot.slane (!%p796_p7), %v582_v46, %v590_v49  ;;  %v601_v54 = vrot.slane (!%p796_p7), %v596_v47, %v586_v48  ;;  %v605_v55 = vrot.slane (!%p796_p7), %v596_v47, %v590_v49 }
  0x2a   : > { %540 = vmatpush1.bf16.msra.mxu0 %v843_v10 }
  0x2b   : > { %541 = vmatprep.subr.bf16.mxu0 %v844_v11 }
  0x2e   : > { %542 = vmatpush1.bf16.msra.mxu0 %v846_v12 }
  0x2f   : > { %543 = vmatprep.subr.bf16.mxu0 %v847_v13 }
  0x32   : > { %544 = vmatpush1.bf16.msra.mxu0 %v849_v16 }
  0x33   : > { %545 = vmatprep.subr.bf16.mxu0 %v850_v17 }
  0x36   : > { %546 = vmatpush1.bf16.msra.mxu0 %v852_v18 }
  0x37   : > { %547 = vmatprep.subr.bf16.mxu0 %v853_v19 }
  0x3a   : > { %548 = vmatpush1.bf16.msra.mxu0 %v855_v20 }
  0x3b   : > { %549 = vmatprep.subr.bf16.mxu0 %v856_v21 }
  0x3e   : > { %550 = vmatpush1.bf16.msra.mxu0 %v858_v22 }
  0x3f   : > { %551 = vmatprep.subr.bf16.mxu0 %v859_v23 }
  0x42   : > { %552 = vmatpush1.bf16.msra.mxu0 %v861_v24 }
  0x43   : > { %553 = vmatprep.subr.bf16.mxu0 %v862_v25 }
  0x46   : > { %554 = vmatpush1.bf16.msra.mxu0 %v864_v26 }
  0x47   : > { %555 = vmatprep.subr.bf16.mxu0 %v865_v27 }
  0x4a   : > { %556 = vmatpush1.bf16.msra.mxu0 %v867_v28 }
  0x4b   : > { %557 = vmatprep.subr.bf16.mxu0 %v868_v29 }
  0x4e   : > { %558 = vmatpush1.bf16.msra.mxu0 %v870_v30 }
  0x4f   : > { %559 = vmatprep.subr.bf16.mxu0 %v871_v31 }
  0x52   : > { %560 = vmatpush1.bf16.msra.mxu0 %v873_v32 }
  0x53   : > { %561 = vmatprep.subr.bf16.mxu0 %v874_v33 }
  0x56   : > { %562 = vmatpush1.bf16.msra.mxu0 %v876_v34 }
  0x59   : > { %564 = vmatmul.mubr.bf16.vlgmr.msra.gmra.mrb[0].mxu0 %v762_v35 }
 0x12a   : > { %579 = sbr.rel (%p796_p7) target bundleno = 321 (0x141), region = 44 }
 0x12c   : > { %v565_v38 = vpop.f32.mrb[0].mxu0 }
 0x12d   : > { %v572_v39 = vadd.f32 %v565_v38, %v329_v36  ;;  %v567_v40 = vpop.f32.mrb[1].mxu0 }
 0x12e   : > { %v573_v41 = vadd.f32 %v567_v40, %v330_v37  ;;  %v569_v42 = vpop.f32.mrb[2].mxu0 }
 0x12f   : > { %574 = vst [vmem:[#allocation2] sm:$0xff] %v572_v39  ;;  %v570_v43 = vpop.f32.mrb[3].mxu0 }
 0x130   : > { %575 = vst [vmem:[#allocation2 + $0x8] sm:$0xff] %v573_v41 }
 0x136   : > { %v580_v50 = vld [vmem:[#allocation2] sm:$0xff] }
 0x137   : > { %v581_v51 = vld [vmem:[#allocation2 + $0x8] sm:$0xff]  ;;  %v594_v56 = vmul.f32 %v587_v52, %v580_v50 }
 0x138   : > { %v595_v57 = vmul.f32 %v591_v53, %v581_v51 }
 0x139   : > { %v608_v58 = vadd.f32 %v601_v54, %v594_v56 }
 0x13a   : > { %v609_v59 = vadd.f32 %v605_v55, %v595_v57 }
 0x13b   : > { %v610_v60 = vmax.f32 %v608_v58, 0.0 }
 0x13c   : > { %v611_v61 = vmax.f32 %v609_v59, 0.0 }
 0x13e   : > { %v803_v62 = vpack.c.bf16 %v611_v61, %v610_v60 }
 0x140   : > { %620 = vst [vmem:[%s1018_s4] sm:$0xff] %v803_v62 }
 0x141 PF: > { %s14_s17 = sadd.s32 1, %s901_s17   ;;  %s1019_s15 = smov %s897_s16 }
 0x142   : > { %p11_p8 = scmp.ge.s32.totalorder %s14_s17, 11   ;;  %s1020_s16 = smov %s1022_s18 }
 0x144   :  { %13 = sbr.rel (!%p11_p8) target bundleno = 2 (0x2), region = 83 }

// kernel: variant_resnet_forward.38
= control target key start
LH: loop header
LB: loop body
LE: loop exit
PB: predicated region body
PF: predicated region fallthrough
CT: control target
= control target key end

     0   :  { %s1145_s15 = smov 0   ;;  %s1147_s16 = smov 0   ;;  %s1368_s0 = inlined_call_operand.vmem [shape: bf16[8,2304], index: 0, kind: input, shape index: {}]   ;;  %s1369_s1 = inlined_call_operand.vmem [shape: bf16[2304,512], index: 1, kind: input, shape index: {}]   ;;  %s1370_s2 = inlined_call_operand.vmem [shape: f32[1,512], index: 2, kind: input, shape index: {}]   ;;  %s1371_s3 = inlined_call_operand.vmem [shape: f32[1,512], index: 3, kind: input, shape index: {}]   ;;  %s1372_s4 = inlined_call_operand.vmem [shape: bf16[8,512], index: 4, kind: output, shape index: {}]  }
   0x1   :  { %s1149_s17 = smov 0   ;;  %s1151_s18 = smov 0  }
   0x2   :  { %s1153_s19 = smov 0   ;;  %s1155_s20 = smov 0  }
   0x3   :  { %s1157_s21 = smov 0  }
   0x4 LB: > { %s26_s22 = sadd.s32 1, %s1109_s19  ;;  %s29_s23 = sadd.s32 1, %s1113_s20  ;;  %s1117_s21 = sphi %s1157_s21, %s14_s21   ;;  %s1113_s20 = sphi %s1155_s20, %s1378_s20   ;;  %s1109_s19 = sphi %s1153_s19, %s1377_s19   ;;  %s1105_s18 = sphi %s1151_s18, %s1376_s18   ;;  %s1101_s17 = sphi %s1149_s17, %s1375_s17   ;;  %s1097_s16 = sphi %s1147_s16, %s1374_s16   ;;  %s1093_s15 = sphi %s1145_s15, %s1373_s15  }
   0x5   : > { %p27_p0 = scmp.ge.s32.totalorder %s26_s22, 9  ;;  %p77_p1 = scmp.ne.s32.totalorder %s1097_s16, %s1093_s15 }
   0x6   : > { %p78_p2 = scmp.eq.s32.totalorder %s1117_s21, 0  ;;  %s70_s27 = sadd.s32 1, %s1097_s16 }
   0x7   : > { %s1380_s22 = smov (%p27_p0, %s26_s22), 0  ;;  %s1382_s23 = smov (!%p27_p0, %s29_s23), %s1113_s20 }
   0x8   : > { %p79_p3 = por %p78_p2, %p77_p1  ;;  %p31_p4 = scmp.ge.s32.totalorder %s1382_s23, 2 }
   0x9   : > { %s65_s24 = ssub.s32 %s1109_s19, %s1380_s22  ;;  %p901_p6 = scmp.ge.s32.totalorder %s1117_s21, 18 }
   0xa   : > { %s1384_s23 = smov (%p31_p4, %s1382_s23), 0 }
   0xb   : > { %s66_s25 = ssub.s32 %s1113_s20, %s1384_s23  ;;  %183 = sbr.rel (%p901_p6) target bundleno = 41 (0x29), region = 16 }
   0xc   : > { %s67_s26 = sor.u32 %s66_s25, %s65_s24 }
   0xd   : > { %p68_p5 = scmp.eq.s32.totalorder %s67_s26, 0 }
   0xf   : > { %s1196_s28 = scalar_select %p68_p5, %s1097_s16, %s70_s27  }
  0x12   : > { %199 = sbr.rel (!%p79_p3) target bundleno = 41 (0x29), region = 24  ;;  %s201_s29 = sand.u32 (%p79_p3), 1, %s1097_s16  }
  0x13   : > { %s904_s30 = sshll.u32 (%p79_p3), %s1113_s20, 1  ;;  %s902_s5 = sshll.u32 (%p79_p3), %s201_s29, 8 }
  0x14   : > { %s954_s6 = sshll.u32 (%p79_p3), %s1109_s19, 7  ;;  %s1210_s12 = scalar_lea.vmem (%p79_p3), [#allocation3], %s902_s5 }
  0x15   : > { %s207_s7 = sadd.s32 (%p79_p3), %s954_s6, %s904_s30 }
  0x16   : > { %s906_s8 = sshll.u32 (%p79_p3), %s207_s7, 2 }
  0x17   : > { %s1205_s11 = scalar_lea.vmem (%p79_p3), %s1369_s1, %s906_s8 }
  0x18   : > { %v299_v0 = vld [vmem:[%s1205_s11] sm:$0xff] (%p79_p3)  ;;  %v301_v1 = vld [vmem:[%s1205_s11 + $0x10] sm:$0xff] (%p79_p3) }
  0x19   : > { %v303_v2 = vld [vmem:[%s1205_s11 + $0x20] sm:$0xff]  ;;  %300 = vst [vmem:[%s1210_s12] sm:$0xff] %v299_v0  ;;  %302 = vst [vmem:[%s1210_s12 + $0x8] sm:$0xff] %v301_v1  ;;  %v305_v3 = vld [vmem:[%s1205_s11 + $0x30] sm:$0xff] }
  0x1a   : > { %304 = vst [vmem:[%s1210_s12 + $0x10] sm:$0xff] %v303_v2  ;;  %v307_v4 = vld [vmem:[%s1205_s11 + $0x40] sm:$0xff]  ;;  %v309_v5 = vld [vmem:[%s1205_s11 + $0x50] sm:$0xff]  ;;  %306 = vst [vmem:[%s1210_s12 + $0x18] sm:$0xff] %v305_v3 }
  0x1b   : > { %308 = vst [vmem:[%s1210_s12 + $0x20] sm:$0xff] %v307_v4  ;;  %310 = vst [vmem:[%s1210_s12 + $0x28] sm:$0xff] %v309_v5  ;;  %v311_v6 = vld [vmem:[%s1205_s11 + $0x60] sm:$0xff]  ;;  %v313_v7 = vld [vmem:[%s1205_s11 + $0x70] sm:$0xff] }
  0x1c   : > { %v315_v8 = vld [vmem:[%s1205_s11 + $0x80] sm:$0xff]  ;;  %312 = vst [vmem:[%s1210_s12 + $0x30] sm:$0xff] %v311_v6  ;;  %314 = vst [vmem:[%s1210_s12 + $0x38] sm:$0xff] %v313_v7  ;;  %v317_v9 = vld [vmem:[%s1205_s11 + $0x90] sm:$0xff] }
  0x1d   : > { %316 = vst [vmem:[%s1210_s12 + $0x40] sm:$0xff] %v315_v8  ;;  %v319_v10 = vld [vmem:[%s1205_s11 + $0xa0] sm:$0xff]  ;;  %v321_v11 = vld [vmem:[%s1205_s11 + $0xb0] sm:$0xff]  ;;  %318 = vst [vmem:[%s1210_s12 + $0x48] sm:$0xff] %v317_v9 }
  0x1e   : > { %320 = vst [vmem:[%s1210_s12 + $0x50] sm:$0xff] %v319_v10  ;;  %322 = vst [vmem:[%s1210_s12 + $0x58] sm:$0xff] %v321_v11  ;;  %v323_v12 = vld [vmem:[%s1205_s11 + $0xc0] sm:$0xff]  ;;  %v325_v13 = vld [vmem:[%s1205_s11 + $0xd0] sm:$0xff] }
  0x1f   : > { %v327_v14 = vld [vmem:[%s1205_s11 + $0xe0] sm:$0xff]  ;;  %324 = vst [vmem:[%s1210_s12 + $0x60] sm:$0xff] %v323_v12  ;;  %326 = vst [vmem:[%s1210_s12 + $0x68] sm:$0xff] %v325_v13  ;;  %v329_v15 = vld [vmem:[%s1205_s11 + $0xf0] sm:$0xff] }
  0x20   : > { %328 = vst [vmem:[%s1210_s12 + $0x70] sm:$0xff] %v327_v14  ;;  %v331_v16 = vld [vmem:[%s1205_s11 + $0x100] sm:$0xff]  ;;  %v333_v17 = vld [vmem:[%s1205_s11 + $0x110] sm:$0xff]  ;;  %330 = vst [vmem:[%s1210_s12 + $0x78] sm:$0xff] %v329_v15 }
  0x21   : > { %332 = vst [vmem:[%s1210_s12 + $0x80] sm:$0xff] %v331_v16  ;;  %334 = vst [vmem:[%s1210_s12 + $0x88] sm:$0xff] %v333_v17  ;;  %v335_v18 = vld [vmem:[%s1205_s11 + $0x120] sm:$0xff]  ;;  %v337_v19 = vld [vmem:[%s1205_s11 + $0x130] sm:$0xff] }
  0x22   : > { %v339_v20 = vld [vmem:[%s1205_s11 + $0x140] sm:$0xff]  ;;  %336 = vst [vmem:[%s1210_s12 + $0x90] sm:$0xff] %v335_v18  ;;  %338 = vst [vmem:[%s1210_s12 + $0x98] sm:$0xff] %v337_v19  ;;  %v341_v21 = vld [vmem:[%s1205_s11 + $0x150] sm:$0xff] }
  0x23   : > { %340 = vst [vmem:[%s1210_s12 + $0xa0] sm:$0xff] %v339_v20  ;;  %v343_v22 = vld [vmem:[%s1205_s11 + $0x160] sm:$0xff]  ;;  %v345_v23 = vld [vmem:[%s1205_s11 + $0x170] sm:$0xff]  ;;  %342 = vst [vmem:[%s1210_s12 + $0xa8] sm:$0xff] %v341_v21 }
  0x24   : > { %344 = vst [vmem:[%s1210_s12 + $0xb0] sm:$0xff] %v343_v22  ;;  %346 = vst [vmem:[%s1210_s12 + $0xb8] sm:$0xff] %v345_v23  ;;  %v347_v24 = vld [vmem:[%s1205_s11 + $0x180] sm:$0xff]  ;;  %v349_v25 = vld [vmem:[%s1205_s11 + $0x190] sm:$0xff] }
  0x25   : > { %v351_v26 = vld [vmem:[%s1205_s11 + $0x1a0] sm:$0xff]  ;;  %348 = vst [vmem:[%s1210_s12 + $0xc0] sm:$0xff] %v347_v24  ;;  %350 = vst [vmem:[%s1210_s12 + $0xc8] sm:$0xff] %v349_v25  ;;  %v353_v27 = vld [vmem:[%s1205_s11 + $0x1b0] sm:$0xff] }
  0x26   : > { %352 = vst [vmem:[%s1210_s12 + $0xd0] sm:$0xff] %v351_v26  ;;  %v355_v28 = vld [vmem:[%s1205_s11 + $0x1c0] sm:$0xff]  ;;  %v357_v29 = vld [vmem:[%s1205_s11 + $0x1d0] sm:$0xff]  ;;  %354 = vst [vmem:[%s1210_s12 + $0xd8] sm:$0xff] %v353_v27 }
  0x27   : > { %356 = vst [vmem:[%s1210_s12 + $0xe0] sm:$0xff] %v355_v28  ;;  %358 = vst [vmem:[%s1210_s12 + $0xe8] sm:$0xff] %v357_v29  ;;  %v359_v30 = vld [vmem:[%s1205_s11 + $0x1e0] sm:$0xff]  ;;  %v361_v31 = vld [vmem:[%s1205_s11 + $0x1f0] sm:$0xff] }
  0x28   : > { %360 = vst [vmem:[%s1210_s12 + $0xf0] sm:$0xff] %v359_v30  ;;  %362 = vst [vmem:[%s1210_s12 + $0xf8] sm:$0xff] %v361_v31 }
  0x29 PF: > { %p907_p7 = scmp.ge.s32.totalorder %s1117_s21, 1  ;;  %p383_p8 = scmp.lt.s32.totalorder %s1117_s21, 19 }
  0x2b   : > { %p384_p9 = pnand %p907_p7, %p383_p8 }
  0x2c   : > { %s390_s13 = sand.u32 (!%p384_p9), 1, %s1093_s15   ;;  %s909_s14 = sshll.u32 (!%p384_p9), %s1101_s17, 1 }
  0x2d   : > { %387 = sbr.rel (%p384_p9) target bundleno = 359 (0x167), region = 70  ;;  %s908_s24 = sshll.u32 (!%p384_p9), %s390_s13, 8 }
  0x2e   : > { %p439_p10 = scmp.lt.s32.totalorder (!%p384_p9), %s909_s14, 17  ;;  %s911_s25 = sshll.u32 (!%p384_p9), %s1105_s18, 1 }
  0x2f   : > { %p449_p11 = scmp.lt.s32.totalorder (!%p384_p9), %s911_s25, 3  ;;  %s1299_s13 = scalar_lea.vmem (!%p384_p9), [#allocation3], %s908_s24 }
  0x30   : > { %p915_p12 = scmp.ne.s32.totalorder (!%p384_p9), %s1101_s17, 0 }
  0x34   : > { %s1386_s14 = smov (!%p439_p10, %s909_s14), 17  ;;  %s1388_s25 = smov (!%p449_p11, %s911_s25), 3 }
  0x35   : > { %s910_s26 = sshll.u32 %s1386_s14, 2  ;;  %s451_s15 = scalar_lea.vmem %s1370_s2, %s1388_s25  ;;  %v1119_v32 = vmov (!%p915_p12), 0.0  }
  0x36   : > { %s1281_s30 = scalar_lea.vmem %s1368_s0, %s910_s26  ;;  %s456_s18 = scalar_lea.vmem %s1371_s3, %s1388_s25  ;;  %472 = vst [vmem:[#allocation2] sm:$0xff] (!%p915_p12), %v1119_v32  ;;  %473 = vst [vmem:[#allocation2 + $0x8] sm:$0xff] (!%p915_p12), %v1119_v32 }
  0x37   : > { %s914_s9 = sshll.u32 %s1388_s25, 2  ;;  %471 = sbr.rel (%p915_p12) target bundleno = 62 (0x3e), region = 78 }
  0x38   : > { %s1297_s12 = scalar_lea.vmem %s1372_s4, %s914_s9 }
  0x3e PF: > { %v1013_v33 = vld [vmem:[%s1299_s13 + $0x4] ss:$8 sps:$4 sm:$0xff]   ;;  %v1015_v34 = vld [vmem:[%s1299_s13] ss:$8 sps:$4 sm:$0xff]   ;;  %v1016_v35 = vld [vmem:[%s1299_s13 + $0x14] ss:$8 sps:$4 sm:$0xff]  }
  0x3f   : > { %676 = vmatprep.subr.bf16.mxu0 %v1013_v33  ;;  %v1018_v36 = vld [vmem:[%s1299_s13 + $0x10] ss:$8 sps:$4 sm:$0xff]   ;;  %v1019_v37 = vld [vmem:[%s1299_s13 + $0x24] ss:$8 sps:$4 sm:$0xff]   ;;  %v1021_v38 = vld [vmem:[%s1299_s13 + $0x20] ss:$8 sps:$4 sm:$0xff]  }
  0x40   : > { %677 = vmatpush1.bf16.msra.mxu0 %v1015_v34  ;;  %v1022_v39 = vld [vmem:[%s1299_s13 + $0x34] ss:$8 sps:$4 sm:$0xff]   ;;  %v1024_v40 = vld [vmem:[%s1299_s13 + $0x30] ss:$8 sps:$4 sm:$0xff]   ;;  %v1025_v41 = vld [vmem:[%s1299_s13 + $0x44] ss:$8 sps:$4 sm:$0xff]  }
  0x41   : > { %678 = vmatprep.subr.bf16.mxu0 %v1016_v35  ;;  %v1027_v42 = vld [vmem:[%s1299_s13 + $0x40] ss:$8 sps:$4 sm:$0xff]   ;;  %v1028_v43 = vld [vmem:[%s1299_s13 + $0x54] ss:$8 sps:$4 sm:$0xff]   ;;  %v1030_v44 = vld [vmem:[%s1299_s13 + $0x50] ss:$8 sps:$4 sm:$0xff]  }
  0x42   : > { %v1031_v45 = vld [vmem:[%s1299_s13 + $0x64] ss:$8 sps:$4 sm:$0xff]   ;;  %v476_v46 = vld [vmem:[%s1281_s30] sm:$0xff]  ;;  %v1033_v48 = vld [vmem:[%s1299_s13 + $0x60] ss:$8 sps:$4 sm:$0xff]   ;;  %p950_p13 = scmp.ne.s32.totalorder %s1101_s17, 8 }
  0x43   : > { %v917_v47 = vcombine.high %v476_v46, %v476_v46  ;;  %v1034_v49 = vld [vmem:[%s1299_s13 + $0x74] ss:$8 sps:$4 sm:$0xff]   ;;  %v1036_v50 = vld [vmem:[%s1299_s13 + $0x70] ss:$8 sps:$4 sm:$0xff]   ;;  %v1037_v51 = vld [vmem:[%s1299_s13 + $0x84] ss:$8 sps:$4 sm:$0xff]   ;;  %v916_v3 = vcombine.low %v476_v46, %v476_v46  ;;  %v729_v12 = vlaneseq (!%p950_p13) }
  0x44   : > { %679 = vmatpush1.bf16.msra.mxu0 %v1018_v36  ;;  %v1039_v52 = vld [vmem:[%s1299_s13 + $0x80] ss:$8 sps:$4 sm:$0xff]   ;;  %v1040_v53 = vld [vmem:[%s1299_s13 + $0x94] ss:$8 sps:$4 sm:$0xff]   ;;  %v1042_v54 = vld [vmem:[%s1299_s13 + $0x90] ss:$8 sps:$4 sm:$0xff]  }
  0x45   : > { %680 = vmatprep.subr.bf16.mxu0 %v1019_v37  ;;  %708 = vmatprep.mubr.bf16.mxu0 %v917_v47  ;;  %v1043_v55 = vld [vmem:[%s1299_s13 + $0xa4] ss:$8 sps:$4 sm:$0xff]   ;;  %v1045_v56 = vld [vmem:[%s1299_s13 + $0xa0] ss:$8 sps:$4 sm:$0xff]   ;;  %v1046_v57 = vld [vmem:[%s1299_s13 + $0xb4] ss:$8 sps:$4 sm:$0xff]  }
  0x46   : > { %v1048_v58 = vld [vmem:[%s1299_s13 + $0xb0] ss:$8 sps:$4 sm:$0xff]   ;;  %v1049_v59 = vld [vmem:[%s1299_s13 + $0xc4] ss:$8 sps:$4 sm:$0xff]   ;;  %v1051_v60 = vld [vmem:[%s1299_s13 + $0xc0] ss:$8 sps:$4 sm:$0xff]  }
  0x47   : > { %v1052_v61 = vld [vmem:[%s1299_s13 + $0xd4] ss:$8 sps:$4 sm:$0xff]   ;;  %v1054_v62 = vld [vmem:[%s1299_s13 + $0xd0] ss:$8 sps:$4 sm:$0xff]   ;;  %v1055_v63 = vld [vmem:[%s1299_s13 + $0xe4] ss:$8 sps:$4 sm:$0xff]  }
  0x48   : > { %681 = vmatpush1.bf16.msra.mxu0 %v1021_v38  ;;  %v1057_v0 = vld [vmem:[%s1299_s13 + $0xe0] ss:$8 sps:$4 sm:$0xff]   ;;  %v1058_v1 = vld [vmem:[%s1299_s13 + $0xf4] ss:$8 sps:$4 sm:$0xff]   ;;  %v1060_v2 = vld [vmem:[%s1299_s13 + $0xf0] ss:$8 sps:$4 sm:$0xff]  }
  0x49   : > { %682 = vmatprep.subr.bf16.mxu0 %v1022_v39  ;;  %v474_v4 = vld [vmem:[#allocation2] sm:$0xff]  ;;  %v475_v5 = vld [vmem:[#allocation2 + $0x8] sm:$0xff]  ;;  %v730_v13 = vshrl.u32 (!%p950_p13), %v729_v12, 7 }
  0x4a   : > { %v727_v14 = vld [vmem:[%s451_s15] sm:$0x3] (!%p950_p13) }
  0x4b   : > { %v741_v15 = vld [vmem:[%s456_s18] sm:$0x3] (!%p950_p13)  ;;  %v731_v16 = vsub.s32 (!%p950_p13), 0, %v730_v13  ;;  %v735_v17 = vsub.s32 (!%p950_p13), 1, %v730_v13 }
  0x4c   : > { %683 = vmatpush1.bf16.msra.mxu0 %v1024_v40 }
  0x4d   : > { %684 = vmatprep.subr.bf16.mxu0 %v1025_v41  ;;  %v732_v20 = vrot.slane (!%p950_p13), %v727_v14, %v731_v16  ;;  %v736_v21 = vrot.slane (!%p950_p13), %v727_v14, %v735_v17  ;;  %v746_v22 = vrot.slane (!%p950_p13), %v741_v15, %v731_v16  ;;  %v750_v23 = vrot.slane (!%p950_p13), %v741_v15, %v735_v17 }
  0x50   : > { %685 = vmatpush1.bf16.msra.mxu0 %v1027_v42 }
  0x51   : > { %686 = vmatprep.subr.bf16.mxu0 %v1028_v43 }
  0x54   : > { %687 = vmatpush1.bf16.msra.mxu0 %v1030_v44 }
  0x55   : > { %688 = vmatprep.subr.bf16.mxu0 %v1031_v45 }
  0x58   : > { %689 = vmatpush1.bf16.msra.mxu0 %v1033_v48 }
  0x59   : > { %690 = vmatprep.subr.bf16.mxu0 %v1034_v49 }
  0x5c   : > { %691 = vmatpush1.bf16.msra.mxu0 %v1036_v50 }
  0x5d   : > { %692 = vmatprep.subr.bf16.mxu0 %v1037_v51 }
  0x60   : > { %693 = vmatpush1.bf16.msra.mxu0 %v1039_v52 }
  0x61   : > { %694 = vmatprep.subr.bf16.mxu0 %v1040_v53 }
  0x64   : > { %695 = vmatpush1.bf16.msra.mxu0 %v1042_v54 }
  0x65   : > { %696 = vmatprep.subr.bf16.mxu0 %v1043_v55 }
  0x68   : > { %697 = vmatpush1.bf16.msra.mxu0 %v1045_v56 }
  0x69   : > { %698 = vmatprep.subr.bf16.mxu0 %v1046_v57 }
  0x6c   : > { %699 = vmatpush1.bf16.msra.mxu0 %v1048_v58 }
  0x6d   : > { %700 = vmatprep.subr.bf16.mxu0 %v1049_v59 }
  0x70   : > { %701 = vmatpush1.bf16.msra.mxu0 %v1051_v60 }
  0x71   : > { %702 = vmatprep.subr.bf16.mxu0 %v1052_v61 }
  0x74   : > { %703 = vmatpush1.bf16.msra.mxu0 %v1054_v62 }
  0x75   : > { %704 = vmatprep.subr.bf16.mxu0 %v1055_v63 }
  0x78   : > { %705 = vmatpush1.bf16.msra.mxu0 %v1057_v0 }
  0x79   : > { %706 = vmatprep.subr.bf16.mxu0 %v1058_v1 }
  0x7c   : > { %707 = vmatpush1.bf16.msra.mxu0 %v1060_v2 }
  0x7f   : > { %709 = vmatmul.mubr.bf16.vlgmr.msra.gmra.mrb[0].mxu0 %v916_v3 }
 0x150   : > { %724 = sbr.rel (%p950_p13) target bundleno = 359 (0x167), region = 82 }
 0x152   : > { %v710_v6 = vpop.f32.mrb[0].mxu0 }
 0x153   : > { %v717_v7 = vadd.f32 %v710_v6, %v474_v4  ;;  %v712_v8 = vpop.f32.mrb[1].mxu0 }
 0x154   : > { %v718_v9 = vadd.f32 %v712_v8, %v475_v5  ;;  %v714_v10 = vpop.f32.mrb[2].mxu0 }
 0x155   : > { %719 = vst [vmem:[#allocation2] sm:$0xff] %v717_v7  ;;  %v715_v11 = vpop.f32.mrb[3].mxu0 }
 0x156   : > { %720 = vst [vmem:[#allocation2 + $0x8] sm:$0xff] %v718_v9 }
 0x15c   : > { %v725_v18 = vld [vmem:[#allocation2] sm:$0xff] }
 0x15d   : > { %v726_v19 = vld [vmem:[#allocation2 + $0x8] sm:$0xff]  ;;  %v739_v24 = vmul.f32 %v732_v20, %v725_v18 }
 0x15e   : > { %v740_v25 = vmul.f32 %v736_v21, %v726_v19 }
 0x15f   : > { %v753_v26 = vadd.f32 %v746_v22, %v739_v24 }
 0x160   : > { %v754_v27 = vadd.f32 %v750_v23, %v740_v25 }
 0x161   : > { %v755_v28 = vmax.f32 %v753_v26, 0.0 }
 0x162   : > { %v756_v29 = vmax.f32 %v754_v27, 0.0 }
 0x164   : > { %v955_v30 = vpack.c.bf16 %v756_v29, %v755_v28 }
 0x166   : > { %765 = vst [vmem:[%s1297_s12] sm:$0xff] %v955_v30 }
 0x167 PF: > { %s14_s21 = sadd.s32 1, %s1117_s21   ;;  %s1373_s15 = smov %s1097_s16 }
 0x168   : > { %p11_p0 = scmp.ge.s32.totalorder %s14_s21, 20   ;;  %s1374_s16 = smov %s1196_s28 }
 0x169   : > { %s1375_s17 = smov %s1109_s19  ;;  %s1376_s18 = smov %s1113_s20 }
 0x16a   : > { %s1377_s19 = smov %s1380_s22  ;;  %s1378_s20 = smov %s1384_s23 }
 0x16b   :  { %13 = sbr.rel (!%p11_p0) target bundleno = 4 (0x4), region = 126 }

// kernel: variant_resnet_forward.39
= control target key start
LH: loop header
LB: loop body
LE: loop exit
PB: predicated region body
PF: predicated region fallthrough
CT: control target
= control target key end

     0   :  { %s1103_s15 = smov 0   ;;  %s1105_s16 = smov 0   ;;  %s1285_s0 = inlined_call_operand.vmem [shape: bf16[8,256], index: 0, kind: input, shape index: {}]   ;;  %s1286_s1 = inlined_call_operand.vmem [shape: bf16[256,512], index: 1, kind: input, shape index: {}]   ;;  %s1287_s2 = inlined_call_operand.vmem [shape: f32[1,512], index: 2, kind: input, shape index: {}]   ;;  %s1288_s3 = inlined_call_operand.vmem [shape: f32[1,512], index: 3, kind: input, shape index: {}]   ;;  %s1289_s4 = inlined_call_operand.vmem [shape: bf16[8,512], index: 4, kind: output, shape index: {}]  }
   0x1   :  { %s1107_s17 = smov 0   ;;  %s1109_s18 = smov 0  }
   0x2   :  { %s1111_s19 = smov 0  }
   0x3 LB: > { %s29_s20 = sadd.s32 1, %s1072_s18  ;;  %p77_p1 = scmp.ne.s32.totalorder %s1064_s16, %s1060_s15  ;;  %s1076_s19 = sphi %s1111_s19, %s14_s19   ;;  %s1072_s18 = sphi %s1109_s18, %s1293_s18   ;;  %s1068_s17 = sphi %s1107_s17, %s1292_s17   ;;  %s1064_s16 = sphi %s1105_s16, %s1291_s16   ;;  %s1060_s15 = sphi %s1103_s15, %s1290_s15  }
   0x4   : > { %p31_p0 = scmp.ge.s32.totalorder %s29_s20, 2  ;;  %p78_p2 = scmp.eq.s32.totalorder %s1076_s19, 0 }
   0x5   : > { %s70_s22 = sadd.s32 1, %s1064_s16  ;;  %p899_p5 = scmp.ge.s32.totalorder %s1076_s19, 2 }
   0x6   : > { %s1295_s20 = smov (%p31_p0, %s29_s20), 0  ;;  %p79_p3 = por %p78_p2, %p77_p1 }
   0x7   : > { %s66_s21 = ssub.s32 %s1072_s18, %s1295_s20  ;;  %196 = sbr.rel (%p899_p5) target bundleno = 34 (0x22), region = 20 }
   0x8   : > { %p68_p4 = scmp.eq.s32.totalorder %s66_s21, 0 }
   0xa   : > { %s1138_s23 = scalar_select %p68_p4, %s1064_s16, %s70_s22  }
   0xe   : > { %199 = sbr.rel (!%p79_p3) target bundleno = 34 (0x22), region = 24  ;;  %s201_s24 = sand.u32 (%p79_p3), 1, %s1064_s16  }
   0xf   : > { %s946_s25 = sshll.u32 (%p79_p3), %s1072_s18, 3  ;;  %s900_s26 = sshll.u32 (%p79_p3), %s201_s24, 8 }
  0x10   : > { %s1146_s29 = scalar_lea.vmem (%p79_p3), %s1286_s1, %s946_s25  ;;  %s1151_s30 = scalar_lea.vmem (%p79_p3), [#allocation3], %s900_s26 }
  0x11   : > { %v299_v0 = vld [vmem:[%s1146_s29] sm:$0xff] (%p79_p3)  ;;  %v301_v1 = vld [vmem:[%s1146_s29 + $0x10] sm:$0xff] (%p79_p3) }
  0x12   : > { %v303_v2 = vld [vmem:[%s1146_s29 + $0x20] sm:$0xff] (%p79_p3)  ;;  %300 = vst [vmem:[%s1151_s30] sm:$0xff] (%p79_p3), %v299_v0  ;;  %302 = vst [vmem:[%s1151_s30 + $0x8] sm:$0xff] (%p79_p3), %v301_v1  ;;  %v305_v3 = vld [vmem:[%s1146_s29 + $0x30] sm:$0xff] (%p79_p3) }
  0x13   : > { %304 = vst [vmem:[%s1151_s30 + $0x10] sm:$0xff] (%p79_p3), %v303_v2  ;;  %v307_v4 = vld [vmem:[%s1146_s29 + $0x40] sm:$0xff] (%p79_p3)  ;;  %v309_v5 = vld [vmem:[%s1146_s29 + $0x50] sm:$0xff] (%p79_p3)  ;;  %306 = vst [vmem:[%s1151_s30 + $0x18] sm:$0xff] (%p79_p3), %v305_v3 }
  0x14   : > { %308 = vst [vmem:[%s1151_s30 + $0x20] sm:$0xff] (%p79_p3), %v307_v4  ;;  %310 = vst [vmem:[%s1151_s30 + $0x28] sm:$0xff] (%p79_p3), %v309_v5  ;;  %v311_v6 = vld [vmem:[%s1146_s29 + $0x60] sm:$0xff] (%p79_p3)  ;;  %v313_v7 = vld [vmem:[%s1146_s29 + $0x70] sm:$0xff] (%p79_p3) }
  0x15   : > { %v315_v8 = vld [vmem:[%s1146_s29 + $0x80] sm:$0xff]  ;;  %312 = vst [vmem:[%s1151_s30 + $0x30] sm:$0xff] %v311_v6  ;;  %314 = vst [vmem:[%s1151_s30 + $0x38] sm:$0xff] %v313_v7  ;;  %v317_v9 = vld [vmem:[%s1146_s29 + $0x90] sm:$0xff] }
  0x16   : > { %316 = vst [vmem:[%s1151_s30 + $0x40] sm:$0xff] %v315_v8  ;;  %v319_v10 = vld [vmem:[%s1146_s29 + $0xa0] sm:$0xff]  ;;  %v321_v11 = vld [vmem:[%s1146_s29 + $0xb0] sm:$0xff]  ;;  %318 = vst [vmem:[%s1151_s30 + $0x48] sm:$0xff] %v317_v9 }
  0x17   : > { %320 = vst [vmem:[%s1151_s30 + $0x50] sm:$0xff] %v319_v10  ;;  %322 = vst [vmem:[%s1151_s30 + $0x58] sm:$0xff] %v321_v11  ;;  %v323_v12 = vld [vmem:[%s1146_s29 + $0xc0] sm:$0xff]  ;;  %v325_v13 = vld [vmem:[%s1146_s29 + $0xd0] sm:$0xff] }
  0x18   : > { %v327_v14 = vld [vmem:[%s1146_s29 + $0xe0] sm:$0xff]  ;;  %324 = vst [vmem:[%s1151_s30 + $0x60] sm:$0xff] %v323_v12  ;;  %326 = vst [vmem:[%s1151_s30 + $0x68] sm:$0xff] %v325_v13  ;;  %v329_v15 = vld [vmem:[%s1146_s29 + $0xf0] sm:$0xff] }
  0x19   : > { %328 = vst [vmem:[%s1151_s30 + $0x70] sm:$0xff] %v327_v14  ;;  %v331_v16 = vld [vmem:[%s1146_s29 + $0x100] sm:$0xff]  ;;  %v333_v17 = vld [vmem:[%s1146_s29 + $0x110] sm:$0xff]  ;;  %330 = vst [vmem:[%s1151_s30 + $0x78] sm:$0xff] %v329_v15 }
  0x1a   : > { %332 = vst [vmem:[%s1151_s30 + $0x80] sm:$0xff] %v331_v16  ;;  %334 = vst [vmem:[%s1151_s30 + $0x88] sm:$0xff] %v333_v17  ;;  %v335_v18 = vld [vmem:[%s1146_s29 + $0x120] sm:$0xff]  ;;  %v337_v19 = vld [vmem:[%s1146_s29 + $0x130] sm:$0xff] }
  0x1b   : > { %v339_v20 = vld [vmem:[%s1146_s29 + $0x140] sm:$0xff]  ;;  %336 = vst [vmem:[%s1151_s30 + $0x90] sm:$0xff] %v335_v18  ;;  %338 = vst [vmem:[%s1151_s30 + $0x98] sm:$0xff] %v337_v19  ;;  %v341_v21 = vld [vmem:[%s1146_s29 + $0x150] sm:$0xff] }
  0x1c   : > { %340 = vst [vmem:[%s1151_s30 + $0xa0] sm:$0xff] %v339_v20  ;;  %v343_v22 = vld [vmem:[%s1146_s29 + $0x160] sm:$0xff]  ;;  %v345_v23 = vld [vmem:[%s1146_s29 + $0x170] sm:$0xff]  ;;  %342 = vst [vmem:[%s1151_s30 + $0xa8] sm:$0xff] %v341_v21 }
  0x1d   : > { %344 = vst [vmem:[%s1151_s30 + $0xb0] sm:$0xff] %v343_v22  ;;  %346 = vst [vmem:[%s1151_s30 + $0xb8] sm:$0xff] %v345_v23  ;;  %v347_v24 = vld [vmem:[%s1146_s29 + $0x180] sm:$0xff]  ;;  %v349_v25 = vld [vmem:[%s1146_s29 + $0x190] sm:$0xff] }
  0x1e   : > { %v351_v26 = vld [vmem:[%s1146_s29 + $0x1a0] sm:$0xff]  ;;  %348 = vst [vmem:[%s1151_s30 + $0xc0] sm:$0xff] %v347_v24  ;;  %350 = vst [vmem:[%s1151_s30 + $0xc8] sm:$0xff] %v349_v25  ;;  %v353_v27 = vld [vmem:[%s1146_s29 + $0x1b0] sm:$0xff] }
  0x1f   : > { %352 = vst [vmem:[%s1151_s30 + $0xd0] sm:$0xff] %v351_v26  ;;  %v355_v28 = vld [vmem:[%s1146_s29 + $0x1c0] sm:$0xff]  ;;  %v357_v29 = vld [vmem:[%s1146_s29 + $0x1d0] sm:$0xff]  ;;  %354 = vst [vmem:[%s1151_s30 + $0xd8] sm:$0xff] %v353_v27 }
  0x20   : > { %356 = vst [vmem:[%s1151_s30 + $0xe0] sm:$0xff] %v355_v28  ;;  %358 = vst [vmem:[%s1151_s30 + $0xe8] sm:$0xff] %v357_v29  ;;  %v359_v30 = vld [vmem:[%s1146_s29 + $0x1e0] sm:$0xff]  ;;  %v361_v31 = vld [vmem:[%s1146_s29 + $0x1f0] sm:$0xff] }
  0x21   : > { %360 = vst [vmem:[%s1151_s30 + $0xf0] sm:$0xff] %v359_v30  ;;  %362 = vst [vmem:[%s1151_s30 + $0xf8] sm:$0xff] %v361_v31 }
  0x22 PF: > { %p903_p6 = scmp.ge.s32.totalorder %s1076_s19, 1  ;;  %p383_p7 = scmp.lt.s32.totalorder %s1076_s19, 3 }
  0x24   : > { %p384_p8 = pnand %p903_p6, %p383_p7 }
  0x25   : > { %s390_s5 = sand.u32 (!%p384_p8), 1, %s1060_s15   ;;  %v1220_v32 = vld [vmem:[%s1285_s0] sm:$0xff] (!%p384_p8)  ;;  %s905_s10 = sshll.u32 (!%p384_p8), %s1068_s17, 1  ;;  %v728_v3 = vlaneseq (!%p384_p8) }
  0x26   : > { %387 = sbr.rel (%p384_p8) target bundleno = 325 (0x145), region = 70  ;;  %s904_s8 = sshll.u32 (!%p384_p8), %s390_s5, 8  ;;  %v910_v33 = vcombine.high (!%p384_p8), %v1220_v32, %v1220_v32  ;;  %v909_v2 = vcombine.low (!%p384_p8), %v1220_v32, %v1220_v32 }
  0x27   : > { %s1224_s9 = scalar_lea.vmem (!%p384_p8), [#allocation3], %s904_s8  ;;  %p449_p9 = scmp.lt.s32.totalorder (!%p384_p8), %s905_s10, 3  ;;  %v729_v4 = vshrl.u32 (!%p384_p8), %v728_v3, 7 }
  0x28   : > { %v988_v34 = vld [vmem:[%s1224_s9 + $0x4] ss:$8 sps:$4 sm:$0xff] (!%p384_p8)   ;;  %708 = vmatprep.mubr.bf16.mxu0 (!%p384_p8), %v910_v33  ;;  %v990_v35 = vld [vmem:[%s1224_s9] ss:$8 sps:$4 sm:$0xff] (!%p384_p8)   ;;  %v991_v36 = vld [vmem:[%s1224_s9 + $0x14] ss:$8 sps:$4 sm:$0xff] (!%p384_p8)  }
  0x29   : > { %676 = vmatprep.subr.bf16.mxu0 (!%p384_p8), %v988_v34  ;;  %v993_v37 = vld [vmem:[%s1224_s9 + $0x10] ss:$8 sps:$4 sm:$0xff] (!%p384_p8)   ;;  %v994_v38 = vld [vmem:[%s1224_s9 + $0x24] ss:$8 sps:$4 sm:$0xff] (!%p384_p8)   ;;  %v996_v39 = vld [vmem:[%s1224_s9 + $0x20] ss:$8 sps:$4 sm:$0xff] (!%p384_p8)  }
  0x2a   : > { %677 = vmatpush1.bf16.msra.mxu0 (!%p384_p8), %v990_v35  ;;  %v997_v40 = vld [vmem:[%s1224_s9 + $0x34] ss:$8 sps:$4 sm:$0xff] (!%p384_p8)   ;;  %v999_v41 = vld [vmem:[%s1224_s9 + $0x30] ss:$8 sps:$4 sm:$0xff] (!%p384_p8)   ;;  %v1000_v42 = vld [vmem:[%s1224_s9 + $0x44] ss:$8 sps:$4 sm:$0xff] (!%p384_p8)  }
  0x2b   : > { %678 = vmatprep.subr.bf16.mxu0 (!%p384_p8), %v991_v36  ;;  %v1002_v43 = vld [vmem:[%s1224_s9 + $0x40] ss:$8 sps:$4 sm:$0xff] (!%p384_p8)   ;;  %v1003_v44 = vld [vmem:[%s1224_s9 + $0x54] ss:$8 sps:$4 sm:$0xff] (!%p384_p8)   ;;  %v1005_v45 = vld [vmem:[%s1224_s9 + $0x50] ss:$8 sps:$4 sm:$0xff] (!%p384_p8)  }
  0x2c   : > { %v1006_v46 = vld [vmem:[%s1224_s9 + $0x64] ss:$8 sps:$4 sm:$0xff] (!%p384_p8)   ;;  %v1008_v47 = vld [vmem:[%s1224_s9 + $0x60] ss:$8 sps:$4 sm:$0xff] (!%p384_p8)   ;;  %v1009_v48 = vld [vmem:[%s1224_s9 + $0x74] ss:$8 sps:$4 sm:$0xff] (!%p384_p8)  }
  0x2d   : > { %v1011_v49 = vld [vmem:[%s1224_s9 + $0x70] ss:$8 sps:$4 sm:$0xff]   ;;  %v1012_v50 = vld [vmem:[%s1224_s9 + $0x84] ss:$8 sps:$4 sm:$0xff]   ;;  %v1014_v51 = vld [vmem:[%s1224_s9 + $0x80] ss:$8 sps:$4 sm:$0xff]  }
  0x2e   : > { %679 = vmatpush1.bf16.msra.mxu0 %v993_v37  ;;  %v1015_v52 = vld [vmem:[%s1224_s9 + $0x94] ss:$8 sps:$4 sm:$0xff]   ;;  %v1017_v53 = vld [vmem:[%s1224_s9 + $0x90] ss:$8 sps:$4 sm:$0xff]   ;;  %v1018_v54 = vld [vmem:[%s1224_s9 + $0xa4] ss:$8 sps:$4 sm:$0xff]  }
  0x2f   : > { %680 = vmatprep.subr.bf16.mxu0 %v994_v38  ;;  %v1020_v55 = vld [vmem:[%s1224_s9 + $0xa0] ss:$8 sps:$4 sm:$0xff]   ;;  %v1021_v56 = vld [vmem:[%s1224_s9 + $0xb4] ss:$8 sps:$4 sm:$0xff]   ;;  %v1023_v57 = vld [vmem:[%s1224_s9 + $0xb0] ss:$8 sps:$4 sm:$0xff]  }
  0x30   : > { %v1024_v58 = vld [vmem:[%s1224_s9 + $0xc4] ss:$8 sps:$4 sm:$0xff]   ;;  %v1026_v59 = vld [vmem:[%s1224_s9 + $0xc0] ss:$8 sps:$4 sm:$0xff]   ;;  %v1027_v60 = vld [vmem:[%s1224_s9 + $0xd4] ss:$8 sps:$4 sm:$0xff]  }
  0x31   : > { %v1029_v61 = vld [vmem:[%s1224_s9 + $0xd0] ss:$8 sps:$4 sm:$0xff]   ;;  %v1030_v62 = vld [vmem:[%s1224_s9 + $0xe4] ss:$8 sps:$4 sm:$0xff]   ;;  %v1032_v63 = vld [vmem:[%s1224_s9 + $0xe0] ss:$8 sps:$4 sm:$0xff]  }
  0x32   : > { %681 = vmatpush1.bf16.msra.mxu0 %v996_v39  ;;  %v1033_v0 = vld [vmem:[%s1224_s9 + $0xf4] ss:$8 sps:$4 sm:$0xff]   ;;  %v1035_v1 = vld [vmem:[%s1224_s9 + $0xf0] ss:$8 sps:$4 sm:$0xff]   ;;  %s1297_s10 = smov (!%p449_p9, %s905_s10), 3  ;;  %v730_v5 = vsub.s32 0, %v729_v4 }
  0x33   : > { %682 = vmatprep.subr.bf16.mxu0 %v997_v40  ;;  %s451_s13 = scalar_lea.vmem %s1287_s2, %s1297_s10  ;;  %s456_s21 = scalar_lea.vmem %s1288_s3, %s1297_s10  ;;  %v734_v7 = vsub.s32 1, %v729_v4 }
  0x34   : > { %v726_v6 = vld [vmem:[%s451_s13] sm:$0x3]  ;;  %s908_s17 = sshll.u32 %s1297_s10, 2 }
  0x35   : > { %v740_v8 = vld [vmem:[%s456_s21] sm:$0x3]  ;;  %v731_v9 = vrot.slane %v726_v6, %v730_v5  ;;  %v735_v10 = vrot.slane %v726_v6, %v734_v7  ;;  %s466_s25 = scalar_lea.vmem %s1289_s4, %s908_s17 }
  0x36   : > { %683 = vmatpush1.bf16.msra.mxu0 %v999_v41  ;;  %v745_v11 = vrot.slane %v740_v8, %v730_v5  ;;  %v749_v13 = vrot.slane %v740_v8, %v734_v7 }
  0x37   : > { %684 = vmatprep.subr.bf16.mxu0 %v1000_v42 }
  0x3a   : > { %685 = vmatpush1.bf16.msra.mxu0 %v1002_v43 }
  0x3b   : > { %686 = vmatprep.subr.bf16.mxu0 %v1003_v44 }
  0x3e   : > { %687 = vmatpush1.bf16.msra.mxu0 %v1005_v45 }
  0x3f   : > { %688 = vmatprep.subr.bf16.mxu0 %v1006_v46 }
  0x42   : > { %689 = vmatpush1.bf16.msra.mxu0 %v1008_v47 }
  0x43   : > { %690 = vmatprep.subr.bf16.mxu0 %v1009_v48 }
  0x46   : > { %691 = vmatpush1.bf16.msra.mxu0 %v1011_v49 }
  0x47   : > { %692 = vmatprep.subr.bf16.mxu0 %v1012_v50 }
  0x4a   : > { %693 = vmatpush1.bf16.msra.mxu0 %v1014_v51 }
  0x4b   : > { %694 = vmatprep.subr.bf16.mxu0 %v1015_v52 }
  0x4e   : > { %695 = vmatpush1.bf16.msra.mxu0 %v1017_v53 }
  0x4f   : > { %696 = vmatprep.subr.bf16.mxu0 %v1018_v54 }
  0x52   : > { %697 = vmatpush1.bf16.msra.mxu0 %v1020_v55 }
  0x53   : > { %698 = vmatprep.subr.bf16.mxu0 %v1021_v56 }
  0x56   : > { %699 = vmatpush1.bf16.msra.mxu0 %v1023_v57 }
  0x57   : > { %700 = vmatprep.subr.bf16.mxu0 %v1024_v58 }
  0x5a   : > { %701 = vmatpush1.bf16.msra.mxu0 %v1026_v59 }
  0x5b   : > { %702 = vmatprep.subr.bf16.mxu0 %v1027_v60 }
  0x5e   : > { %703 = vmatpush1.bf16.msra.mxu0 %v1029_v61 }
  0x5f   : > { %704 = vmatprep.subr.bf16.mxu0 %v1030_v62 }
  0x62   : > { %705 = vmatpush1.bf16.msra.mxu0 %v1032_v63 }
  0x63   : > { %706 = vmatprep.subr.bf16.mxu0 %v1033_v0 }
  0x66   : > { %707 = vmatpush1.bf16.msra.mxu0 %v1035_v1 }
  0x69   : > { %709 = vmatmul.mubr.bf16.vlgmr.msra.gmra.mrb[0].mxu0 %v909_v2 }
 0x13c   : > { %v710_v12 = vpop.f32.mrb[0].mxu0 }
 0x13d   : > { %v738_v14 = vmul.f32 %v731_v9, %v710_v12  ;;  %v712_v15 = vpop.f32.mrb[1].mxu0 }
 0x13e   : > { %v739_v16 = vmul.f32 %v735_v10, %v712_v15  ;;  %v714_v17 = vpop.f32.mrb[2].mxu0 }
 0x13f   : > { %v752_v18 = vadd.f32 %v745_v11, %v738_v14  ;;  %v715_v19 = vpop.f32.mrb[3].mxu0 }
 0x140   : > { %v753_v20 = vadd.f32 %v749_v13, %v739_v16 }
 0x142   : > { %v947_v21 = vpack.c.bf16 %v753_v20, %v752_v18 }
 0x144   : > { %762 = vst [vmem:[%s466_s25] sm:$0xff] %v947_v21 }
 0x145 PF: > { %s14_s19 = sadd.s32 1, %s1076_s19   ;;  %s1290_s15 = smov %s1064_s16 }
 0x146   : > { %p11_p10 = scmp.ge.s32.totalorder %s14_s19, 4   ;;  %s1291_s16 = smov %s1138_s23 }
 0x147   : > { %s1292_s17 = smov %s1072_s18  ;;  %s1293_s18 = smov %s1295_s20 }
 0x148   :  { %13 = sbr.rel (!%p11_p10) target bundleno = 3 (0x3), region = 126 }

// kernel: variant_resnet_forward.40
= control target key start
LH: loop header
LB: loop body
LE: loop exit
PB: predicated region body
PF: predicated region fallthrough
CT: control target
= control target key end

     0   :  { %s1691_s18 = smov 0   ;;  %s1693_s19 = smov 0   ;;  %s2017_s0 = inlined_call_operand.vmem [shape: bf16[8,4608], index: 0, kind: input, shape index: {}]   ;;  %s2018_s1 = inlined_call_operand.vmem [shape: bf16[4608,512], index: 1, kind: input, shape index: {}]   ;;  %s2019_s2 = inlined_call_operand.vmem [shape: f32[1,512], index: 2, kind: input, shape index: {}]   ;;  %s2020_s3 = inlined_call_operand.vmem [shape: f32[1,512], index: 3, kind: input, shape index: {}]   ;;  %s2021_s4 = inlined_call_operand.vmem [shape: bf16[8,512], index: 4, kind: input, shape index: {}]   ;;  %s2022_s5 = inlined_call_operand.vmem [shape: bf16[8,512], index: 5, kind: output, shape index: {}]  }
   0x1   :  { %s1695_s20 = smov 0   ;;  %s1697_s21 = smov 0  }
   0x2   :  { %s1699_s22 = smov 0   ;;  %s1701_s23 = smov 0  }
   0x3   :  { %s1703_s24 = smov 0  }
   0x4 LB: > { %s27_s25 = sadd.s32 1, %s1650_s22  ;;  %s30_s26 = sadd.s32 1, %s1654_s23  ;;  %s1658_s24 = sphi %s1703_s24, %s15_s24   ;;  %s1654_s23 = sphi %s1701_s23, %s2028_s23   ;;  %s1650_s22 = sphi %s1699_s22, %s2027_s22   ;;  %s1646_s21 = sphi %s1697_s21, %s2026_s21   ;;  %s1642_s20 = sphi %s1695_s20, %s2025_s20   ;;  %s1638_s19 = sphi %s1693_s19, %s2024_s19   ;;  %s1634_s18 = sphi %s1691_s18, %s2023_s18  }
   0x5   : > { %p28_p0 = scmp.ge.s32.totalorder %s27_s25, 9  ;;  %p78_p1 = scmp.ne.s32.totalorder %s1638_s19, %s1634_s18 }
   0x6   : > { %p79_p2 = scmp.eq.s32.totalorder %s1658_s24, 0  ;;  %s71_s30 = sadd.s32 1, %s1638_s19 }
   0x7   : > { %s2030_s25 = smov (%p28_p0, %s27_s25), 0  ;;  %s2032_s26 = smov (!%p28_p0, %s30_s26), %s1654_s23 }
   0x8   : > { %p80_p3 = por %p79_p2, %p78_p1  ;;  %p32_p4 = scmp.ge.s32.totalorder %s2032_s26, 2 }
   0x9   : > { %s66_s27 = ssub.s32 %s1650_s22, %s2030_s25  ;;  %p1356_p6 = scmp.ge.s32.totalorder %s1658_s24, 18 }
   0xa   : > { %s2034_s26 = smov (%p32_p4, %s2032_s26), 0 }
   0xb   : > { %s67_s28 = ssub.s32 %s1654_s23, %s2034_s26  ;;  %212 = sbr.rel (%p1356_p6) target bundleno = 57 (0x39), region = 16 }
   0xc   : > { %s68_s29 = sor.u32 %s67_s28, %s66_s27 }
   0xd   : > { %p69_p5 = scmp.eq.s32.totalorder %s68_s29, 0 }
   0xf   : > { %s1742_s6 = scalar_select %p69_p5, %s1638_s19, %s71_s30  }
  0x12   : > { %228 = sbr.rel (!%p80_p3) target bundleno = 57 (0x39), region = 24  ;;  %s230_s7 = sand.u32 (%p80_p3), 1, %s1638_s19  }
  0x13   : > { %s1359_s8 = sshll.u32 (%p80_p3), %s1654_s23, 1  ;;  %s1357_s9 = sshll.u32 (%p80_p3), %s230_s7, 9 }
  0x14   : > { %s1445_s10 = sshll.u32 (%p80_p3), %s1650_s22, 8  ;;  %s1756_s16 = scalar_lea.vmem (%p80_p3), [#allocation3], %s1357_s9 }
  0x15   : > { %s236_s11 = sadd.s32 (%p80_p3), %s1445_s10, %s1359_s8 }
  0x16   : > { %s1361_s12 = sshll.u32 (%p80_p3), %s236_s11, 2 }
  0x17   : > { %s1751_s15 = scalar_lea.vmem (%p80_p3), %s2018_s1, %s1361_s12 }
  0x18   : > { %v392_v0 = vld [vmem:[%s1751_s15] sm:$0xff] (%p80_p3)  ;;  %v394_v1 = vld [vmem:[%s1751_s15 + $0x10] sm:$0xff] (%p80_p3) }
  0x19   : > { %v396_v2 = vld [vmem:[%s1751_s15 + $0x20] sm:$0xff]  ;;  %393 = vst [vmem:[%s1756_s16] sm:$0xff] %v392_v0  ;;  %395 = vst [vmem:[%s1756_s16 + $0x8] sm:$0xff] %v394_v1  ;;  %v398_v3 = vld [vmem:[%s1751_s15 + $0x30] sm:$0xff] }
  0x1a   : > { %397 = vst [vmem:[%s1756_s16 + $0x10] sm:$0xff] %v396_v2  ;;  %v400_v4 = vld [vmem:[%s1751_s15 + $0x40] sm:$0xff]  ;;  %v402_v5 = vld [vmem:[%s1751_s15 + $0x50] sm:$0xff]  ;;  %399 = vst [vmem:[%s1756_s16 + $0x18] sm:$0xff] %v398_v3 }
  0x1b   : > { %401 = vst [vmem:[%s1756_s16 + $0x20] sm:$0xff] %v400_v4  ;;  %403 = vst [vmem:[%s1756_s16 + $0x28] sm:$0xff] %v402_v5  ;;  %v404_v6 = vld [vmem:[%s1751_s15 + $0x60] sm:$0xff]  ;;  %v406_v7 = vld [vmem:[%s1751_s15 + $0x70] sm:$0xff] }
  0x1c   : > { %v408_v8 = vld [vmem:[%s1751_s15 + $0x80] sm:$0xff]  ;;  %405 = vst [vmem:[%s1756_s16 + $0x30] sm:$0xff] %v404_v6  ;;  %407 = vst [vmem:[%s1756_s16 + $0x38] sm:$0xff] %v406_v7  ;;  %v410_v9 = vld [vmem:[%s1751_s15 + $0x90] sm:$0xff] }
  0x1d   : > { %409 = vst [vmem:[%s1756_s16 + $0x40] sm:$0xff] %v408_v8  ;;  %v412_v10 = vld [vmem:[%s1751_s15 + $0xa0] sm:$0xff]  ;;  %v414_v11 = vld [vmem:[%s1751_s15 + $0xb0] sm:$0xff]  ;;  %411 = vst [vmem:[%s1756_s16 + $0x48] sm:$0xff] %v410_v9 }
  0x1e   : > { %413 = vst [vmem:[%s1756_s16 + $0x50] sm:$0xff] %v412_v10  ;;  %415 = vst [vmem:[%s1756_s16 + $0x58] sm:$0xff] %v414_v11  ;;  %v416_v12 = vld [vmem:[%s1751_s15 + $0xc0] sm:$0xff]  ;;  %v418_v13 = vld [vmem:[%s1751_s15 + $0xd0] sm:$0xff] }
  0x1f   : > { %v420_v14 = vld [vmem:[%s1751_s15 + $0xe0] sm:$0xff]  ;;  %417 = vst [vmem:[%s1756_s16 + $0x60] sm:$0xff] %v416_v12  ;;  %419 = vst [vmem:[%s1756_s16 + $0x68] sm:$0xff] %v418_v13  ;;  %v422_v15 = vld [vmem:[%s1751_s15 + $0xf0] sm:$0xff] }
  0x20   : > { %421 = vst [vmem:[%s1756_s16 + $0x70] sm:$0xff] %v420_v14  ;;  %v424_v16 = vld [vmem:[%s1751_s15 + $0x100] sm:$0xff]  ;;  %v426_v17 = vld [vmem:[%s1751_s15 + $0x110] sm:$0xff]  ;;  %423 = vst [vmem:[%s1756_s16 + $0x78] sm:$0xff] %v422_v15 }
  0x21   : > { %425 = vst [vmem:[%s1756_s16 + $0x80] sm:$0xff] %v424_v16  ;;  %427 = vst [vmem:[%s1756_s16 + $0x88] sm:$0xff] %v426_v17  ;;  %v428_v18 = vld [vmem:[%s1751_s15 + $0x120] sm:$0xff]  ;;  %v430_v19 = vld [vmem:[%s1751_s15 + $0x130] sm:$0xff] }
  0x22   : > { %v432_v20 = vld [vmem:[%s1751_s15 + $0x140] sm:$0xff]  ;;  %429 = vst [vmem:[%s1756_s16 + $0x90] sm:$0xff] %v428_v18  ;;  %431 = vst [vmem:[%s1756_s16 + $0x98] sm:$0xff] %v430_v19  ;;  %v434_v21 = vld [vmem:[%s1751_s15 + $0x150] sm:$0xff] }
  0x23   : > { %433 = vst [vmem:[%s1756_s16 + $0xa0] sm:$0xff] %v432_v20  ;;  %v436_v22 = vld [vmem:[%s1751_s15 + $0x160] sm:$0xff]  ;;  %v438_v23 = vld [vmem:[%s1751_s15 + $0x170] sm:$0xff]  ;;  %435 = vst [vmem:[%s1756_s16 + $0xa8] sm:$0xff] %v434_v21 }
  0x24   : > { %437 = vst [vmem:[%s1756_s16 + $0xb0] sm:$0xff] %v436_v22  ;;  %439 = vst [vmem:[%s1756_s16 + $0xb8] sm:$0xff] %v438_v23  ;;  %v440_v24 = vld [vmem:[%s1751_s15 + $0x180] sm:$0xff]  ;;  %v442_v25 = vld [vmem:[%s1751_s15 + $0x190] sm:$0xff] }
  0x25   : > { %v444_v26 = vld [vmem:[%s1751_s15 + $0x1a0] sm:$0xff]  ;;  %441 = vst [vmem:[%s1756_s16 + $0xc0] sm:$0xff] %v440_v24  ;;  %443 = vst [vmem:[%s1756_s16 + $0xc8] sm:$0xff] %v442_v25  ;;  %v446_v27 = vld [vmem:[%s1751_s15 + $0x1b0] sm:$0xff] }
  0x26   : > { %445 = vst [vmem:[%s1756_s16 + $0xd0] sm:$0xff] %v444_v26  ;;  %v448_v28 = vld [vmem:[%s1751_s15 + $0x1c0] sm:$0xff]  ;;  %v450_v29 = vld [vmem:[%s1751_s15 + $0x1d0] sm:$0xff]  ;;  %447 = vst [vmem:[%s1756_s16 + $0xd8] sm:$0xff] %v446_v27 }
  0x27   : > { %449 = vst [vmem:[%s1756_s16 + $0xe0] sm:$0xff] %v448_v28  ;;  %451 = vst [vmem:[%s1756_s16 + $0xe8] sm:$0xff] %v450_v29  ;;  %v452_v30 = vld [vmem:[%s1751_s15 + $0x1e0] sm:$0xff]  ;;  %v454_v31 = vld [vmem:[%s1751_s15 + $0x1f0] sm:$0xff] }
  0x28   : > { %v456_v32 = vld [vmem:[%s1751_s15 + $0x200] sm:$0xff]  ;;  %453 = vst [vmem:[%s1756_s16 + $0xf0] sm:$0xff] %v452_v30  ;;  %455 = vst [vmem:[%s1756_s16 + $0xf8] sm:$0xff] %v454_v31  ;;  %v458_v33 = vld [vmem:[%s1751_s15 + $0x210] sm:$0xff] }
  0x29   : > { %457 = vst [vmem:[%s1756_s16 + $0x100] sm:$0xff] %v456_v32  ;;  %v460_v34 = vld [vmem:[%s1751_s15 + $0x220] sm:$0xff]  ;;  %v462_v35 = vld [vmem:[%s1751_s15 + $0x230] sm:$0xff]  ;;  %459 = vst [vmem:[%s1756_s16 + $0x108] sm:$0xff] %v458_v33 }
  0x2a   : > { %461 = vst [vmem:[%s1756_s16 + $0x110] sm:$0xff] %v460_v34  ;;  %463 = vst [vmem:[%s1756_s16 + $0x118] sm:$0xff] %v462_v35  ;;  %v464_v36 = vld [vmem:[%s1751_s15 + $0x240] sm:$0xff]  ;;  %v466_v37 = vld [vmem:[%s1751_s15 + $0x250] sm:$0xff] }
  0x2b   : > { %v468_v38 = vld [vmem:[%s1751_s15 + $0x260] sm:$0xff]  ;;  %465 = vst [vmem:[%s1756_s16 + $0x120] sm:$0xff] %v464_v36  ;;  %467 = vst [vmem:[%s1756_s16 + $0x128] sm:$0xff] %v466_v37  ;;  %v470_v39 = vld [vmem:[%s1751_s15 + $0x270] sm:$0xff] }
  0x2c   : > { %469 = vst [vmem:[%s1756_s16 + $0x130] sm:$0xff] %v468_v38  ;;  %v472_v40 = vld [vmem:[%s1751_s15 + $0x280] sm:$0xff]  ;;  %v474_v41 = vld [vmem:[%s1751_s15 + $0x290] sm:$0xff]  ;;  %471 = vst [vmem:[%s1756_s16 + $0x138] sm:$0xff] %v470_v39 }
  0x2d   : > { %473 = vst [vmem:[%s1756_s16 + $0x140] sm:$0xff] %v472_v40  ;;  %475 = vst [vmem:[%s1756_s16 + $0x148] sm:$0xff] %v474_v41  ;;  %v476_v42 = vld [vmem:[%s1751_s15 + $0x2a0] sm:$0xff]  ;;  %v478_v43 = vld [vmem:[%s1751_s15 + $0x2b0] sm:$0xff] }
  0x2e   : > { %v480_v44 = vld [vmem:[%s1751_s15 + $0x2c0] sm:$0xff]  ;;  %477 = vst [vmem:[%s1756_s16 + $0x150] sm:$0xff] %v476_v42  ;;  %479 = vst [vmem:[%s1756_s16 + $0x158] sm:$0xff] %v478_v43  ;;  %v482_v45 = vld [vmem:[%s1751_s15 + $0x2d0] sm:$0xff] }
  0x2f   : > { %481 = vst [vmem:[%s1756_s16 + $0x160] sm:$0xff] %v480_v44  ;;  %v484_v46 = vld [vmem:[%s1751_s15 + $0x2e0] sm:$0xff]  ;;  %v486_v47 = vld [vmem:[%s1751_s15 + $0x2f0] sm:$0xff]  ;;  %483 = vst [vmem:[%s1756_s16 + $0x168] sm:$0xff] %v482_v45 }
  0x30   : > { %485 = vst [vmem:[%s1756_s16 + $0x170] sm:$0xff] %v484_v46  ;;  %487 = vst [vmem:[%s1756_s16 + $0x178] sm:$0xff] %v486_v47  ;;  %v488_v48 = vld [vmem:[%s1751_s15 + $0x300] sm:$0xff]  ;;  %v490_v49 = vld [vmem:[%s1751_s15 + $0x310] sm:$0xff] }
  0x31   : > { %v492_v50 = vld [vmem:[%s1751_s15 + $0x320] sm:$0xff]  ;;  %489 = vst [vmem:[%s1756_s16 + $0x180] sm:$0xff] %v488_v48  ;;  %491 = vst [vmem:[%s1756_s16 + $0x188] sm:$0xff] %v490_v49  ;;  %v494_v51 = vld [vmem:[%s1751_s15 + $0x330] sm:$0xff] }
  0x32   : > { %493 = vst [vmem:[%s1756_s16 + $0x190] sm:$0xff] %v492_v50  ;;  %v496_v52 = vld [vmem:[%s1751_s15 + $0x340] sm:$0xff]  ;;  %v498_v53 = vld [vmem:[%s1751_s15 + $0x350] sm:$0xff]  ;;  %495 = vst [vmem:[%s1756_s16 + $0x198] sm:$0xff] %v494_v51 }
  0x33   : > { %497 = vst [vmem:[%s1756_s16 + $0x1a0] sm:$0xff] %v496_v52  ;;  %499 = vst [vmem:[%s1756_s16 + $0x1a8] sm:$0xff] %v498_v53  ;;  %v500_v54 = vld [vmem:[%s1751_s15 + $0x360] sm:$0xff]  ;;  %v502_v55 = vld [vmem:[%s1751_s15 + $0x370] sm:$0xff] }
  0x34   : > { %v504_v56 = vld [vmem:[%s1751_s15 + $0x380] sm:$0xff]  ;;  %501 = vst [vmem:[%s1756_s16 + $0x1b0] sm:$0xff] %v500_v54  ;;  %503 = vst [vmem:[%s1756_s16 + $0x1b8] sm:$0xff] %v502_v55  ;;  %v506_v57 = vld [vmem:[%s1751_s15 + $0x390] sm:$0xff] }
  0x35   : > { %505 = vst [vmem:[%s1756_s16 + $0x1c0] sm:$0xff] %v504_v56  ;;  %v508_v58 = vld [vmem:[%s1751_s15 + $0x3a0] sm:$0xff]  ;;  %v510_v59 = vld [vmem:[%s1751_s15 + $0x3b0] sm:$0xff]  ;;  %507 = vst [vmem:[%s1756_s16 + $0x1c8] sm:$0xff] %v506_v57 }
  0x36   : > { %509 = vst [vmem:[%s1756_s16 + $0x1d0] sm:$0xff] %v508_v58  ;;  %511 = vst [vmem:[%s1756_s16 + $0x1d8] sm:$0xff] %v510_v59  ;;  %v512_v60 = vld [vmem:[%s1751_s15 + $0x3c0] sm:$0xff]  ;;  %v514_v61 = vld [vmem:[%s1751_s15 + $0x3d0] sm:$0xff] }
  0x37   : > { %v516_v62 = vld [vmem:[%s1751_s15 + $0x3e0] sm:$0xff]  ;;  %513 = vst [vmem:[%s1756_s16 + $0x1e0] sm:$0xff] %v512_v60  ;;  %515 = vst [vmem:[%s1756_s16 + $0x1e8] sm:$0xff] %v514_v61  ;;  %v518_v63 = vld [vmem:[%s1751_s15 + $0x3f0] sm:$0xff] }
  0x38   : > { %517 = vst [vmem:[%s1756_s16 + $0x1f0] sm:$0xff] %v516_v62  ;;  %519 = vst [vmem:[%s1756_s16 + $0x1f8] sm:$0xff] %v518_v63 }
  0x39 PF: > { %p1362_p7 = scmp.ge.s32.totalorder %s1658_s24, 1  ;;  %p553_p8 = scmp.lt.s32.totalorder %s1658_s24, 19 }
  0x3b   : > { %p554_p9 = pnand %p1362_p7, %p553_p8 }
  0x3c   : > { %s560_s17 = sand.u32 (!%p554_p9), 1, %s1634_s18   ;;  %s1364_s27 = sshll.u32 (!%p554_p9), %s1642_s20, 2 }
  0x3d   : > { %557 = sbr.rel (%p554_p9) target bundleno = 380 (0x17c), region = 74  ;;  %s1363_s28 = sshll.u32 (!%p554_p9), %s560_s17, 9 }
  0x3e   : > { %p620_p10 = scmp.lt.s32.totalorder (!%p554_p9), %s1364_s27, 35  ;;  %s1366_s29 = sshll.u32 (!%p554_p9), %s1646_s21, 1 }
  0x3f   : > { %p630_p11 = scmp.lt.s32.totalorder (!%p554_p9), %s1366_s29, 3  ;;  %s1914_s8 = scalar_lea.vmem (!%p554_p9), [#allocation3], %s1363_s28 }
  0x40   : > { %p1372_p12 = scmp.ne.s32.totalorder (!%p554_p9), %s1642_s20, 0 }
  0x44   : > { %s2036_s27 = smov (!%p620_p10, %s1364_s27), 35  ;;  %s2038_s29 = smov (!%p630_p11, %s1366_s29), 3 }
  0x45   : > { %s1365_s30 = sshll.u32 %s2036_s27, 2  ;;  %s632_s18 = scalar_lea.vmem %s2019_s2, %s2038_s29  ;;  %v1660_v0 = vmov (!%p1372_p12), 0.0  }
  0x46   : > { %s1891_s9 = scalar_lea.vmem %s2017_s0, %s1365_s30  ;;  %s637_s21 = scalar_lea.vmem %s2020_s3, %s2038_s29  ;;  %663 = vst [vmem:[#allocation2] sm:$0xff] (!%p1372_p12), %v1660_v0  ;;  %664 = vst [vmem:[#allocation2 + $0x8] sm:$0xff] (!%p1372_p12), %v1660_v0 }
  0x47   : > { %s1369_s14 = sshll.u32 %s2038_s29, 2  ;;  %662 = sbr.rel (%p1372_p12) target bundleno = 78 (0x4e), region = 82 }
  0x48   : > { %s1907_s17 = scalar_lea.vmem %s2021_s4, %s1369_s14  ;;  %s1912_s7 = scalar_lea.vmem %s2022_s5, %s1369_s14 }
  0x4e PF: > { %v1504_v1 = vld [vmem:[%s1914_s8 + $0x4] ss:$8 sps:$4 sm:$0xff]   ;;  %v1508_v3 = vld [vmem:[%s1914_s8] ss:$8 sps:$4 sm:$0xff]   ;;  %v1510_v5 = vld [vmem:[%s1914_s8 + $0x14] ss:$8 sps:$4 sm:$0xff]  }
  0x4f   : > { %v1506_v2 = vld [vmem:[%s1914_s8 + $0x104] ss:$8 sps:$4 sm:$0xff]   ;;  %1067 = vmatprep.subr.bf16.mxu0 %v1504_v1  ;;  %v1509_v4 = vld [vmem:[%s1914_s8 + $0x100] ss:$8 sps:$4 sm:$0xff]   ;;  %v1512_v6 = vld [vmem:[%s1914_s8 + $0x114] ss:$8 sps:$4 sm:$0xff]  }
  0x50   : > { %1108 = vmatprep.subr.bf16.mxu1 %v1506_v2  ;;  %1068 = vmatpush1.bf16.msra.mxu0 %v1508_v3  ;;  %v1514_v7 = vld [vmem:[%s1914_s8 + $0x10] ss:$8 sps:$4 sm:$0xff]   ;;  %v1516_v9 = vld [vmem:[%s1914_s8 + $0x24] ss:$8 sps:$4 sm:$0xff]   ;;  %v1520_v11 = vld [vmem:[%s1914_s8 + $0x20] ss:$8 sps:$4 sm:$0xff]  }
  0x51   : > { %1109 = vmatpush1.bf16.msra.mxu1 %v1509_v4  ;;  %1069 = vmatprep.subr.bf16.mxu0 %v1510_v5  ;;  %v1515_v8 = vld [vmem:[%s1914_s8 + $0x110] ss:$8 sps:$4 sm:$0xff]   ;;  %v1518_v10 = vld [vmem:[%s1914_s8 + $0x124] ss:$8 sps:$4 sm:$0xff]   ;;  %v1521_v12 = vld [vmem:[%s1914_s8 + $0x120] ss:$8 sps:$4 sm:$0xff]  }
  0x52   : > { %1110 = vmatprep.subr.bf16.mxu1 %v1512_v6  ;;  %v1522_v13 = vld [vmem:[%s1914_s8 + $0x34] ss:$8 sps:$4 sm:$0xff]   ;;  %v1526_v15 = vld [vmem:[%s1914_s8 + $0x30] ss:$8 sps:$4 sm:$0xff]   ;;  %v1528_v17 = vld [vmem:[%s1914_s8 + $0x44] ss:$8 sps:$4 sm:$0xff]  }
  0x53   : > { %v1524_v14 = vld [vmem:[%s1914_s8 + $0x134] ss:$8 sps:$4 sm:$0xff]   ;;  %v1527_v16 = vld [vmem:[%s1914_s8 + $0x130] ss:$8 sps:$4 sm:$0xff]   ;;  %v1530_v18 = vld [vmem:[%s1914_s8 + $0x144] ss:$8 sps:$4 sm:$0xff]  }
  0x54   : > { %1070 = vmatpush1.bf16.msra.mxu0 %v1514_v7  ;;  %v1532_v19 = vld [vmem:[%s1914_s8 + $0x40] ss:$8 sps:$4 sm:$0xff]   ;;  %v1534_v21 = vld [vmem:[%s1914_s8 + $0x54] ss:$8 sps:$4 sm:$0xff]   ;;  %v1538_v23 = vld [vmem:[%s1914_s8 + $0x50] ss:$8 sps:$4 sm:$0xff]  }
  0x55   : > { %1111 = vmatpush1.bf16.msra.mxu1 %v1515_v8  ;;  %1071 = vmatprep.subr.bf16.mxu0 %v1516_v9  ;;  %v1533_v20 = vld [vmem:[%s1914_s8 + $0x140] ss:$8 sps:$4 sm:$0xff]   ;;  %v1536_v22 = vld [vmem:[%s1914_s8 + $0x154] ss:$8 sps:$4 sm:$0xff]   ;;  %v1539_v24 = vld [vmem:[%s1914_s8 + $0x150] ss:$8 sps:$4 sm:$0xff]  }
  0x56   : > { %1112 = vmatprep.subr.bf16.mxu1 %v1518_v10  ;;  %v1540_v25 = vld [vmem:[%s1914_s8 + $0x64] ss:$8 sps:$4 sm:$0xff]   ;;  %v1544_v27 = vld [vmem:[%s1914_s8 + $0x60] ss:$8 sps:$4 sm:$0xff]   ;;  %v1546_v29 = vld [vmem:[%s1914_s8 + $0x74] ss:$8 sps:$4 sm:$0xff]  }
  0x57   : > { %v1542_v26 = vld [vmem:[%s1914_s8 + $0x164] ss:$8 sps:$4 sm:$0xff]   ;;  %v1545_v28 = vld [vmem:[%s1914_s8 + $0x160] ss:$8 sps:$4 sm:$0xff]   ;;  %v1548_v30 = vld [vmem:[%s1914_s8 + $0x174] ss:$8 sps:$4 sm:$0xff]  }
  0x58   : > { %1072 = vmatpush1.bf16.msra.mxu0 %v1520_v11  ;;  %v1550_v31 = vld [vmem:[%s1914_s8 + $0x70] ss:$8 sps:$4 sm:$0xff]   ;;  %v1552_v33 = vld [vmem:[%s1914_s8 + $0x84] ss:$8 sps:$4 sm:$0xff]   ;;  %v1556_v35 = vld [vmem:[%s1914_s8 + $0x80] ss:$8 sps:$4 sm:$0xff]  }
  0x59   : > { %1113 = vmatpush1.bf16.msra.mxu1 %v1521_v12  ;;  %1073 = vmatprep.subr.bf16.mxu0 %v1522_v13  ;;  %v1551_v32 = vld [vmem:[%s1914_s8 + $0x170] ss:$8 sps:$4 sm:$0xff]   ;;  %v1554_v34 = vld [vmem:[%s1914_s8 + $0x184] ss:$8 sps:$4 sm:$0xff]   ;;  %v1557_v36 = vld [vmem:[%s1914_s8 + $0x180] ss:$8 sps:$4 sm:$0xff]  }
  0x5a   : > { %1114 = vmatprep.subr.bf16.mxu1 %v1524_v14  ;;  %v1558_v37 = vld [vmem:[%s1914_s8 + $0x94] ss:$8 sps:$4 sm:$0xff]   ;;  %v1562_v39 = vld [vmem:[%s1914_s8 + $0x90] ss:$8 sps:$4 sm:$0xff]   ;;  %v1564_v41 = vld [vmem:[%s1914_s8 + $0xa4] ss:$8 sps:$4 sm:$0xff]  }
  0x5b   : > { %v1560_v38 = vld [vmem:[%s1914_s8 + $0x194] ss:$8 sps:$4 sm:$0xff]   ;;  %v1563_v40 = vld [vmem:[%s1914_s8 + $0x190] ss:$8 sps:$4 sm:$0xff]   ;;  %v1566_v42 = vld [vmem:[%s1914_s8 + $0x1a4] ss:$8 sps:$4 sm:$0xff]  }
  0x5c   : > { %1074 = vmatpush1.bf16.msra.mxu0 %v1526_v15  ;;  %v1568_v43 = vld [vmem:[%s1914_s8 + $0xa0] ss:$8 sps:$4 sm:$0xff]   ;;  %v1570_v45 = vld [vmem:[%s1914_s8 + $0xb4] ss:$8 sps:$4 sm:$0xff]   ;;  %v1574_v50 = vld [vmem:[%s1914_s8 + $0xb0] ss:$8 sps:$4 sm:$0xff]  }
  0x5d   : > { %1115 = vmatpush1.bf16.msra.mxu1 %v1527_v16  ;;  %1075 = vmatprep.subr.bf16.mxu0 %v1528_v17  ;;  %v1569_v44 = vld [vmem:[%s1914_s8 + $0x1a0] ss:$8 sps:$4 sm:$0xff]   ;;  %v1572_v46 = vld [vmem:[%s1914_s8 + $0x1b4] ss:$8 sps:$4 sm:$0xff]   ;;  %v1575_v51 = vld [vmem:[%s1914_s8 + $0x1b0] ss:$8 sps:$4 sm:$0xff]  }
  0x5e   : > { %1116 = vmatprep.subr.bf16.mxu1 %v1530_v18  ;;  %v667_v47 = vld [vmem:[%s1891_s9] sm:$0xff]  ;;  %v668_v49 = vld [vmem:[%s1891_s9 + $0x8] sm:$0xff]  ;;  %v1576_v53 = vld [vmem:[%s1914_s8 + $0xc4] ss:$8 sps:$4 sm:$0xff]   ;;  %p1441_p13 = scmp.ne.s32.totalorder %s1642_s20, 8 }
  0x5f   : > { %v1374_v48 = vcombine.high %v667_v47, %v667_v47  ;;  %v1376_v52 = vcombine.high %v668_v49, %v668_v49  ;;  %v1578_v54 = vld [vmem:[%s1914_s8 + $0x1c4] ss:$8 sps:$4 sm:$0xff]   ;;  %v1580_v55 = vld [vmem:[%s1914_s8 + $0xc0] ss:$8 sps:$4 sm:$0xff]   ;;  %v1582_v57 = vld [vmem:[%s1914_s8 + $0xd4] ss:$8 sps:$4 sm:$0xff]   ;;  %v1373_v5 = vcombine.low %v667_v47, %v667_v47  ;;  %v1375_v6 = vcombine.low %v668_v49, %v668_v49 }
  0x60   : > { %1076 = vmatpush1.bf16.msra.mxu0 %v1532_v19  ;;  %v1581_v56 = vld [vmem:[%s1914_s8 + $0x1c0] ss:$8 sps:$4 sm:$0xff]   ;;  %v1584_v58 = vld [vmem:[%s1914_s8 + $0x1d4] ss:$8 sps:$4 sm:$0xff]   ;;  %v1586_v59 = vld [vmem:[%s1914_s8 + $0xd0] ss:$8 sps:$4 sm:$0xff]  }
  0x61   : > { %1117 = vmatpush1.bf16.msra.mxu1 %v1533_v20  ;;  %1077 = vmatprep.subr.bf16.mxu0 %v1534_v21  ;;  %v1587_v60 = vld [vmem:[%s1914_s8 + $0x1d0] ss:$8 sps:$4 sm:$0xff]   ;;  %v1588_v61 = vld [vmem:[%s1914_s8 + $0xe4] ss:$8 sps:$4 sm:$0xff]   ;;  %v1592_v63 = vld [vmem:[%s1914_s8 + $0xe0] ss:$8 sps:$4 sm:$0xff]   ;;  %v1161_v21 = vlaneseq (!%p1441_p13) }
  0x62   : > { %1118 = vmatprep.subr.bf16.mxu1 %v1536_v22  ;;  %1099 = vmatprep.mubr.bf16.mxu0 %v1374_v48  ;;  %v1590_v62 = vld [vmem:[%s1914_s8 + $0x1e4] ss:$8 sps:$4 sm:$0xff]   ;;  %v1593_v0 = vld [vmem:[%s1914_s8 + $0x1e0] ss:$8 sps:$4 sm:$0xff]   ;;  %v1594_v1 = vld [vmem:[%s1914_s8 + $0xf4] ss:$8 sps:$4 sm:$0xff]  }
  0x63   : > { %1140 = vmatprep.mubr.bf16.mxu1 %v1376_v52  ;;  %v1596_v2 = vld [vmem:[%s1914_s8 + $0x1f4] ss:$8 sps:$4 sm:$0xff]   ;;  %v1598_v3 = vld [vmem:[%s1914_s8 + $0xf0] ss:$8 sps:$4 sm:$0xff]   ;;  %v1162_v22 = vshrl.u32 (!%p1441_p13), %v1161_v21, 7 }
  0x64   : > { %1078 = vmatpush1.bf16.msra.mxu0 %v1538_v23  ;;  %v1599_v4 = vld [vmem:[%s1914_s8 + $0x1f0] ss:$8 sps:$4 sm:$0xff]  }
  0x65   : > { %1119 = vmatpush1.bf16.msra.mxu1 %v1539_v24  ;;  %1079 = vmatprep.subr.bf16.mxu0 %v1540_v25  ;;  %v665_v8 = vld [vmem:[#allocation2] sm:$0xff]  ;;  %v666_v12 = vld [vmem:[#allocation2 + $0x8] sm:$0xff]  ;;  %v1163_v25 = vsub.s32 (!%p1441_p13), 0, %v1162_v22 }
  0x66   : > { %1120 = vmatprep.subr.bf16.mxu1 %v1542_v26  ;;  %v1159_v23 = vld [vmem:[%s632_s18] sm:$0x3] (!%p1441_p13)  ;;  %v1167_v26 = vsub.s32 (!%p1441_p13), 1, %v1162_v22 }
  0x67   : > { %v1173_v24 = vld [vmem:[%s637_s21] sm:$0x3] (!%p1441_p13) }
  0x68   : > { %1080 = vmatpush1.bf16.msra.mxu0 %v1544_v27 }
  0x69   : > { %1121 = vmatpush1.bf16.msra.mxu1 %v1545_v28  ;;  %1081 = vmatprep.subr.bf16.mxu0 %v1546_v29  ;;  %v1187_v29 = vld [vmem:[%s1907_s17] sm:$0xff] (!%p1441_p13) }
  0x6a   : > { %1122 = vmatprep.subr.bf16.mxu1 %v1548_v30  ;;  %v1164_v30 = vrot.slane (!%p1441_p13), %v1159_v23, %v1163_v25 }
  0x6c   : > { %1082 = vmatpush1.bf16.msra.mxu0 %v1550_v31  ;;  %v1168_v31 = vrot.slane (!%p1441_p13), %v1159_v23, %v1167_v26 }
  0x6d   : > { %1123 = vmatpush1.bf16.msra.mxu1 %v1551_v32  ;;  %1083 = vmatprep.subr.bf16.mxu0 %v1552_v33  ;;  %v1178_v32 = vrot.slane (!%p1441_p13), %v1173_v24, %v1163_v25  ;;  %v1182_v33 = vrot.slane (!%p1441_p13), %v1173_v24, %v1167_v26 }
  0x6e   : > { %1124 = vmatprep.subr.bf16.mxu1 %v1554_v34 }
  0x70   : > { %1084 = vmatpush1.bf16.msra.mxu0 %v1556_v35 }
  0x71   : > { %1125 = vmatpush1.bf16.msra.mxu1 %v1557_v36  ;;  %1085 = vmatprep.subr.bf16.mxu0 %v1558_v37  ;;  %v1188_v36 = vunpack.c.l.bf16 (!%p1441_p13), %v1187_v29  ;;  %v1189_v37 = vunpack.c.h.bf16 (!%p1441_p13), %v1187_v29 }
  0x72   : > { %1126 = vmatprep.subr.bf16.mxu1 %v1560_v38 }
  0x74   : > { %1086 = vmatpush1.bf16.msra.mxu0 %v1562_v39 }
  0x75   : > { %1127 = vmatpush1.bf16.msra.mxu1 %v1563_v40  ;;  %1087 = vmatprep.subr.bf16.mxu0 %v1564_v41 }
  0x76   : > { %1128 = vmatprep.subr.bf16.mxu1 %v1566_v42 }
  0x78   : > { %1088 = vmatpush1.bf16.msra.mxu0 %v1568_v43 }
  0x79   : > { %1129 = vmatpush1.bf16.msra.mxu1 %v1569_v44  ;;  %1089 = vmatprep.subr.bf16.mxu0 %v1570_v45 }
  0x7a   : > { %1130 = vmatprep.subr.bf16.mxu1 %v1572_v46 }
  0x7c   : > { %1090 = vmatpush1.bf16.msra.mxu0 %v1574_v50 }
  0x7d   : > { %1131 = vmatpush1.bf16.msra.mxu1 %v1575_v51  ;;  %1091 = vmatprep.subr.bf16.mxu0 %v1576_v53 }
  0x7e   : > { %1132 = vmatprep.subr.bf16.mxu1 %v1578_v54 }
  0x80   : > { %1092 = vmatpush1.bf16.msra.mxu0 %v1580_v55 }
  0x81   : > { %1133 = vmatpush1.bf16.msra.mxu1 %v1581_v56  ;;  %1093 = vmatprep.subr.bf16.mxu0 %v1582_v57 }
  0x82   : > { %1134 = vmatprep.subr.bf16.mxu1 %v1584_v58 }
  0x84   : > { %1094 = vmatpush1.bf16.msra.mxu0 %v1586_v59 }
  0x85   : > { %1135 = vmatpush1.bf16.msra.mxu1 %v1587_v60  ;;  %1095 = vmatprep.subr.bf16.mxu0 %v1588_v61 }
  0x86   : > { %1136 = vmatprep.subr.bf16.mxu1 %v1590_v62 }
  0x88   : > { %1096 = vmatpush1.bf16.msra.mxu0 %v1592_v63 }
  0x89   : > { %1137 = vmatpush1.bf16.msra.mxu1 %v1593_v0  ;;  %1097 = vmatprep.subr.bf16.mxu0 %v1594_v1 }
  0x8a   : > { %1138 = vmatprep.subr.bf16.mxu1 %v1596_v2 }
  0x8c   : > { %1098 = vmatpush1.bf16.msra.mxu0 %v1598_v3 }
  0x8d   : > { %1139 = vmatpush1.bf16.msra.mxu1 %v1599_v4 }
  0x8f   : > { %1100 = vmatmul.mubr.bf16.vlgmr.msra.gmra.mrb[0].mxu0 %v1373_v5 }
  0x90   : > { %1141 = vmatmul.mubr.bf16.vlgmr.msra.gmra.mrb[0].mxu1 %v1375_v6 }
 0x162   : > { %v1101_v7 = vpop.f32.mrb[0].mxu0 }
 0x163   : > { %v1142_v9 = vpop.f32.mrb[0].mxu1  ;;  %v1103_v11 = vpop.f32.mrb[1].mxu0  ;;  %1156 = sbr.rel (%p1441_p13) target bundleno = 380 (0x17c), region = 86 }
 0x164   : > { %v1143_v10 = vadd.f32 %v1142_v9, %v1101_v7  ;;  %v1144_v13 = vpop.f32.mrb[1].mxu1  ;;  %v1105_v15 = vpop.f32.mrb[2].mxu0 }
 0x165   : > { %v1145_v14 = vadd.f32 %v1144_v13, %v1103_v11  ;;  %v1146_v16 = vpop.f32.mrb[2].mxu1  ;;  %v1106_v18 = vpop.f32.mrb[3].mxu0 }
 0x166   : > { %v1149_v17 = vadd.f32 %v1143_v10, %v665_v8  ;;  %v1147_v19 = vpop.f32.mrb[3].mxu1 }
 0x167   : > { %v1150_v20 = vadd.f32 %v1145_v14, %v666_v12 }
 0x168   : > { %1151 = vst [vmem:[#allocation2] sm:$0xff] %v1149_v17 }
 0x169   : > { %1152 = vst [vmem:[#allocation2 + $0x8] sm:$0xff] %v1150_v20 }
 0x16f   : > { %v1157_v27 = vld [vmem:[#allocation2] sm:$0xff] }
 0x170   : > { %v1158_v28 = vld [vmem:[#allocation2 + $0x8] sm:$0xff]  ;;  %v1171_v34 = vmul.f32 %v1164_v30, %v1157_v27 }
 0x171   : > { %v1172_v35 = vmul.f32 %v1168_v31, %v1158_v28 }
 0x172   : > { %v1185_v38 = vadd.f32 %v1178_v32, %v1171_v34 }
 0x173   : > { %v1186_v39 = vadd.f32 %v1182_v33, %v1172_v35 }
 0x174   : > { %v1190_v40 = vadd.f32 %v1188_v36, %v1185_v38 }
 0x175   : > { %v1191_v41 = vadd.f32 %v1189_v37, %v1186_v39 }
 0x176   : > { %v1192_v42 = vmax.f32 %v1190_v40, 0.0 }
 0x177   : > { %v1193_v43 = vmax.f32 %v1191_v41, 0.0 }
 0x179   : > { %v1446_v44 = vpack.c.bf16 %v1193_v43, %v1192_v42 }
 0x17b   : > { %1202 = vst [vmem:[%s1912_s7] sm:$0xff] %v1446_v44 }
 0x17c PF: > { %s15_s24 = sadd.s32 1, %s1658_s24   ;;  %s2023_s18 = smov %s1638_s19 }
 0x17d   : > { %p12_p0 = scmp.ge.s32.totalorder %s15_s24, 20   ;;  %s2024_s19 = smov %s1742_s6 }
 0x17e   : > { %s2025_s20 = smov %s1650_s22  ;;  %s2026_s21 = smov %s1654_s23 }
 0x17f   : > { %s2027_s22 = smov %s2030_s25  ;;  %s2028_s23 = smov %s2034_s26 }
 0x180   :  { %14 = sbr.rel (!%p12_p0) target bundleno = 4 (0x4), region = 133 }

// kernel: variant_resnet_forward.41
= control target key start
LH: loop header
LB: loop body
LE: loop exit
PB: predicated region body
PF: predicated region fallthrough
CT: control target
= control target key end

     0   :  { %s1598_s15 = smov 0   ;;  %s1600_s16 = smov 0   ;;  %s1918_s0 = inlined_call_operand.vmem [shape: bf16[8,4608], index: 0, kind: input, shape index: {}]   ;;  %s1919_s1 = inlined_call_operand.vmem [shape: bf16[4608,512], index: 1, kind: input, shape index: {}]   ;;  %s1920_s2 = inlined_call_operand.vmem [shape: f32[1,512], index: 2, kind: input, shape index: {}]   ;;  %s1921_s3 = inlined_call_operand.vmem [shape: f32[1,512], index: 3, kind: input, shape index: {}]   ;;  %s1922_s4 = inlined_call_operand.vmem [shape: bf16[8,512], index: 4, kind: output, shape index: {}]  }
   0x1   :  { %s1602_s17 = smov 0   ;;  %s1604_s18 = smov 0  }
   0x2   :  { %s1606_s19 = smov 0   ;;  %s1608_s20 = smov 0  }
   0x3   :  { %s1610_s21 = smov 0  }
   0x4 LB: > { %s26_s22 = sadd.s32 1, %s1562_s19  ;;  %s29_s23 = sadd.s32 1, %s1566_s20  ;;  %s1570_s21 = sphi %s1610_s21, %s14_s21   ;;  %s1566_s20 = sphi %s1608_s20, %s1928_s20   ;;  %s1562_s19 = sphi %s1606_s19, %s1927_s19   ;;  %s1558_s18 = sphi %s1604_s18, %s1926_s18   ;;  %s1554_s17 = sphi %s1602_s17, %s1925_s17   ;;  %s1550_s16 = sphi %s1600_s16, %s1924_s16   ;;  %s1546_s15 = sphi %s1598_s15, %s1923_s15  }
   0x5   : > { %p27_p0 = scmp.ge.s32.totalorder %s26_s22, 9  ;;  %p77_p1 = scmp.ne.s32.totalorder %s1550_s16, %s1546_s15 }
   0x6   : > { %p78_p2 = scmp.eq.s32.totalorder %s1570_s21, 0  ;;  %s70_s27 = sadd.s32 1, %s1550_s16 }
   0x7   : > { %s1930_s22 = smov (%p27_p0, %s26_s22), 0  ;;  %s1932_s23 = smov (!%p27_p0, %s29_s23), %s1566_s20 }
   0x8   : > { %p79_p3 = por %p78_p2, %p77_p1  ;;  %p31_p4 = scmp.ge.s32.totalorder %s1932_s23, 2 }
   0x9   : > { %s65_s24 = ssub.s32 %s1562_s19, %s1930_s22  ;;  %p1270_p6 = scmp.ge.s32.totalorder %s1570_s21, 18 }
   0xa   : > { %s1934_s23 = smov (%p31_p4, %s1932_s23), 0 }
   0xb   : > { %s66_s25 = ssub.s32 %s1566_s20, %s1934_s23  ;;  %183 = sbr.rel (%p1270_p6) target bundleno = 57 (0x39), region = 16 }
   0xc   : > { %s67_s26 = sor.u32 %s66_s25, %s65_s24 }
   0xd   : > { %p68_p5 = scmp.eq.s32.totalorder %s67_s26, 0 }
   0xf   : > { %s1649_s28 = scalar_select %p68_p5, %s1550_s16, %s70_s27  }
  0x12   : > { %199 = sbr.rel (!%p79_p3) target bundleno = 57 (0x39), region = 24  ;;  %s201_s29 = sand.u32 (%p79_p3), 1, %s1550_s16  }
  0x13   : > { %s1273_s30 = sshll.u32 (%p79_p3), %s1566_s20, 1  ;;  %s1271_s5 = sshll.u32 (%p79_p3), %s201_s29, 9 }
  0x14   : > { %s1357_s6 = sshll.u32 (%p79_p3), %s1562_s19, 8  ;;  %s1663_s12 = scalar_lea.vmem (%p79_p3), [#allocation3], %s1271_s5 }
  0x15   : > { %s207_s7 = sadd.s32 (%p79_p3), %s1357_s6, %s1273_s30 }
  0x16   : > { %s1275_s8 = sshll.u32 (%p79_p3), %s207_s7, 2 }
  0x17   : > { %s1658_s11 = scalar_lea.vmem (%p79_p3), %s1919_s1, %s1275_s8 }
  0x18   : > { %v363_v0 = vld [vmem:[%s1658_s11] sm:$0xff] (%p79_p3)  ;;  %v365_v1 = vld [vmem:[%s1658_s11 + $0x10] sm:$0xff] (%p79_p3) }
  0x19   : > { %v367_v2 = vld [vmem:[%s1658_s11 + $0x20] sm:$0xff]  ;;  %364 = vst [vmem:[%s1663_s12] sm:$0xff] %v363_v0  ;;  %366 = vst [vmem:[%s1663_s12 + $0x8] sm:$0xff] %v365_v1  ;;  %v369_v3 = vld [vmem:[%s1658_s11 + $0x30] sm:$0xff] }
  0x1a   : > { %368 = vst [vmem:[%s1663_s12 + $0x10] sm:$0xff] %v367_v2  ;;  %v371_v4 = vld [vmem:[%s1658_s11 + $0x40] sm:$0xff]  ;;  %v373_v5 = vld [vmem:[%s1658_s11 + $0x50] sm:$0xff]  ;;  %370 = vst [vmem:[%s1663_s12 + $0x18] sm:$0xff] %v369_v3 }
  0x1b   : > { %372 = vst [vmem:[%s1663_s12 + $0x20] sm:$0xff] %v371_v4  ;;  %374 = vst [vmem:[%s1663_s12 + $0x28] sm:$0xff] %v373_v5  ;;  %v375_v6 = vld [vmem:[%s1658_s11 + $0x60] sm:$0xff]  ;;  %v377_v7 = vld [vmem:[%s1658_s11 + $0x70] sm:$0xff] }
  0x1c   : > { %v379_v8 = vld [vmem:[%s1658_s11 + $0x80] sm:$0xff]  ;;  %376 = vst [vmem:[%s1663_s12 + $0x30] sm:$0xff] %v375_v6  ;;  %378 = vst [vmem:[%s1663_s12 + $0x38] sm:$0xff] %v377_v7  ;;  %v381_v9 = vld [vmem:[%s1658_s11 + $0x90] sm:$0xff] }
  0x1d   : > { %380 = vst [vmem:[%s1663_s12 + $0x40] sm:$0xff] %v379_v8  ;;  %v383_v10 = vld [vmem:[%s1658_s11 + $0xa0] sm:$0xff]  ;;  %v385_v11 = vld [vmem:[%s1658_s11 + $0xb0] sm:$0xff]  ;;  %382 = vst [vmem:[%s1663_s12 + $0x48] sm:$0xff] %v381_v9 }
  0x1e   : > { %384 = vst [vmem:[%s1663_s12 + $0x50] sm:$0xff] %v383_v10  ;;  %386 = vst [vmem:[%s1663_s12 + $0x58] sm:$0xff] %v385_v11  ;;  %v387_v12 = vld [vmem:[%s1658_s11 + $0xc0] sm:$0xff]  ;;  %v389_v13 = vld [vmem:[%s1658_s11 + $0xd0] sm:$0xff] }
  0x1f   : > { %v391_v14 = vld [vmem:[%s1658_s11 + $0xe0] sm:$0xff]  ;;  %388 = vst [vmem:[%s1663_s12 + $0x60] sm:$0xff] %v387_v12  ;;  %390 = vst [vmem:[%s1663_s12 + $0x68] sm:$0xff] %v389_v13  ;;  %v393_v15 = vld [vmem:[%s1658_s11 + $0xf0] sm:$0xff] }
  0x20   : > { %392 = vst [vmem:[%s1663_s12 + $0x70] sm:$0xff] %v391_v14  ;;  %v395_v16 = vld [vmem:[%s1658_s11 + $0x100] sm:$0xff]  ;;  %v397_v17 = vld [vmem:[%s1658_s11 + $0x110] sm:$0xff]  ;;  %394 = vst [vmem:[%s1663_s12 + $0x78] sm:$0xff] %v393_v15 }
  0x21   : > { %396 = vst [vmem:[%s1663_s12 + $0x80] sm:$0xff] %v395_v16  ;;  %398 = vst [vmem:[%s1663_s12 + $0x88] sm:$0xff] %v397_v17  ;;  %v399_v18 = vld [vmem:[%s1658_s11 + $0x120] sm:$0xff]  ;;  %v401_v19 = vld [vmem:[%s1658_s11 + $0x130] sm:$0xff] }
  0x22   : > { %v403_v20 = vld [vmem:[%s1658_s11 + $0x140] sm:$0xff]  ;;  %400 = vst [vmem:[%s1663_s12 + $0x90] sm:$0xff] %v399_v18  ;;  %402 = vst [vmem:[%s1663_s12 + $0x98] sm:$0xff] %v401_v19  ;;  %v405_v21 = vld [vmem:[%s1658_s11 + $0x150] sm:$0xff] }
  0x23   : > { %404 = vst [vmem:[%s1663_s12 + $0xa0] sm:$0xff] %v403_v20  ;;  %v407_v22 = vld [vmem:[%s1658_s11 + $0x160] sm:$0xff]  ;;  %v409_v23 = vld [vmem:[%s1658_s11 + $0x170] sm:$0xff]  ;;  %406 = vst [vmem:[%s1663_s12 + $0xa8] sm:$0xff] %v405_v21 }
  0x24   : > { %408 = vst [vmem:[%s1663_s12 + $0xb0] sm:$0xff] %v407_v22  ;;  %410 = vst [vmem:[%s1663_s12 + $0xb8] sm:$0xff] %v409_v23  ;;  %v411_v24 = vld [vmem:[%s1658_s11 + $0x180] sm:$0xff]  ;;  %v413_v25 = vld [vmem:[%s1658_s11 + $0x190] sm:$0xff] }
  0x25   : > { %v415_v26 = vld [vmem:[%s1658_s11 + $0x1a0] sm:$0xff]  ;;  %412 = vst [vmem:[%s1663_s12 + $0xc0] sm:$0xff] %v411_v24  ;;  %414 = vst [vmem:[%s1663_s12 + $0xc8] sm:$0xff] %v413_v25  ;;  %v417_v27 = vld [vmem:[%s1658_s11 + $0x1b0] sm:$0xff] }
  0x26   : > { %416 = vst [vmem:[%s1663_s12 + $0xd0] sm:$0xff] %v415_v26  ;;  %v419_v28 = vld [vmem:[%s1658_s11 + $0x1c0] sm:$0xff]  ;;  %v421_v29 = vld [vmem:[%s1658_s11 + $0x1d0] sm:$0xff]  ;;  %418 = vst [vmem:[%s1663_s12 + $0xd8] sm:$0xff] %v417_v27 }
  0x27   : > { %420 = vst [vmem:[%s1663_s12 + $0xe0] sm:$0xff] %v419_v28  ;;  %422 = vst [vmem:[%s1663_s12 + $0xe8] sm:$0xff] %v421_v29  ;;  %v423_v30 = vld [vmem:[%s1658_s11 + $0x1e0] sm:$0xff]  ;;  %v425_v31 = vld [vmem:[%s1658_s11 + $0x1f0] sm:$0xff] }
  0x28   : > { %v427_v32 = vld [vmem:[%s1658_s11 + $0x200] sm:$0xff]  ;;  %424 = vst [vmem:[%s1663_s12 + $0xf0] sm:$0xff] %v423_v30  ;;  %426 = vst [vmem:[%s1663_s12 + $0xf8] sm:$0xff] %v425_v31  ;;  %v429_v33 = vld [vmem:[%s1658_s11 + $0x210] sm:$0xff] }
  0x29   : > { %428 = vst [vmem:[%s1663_s12 + $0x100] sm:$0xff] %v427_v32  ;;  %v431_v34 = vld [vmem:[%s1658_s11 + $0x220] sm:$0xff]  ;;  %v433_v35 = vld [vmem:[%s1658_s11 + $0x230] sm:$0xff]  ;;  %430 = vst [vmem:[%s1663_s12 + $0x108] sm:$0xff] %v429_v33 }
  0x2a   : > { %432 = vst [vmem:[%s1663_s12 + $0x110] sm:$0xff] %v431_v34  ;;  %434 = vst [vmem:[%s1663_s12 + $0x118] sm:$0xff] %v433_v35  ;;  %v435_v36 = vld [vmem:[%s1658_s11 + $0x240] sm:$0xff]  ;;  %v437_v37 = vld [vmem:[%s1658_s11 + $0x250] sm:$0xff] }
  0x2b   : > { %v439_v38 = vld [vmem:[%s1658_s11 + $0x260] sm:$0xff]  ;;  %436 = vst [vmem:[%s1663_s12 + $0x120] sm:$0xff] %v435_v36  ;;  %438 = vst [vmem:[%s1663_s12 + $0x128] sm:$0xff] %v437_v37  ;;  %v441_v39 = vld [vmem:[%s1658_s11 + $0x270] sm:$0xff] }
  0x2c   : > { %440 = vst [vmem:[%s1663_s12 + $0x130] sm:$0xff] %v439_v38  ;;  %v443_v40 = vld [vmem:[%s1658_s11 + $0x280] sm:$0xff]  ;;  %v445_v41 = vld [vmem:[%s1658_s11 + $0x290] sm:$0xff]  ;;  %442 = vst [vmem:[%s1663_s12 + $0x138] sm:$0xff] %v441_v39 }
  0x2d   : > { %444 = vst [vmem:[%s1663_s12 + $0x140] sm:$0xff] %v443_v40  ;;  %446 = vst [vmem:[%s1663_s12 + $0x148] sm:$0xff] %v445_v41  ;;  %v447_v42 = vld [vmem:[%s1658_s11 + $0x2a0] sm:$0xff]  ;;  %v449_v43 = vld [vmem:[%s1658_s11 + $0x2b0] sm:$0xff] }
  0x2e   : > { %v451_v44 = vld [vmem:[%s1658_s11 + $0x2c0] sm:$0xff]  ;;  %448 = vst [vmem:[%s1663_s12 + $0x150] sm:$0xff] %v447_v42  ;;  %450 = vst [vmem:[%s1663_s12 + $0x158] sm:$0xff] %v449_v43  ;;  %v453_v45 = vld [vmem:[%s1658_s11 + $0x2d0] sm:$0xff] }
  0x2f   : > { %452 = vst [vmem:[%s1663_s12 + $0x160] sm:$0xff] %v451_v44  ;;  %v455_v46 = vld [vmem:[%s1658_s11 + $0x2e0] sm:$0xff]  ;;  %v457_v47 = vld [vmem:[%s1658_s11 + $0x2f0] sm:$0xff]  ;;  %454 = vst [vmem:[%s1663_s12 + $0x168] sm:$0xff] %v453_v45 }
  0x30   : > { %456 = vst [vmem:[%s1663_s12 + $0x170] sm:$0xff] %v455_v46  ;;  %458 = vst [vmem:[%s1663_s12 + $0x178] sm:$0xff] %v457_v47  ;;  %v459_v48 = vld [vmem:[%s1658_s11 + $0x300] sm:$0xff]  ;;  %v461_v49 = vld [vmem:[%s1658_s11 + $0x310] sm:$0xff] }
  0x31   : > { %v463_v50 = vld [vmem:[%s1658_s11 + $0x320] sm:$0xff]  ;;  %460 = vst [vmem:[%s1663_s12 + $0x180] sm:$0xff] %v459_v48  ;;  %462 = vst [vmem:[%s1663_s12 + $0x188] sm:$0xff] %v461_v49  ;;  %v465_v51 = vld [vmem:[%s1658_s11 + $0x330] sm:$0xff] }
  0x32   : > { %464 = vst [vmem:[%s1663_s12 + $0x190] sm:$0xff] %v463_v50  ;;  %v467_v52 = vld [vmem:[%s1658_s11 + $0x340] sm:$0xff]  ;;  %v469_v53 = vld [vmem:[%s1658_s11 + $0x350] sm:$0xff]  ;;  %466 = vst [vmem:[%s1663_s12 + $0x198] sm:$0xff] %v465_v51 }
  0x33   : > { %468 = vst [vmem:[%s1663_s12 + $0x1a0] sm:$0xff] %v467_v52  ;;  %470 = vst [vmem:[%s1663_s12 + $0x1a8] sm:$0xff] %v469_v53  ;;  %v471_v54 = vld [vmem:[%s1658_s11 + $0x360] sm:$0xff]  ;;  %v473_v55 = vld [vmem:[%s1658_s11 + $0x370] sm:$0xff] }
  0x34   : > { %v475_v56 = vld [vmem:[%s1658_s11 + $0x380] sm:$0xff]  ;;  %472 = vst [vmem:[%s1663_s12 + $0x1b0] sm:$0xff] %v471_v54  ;;  %474 = vst [vmem:[%s1663_s12 + $0x1b8] sm:$0xff] %v473_v55  ;;  %v477_v57 = vld [vmem:[%s1658_s11 + $0x390] sm:$0xff] }
  0x35   : > { %476 = vst [vmem:[%s1663_s12 + $0x1c0] sm:$0xff] %v475_v56  ;;  %v479_v58 = vld [vmem:[%s1658_s11 + $0x3a0] sm:$0xff]  ;;  %v481_v59 = vld [vmem:[%s1658_s11 + $0x3b0] sm:$0xff]  ;;  %478 = vst [vmem:[%s1663_s12 + $0x1c8] sm:$0xff] %v477_v57 }
  0x36   : > { %480 = vst [vmem:[%s1663_s12 + $0x1d0] sm:$0xff] %v479_v58  ;;  %482 = vst [vmem:[%s1663_s12 + $0x1d8] sm:$0xff] %v481_v59  ;;  %v483_v60 = vld [vmem:[%s1658_s11 + $0x3c0] sm:$0xff]  ;;  %v485_v61 = vld [vmem:[%s1658_s11 + $0x3d0] sm:$0xff] }
  0x37   : > { %v487_v62 = vld [vmem:[%s1658_s11 + $0x3e0] sm:$0xff]  ;;  %484 = vst [vmem:[%s1663_s12 + $0x1e0] sm:$0xff] %v483_v60  ;;  %486 = vst [vmem:[%s1663_s12 + $0x1e8] sm:$0xff] %v485_v61  ;;  %v489_v63 = vld [vmem:[%s1658_s11 + $0x3f0] sm:$0xff] }
  0x38   : > { %488 = vst [vmem:[%s1663_s12 + $0x1f0] sm:$0xff] %v487_v62  ;;  %490 = vst [vmem:[%s1663_s12 + $0x1f8] sm:$0xff] %v489_v63 }
  0x39 PF: > { %p1276_p7 = scmp.ge.s32.totalorder %s1570_s21, 1  ;;  %p511_p8 = scmp.lt.s32.totalorder %s1570_s21, 19 }
  0x3b   : > { %p512_p9 = pnand %p1276_p7, %p511_p8 }
  0x3c   : > { %s518_s13 = sand.u32 (!%p512_p9), 1, %s1546_s15   ;;  %s1278_s14 = sshll.u32 (!%p512_p9), %s1554_s17, 2 }
  0x3d   : > { %515 = sbr.rel (%p512_p9) target bundleno = 378 (0x17a), region = 70  ;;  %s1277_s24 = sshll.u32 (!%p512_p9), %s518_s13, 9 }
  0x3e   : > { %p567_p10 = scmp.lt.s32.totalorder (!%p512_p9), %s1278_s14, 35  ;;  %s1280_s25 = sshll.u32 (!%p512_p9), %s1558_s18, 1 }
  0x3f   : > { %p577_p11 = scmp.lt.s32.totalorder (!%p512_p9), %s1280_s25, 3  ;;  %s1816_s13 = scalar_lea.vmem (!%p512_p9), [#allocation3], %s1277_s24 }
  0x40   : > { %p1284_p12 = scmp.ne.s32.totalorder (!%p512_p9), %s1554_s17, 0 }
  0x44   : > { %s1936_s14 = smov (!%p567_p10, %s1278_s14), 35  ;;  %s1938_s25 = smov (!%p577_p11, %s1280_s25), 3 }
  0x45   : > { %s1279_s26 = sshll.u32 %s1936_s14, 2  ;;  %s579_s15 = scalar_lea.vmem %s1920_s2, %s1938_s25  ;;  %v1572_v0 = vmov (!%p1284_p12), 0.0  }
  0x46   : > { %s1798_s30 = scalar_lea.vmem %s1918_s0, %s1279_s26  ;;  %s584_s18 = scalar_lea.vmem %s1921_s3, %s1938_s25  ;;  %600 = vst [vmem:[#allocation2] sm:$0xff] (!%p1284_p12), %v1572_v0  ;;  %601 = vst [vmem:[#allocation2 + $0x8] sm:$0xff] (!%p1284_p12), %v1572_v0 }
  0x47   : > { %s1283_s9 = sshll.u32 %s1938_s25, 2  ;;  %599 = sbr.rel (%p1284_p12) target bundleno = 78 (0x4e), region = 78 }
  0x48   : > { %s1814_s12 = scalar_lea.vmem %s1922_s4, %s1283_s9 }
  0x4e PF: > { %v1416_v1 = vld [vmem:[%s1816_s13 + $0x4] ss:$8 sps:$4 sm:$0xff]   ;;  %v1420_v3 = vld [vmem:[%s1816_s13] ss:$8 sps:$4 sm:$0xff]   ;;  %v1422_v5 = vld [vmem:[%s1816_s13 + $0x14] ss:$8 sps:$4 sm:$0xff]  }
  0x4f   : > { %v1418_v2 = vld [vmem:[%s1816_s13 + $0x104] ss:$8 sps:$4 sm:$0xff]   ;;  %1004 = vmatprep.subr.bf16.mxu0 %v1416_v1  ;;  %v1421_v4 = vld [vmem:[%s1816_s13 + $0x100] ss:$8 sps:$4 sm:$0xff]   ;;  %v1424_v6 = vld [vmem:[%s1816_s13 + $0x114] ss:$8 sps:$4 sm:$0xff]  }
  0x50   : > { %1045 = vmatprep.subr.bf16.mxu1 %v1418_v2  ;;  %1005 = vmatpush1.bf16.msra.mxu0 %v1420_v3  ;;  %v1426_v7 = vld [vmem:[%s1816_s13 + $0x10] ss:$8 sps:$4 sm:$0xff]   ;;  %v1428_v9 = vld [vmem:[%s1816_s13 + $0x24] ss:$8 sps:$4 sm:$0xff]   ;;  %v1432_v11 = vld [vmem:[%s1816_s13 + $0x20] ss:$8 sps:$4 sm:$0xff]  }
  0x51   : > { %1046 = vmatpush1.bf16.msra.mxu1 %v1421_v4  ;;  %1006 = vmatprep.subr.bf16.mxu0 %v1422_v5  ;;  %v1427_v8 = vld [vmem:[%s1816_s13 + $0x110] ss:$8 sps:$4 sm:$0xff]   ;;  %v1430_v10 = vld [vmem:[%s1816_s13 + $0x124] ss:$8 sps:$4 sm:$0xff]   ;;  %v1433_v12 = vld [vmem:[%s1816_s13 + $0x120] ss:$8 sps:$4 sm:$0xff]  }
  0x52   : > { %1047 = vmatprep.subr.bf16.mxu1 %v1424_v6  ;;  %v1434_v13 = vld [vmem:[%s1816_s13 + $0x34] ss:$8 sps:$4 sm:$0xff]   ;;  %v1438_v15 = vld [vmem:[%s1816_s13 + $0x30] ss:$8 sps:$4 sm:$0xff]   ;;  %v1440_v17 = vld [vmem:[%s1816_s13 + $0x44] ss:$8 sps:$4 sm:$0xff]  }
  0x53   : > { %v1436_v14 = vld [vmem:[%s1816_s13 + $0x134] ss:$8 sps:$4 sm:$0xff]   ;;  %v1439_v16 = vld [vmem:[%s1816_s13 + $0x130] ss:$8 sps:$4 sm:$0xff]   ;;  %v1442_v18 = vld [vmem:[%s1816_s13 + $0x144] ss:$8 sps:$4 sm:$0xff]  }
  0x54   : > { %1007 = vmatpush1.bf16.msra.mxu0 %v1426_v7  ;;  %v1444_v19 = vld [vmem:[%s1816_s13 + $0x40] ss:$8 sps:$4 sm:$0xff]   ;;  %v1446_v21 = vld [vmem:[%s1816_s13 + $0x54] ss:$8 sps:$4 sm:$0xff]   ;;  %v1450_v23 = vld [vmem:[%s1816_s13 + $0x50] ss:$8 sps:$4 sm:$0xff]  }
  0x55   : > { %1048 = vmatpush1.bf16.msra.mxu1 %v1427_v8  ;;  %1008 = vmatprep.subr.bf16.mxu0 %v1428_v9  ;;  %v1445_v20 = vld [vmem:[%s1816_s13 + $0x140] ss:$8 sps:$4 sm:$0xff]   ;;  %v1448_v22 = vld [vmem:[%s1816_s13 + $0x154] ss:$8 sps:$4 sm:$0xff]   ;;  %v1451_v24 = vld [vmem:[%s1816_s13 + $0x150] ss:$8 sps:$4 sm:$0xff]  }
  0x56   : > { %1049 = vmatprep.subr.bf16.mxu1 %v1430_v10  ;;  %v1452_v25 = vld [vmem:[%s1816_s13 + $0x64] ss:$8 sps:$4 sm:$0xff]   ;;  %v1456_v27 = vld [vmem:[%s1816_s13 + $0x60] ss:$8 sps:$4 sm:$0xff]   ;;  %v1458_v29 = vld [vmem:[%s1816_s13 + $0x74] ss:$8 sps:$4 sm:$0xff]  }
  0x57   : > { %v1454_v26 = vld [vmem:[%s1816_s13 + $0x164] ss:$8 sps:$4 sm:$0xff]   ;;  %v1457_v28 = vld [vmem:[%s1816_s13 + $0x160] ss:$8 sps:$4 sm:$0xff]   ;;  %v1460_v30 = vld [vmem:[%s1816_s13 + $0x174] ss:$8 sps:$4 sm:$0xff]  }
  0x58   : > { %1009 = vmatpush1.bf16.msra.mxu0 %v1432_v11  ;;  %v1462_v31 = vld [vmem:[%s1816_s13 + $0x70] ss:$8 sps:$4 sm:$0xff]   ;;  %v1464_v33 = vld [vmem:[%s1816_s13 + $0x84] ss:$8 sps:$4 sm:$0xff]   ;;  %v1468_v35 = vld [vmem:[%s1816_s13 + $0x80] ss:$8 sps:$4 sm:$0xff]  }
  0x59   : > { %1050 = vmatpush1.bf16.msra.mxu1 %v1433_v12  ;;  %1010 = vmatprep.subr.bf16.mxu0 %v1434_v13  ;;  %v1463_v32 = vld [vmem:[%s1816_s13 + $0x170] ss:$8 sps:$4 sm:$0xff]   ;;  %v1466_v34 = vld [vmem:[%s1816_s13 + $0x184] ss:$8 sps:$4 sm:$0xff]   ;;  %v1469_v36 = vld [vmem:[%s1816_s13 + $0x180] ss:$8 sps:$4 sm:$0xff]  }
  0x5a   : > { %1051 = vmatprep.subr.bf16.mxu1 %v1436_v14  ;;  %v1470_v37 = vld [vmem:[%s1816_s13 + $0x94] ss:$8 sps:$4 sm:$0xff]   ;;  %v1474_v39 = vld [vmem:[%s1816_s13 + $0x90] ss:$8 sps:$4 sm:$0xff]   ;;  %v1476_v41 = vld [vmem:[%s1816_s13 + $0xa4] ss:$8 sps:$4 sm:$0xff]  }
  0x5b   : > { %v1472_v38 = vld [vmem:[%s1816_s13 + $0x194] ss:$8 sps:$4 sm:$0xff]   ;;  %v1475_v40 = vld [vmem:[%s1816_s13 + $0x190] ss:$8 sps:$4 sm:$0xff]   ;;  %v1478_v42 = vld [vmem:[%s1816_s13 + $0x1a4] ss:$8 sps:$4 sm:$0xff]  }
  0x5c   : > { %1011 = vmatpush1.bf16.msra.mxu0 %v1438_v15  ;;  %v1480_v43 = vld [vmem:[%s1816_s13 + $0xa0] ss:$8 sps:$4 sm:$0xff]   ;;  %v1482_v45 = vld [vmem:[%s1816_s13 + $0xb4] ss:$8 sps:$4 sm:$0xff]   ;;  %v1486_v50 = vld [vmem:[%s1816_s13 + $0xb0] ss:$8 sps:$4 sm:$0xff]  }
  0x5d   : > { %1052 = vmatpush1.bf16.msra.mxu1 %v1439_v16  ;;  %1012 = vmatprep.subr.bf16.mxu0 %v1440_v17  ;;  %v1481_v44 = vld [vmem:[%s1816_s13 + $0x1a0] ss:$8 sps:$4 sm:$0xff]   ;;  %v1484_v46 = vld [vmem:[%s1816_s13 + $0x1b4] ss:$8 sps:$4 sm:$0xff]   ;;  %v1487_v51 = vld [vmem:[%s1816_s13 + $0x1b0] ss:$8 sps:$4 sm:$0xff]  }
  0x5e   : > { %1053 = vmatprep.subr.bf16.mxu1 %v1442_v18  ;;  %v604_v47 = vld [vmem:[%s1798_s30] sm:$0xff]  ;;  %v605_v49 = vld [vmem:[%s1798_s30 + $0x8] sm:$0xff]  ;;  %v1488_v53 = vld [vmem:[%s1816_s13 + $0xc4] ss:$8 sps:$4 sm:$0xff]   ;;  %p1353_p13 = scmp.ne.s32.totalorder %s1554_s17, 8 }
  0x5f   : > { %v1286_v48 = vcombine.high %v604_v47, %v604_v47  ;;  %v1288_v52 = vcombine.high %v605_v49, %v605_v49  ;;  %v1490_v54 = vld [vmem:[%s1816_s13 + $0x1c4] ss:$8 sps:$4 sm:$0xff]   ;;  %v1492_v55 = vld [vmem:[%s1816_s13 + $0xc0] ss:$8 sps:$4 sm:$0xff]   ;;  %v1494_v57 = vld [vmem:[%s1816_s13 + $0xd4] ss:$8 sps:$4 sm:$0xff]   ;;  %v1285_v5 = vcombine.low %v604_v47, %v604_v47  ;;  %v1287_v6 = vcombine.low %v605_v49, %v605_v49 }
  0x60   : > { %1013 = vmatpush1.bf16.msra.mxu0 %v1444_v19  ;;  %v1493_v56 = vld [vmem:[%s1816_s13 + $0x1c0] ss:$8 sps:$4 sm:$0xff]   ;;  %v1496_v58 = vld [vmem:[%s1816_s13 + $0x1d4] ss:$8 sps:$4 sm:$0xff]   ;;  %v1498_v59 = vld [vmem:[%s1816_s13 + $0xd0] ss:$8 sps:$4 sm:$0xff]  }
  0x61   : > { %1054 = vmatpush1.bf16.msra.mxu1 %v1445_v20  ;;  %1014 = vmatprep.subr.bf16.mxu0 %v1446_v21  ;;  %v1499_v60 = vld [vmem:[%s1816_s13 + $0x1d0] ss:$8 sps:$4 sm:$0xff]   ;;  %v1500_v61 = vld [vmem:[%s1816_s13 + $0xe4] ss:$8 sps:$4 sm:$0xff]   ;;  %v1504_v63 = vld [vmem:[%s1816_s13 + $0xe0] ss:$8 sps:$4 sm:$0xff]   ;;  %v1098_v21 = vlaneseq (!%p1353_p13) }
  0x62   : > { %1055 = vmatprep.subr.bf16.mxu1 %v1448_v22  ;;  %1036 = vmatprep.mubr.bf16.mxu0 %v1286_v48  ;;  %v1502_v62 = vld [vmem:[%s1816_s13 + $0x1e4] ss:$8 sps:$4 sm:$0xff]   ;;  %v1505_v0 = vld [vmem:[%s1816_s13 + $0x1e0] ss:$8 sps:$4 sm:$0xff]   ;;  %v1506_v1 = vld [vmem:[%s1816_s13 + $0xf4] ss:$8 sps:$4 sm:$0xff]  }
  0x63   : > { %1077 = vmatprep.mubr.bf16.mxu1 %v1288_v52  ;;  %v1508_v2 = vld [vmem:[%s1816_s13 + $0x1f4] ss:$8 sps:$4 sm:$0xff]   ;;  %v1510_v3 = vld [vmem:[%s1816_s13 + $0xf0] ss:$8 sps:$4 sm:$0xff]   ;;  %v1099_v22 = vshrl.u32 (!%p1353_p13), %v1098_v21, 7 }
  0x64   : > { %1015 = vmatpush1.bf16.msra.mxu0 %v1450_v23  ;;  %v1511_v4 = vld [vmem:[%s1816_s13 + $0x1f0] ss:$8 sps:$4 sm:$0xff]  }
  0x65   : > { %1056 = vmatpush1.bf16.msra.mxu1 %v1451_v24  ;;  %1016 = vmatprep.subr.bf16.mxu0 %v1452_v25  ;;  %v602_v8 = vld [vmem:[#allocation2] sm:$0xff]  ;;  %v603_v12 = vld [vmem:[#allocation2 + $0x8] sm:$0xff]  ;;  %v1100_v25 = vsub.s32 (!%p1353_p13), 0, %v1099_v22 }
  0x66   : > { %1057 = vmatprep.subr.bf16.mxu1 %v1454_v26  ;;  %v1096_v23 = vld [vmem:[%s579_s15] sm:$0x3] (!%p1353_p13)  ;;  %v1104_v26 = vsub.s32 (!%p1353_p13), 1, %v1099_v22 }
  0x67   : > { %v1110_v24 = vld [vmem:[%s584_s18] sm:$0x3] (!%p1353_p13) }
  0x68   : > { %1017 = vmatpush1.bf16.msra.mxu0 %v1456_v27 }
  0x69   : > { %1058 = vmatpush1.bf16.msra.mxu1 %v1457_v28  ;;  %1018 = vmatprep.subr.bf16.mxu0 %v1458_v29  ;;  %v1101_v29 = vrot.slane (!%p1353_p13), %v1096_v23, %v1100_v25 }
  0x6a   : > { %1059 = vmatprep.subr.bf16.mxu1 %v1460_v30  ;;  %v1105_v30 = vrot.slane (!%p1353_p13), %v1096_v23, %v1104_v26 }
  0x6c   : > { %1019 = vmatpush1.bf16.msra.mxu0 %v1462_v31  ;;  %v1115_v31 = vrot.slane (!%p1353_p13), %v1110_v24, %v1100_v25 }
  0x6d   : > { %1060 = vmatpush1.bf16.msra.mxu1 %v1463_v32  ;;  %1020 = vmatprep.subr.bf16.mxu0 %v1464_v33  ;;  %v1119_v32 = vrot.slane (!%p1353_p13), %v1110_v24, %v1104_v26 }
  0x6e   : > { %1061 = vmatprep.subr.bf16.mxu1 %v1466_v34 }
  0x70   : > { %1021 = vmatpush1.bf16.msra.mxu0 %v1468_v35 }
  0x71   : > { %1062 = vmatpush1.bf16.msra.mxu1 %v1469_v36  ;;  %1022 = vmatprep.subr.bf16.mxu0 %v1470_v37 }
  0x72   : > { %1063 = vmatprep.subr.bf16.mxu1 %v1472_v38 }
  0x74   : > { %1023 = vmatpush1.bf16.msra.mxu0 %v1474_v39 }
  0x75   : > { %1064 = vmatpush1.bf16.msra.mxu1 %v1475_v40  ;;  %1024 = vmatprep.subr.bf16.mxu0 %v1476_v41 }
  0x76   : > { %1065 = vmatprep.subr.bf16.mxu1 %v1478_v42 }
  0x78   : > { %1025 = vmatpush1.bf16.msra.mxu0 %v1480_v43 }
  0x79   : > { %1066 = vmatpush1.bf16.msra.mxu1 %v1481_v44  ;;  %1026 = vmatprep.subr.bf16.mxu0 %v1482_v45 }
  0x7a   : > { %1067 = vmatprep.subr.bf16.mxu1 %v1484_v46 }
  0x7c   : > { %1027 = vmatpush1.bf16.msra.mxu0 %v1486_v50 }
  0x7d   : > { %1068 = vmatpush1.bf16.msra.mxu1 %v1487_v51  ;;  %1028 = vmatprep.subr.bf16.mxu0 %v1488_v53 }
  0x7e   : > { %1069 = vmatprep.subr.bf16.mxu1 %v1490_v54 }
  0x80   : > { %1029 = vmatpush1.bf16.msra.mxu0 %v1492_v55 }
  0x81   : > { %1070 = vmatpush1.bf16.msra.mxu1 %v1493_v56  ;;  %1030 = vmatprep.subr.bf16.mxu0 %v1494_v57 }
  0x82   : > { %1071 = vmatprep.subr.bf16.mxu1 %v1496_v58 }
  0x84   : > { %1031 = vmatpush1.bf16.msra.mxu0 %v1498_v59 }
  0x85   : > { %1072 = vmatpush1.bf16.msra.mxu1 %v1499_v60  ;;  %1032 = vmatprep.subr.bf16.mxu0 %v1500_v61 }
  0x86   : > { %1073 = vmatprep.subr.bf16.mxu1 %v1502_v62 }
  0x88   : > { %1033 = vmatpush1.bf16.msra.mxu0 %v1504_v63 }
  0x89   : > { %1074 = vmatpush1.bf16.msra.mxu1 %v1505_v0  ;;  %1034 = vmatprep.subr.bf16.mxu0 %v1506_v1 }
  0x8a   : > { %1075 = vmatprep.subr.bf16.mxu1 %v1508_v2 }
  0x8c   : > { %1035 = vmatpush1.bf16.msra.mxu0 %v1510_v3 }
  0x8d   : > { %1076 = vmatpush1.bf16.msra.mxu1 %v1511_v4 }
  0x8f   : > { %1037 = vmatmul.mubr.bf16.vlgmr.msra.gmra.mrb[0].mxu0 %v1285_v5 }
  0x90   : > { %1078 = vmatmul.mubr.bf16.vlgmr.msra.gmra.mrb[0].mxu1 %v1287_v6 }
 0x162   : > { %v1038_v7 = vpop.f32.mrb[0].mxu0 }
 0x163   : > { %v1079_v9 = vpop.f32.mrb[0].mxu1  ;;  %v1040_v11 = vpop.f32.mrb[1].mxu0  ;;  %1093 = sbr.rel (%p1353_p13) target bundleno = 378 (0x17a), region = 82 }
 0x164   : > { %v1080_v10 = vadd.f32 %v1079_v9, %v1038_v7  ;;  %v1081_v13 = vpop.f32.mrb[1].mxu1  ;;  %v1042_v15 = vpop.f32.mrb[2].mxu0 }
 0x165   : > { %v1082_v14 = vadd.f32 %v1081_v13, %v1040_v11  ;;  %v1083_v16 = vpop.f32.mrb[2].mxu1  ;;  %v1043_v18 = vpop.f32.mrb[3].mxu0 }
 0x166   : > { %v1086_v17 = vadd.f32 %v1080_v10, %v602_v8  ;;  %v1084_v19 = vpop.f32.mrb[3].mxu1 }
 0x167   : > { %v1087_v20 = vadd.f32 %v1082_v14, %v603_v12 }
 0x168   : > { %1088 = vst [vmem:[#allocation2] sm:$0xff] %v1086_v17 }
 0x169   : > { %1089 = vst [vmem:[#allocation2 + $0x8] sm:$0xff] %v1087_v20 }
 0x16f   : > { %v1094_v27 = vld [vmem:[#allocation2] sm:$0xff] }
 0x170   : > { %v1095_v28 = vld [vmem:[#allocation2 + $0x8] sm:$0xff]  ;;  %v1108_v33 = vmul.f32 %v1101_v29, %v1094_v27 }
 0x171   : > { %v1109_v34 = vmul.f32 %v1105_v30, %v1095_v28 }
 0x172   : > { %v1122_v35 = vadd.f32 %v1115_v31, %v1108_v33 }
 0x173   : > { %v1123_v36 = vadd.f32 %v1119_v32, %v1109_v34 }
 0x174   : > { %v1124_v37 = vmax.f32 %v1122_v35, 0.0 }
 0x175   : > { %v1125_v38 = vmax.f32 %v1123_v36, 0.0 }
 0x177   : > { %v1358_v39 = vpack.c.bf16 %v1125_v38, %v1124_v37 }
 0x179   : > { %1134 = vst [vmem:[%s1814_s12] sm:$0xff] %v1358_v39 }
 0x17a PF: > { %s14_s21 = sadd.s32 1, %s1570_s21   ;;  %s1923_s15 = smov %s1550_s16 }
 0x17b   : > { %p11_p0 = scmp.ge.s32.totalorder %s14_s21, 20   ;;  %s1924_s16 = smov %s1649_s28 }
 0x17c   : > { %s1925_s17 = smov %s1562_s19  ;;  %s1926_s18 = smov %s1566_s20 }
 0x17d   : > { %s1927_s19 = smov %s1930_s22  ;;  %s1928_s20 = smov %s1934_s23 }
 0x17e   :  { %13 = sbr.rel (!%p11_p0) target bundleno = 4 (0x4), region = 126 }

// kernel: variant_resnet_forward.43
= control target key start
LH: loop header
LB: loop body
LE: loop exit
PB: predicated region body
PF: predicated region fallthrough
CT: control target
= control target key end

     0   :  { %v94_v51 = vlaneseq  ;;  %s695_s0 = inlined_call_operand.vmem [shape: bf16[2,1,512], index: 0, kind: input, shape index: {}]   ;;  %s696_s1 = inlined_call_operand.vmem [shape: f32[512,128], index: 1, kind: input, shape index: {}]   ;;  %s697_s2 = inlined_call_operand.vmem [shape: f32[1,128], index: 2, kind: input, shape index: {}]   ;;  %s698_s3 = inlined_call_operand.hbm [shape: f32[2,128], index: 3, kind: output, shape index: {}]  }
   0x1   :  { %v37_v0 = vld [vmem:[%s696_s1 + $0x80] sm:$0xff]  ;;  %v38_v1 = vld [vmem:[%s696_s1 + $0x88] sm:$0xff]  ;;  %v39_v11 = vld [vmem:[%s696_s1 + $0x90] sm:$0xff] }
   0x2   :  { %v21_v2 = vld [vmem:[%s696_s1] sm:$0xff]  ;;  %v365_v3 = vpack.c.bf16 %v38_v1, %v37_v0  ;;  %v22_v4 = vld [vmem:[%s696_s1 + $0x8] sm:$0xff]  ;;  %v40_v13 = vld [vmem:[%s696_s1 + $0x98] sm:$0xff]  ;;  %v607_v0 = vshrl.u32 %v94_v51, 7 }
   0x3   :  { %v69_v5 = vld [vmem:[%s696_s1 + $0x180] sm:$0xff]  ;;  %v70_v6 = vld [vmem:[%s696_s1 + $0x188] sm:$0xff]  ;;  %v367_v7 = vpack.c.bf16 %v22_v4, %v21_v2  ;;  %v23_v14 = vld [vmem:[%s696_s1 + $0x10] sm:$0xff]  ;;  %v369_v16 = vpack.c.bf16 %v40_v13, %v39_v11 }
   0x4   :  { %v397_v8 = vpack.c.bf16 %v70_v6, %v69_v5  ;;  %v53_v9 = vld [vmem:[%s696_s1 + $0x100] sm:$0xff]  ;;  %v54_v10 = vld [vmem:[%s696_s1 + $0x108] sm:$0xff]  ;;  %366 = vmatprep.subr.bf16.mxu0 %v365_v3  ;;  %v24_v15 = vld [vmem:[%s696_s1 + $0x18] sm:$0xff] }
   0x5   :  { %v399_v12 = vpack.c.bf16 %v54_v10, %v53_v9  ;;  %368 = vmatpush3.bf16.msra.mxu0 %v367_v7  ;;  %v371_v17 = vpack.c.bf16 %v24_v15, %v23_v14  ;;  %v71_v18 = vld [vmem:[%s696_s1 + $0x190] sm:$0xff]  ;;  %v72_v19 = vld [vmem:[%s696_s1 + $0x198] sm:$0xff]  ;;  %v41_v23 = vld [vmem:[%s696_s1 + $0xa0] sm:$0xff] }
   0x6   :  { %398 = vmatprep.subr.bf16.mxu1 %v397_v8  ;;  %v55_v20 = vld [vmem:[%s696_s1 + $0x110] sm:$0xff]  ;;  %v401_v21 = vpack.c.bf16 %v72_v19, %v71_v18  ;;  %v56_v22 = vld [vmem:[%s696_s1 + $0x118] sm:$0xff]  ;;  %v42_v24 = vld [vmem:[%s696_s1 + $0xa8] sm:$0xff]  ;;  %370 = vmatprep.subr.bf16.mxu0 %v369_v16  ;;  %v100_v16 = vsub.s32 2, %v607_v0 }
   0x7   :  { %400 = vmatpush3.bf16.msra.mxu1 %v399_v12  ;;  %v403_v25 = vpack.c.bf16 %v56_v22, %v55_v20  ;;  %v373_v26 = vpack.c.bf16 %v42_v24, %v41_v23  ;;  %v25_v27 = vld [vmem:[%s696_s1 + $0x20] sm:$0xff]  ;;  %v26_v28 = vld [vmem:[%s696_s1 + $0x28] sm:$0xff]  ;;  %v43_v35 = vld [vmem:[%s696_s1 + $0xb0] sm:$0xff] }
   0x8   :  { %v73_v29 = vld [vmem:[%s696_s1 + $0x1a0] sm:$0xff]  ;;  %402 = vmatprep.subr.bf16.mxu1 %v401_v21  ;;  %v74_v30 = vld [vmem:[%s696_s1 + $0x1a8] sm:$0xff]  ;;  %v375_v33 = vpack.c.bf16 %v26_v28, %v25_v27  ;;  %v44_v36 = vld [vmem:[%s696_s1 + $0xb8] sm:$0xff]  ;;  %v108_v21 = vsub.s32 6, %v607_v0 }
   0x9   :  { %v57_v31 = vld [vmem:[%s696_s1 + $0x120] sm:$0xff]  ;;  %v58_v32 = vld [vmem:[%s696_s1 + $0x128] sm:$0xff]  ;;  %372 = vmatpush3.bf16.msra.mxu0 %v371_v17  ;;  %v405_v34 = vpack.c.bf16 %v74_v30, %v73_v29  ;;  %v27_v37 = vld [vmem:[%s696_s1 + $0x30] sm:$0xff]  ;;  %v377_v39 = vpack.c.bf16 %v44_v36, %v43_v35 }
   0xa   :  { %374 = vmatprep.subr.bf16.mxu0 %v373_v26  ;;  %v407_v38 = vpack.c.bf16 %v58_v32, %v57_v31  ;;  %v28_v40 = vld [vmem:[%s696_s1 + $0x38] sm:$0xff]  ;;  %v75_v41 = vld [vmem:[%s696_s1 + $0x1b0] sm:$0xff]  ;;  %v45_v46 = vld [vmem:[%s696_s1 + $0xc0] sm:$0xff] }
   0xb   :  { %404 = vmatpush3.bf16.msra.mxu1 %v403_v25  ;;  %v76_v42 = vld [vmem:[%s696_s1 + $0x1b8] sm:$0xff]  ;;  %v59_v44 = vld [vmem:[%s696_s1 + $0x130] sm:$0xff]  ;;  %v46_v47 = vld [vmem:[%s696_s1 + $0xc8] sm:$0xff]  ;;  %v379_v48 = vpack.c.bf16 %v28_v40, %v27_v37 }
   0xc   :  { %406 = vmatprep.subr.bf16.mxu1 %v405_v34  ;;  %v409_v43 = vpack.c.bf16 %v76_v42, %v75_v41  ;;  %v60_v45 = vld [vmem:[%s696_s1 + $0x138] sm:$0xff]  ;;  %v77_v49 = vld [vmem:[%s696_s1 + $0x1c0] sm:$0xff]  ;;  %v78_v50 = vld [vmem:[%s696_s1 + $0x1c8] sm:$0xff]  ;;  %v381_v53 = vpack.c.bf16 %v46_v47, %v45_v46 }
   0xd   :  { %376 = vmatpush3.bf16.msra.mxu0 %v375_v33  ;;  %v411_v52 = vpack.c.bf16 %v60_v45, %v59_v44  ;;  %v29_v54 = vld [vmem:[%s696_s1 + $0x40] sm:$0xff]  ;;  %v30_v55 = vld [vmem:[%s696_s1 + $0x48] sm:$0xff]  ;;  %v413_v57 = vpack.c.bf16 %v78_v50, %v77_v49  ;;  %v47_v59 = vld [vmem:[%s696_s1 + $0xd0] sm:$0xff] }
   0xe   :  { %378 = vmatprep.subr.bf16.mxu0 %v377_v39  ;;  %v61_v56 = vld [vmem:[%s696_s1 + $0x140] sm:$0xff]  ;;  %v62_v58 = vld [vmem:[%s696_s1 + $0x148] sm:$0xff]  ;;  %v48_v60 = vld [vmem:[%s696_s1 + $0xd8] sm:$0xff]  ;;  %v383_v63 = vpack.c.bf16 %v30_v55, %v29_v54 }
   0xf   :  { %408 = vmatpush3.bf16.msra.mxu1 %v407_v38  ;;  %v79_v61 = vld [vmem:[%s696_s1 + $0x1d0] sm:$0xff]  ;;  %v80_v62 = vld [vmem:[%s696_s1 + $0x1d8] sm:$0xff]  ;;  %v415_v1 = vpack.c.bf16 %v62_v58, %v61_v56  ;;  %v385_v2 = vpack.c.bf16 %v48_v60, %v47_v59  ;;  %v49_v8 = vld [vmem:[%s696_s1 + $0xe0] sm:$0xff] }
  0x10   :  { %410 = vmatprep.subr.bf16.mxu1 %v409_v43  ;;  %v31_v3 = vld [vmem:[%s696_s1 + $0x50] sm:$0xff]  ;;  %v32_v4 = vld [vmem:[%s696_s1 + $0x58] sm:$0xff]  ;;  %v417_v6 = vpack.c.bf16 %v80_v62, %v79_v61  ;;  %v50_v9 = vld [vmem:[%s696_s1 + $0xe8] sm:$0xff] }
  0x11   :  { %380 = vmatpush3.bf16.msra.mxu0 %v379_v48  ;;  %v63_v5 = vld [vmem:[%s696_s1 + $0x150] sm:$0xff]  ;;  %v64_v7 = vld [vmem:[%s696_s1 + $0x158] sm:$0xff]  ;;  %v81_v10 = vld [vmem:[%s696_s1 + $0x1e0] sm:$0xff]  ;;  %v387_v12 = vpack.c.bf16 %v32_v4, %v31_v3  ;;  %v389_v18 = vpack.c.bf16 %v50_v9, %v49_v8 }
  0x12   :  { %382 = vmatprep.subr.bf16.mxu0 %v381_v53  ;;  %v82_v11 = vld [vmem:[%s696_s1 + $0x1e8] sm:$0xff]  ;;  %v33_v13 = vld [vmem:[%s696_s1 + $0x60] sm:$0xff]  ;;  %v419_v17 = vpack.c.bf16 %v64_v7, %v63_v5 }
  0x13   :  { %412 = vmatpush3.bf16.msra.mxu1 %v411_v52  ;;  %v34_v14 = vld [vmem:[%s696_s1 + $0x68] sm:$0xff]  ;;  %v65_v15 = vld [vmem:[%s696_s1 + $0x160] sm:$0xff] }
  0x14   :  { %414 = vmatprep.subr.bf16.mxu1 %v413_v57  ;;  %v66_v19 = vld [vmem:[%s696_s1 + $0x168] sm:$0xff]  ;;  %v292_v20 = vld [vmem:[%s695_s0] sm:$0xff]  }
  0x15   :  { %384 = vmatpush3.bf16.msra.mxu0 %v383_v63 }
  0x16   :  { %386 = vmatprep.subr.bf16.mxu0 %v385_v2 }
  0x17   :  { %416 = vmatpush3.bf16.msra.mxu1 %v415_v1 }
  0x18   :  { %8 = vsyncpa [#allocation3], 0  ;;  %418 = vmatprep.subr.bf16.mxu1 %v417_v6  ;;  %v421_v22 = vpack.c.bf16 %v82_v11, %v81_v10  ;;  %v51_v23 = vld [vmem:[%s696_s1 + $0xf0] sm:$0xff]  ;;  %v52_v24 = vld [vmem:[%s696_s1 + $0xf8] sm:$0xff]  ;;  %v293_v25 = vunpack.c.l.bf16 %v292_v20  ;;  %v294_v26 = vunpack.c.h.bf16 %v292_v20  ;;  %vm126_vm0 = vcmask 1041409   ;;  %s454_s7 = smov [#allocation2]  }
  0x19   :  { %v83_v27 = vld [vmem:[%s696_s1 + $0x1f0] sm:$0xff]  ;;  %v84_v28 = vld [vmem:[%s696_s1 + $0x1f8] sm:$0xff]  ;;  %v96_v29 = vsub.s32 0, %v607_v0  ;;  %388 = vmatpush3.bf16.msra.mxu0 %v387_v12  ;;  %v391_v30 = vpack.c.bf16 %v34_v14, %v33_v13  ;;  %v423_v31 = vpack.c.bf16 %v66_v19, %v65_v15  ;;  %v393_v34 = vpack.c.bf16 %v52_v24, %v51_v23  ;;  %v290_v54 = vld [vmem:[%s697_s2] ss:$0 sm:$0xff]  ;;  %s282_s8 = sshll.u32 %s454_s7, 4  ;;  %s283_s8 = int_to_ptr.vmem [resolvable:$true] %s282_s8 }
  0x1a   :  { %v101_v32 = vrot.slane %v293_v25, %v100_v16  ;;  %v117_v33 = vrot.slane %v294_v26, %v100_v16  ;;  %390 = vmatprep.subr.bf16.mxu0 %v389_v18  ;;  %v35_v35 = vld [vmem:[%s696_s1 + $0x70] sm:$0xff]  ;;  %v36_v36 = vld [vmem:[%s696_s1 + $0x78] sm:$0xff]  ;;  %v109_v37 = vrot.slane %v293_v25, %v108_v21  ;;  %v125_v38 = vrot.slane %v294_v26, %v108_v21  ;;  %s430_s9 = scalar_lea.vmem %s283_s8, 32  ;;  %p435_p1 = scmp.lt.s32.totalorder %s283_s8, %s283_s8 }
  0x1b   :  { %420 = vmatpush3.bf16.msra.mxu1 %v419_v17  ;;  %v104_v39 = vsub.s32 4, %v607_v0  ;;  %v425_v40 = vpack.c.bf16 %v84_v28, %v83_v27  ;;  %v67_v41 = vld [vmem:[%s696_s1 + $0x170] sm:$0xff]  ;;  %v68_v42 = vld [vmem:[%s696_s1 + $0x178] sm:$0xff]  ;;  %v395_v45 = vpack.c.bf16 %v36_v36, %v35_v35  ;;  %v97_v46 = vrot.slane %v293_v25, %v96_v29  ;;  %p431_p0 = scmp.ne.s32.totalorder %s283_s8, %s430_s9  ;;  %p436_p2 = scmp.lt.s32.totalorder %s430_s9, %s430_s9 }
  0x1c   :  { %422 = vmatprep.subr.bf16.mxu1 %v421_v22  ;;  %v128_v43 = vsel %vm126_vm0, %v117_v33, %v101_v32  ;;  %v130_v44 = vsel %vm126_vm0, %v125_v38, %v109_v37  ;;  %v113_v47 = vrot.slane %v294_v26, %v96_v29  ;;  %v427_v48 = vpack.c.bf16 %v68_v42, %v67_v41 }
  0x1d   :  { %199 = vmatprep.mubr.f32.mxu0 %v128_v43  ;;  %392 = vmatpush3.bf16.msra.mxu0 %v391_v30  ;;  %v105_v49 = vrot.slane %v293_v25, %v104_v39  ;;  %v121_v50 = vrot.slane %v294_v26, %v104_v39  ;;  %p437_p3 = por %p436_p2, %p435_p1 }
  0x1e   :  { %269 = vmatprep.mubr.f32.mxu1 %v130_v44  ;;  %394 = vmatprep.subr.bf16.mxu0 %v393_v34  ;;  %v127_v51 = vsel %vm126_vm0, %v113_v47, %v97_v46 }
  0x1f   :  { %424 = vmatpush3.bf16.msra.mxu1 %v423_v31  ;;  %v129_v52 = vsel %vm126_vm0, %v121_v50, %v105_v49  ;;  %p438_p4 = pnand %p437_p3, %p431_p0 }
  0x20   :  { %426 = vmatprep.subr.bf16.mxu1 %v425_v40 }
  0x21   :  { %396 = vmatpush3.bf16.msra.mxu0 %v395_v45 }
  0x23   :  { %428 = vmatpush3.bf16.msra.mxu1 %v427_v48 }
  0x24   :  { %200 = vmatmul.mubr.f32.vlgmr.msra.gmra.mrb[0].mxu0 %v127_v51 }
  0x26   :  { %270 = vmatmul.mubr.f32.vlgmr.msra.gmra.mrb[0].mxu1 %v129_v52 }
  0xf7   :  { %v327_v53 = vpop.f32.mrb[0].mxu0 }
  0xf8   :  { %v328_v55 = vpop.f32.mrb[1].mxu0 }
  0xf9   :  { %v362_v56 = vpop.f32.mrb[0].mxu1  ;;  %v329_v57 = vadd.f32 %v328_v55, %v327_v53 }
  0xfa   :  { %v363_v58 = vpop.f32.mrb[1].mxu1 }
  0xfb   :  { %v364_v59 = vadd.f32 %v363_v58, %v362_v56  ;;  %v202_v60 = vadd.f32 %v329_v57, %v290_v54 }
  0xfd   :  { %v272_v61 = vadd.f32 %v364_v59, %v202_v60 }
  0xff   :  { %275 = vst [vmem:[#allocation2] sm:$0x3] %v272_v61 }
 0x100   :  { %441 = shalt.err (!%p438_p4)
}
 0x101   :  { %s442_s11 = scalar_lea.hbm %s698_s3, 32 }
 0x102   :  { %p443_p5 = scmp.ne.s32.totalorder %s698_s3, %s442_s11  ;;  %p446_p6 = scmp.lt.u32.totalorder %s442_s11, %s698_s3 }
 0x104   :  { %p448_p7 = pnand %p446_p6, %p443_p5 }
 0x106   :  { %451 = shalt.err (!%p448_p7)
}
 0x107   :  { %285 = dma.vmem_to_hbm [thread:$0]  %s283_s8, 32, %s698_s3, [#allocation3]  }
 0x108   :  { %452 = dma.done.wait [#allocation3], 32  }
 0x109   :  { %453 = vsyncadd [#allocation3], 4294967264 }
 0x10a   :  { %289 = vsyncpa [#allocation3], 1 }

</bundles_post_ra>
